<compile_context>
chip_gen: v6e
topology: v6e:2x2x1
jax: 0.10.0
libtpu: 0.0.40
codegen_flags: <defaults>
</compile_context>

<pallas_src>
import functools

import jax
import jax.numpy as jnp
from jax import lax
from jax.experimental import pallas as pl
from jax.experimental.pallas import tpu as pltpu

MATMUL_DTYPE = jnp.bfloat16   # MXU operand dtype (accumulation is always f32)
ROW_BLOCK = 256               # default row (sublane) tile for row-tiled kernels


def _params(*sems):
    return pltpu.CompilerParams(dimension_semantics=tuple(sems))


def _round_up(x, m):
    return (x + m - 1) // m * m


def _row_block(m, target=ROW_BLOCK):
    return min(target, _round_up(m, 8))


def _pad_rows(a, mp):
    m = a.shape[0]
    return a if m == mp else jnp.pad(a, ((0, mp - m), (0, 0)))


# --------------------------- fused linear kernel ----------------------------

def _fused_linear_kernel(*refs, act, has_ss, has_res, res_factor, has_ln,
                         ln_eps, out_split):
    it = iter(refs)
    x_ref = next(it)
    w_ref = next(it)
    b_ref = next(it)
    ss_ref = next(it) if has_ss else None
    sh_ref = next(it) if has_ss else None
    res_ref = next(it) if has_res else None
    g_ref = next(it) if has_ln else None
    be_ref = next(it) if has_ln else None
    if out_split is None:
        o_refs = (next(it),)
    else:
        o_refs = tuple(next(it) for _ in out_split)

    x = x_ref[...].astype(jnp.float32)
    if has_ss:                                        # adaptive scale / shift
        x = x * ss_ref[...] + sh_ref[...]
    y = jnp.dot(x.astype(MATMUL_DTYPE), w_ref[...].astype(MATMUL_DTYPE),
                preferred_element_type=jnp.float32)
    y = y + b_ref[...].astype(jnp.float32)
    if act == "relu":
        y = jnp.maximum(y, 0.0)
    elif act == "swish":
        y = y * jax.nn.sigmoid(y)
    if has_res:                                       # residual (module factor)
        y = res_ref[...].astype(jnp.float32) + res_factor * y
    if has_ln:                                        # fused LayerNorm epilogue
        mean = jnp.mean(y, axis=-1, keepdims=True)
        c = y - mean
        var = jnp.mean(c * c, axis=-1, keepdims=True)
        y = c * lax.rsqrt(var + ln_eps)
        y = y * g_ref[...] + be_ref[...]
    if out_split is None:
        o_refs[0][...] = y.astype(o_refs[0].dtype)
    else:                                             # lane-split outputs
        off = 0
        for o_ref, width in zip(o_refs, out_split):
            o_ref[...] = y[:, off:off + width].astype(o_ref.dtype)
            off += width


def fused_linear(x, w, b, *, act="none", scale=None, shift=None,
                 residual=None, res_factor=1.0, ln=None, ln_eps=1e-5,
                 out_split=None, block_rows=ROW_BLOCK):
    """y = LN(res + f * act((x*scale+shift) @ W + b)) with every stage optional.

    x: (M, K), w: (K, N), b: (N,).  Row-tiled over M; weights stay resident.
    `out_split=(n0, n1, ...)` splits the N output columns into several
    lane-dense output tensors written in a single pass.
    """
    M, K = x.shape
    N = w.shape[1]
    bm = _row_block(M, block_rows)
    Mp = _round_up(M, bm)

    in_specs = [pl.BlockSpec((bm, K), lambda i: (i, 0)),
                pl.BlockSpec((K, N), lambda i: (0, 0)),
                pl.BlockSpec((1, N), lambda i: (0, 0))]
    args = [_pad_rows(x, Mp), w, b.reshape(1, N)]
    if scale is not None:
        in_specs += [pl.BlockSpec((1, K), lambda i: (0, 0)),
                     pl.BlockSpec((1, K), lambda i: (0, 0))]
        args += [scale.reshape(1, K), shift.reshape(1, K)]
    if residual is not None:
        in_specs.append(pl.BlockSpec((bm, N), lambda i: (i, 0)))
        args.append(_pad_rows(residual, Mp))
    if ln is not None:
        in_specs += [pl.BlockSpec((1, N), lambda i: (0, 0)),
                     pl.BlockSpec((1, N), lambda i: (0, 0))]
        args += [ln[0].reshape(1, N), ln[1].reshape(1, N)]

    if out_split is None:
        out_specs = pl.BlockSpec((bm, N), lambda i: (i, 0))
        out_shape = jax.ShapeDtypeStruct((Mp, N), jnp.float32)
    else:
        assert sum(out_split) == N
        out_specs = [pl.BlockSpec((bm, n_i), lambda i: (i, 0))
                     for n_i in out_split]
        out_shape = [jax.ShapeDtypeStruct((Mp, n_i), jnp.float32)
                     for n_i in out_split]

    out = pl.pallas_call(
        functools.partial(_fused_linear_kernel, act=act,
                          has_ss=scale is not None,
                          has_res=residual is not None,
                          res_factor=res_factor,
                          has_ln=ln is not None, ln_eps=ln_eps,
                          out_split=out_split),
        grid=(Mp // bm,),
        in_specs=in_specs,
        out_specs=out_specs,
        out_shape=out_shape,
        compiler_params=_params("parallel"),
    )(*args)
    if out_split is None:
        return out[:M]
    return tuple(o[:M] for o in out)


# ----------------------- flash multi-head attention -------------------------

def _flash_mha_kernel(q_ref, kv_ref, o_ref, m_sc, l_sc, acc_sc, *,
                      num_heads, scale, seq_len, block_k):
    ki = pl.program_id(2)

    @pl.when(ki == 0)
    def _init():
        m_sc[...] = jnp.full(m_sc.shape, -1e30, jnp.float32)
        l_sc[...] = jnp.zeros(l_sc.shape, jnp.float32)
        acc_sc[...] = jnp.zeros(acc_sc.shape, jnp.float32)

    e = q_ref.shape[-1]
    dh = e // num_heads
    tk = kv_ref.shape[1]

    # mask key positions beyond the true sequence length (row padding safety)
    k_pos = ki * block_k + lax.broadcasted_iota(jnp.int32, (1, tk), 1)
    k_valid = k_pos < seq_len

    q_all = q_ref[0].astype(jnp.float32) * scale
    for h in range(num_heads):
        q_h = q_all[:, h * dh:(h + 1) * dh]
        k_h = kv_ref[0, :, h * dh:(h + 1) * dh]
        v_h = kv_ref[0, :, e + h * dh:e + (h + 1) * dh]
        s = lax.dot_general(
            q_h.astype(MATMUL_DTYPE), k_h.astype(MATMUL_DTYPE),
            (((1,), (1,)), ((), ())), preferred_element_type=jnp.float32)
        s = jnp.where(k_valid, s, -1e30)
        m_prev = m_sc[h]
        m_new = jnp.maximum(m_prev, jnp.max(s, axis=-1, keepdims=True))
        alpha = jnp.exp(m_prev - m_new)
        p = jnp.exp(s - m_new)
        l_sc[h] = alpha * l_sc[h] + jnp.sum(p, axis=-1, keepdims=True)
        acc_sc[h] = alpha * acc_sc[h] + jnp.dot(
            p.astype(MATMUL_DTYPE), v_h.astype(MATMUL_DTYPE),
            preferred_element_type=jnp.float32)
        m_sc[h] = m_new

    @pl.when(ki == pl.num_programs(2) - 1)
    def _finalize():
        outs = [acc_sc[h] * pl.reciprocal(l_sc[h], approx=True)
                for h in range(num_heads)]
        o_ref[0] = jnp.concatenate(outs, axis=-1).astype(o_ref.dtype)


def flash_mha(q, kv, num_heads, *, max_block=128):
    """Online-softmax attention.

    q: (B, L, E); kv: (B, L, 2E) laid out [k | v] along the last dim.
    """
    B, L, E = q.shape
    assert E % num_heads == 0
    dh = E // num_heads
    t = min(max_block, _round_up(L, 8))
    Lp = _round_up(L, t)
    if Lp != L:
        q = jnp.pad(q, ((0, 0), (0, Lp - L), (0, 0)))
        kv = jnp.pad(kv, ((0, 0), (0, Lp - L), (0, 0)))
    n = Lp // t

    q_spec = pl.BlockSpec((1, t, E), lambda b, qi, ki: (b, qi, 0))
    kv_spec = pl.BlockSpec((1, t, 2 * E), lambda b, qi, ki: (b, ki, 0))
    out = pl.pallas_call(
        functools.partial(_flash_mha_kernel, num_heads=num_heads,
                          scale=1.0 / (dh ** 0.5), seq_len=L, block_k=t),
        grid=(B, n, n),
        in_specs=[q_spec, kv_spec],
        out_specs=pl.BlockSpec((1, t, E), lambda b, qi, ki: (b, qi, 0)),
        out_shape=jax.ShapeDtypeStruct((B, Lp, E), jnp.float32),
        scratch_shapes=[pltpu.VMEM((num_heads, t, 1), jnp.float32),
                        pltpu.VMEM((num_heads, t, 1), jnp.float32),
                        pltpu.VMEM((num_heads, t, dh), jnp.float32)],
        compiler_params=_params("parallel", "parallel", "arbitrary"),
    )(q, kv)
    return out[:, :L, :] if Lp != L else out


# ------------------------ depthwise time convolution ------------------------

def _dwconv1d_kernel(*refs, K, stride, out_len, has_bn_swish):
    it = iter(refs)
    if stride == 1:
        x_refs = (next(it),)
    else:
        x_refs = (next(it), next(it))         # even / odd time rows
    w_ref = next(it)
    b_ref = next(it)
    bn_s_ref = next(it) if has_bn_swish else None
    bn_b_ref = next(it) if has_bn_swish else None
    o_ref = next(it)

    w = w_ref[...].astype(jnp.float32)
    acc = jnp.zeros(o_ref.shape[1:], jnp.float32)
    for k in range(K):                          # taps are static ref slices
        if stride == 1:
            tap = x_refs[0][0, k:k + out_len, :]
        else:
            tap = x_refs[k % 2][0, k // 2:k // 2 + out_len, :]
        acc = acc + tap.astype(jnp.float32) * w[k:k + 1, :]
    y = acc + b_ref[...]
    if has_bn_swish:                            # eval-mode BatchNorm + Swish
        y = y * bn_s_ref[...] + bn_b_ref[...]
        y = y * jax.nn.sigmoid(y)
    o_ref[0] = y.astype(o_ref.dtype)


def depthwise_conv1d(x, w, b, *, stride=1, bn_scale=None, bn_shift=None):
    """'same'-padded (pad=K//2) depthwise conv over time, stride 1 or 2.

    x: (B, L, C), w: (K, C), b: (C,).  The padded input is read ONCE; taps are
    built from static in-kernel slices.  stride-2 computes only the kept
    outputs.  Optional fused eval-BatchNorm + Swish epilogue.
    """
    B, L, C = x.shape
    K = w.shape[0]
    pad = K // 2
    has_bn = bn_scale is not None

    tc = C
    if C > 512 and C % 128 == 0:
        for cand in (512, 256, 128):
            if C % cand == 0:
                tc = cand
                break

    if stride == 1:
        Lout = L
        xp = jnp.pad(x, ((0, 0), (pad, pad), (0, 0)))
        x_args = [xp]
        x_specs = [pl.BlockSpec((1, L + 2 * pad, tc),
                                lambda bb, cc: (bb, 0, cc))]
    else:
        Lout = (L + 2 * pad - K) // stride + 1
        need = stride * (Lout - 1) + K
        Lp = max(L + 2 * pad, need)
        if Lp % 2:
            Lp += 1
        xp = jnp.pad(x, ((0, 0), (pad, Lp - L - pad), (0, 0)))
        x_args = [xp[:, 0::2, :], xp[:, 1::2, :]]
        x_specs = [pl.BlockSpec((1, Lp // 2, tc),
                                lambda bb, cc: (bb, 0, cc))] * 2

    in_specs = x_specs + [pl.BlockSpec((K, tc), lambda bb, cc: (0, cc)),
                          pl.BlockSpec((1, tc), lambda bb, cc: (0, cc))]
    args = x_args + [w, b.reshape(1, C)]
    if has_bn:
        in_specs += [pl.BlockSpec((1, tc), lambda bb, cc: (0, cc)),
                     pl.BlockSpec((1, tc), lambda bb, cc: (0, cc))]
        args += [bn_scale.reshape(1, C), bn_shift.reshape(1, C)]

    return pl.pallas_call(
        functools.partial(_dwconv1d_kernel, K=K, stride=stride,
                          out_len=Lout, has_bn_swish=has_bn),
        grid=(B, C // tc),
        in_specs=in_specs,
        out_specs=pl.BlockSpec((1, Lout, tc), lambda bb, cc: (bb, 0, cc)),
        out_shape=jax.ShapeDtypeStruct((B, Lout, C), jnp.float32),
        compiler_params=_params("parallel", "parallel"),
    )(*args)


# --------------------- subsampling front-end kernels ------------------------

def _dw_taps_kernel(t_ref, w_ref, b_ref, o_ref):
    w = w_ref[...].astype(jnp.float32)
    K = t_ref.shape[0]
    acc = jnp.zeros(o_ref.shape, jnp.float32)
    for k in range(K):
        acc = acc + t_ref[k].astype(jnp.float32) * w[k:k + 1, :]
    o_ref[...] = (acc + b_ref[...]).astype(o_ref.dtype)


def depthwise_taps(taps, w, b, block_rows=ROW_BLOCK):
    """taps: (K, M, C), w: (K, C), b: (C,) -> (M, C); row-tiled."""
    K, M, C = taps.shape
    bm = _row_block(M, block_rows)
    Mp = _round_up(M, bm)
    if Mp != M:
        taps = jnp.pad(taps, ((0, 0), (0, Mp - M), (0, 0)))
    out = pl.pallas_call(
        _dw_taps_kernel,
        grid=(Mp // bm,),
        in_specs=[pl.BlockSpec((K, bm, C), lambda i: (0, i, 0)),
                  pl.BlockSpec((K, C), lambda i: (0, 0)),
                  pl.BlockSpec((1, C), lambda i: (0, 0))],
        out_specs=pl.BlockSpec((bm, C), lambda i: (i, 0)),
        out_shape=jax.ShapeDtypeStruct((Mp, C), jnp.float32),
        compiler_params=_params("parallel"),
    )(taps, w, b.reshape(1, C))
    return out[:M]


def conv2d_3x3_s2_in1(x, w, b, act="relu"):
    """Regular conv, 1 input channel, 3x3, stride 2, pad 1.  x: (B, T, F)."""
    B, T, F = x.shape
    T2, F2 = T // 2, F // 2
    xp = jnp.pad(x, ((0, 0), (1, 1), (1, 1)))
    cols = []
    for kt in range(3):
        for kf in range(3):
            cols.append(xp[:, kt:kt + 2 * T2:2, kf:kf + 2 * F2:2])
    patches = jnp.stack(cols, axis=-1).reshape(B * T2 * F2, 9)
    out = fused_linear(patches, w, b, act=act)
    return out.reshape(B, T2, F2, -1)


def depthwise_conv2d_s2(x, w, b):
    """Depthwise 3x3 conv, stride 2, pad 1.  x: (B, T, F, C) NHWC."""
    B, T, F, C = x.shape
    T2, F2 = T // 2, F // 2
    xp = jnp.pad(x, ((0, 0), (1, 1), (1, 1), (0, 0)))
    taps = []
    for kt in range(3):
        for kf in range(3):
            taps.append(xp[:, kt:kt + 2 * T2:2, kf:kf + 2 * F2:2, :])
    taps = jnp.stack(taps, axis=0).reshape(9, B * T2 * F2, C)
    out = depthwise_taps(taps, w.reshape(9, C), b)
    return out.reshape(B, T2, F2, C)


# ------------------------------ model modules -------------------------------

def sinusoidal_pe(length, d_model):
    pos = jnp.arange(length, dtype=jnp.float32)[:, None]
    i = jnp.arange(0, d_model, 2, dtype=jnp.float32)[None, :]
    angle = pos / jnp.power(10000.0, i / d_model)
    pe = jnp.zeros((length, d_model), jnp.float32)
    pe = pe.at[:, 0::2].set(jnp.sin(angle))
    pe = pe.at[:, 1::2].set(jnp.cos(angle))
    return pe


def conv_subsampling(x, p):
    """DWSepConv2dSubsampling: (B, L, D) -> (B, L//4, E * D//4)."""
    B, L, D = x.shape
    h = conv2d_3x3_s2_in1(x, p["sub_c1_w"], p["sub_c1_b"], act="relu")
    h = depthwise_conv2d_s2(h, p["sub_dw_w"], p["sub_dw_b"])
    _, T2, F2, E = h.shape
    h = fused_linear(h.reshape(B * T2 * F2, E), p["sub_pw_w"], p["sub_pw_b"],
                     act="relu")
    h = h.reshape(B, T2, F2, E)
    # PyTorch: (B, C, T, F).permute(0, 2, 1, 3).reshape(B, T, C*F)
    return jnp.transpose(h, (0, 1, 3, 2)).reshape(B, T2, E * F2)


def time_reduction(x, p):
    """Depthwise conv1d (k=5, stride 2, pad 2) + pointwise conv."""
    B, L, E = x.shape
    h = depthwise_conv1d(x, p["tr_dw_w"], p["tr_dw_b"], stride=2)
    M = h.shape[1]
    h = fused_linear(h.reshape(B * M, E), p["tr_pw_w"], p["tr_pw_b"])
    return h.reshape(B, M, E)


def mha_block(x, lp, num_heads):
    """LN(x + W_o * attn(QKV(scale*x + shift)))  -- residual + ln1 fused."""
    B, L, E = x.shape
    x2 = x.reshape(B * L, E)
    q, kv = fused_linear(x2, lp["mha_qkv_w"], lp["mha_qkv_b"],
                         scale=lp["mha_scale"], shift=lp["mha_shift"],
                         out_split=(E, 2 * E))
    attn = flash_mha(q.reshape(B, L, E), kv.reshape(B, L, 2 * E), num_heads)
    out = fused_linear(attn.reshape(B * L, E), lp["mha_o_w"], lp["mha_o_b"],
                       residual=x2, ln=(lp["ln1_g"], lp["ln1_b"]))
    return out.reshape(B, L, E)


def ff_block(x2, lp, pfx, resid_factor, ln_g, ln_b):
    """LN(x + f * W2(Swish(W1(scale*x + shift)))) on flattened (M, E) rows."""
    h = fused_linear(x2, lp[pfx + "_w1"], lp[pfx + "_b1"], act="swish",
                     scale=lp[pfx + "_scale"], shift=lp[pfx + "_shift"])
    return fused_linear(h, lp[pfx + "_w2"], lp[pfx + "_b2"],
                        residual=x2, res_factor=resid_factor, ln=(ln_g, ln_b))


def conv_block(x, lp, ln_g, ln_b):
    """LN(x + PW2(Swish(BN(DWConv(Swish(PW1(scale*x + shift)))))))."""
    B, L, E = x.shape
    x2 = x.reshape(B * L, E)
    h = fused_linear(x2, lp["cv_pw1_w"], lp["cv_pw1_b"], act="swish",
                     scale=lp["cv_scale"], shift=lp["cv_shift"])
    ch = h.shape[-1]
    bn_scale = lp["cv_bn_g"] * lax.rsqrt(lp["cv_bn_var"] + 1e-5)
    bn_shift = lp["cv_bn_b"] - lp["cv_bn_mean"] * bn_scale
    h = depthwise_conv1d(h.reshape(B, L, ch), lp["cv_dw_w"], lp["cv_dw_b"],
                         stride=1, bn_scale=bn_scale, bn_shift=bn_shift)
    out = fused_linear(h.reshape(B * L, ch), lp["cv_pw2_w"], lp["cv_pw2_b"],
                       residual=x2, ln=(ln_g, ln_b))
    return out.reshape(B, L, E)


def squeezeformer_block(x, lp, num_heads, ff_resid_factor=1.0):
    B, L, E = x.shape
    x = mha_block(x, lp, num_heads)
    x2 = ff_block(x.reshape(B * L, E), lp, "ff1", ff_resid_factor,
                  lp["ln2_g"], lp["ln2_b"])
    x = conv_block(x2.reshape(B, L, E), lp, lp["ln3_g"], lp["ln3_b"])
    x2 = ff_block(x.reshape(B * L, E), lp, "ff2", ff_resid_factor,
                  lp["ln4_g"], lp["ln4_b"])
    return x2.reshape(B, L, E)


def squeezeformer_encoder(x, p, cfg):
    E = cfg["enc_dim"]
    x = conv_subsampling(x, p)
    B, Lp, Fin = x.shape
    # in_proj + positional-encoding add + pre-LayerNorm fused into ONE pass.
    pe = jnp.broadcast_to(sinusoidal_pe(Lp, E)[None], (B, Lp, E))
    x = fused_linear(x.reshape(B * Lp, Fin), p["in_proj_w"], p["in_proj_b"],
                     residual=pe.reshape(B * Lp, E),
                     ln=(p["pre_ln_g"], p["pre_ln_b"]))
    x = x.reshape(B, Lp, E)
    x_skip = None
    for lth, lp in enumerate(p["layers"]):
        if lth == cfg["time_reduce_idx"]:
            x_skip = x
            x = time_reduction(x, p)
        if lth == cfg["time_recover_idx"]:
            x_up = jnp.repeat(x, 2, axis=1)[:, :x_skip.shape[1], :]
            B2, L2, _ = x_up.shape
            x = fused_linear(x_up.reshape(B2 * L2, E), p["trec_w"],
                             p["trec_b"],
                             residual=x_skip.reshape(B2 * L2, E))
            x = x.reshape(B2, L2, E)
        x = squeezeformer_block(x, lp, cfg["heads"], cfg["ff_resid_factor"])
    return x


# ------------------------------- param init ---------------------------------

def init_params(key, cfg):
    E = cfg["enc_dim"]
    D = cfg["in_feats"]
    ffh = E * cfg["ff_expansion"]
    ch = E * cfg["conv_expansion"]
    Kc = cfg["conv_kernel"]
    BF = MATMUL_DTYPE

    keys = iter(jax.random.split(key, 256))

    def nrm(shape, dtype=jnp.float32, scale=0.05):
        return (scale * jax.random.normal(next(keys), shape,
                                          jnp.float32)).astype(dtype)

    p = {}
    # DWSepConv2dSubsampling
    p["sub_c1_w"] = nrm((9, E), BF); p["sub_c1_b"] = jnp.zeros((E,))
    p["sub_dw_w"] = nrm((3, 3, E)); p["sub_dw_b"] = jnp.zeros((E,))
    p["sub_pw_w"] = nrm((E, E), BF); p["sub_pw_b"] = jnp.zeros((E,))
    # in_proj / pre_ln
    p["in_proj_w"] = nrm((E * (D // 2 // 2), E), BF)
    p["in_proj_b"] = jnp.zeros((E,))
    p["pre_ln_g"] = jnp.ones((E,)); p["pre_ln_b"] = jnp.zeros((E,))
    # time reduction / recovery
    p["tr_dw_w"] = nrm((5, E)); p["tr_dw_b"] = jnp.zeros((E,))
    p["tr_pw_w"] = nrm((E, E), BF); p["tr_pw_b"] = jnp.zeros((E,))
    p["trec_w"] = nrm((E, E), BF); p["trec_b"] = jnp.zeros((E,))

    layers = []
    for _ in range(cfg["n_layers"]):
        lp = {}
        lp["mha_scale"] = jnp.ones((E,)); lp["mha_shift"] = jnp.zeros((E,))
        lp["mha_qkv_w"] = nrm((E, 3 * E), BF)
        lp["mha_qkv_b"] = jnp.zeros((3 * E,))
        lp["mha_o_w"] = nrm((E, E), BF); lp["mha_o_b"] = jnp.zeros((E,))
        lp["ln1_g"] = jnp.ones((E,)); lp["ln1_b"] = jnp.zeros((E,))
        for pfx in ("ff1", "ff2"):
            lp[pfx + "_scale"] = jnp.ones((E,))
            lp[pfx + "_shift"] = jnp.zeros((E,))
            lp[pfx + "_w1"] = nrm((E, ffh), BF)
            lp[pfx + "_b1"] = jnp.zeros((ffh,))
            lp[pfx + "_w2"] = nrm((ffh, E), BF)
            lp[pfx + "_b2"] = jnp.zeros((E,))
        lp["ln2_g"] = jnp.ones((E,)); lp["ln2_b"] = jnp.zeros((E,))
        lp["cv_scale"] = jnp.ones((E,)); lp["cv_shift"] = jnp.zeros((E,))
        lp["cv_pw1_w"] = nrm((E, ch), BF); lp["cv_pw1_b"] = jnp.zeros((ch,))
        lp["cv_dw_w"] = nrm((Kc, ch)); lp["cv_dw_b"] = jnp.zeros((ch,))
        lp["cv_bn_g"] = jnp.ones((ch,)); lp["cv_bn_b"] = jnp.zeros((ch,))
        lp["cv_bn_mean"] = jnp.zeros((ch,)); lp["cv_bn_var"] = jnp.ones((ch,))
        lp["cv_pw2_w"] = nrm((ch, E), BF); lp["cv_pw2_b"] = jnp.zeros((E,))
        lp["ln3_g"] = jnp.ones((E,)); lp["ln3_b"] = jnp.zeros((E,))
        lp["ln4_g"] = jnp.ones((E,)); lp["ln4_b"] = jnp.zeros((E,))
        layers.append(lp)
    p["layers"] = layers
    return p


# ---------------------------------- main -------------------------------------

if __name__ == "__main__":
    cfg = dict(
        in_feats=16,          # D (divisible by 4)
        enc_dim=128,          # E (lane-dense)
        n_layers=2,
        time_reduce_idx=0,
        time_recover_idx=1,
        heads=4,
        ff_expansion=4,
        ff_resid_factor=1.0,
        conv_expansion=2,
        conv_kernel=7,
    )
    key = jax.random.PRNGKey(0)
    pkey, xkey = jax.random.split(key)
    params = init_params(pkey, cfg)

    B, L = 2, 64
    x = jax.random.normal(xkey, (B, L, cfg["in_feats"]), jnp.float32)

    fwd = jax.jit(functools.partial(squeezeformer_encoder, cfg=cfg))
    out = fwd(x, params)
    out = jax.block_until_ready(out)
    assert out.shape == (B, L // 4, cfg["enc_dim"]), out.shape
    assert bool(jnp.all(jnp.isfinite(out)))
    print("KERNEL_OK")
</pallas_src>

<mosaic_0001>
module attributes {stable_mosaic.version = 11 : i64} {
  func.func @_fused_linear_kernel(%arg0: i32, %arg1: memref<256x9xf32, #tpu.memory_space<vmem>>, %arg2: memref<9x128xbf16, #tpu.memory_space<vmem>>, %arg3: memref<1x128xf32, #tpu.memory_space<vmem>>, %arg4: memref<256x128xf32, #tpu.memory_space<vmem>>) attributes {dimension_semantics = [#tpu.dimension_semantics<parallel>], iteration_bounds = array<i64: 2>, scalar_prefetch = 0 : i64, scratch_operands = 0 : i64, tpu.core_type = #tpu.core_type<tc>, window_params = [{transform_indices = @transform_0, window_bounds = array<i64: 256, 9>}, {pipeline_mode = #tpu.pipeline_mode<synchronous>, transform_indices = @transform_1, window_bounds = array<i64: 9, 128>}, {pipeline_mode = #tpu.pipeline_mode<synchronous>, transform_indices = @transform_2, window_bounds = array<i64: 1, 128>}, {transform_indices = @transform_3, window_bounds = array<i64: 256, 128>}]} {
    %c0 = arith.constant 0 : index
    %c0_0 = arith.constant 0 : index
    %0 = vector.load %arg1[%c0, %c0_0] : memref<256x9xf32, #tpu.memory_space<vmem>>, vector<256x9xf32>
    %1 = arith.truncf %0 : vector<256x9xf32> to vector<256x9xbf16>
    %c0_1 = arith.constant 0 : index
    %c0_2 = arith.constant 0 : index
    %2 = vector.load %arg2[%c0_1, %c0_2] : memref<9x128xbf16, #tpu.memory_space<vmem>>, vector<9x128xbf16>
    %cst = arith.constant dense<0.000000e+00> : vector<256x128xf32>
    %3 = tpu.matmul %1, %2, %cst {dimension_numbers = #tpu.dot_dimension_numbers<[1], [0], [0], [1], [0, 0, 1, 1], [], []>} : vector<256x9xbf16>, vector<9x128xbf16>, vector<256x128xf32> -> vector<256x128xf32>
    %c0_3 = arith.constant 0 : index
    %c0_4 = arith.constant 0 : index
    %4 = vector.load %arg3[%c0_3, %c0_4] : memref<1x128xf32, #tpu.memory_space<vmem>>, vector<1x128xf32>
    %5 = vector.broadcast %4 : vector<1x128xf32> to vector<256x128xf32>
    %6 = arith.addf %3, %5 : vector<256x128xf32>
    %cst_5 = arith.constant 0.000000e+00 : f32
    %7 = vector.broadcast %cst_5 : f32 to vector<256x128xf32>
    %8 = arith.maximumf %6, %7 : vector<256x128xf32>
    %c0_6 = arith.constant 0 : index
    %c0_7 = arith.constant 0 : index
    %9 = vector.load %arg4[%c0_6, %c0_7] : memref<256x128xf32, #tpu.memory_space<vmem>>, vector<256x128xf32>
    tpu.vector_store %arg4[%c0_6, %c0_7], %8 {strides = array<i32>} : memref<256x128xf32, #tpu.memory_space<vmem>>, vector<256x128xf32>,
    return
  }
  func.func @transform_0(%arg0: i32) -> (i32, i32) {
    %c0_i32 = arith.constant 0 : i32
    %c0_i32_0 = arith.constant 0 : i32
    return %arg0, %c0_i32 : i32, i32
  }
  func.func @transform_1(%arg0: i32) -> (i32, i32) {
    %c0_i32 = arith.constant 0 : i32
    %c0_i32_0 = arith.constant 0 : i32
    %c0_i32_1 = arith.constant 0 : i32
    return %c0_i32, %c0_i32_0 : i32, i32
  }
  func.func @transform_2(%arg0: i32) -> (i32, i32) {
    %c0_i32 = arith.constant 0 : i32
    %c0_i32_0 = arith.constant 0 : i32
    %c0_i32_1 = arith.constant 0 : i32
    return %c0_i32, %c0_i32_0 : i32, i32
  }
  func.func @transform_3(%arg0: i32) -> (i32, i32) {
    %c0_i32 = arith.constant 0 : i32
    %c0_i32_0 = arith.constant 0 : i32
    return %arg0, %c0_i32 : i32, i32
  }
}

module attributes {stable_mosaic.version = 11 : i64} {
  func.func @_fused_linear_kernel(%arg0: i32, %arg1: memref<128x128xf32, #tpu.memory_space<vmem>>, %arg2: memref<128x128xbf16, #tpu.memory_space<vmem>>, %arg3: memref<1x128xf32, #tpu.memory_space<vmem>>, %arg4: memref<128x128xf32, #tpu.memory_space<vmem>>) attributes {dimension_semantics = [#tpu.dimension_semantics<parallel>], iteration_bounds = array<i64: 1>, scalar_prefetch = 0 : i64, scratch_operands = 0 : i64, tpu.core_type = #tpu.core_type<tc>, window_params = [{transform_indices = @transform_0, window_bounds = array<i64: 128, 128>}, {pipeline_mode = #tpu.pipeline_mode<synchronous>, transform_indices = @transform_1, window_bounds = array<i64: 128, 128>}, {pipeline_mode = #tpu.pipeline_mode<synchronous>, transform_indices = @transform_2, window_bounds = array<i64: 1, 128>}, {transform_indices = @transform_3, window_bounds = array<i64: 128, 128>}]} {
    %c0 = arith.constant 0 : index
    %c0_0 = arith.constant 0 : index
    %0 = vector.load %arg1[%c0, %c0_0] : memref<128x128xf32, #tpu.memory_space<vmem>>, vector<128x128xf32>
    %1 = arith.truncf %0 : vector<128x128xf32> to vector<128x128xbf16>
    %c0_1 = arith.constant 0 : index
    %c0_2 = arith.constant 0 : index
    %2 = vector.load %arg2[%c0_1, %c0_2] : memref<128x128xbf16, #tpu.memory_space<vmem>>, vector<128x128xbf16>
    %cst = arith.constant dense<0.000000e+00> : vector<128x128xf32>
    %3 = tpu.matmul %1, %2, %cst {dimension_numbers = #tpu.dot_dimension_numbers<[1], [0], [0], [1], [0, 0, 1, 1], [], []>} : vector<128x128xbf16>, vector<128x128xbf16>, vector<128x128xf32> -> vector<128x128xf32>
    %c0_3 = arith.constant 0 : index
    %c0_4 = arith.constant 0 : index
    %4 = vector.load %arg3[%c0_3, %c0_4] : memref<1x128xf32, #tpu.memory_space<vmem>>, vector<1x128xf32>
    %5 = vector.broadcast %4 : vector<1x128xf32> to vector<128x128xf32>
    %6 = arith.addf %3, %5 : vector<128x128xf32>
    %cst_5 = arith.constant 0.000000e+00 : f32
    %7 = vector.broadcast %cst_5 : f32 to vector<128x128xf32>
    %8 = arith.maximumf %6, %7 : vector<128x128xf32>
    %c0_6 = arith.constant 0 : index
    %c0_7 = arith.constant 0 : index
    %9 = vector.load %arg4[%c0_6, %c0_7] : memref<128x128xf32, #tpu.memory_space<vmem>>, vector<128x128xf32>
    tpu.vector_store %arg4[%c0_6, %c0_7], %8 {strides = array<i32>} : memref<128x128xf32, #tpu.memory_space<vmem>>, vector<128x128xf32>,
    return
  }
  func.func @transform_0(%arg0: i32) -> (i32, i32) {
    %c0_i32 = arith.constant 0 : i32
    %c0_i32_0 = arith.constant 0 : i32
    return %arg0, %c0_i32 : i32, i32
  }
  func.func @transform_1(%arg0: i32) -> (i32, i32) {
    %c0_i32 = arith.constant 0 : i32
    %c0_i32_0 = arith.constant 0 : i32
    %c0_i32_1 = arith.constant 0 : i32
    return %c0_i32, %c0_i32_0 : i32, i32
  }
  func.func @transform_2(%arg0: i32) -> (i32, i32) {
    %c0_i32 = arith.constant 0 : i32
    %c0_i32_0 = arith.constant 0 : i32
    %c0_i32_1 = arith.constant 0 : i32
    return %c0_i32, %c0_i32_0 : i32, i32
  }
  func.func @transform_3(%arg0: i32) -> (i32, i32) {
    %c0_i32 = arith.constant 0 : i32
    %c0_i32_0 = arith.constant 0 : i32
    return %arg0, %c0_i32 : i32, i32
  }
}

module attributes {stable_mosaic.version = 11 : i64} {
  func.func @_dw_taps_kernel(%arg0: i32, %arg1: memref<9x128x128xf32, #tpu.memory_space<vmem>>, %arg2: memref<9x128xf32, #tpu.memory_space<vmem>>, %arg3: memref<1x128xf32, #tpu.memory_space<vmem>>, %arg4: memref<128x128xf32, #tpu.memory_space<vmem>>) attributes {dimension_semantics = [#tpu.dimension_semantics<parallel>], iteration_bounds = array<i64: 1>, scalar_prefetch = 0 : i64, scratch_operands = 0 : i64, tpu.core_type = #tpu.core_type<tc>, window_params = [{transform_indices = @transform_0, window_bounds = array<i64: 9, 128, 128>}, {pipeline_mode = #tpu.pipeline_mode<synchronous>, transform_indices = @transform_1, window_bounds = array<i64: 9, 128>}, {pipeline_mode = #tpu.pipeline_mode<synchronous>, transform_indices = @transform_2, window_bounds = array<i64: 1, 128>}, {transform_indices = @transform_3, window_bounds = array<i64: 128, 128>}]} {
    %c0 = arith.constant 0 : index
    %c0_0 = arith.constant 0 : index
    %0 = vector.load %arg2[%c0, %c0_0] : memref<9x128xf32, #tpu.memory_space<vmem>>, vector<9x128xf32>
    %cst = arith.constant 0.000000e+00 : f32
    %1 = vector.broadcast %cst : f32 to vector<128x128xf32>
    %c0_1 = arith.constant 0 : index
    %c0_2 = arith.constant 0 : index
    %c0_3 = arith.constant 0 : index
    %2 = vector.load %arg1[%c0_1, %c0_2, %c0_3] : memref<9x128x128xf32, #tpu.memory_space<vmem>>, vector<1x128x128xf32>
    %3 = vector.shape_cast %2 : vector<1x128x128xf32> to vector<128x128xf32>
    %4 = vector.extract_strided_slice %0 {offsets = [0, 0], sizes = [1, 128], strides = [1, 1]} : vector<9x128xf32> to vector<1x128xf32>
    %5 = vector.broadcast %4 : vector<1x128xf32> to vector<128x128xf32>
    %6 = arith.mulf %3, %5 : vector<128x128xf32>
    %7 = arith.addf %1, %6 : vector<128x128xf32>
    %c1 = arith.constant 1 : index
    %c0_4 = arith.constant 0 : index
    %c0_5 = arith.constant 0 : index
    %8 = vector.load %arg1[%c1, %c0_4, %c0_5] : memref<9x128x128xf32, #tpu.memory_space<vmem>>, vector<1x128x128xf32>
    %9 = vector.shape_cast %8 : vector<1x128x128xf32> to vector<128x128xf32>
    %10 = vector.extract_strided_slice %0 {offsets = [1, 0], sizes = [1, 128], strides = [1, 1]} : vector<9x128xf32> to vector<1x128xf32>
    %11 = vector.broadcast %10 : vector<1x128xf32> to vector<128x128xf32>
    %12 = arith.mulf %9, %11 : vector<128x128xf32>
    %13 = arith.addf %7, %12 : vector<128x128xf32>
    %c2 = arith.constant 2 : index
    %c0_6 = arith.constant 0 : index
    %c0_7 = arith.constant 0 : index
    %14 = vector.load %arg1[%c2, %c0_6, %c0_7] : memref<9x128x128xf32, #tpu.memory_space<vmem>>, vector<1x128x128xf32>
    %15 = vector.shape_cast %14 : vector<1x128x128xf32> to vector<128x128xf32>
    %16 = vector.extract_strided_slice %0 {offsets = [2, 0], sizes = [1, 128], strides = [1, 1]} : vector<9x128xf32> to vector<1x128xf32>
    %17 = vector.broadcast %16 : vector<1x128xf32> to vector<128x128xf32>
    %18 = arith.mulf %15, %17 : vector<128x128xf32>
    %19 = arith.addf %13, %18 : vector<128x128xf32>
    %c3 = arith.constant 3 : index
    %c0_8 = arith.constant 0 : index
    %c0_9 = arith.constant 0 : index
    %20 = vector.load %arg1[%c3, %c0_8, %c0_9] : memref<9x128x128xf32, #tpu.memory_space<vmem>>, vector<1x128x128xf32>
    %21 = vector.shape_cast %20 : vector<1x128x128xf32> to vector<128x128xf32>
    %22 = vector.extract_strided_slice %0 {offsets = [3, 0], sizes = [1, 128], strides = [1, 1]} : vector<9x128xf32> to vector<1x128xf32>
    %23 = vector.broadcast %22 : vector<1x128xf32> to vector<128x128xf32>
    %24 = arith.mulf %21, %23 : vector<128x128xf32>
    %25 = arith.addf %19, %24 : vector<128x128xf32>
    %c4 = arith.constant 4 : index
    %c0_10 = arith.constant 0 : index
    %c0_11 = arith.constant 0 : index
    %26 = vector.load %arg1[%c4, %c0_10, %c0_11] : memref<9x128x128xf32, #tpu.memory_space<vmem>>, vector<1x128x128xf32>
    %27 = vector.shape_cast %26 : vector<1x128x128xf32> to vector<128x128xf32>
    %28 = vector.extract_strided_slice %0 {offsets = [4, 0], sizes = [1, 128], strides = [1, 1]} : vector<9x128xf32> to vector<1x128xf32>
    %29 = vector.broadcast %28 : vector<1x128xf32> to vector<128x128xf32>
    %30 = arith.mulf %27, %29 : vector<128x128xf32>
    %31 = arith.addf %25, %30 : vector<128x128xf32>
    %c5 = arith.constant 5 : index
    %c0_12 = arith.constant 0 : index
    %c0_13 = arith.constant 0 : index
    %32 = vector.load %arg1[%c5, %c0_12, %c0_13] : memref<9x128x128xf32, #tpu.memory_space<vmem>>, vector<1x128x128xf32>
    %33 = vector.shape_cast %32 : vector<1x128x128xf32> to vector<128x128xf32>
    %34 = vector.extract_strided_slice %0 {offsets = [5, 0], sizes = [1, 128], strides = [1, 1]} : vector<9x128xf32> to vector<1x128xf32>
    %35 = vector.broadcast %34 : vector<1x128xf32> to vector<128x128xf32>
    %36 = arith.mulf %33, %35 : vector<128x128xf32>
    %37 = arith.addf %31, %36 : vector<128x128xf32>
    %c6 = arith.constant 6 : index
    %c0_14 = arith.constant 0 : index
    %c0_15 = arith.constant 0 : index
    %38 = vector.load %arg1[%c6, %c0_14, %c0_15] : memref<9x128x128xf32, #tpu.memory_space<vmem>>, vector<1x128x128xf32>
    %39 = vector.shape_cast %38 : vector<1x128x128xf32> to vector<128x128xf32>
    %40 = vector.extract_strided_slice %0 {offsets = [6, 0], sizes = [1, 128], strides = [1, 1]} : vector<9x128xf32> to vector<1x128xf32>
    %41 = vector.broadcast %40 : vector<1x128xf32> to vector<128x128xf32>
    %42 = arith.mulf %39, %41 : vector<128x128xf32>
    %43 = arith.addf %37, %42 : vector<128x128xf32>
    %c7 = arith.constant 7 : index
    %c0_16 = arith.constant 0 : index
    %c0_17 = arith.constant 0 : index
    %44 = vector.load %arg1[%c7, %c0_16, %c0_17] : memref<9x128x128xf32, #tpu.memory_space<vmem>>, vector<1x128x128xf32>
    %45 = vector.shape_cast %44 : vector<1x128x128xf32> to vector<128x128xf32>
    %46 = vector.extract_strided_slice %0 {offsets = [7, 0], sizes = [1, 128], strides = [1, 1]} : vector<9x128xf32> to vector<1x128xf32>
    %47 = vector.broadcast %46 : vector<1x128xf32> to vector<128x128xf32>
    %48 = arith.mulf %45, %47 : vector<128x128xf32>
    %49 = arith.addf %43, %48 : vector<128x128xf32>
    %c8 = arith.constant 8 : index
    %c0_18 = arith.constant 0 : index
    %c0_19 = arith.constant 0 : index
    %50 = vector.load %arg1[%c8, %c0_18, %c0_19] : memref<9x128x128xf32, #tpu.memory_space<vmem>>, vector<1x128x128xf32>
    %51 = vector.shape_cast %50 : vector<1x128x128xf32> to vector<128x128xf32>
    %52 = vector.extract_strided_slice %0 {offsets = [8, 0], sizes = [1, 128], strides = [1, 1]} : vector<9x128xf32> to vector<1x128xf32>
    %53 = vector.broadcast %52 : vector<1x128xf32> to vector<128x128xf32>
    %54 = arith.mulf %51, %53 : vector<128x128xf32>
    %55 = arith.addf %49, %54 : vector<128x128xf32>
    %c0_20 = arith.constant 0 : index
    %c0_21 = arith.constant 0 : index
    %56 = vector.load %arg3[%c0_20, %c0_21] : memref<1x128xf32, #tpu.memory_space<vmem>>, vector<1x128xf32>
    %57 = vector.broadcast %56 : vector<1x128xf32> to vector<128x128xf32>
    %58 = arith.addf %55, %57 : vector<128x128xf32>
    %c0_22 = arith.constant 0 : index
    %c0_23 = arith.constant 0 : index
    %59 = vector.load %arg4[%c0_22, %c0_23] : memref<128x128xf32, #tpu.memory_space<vmem>>, vector<128x128xf32>
    tpu.vector_store %arg4[%c0_22, %c0_23], %58 {strides = array<i32>} : memref<128x128xf32, #tpu.memory_space<vmem>>, vector<128x128xf32>,
    return
  }
  func.func @transform_0(%arg0: i32) -> (i32, i32, i32) {
    %c0_i32 = arith.constant 0 : i32
    %c0_i32_0 = arith.constant 0 : i32
    %c0_i32_1 = arith.constant 0 : i32
    return %c0_i32, %arg0, %c0_i32_0 : i32, i32, i32
  }
  func.func @transform_1(%arg0: i32) -> (i32, i32) {
    %c0_i32 = arith.constant 0 : i32
    %c0_i32_0 = arith.constant 0 : i32
    %c0_i32_1 = arith.constant 0 : i32
    return %c0_i32, %c0_i32_0 : i32, i32
  }
  func.func @transform_2(%arg0: i32) -> (i32, i32) {
    %c0_i32 = arith.constant 0 : i32
    %c0_i32_0 = arith.constant 0 : i32
    %c0_i32_1 = arith.constant 0 : i32
    return %c0_i32, %c0_i32_0 : i32, i32
  }
  func.func @transform_3(%arg0: i32) -> (i32, i32) {
    %c0_i32 = arith.constant 0 : i32
    %c0_i32_0 = arith.constant 0 : i32
    return %arg0, %c0_i32 : i32, i32
  }
}

module attributes {stable_mosaic.version = 11 : i64} {
  func.func @_fused_linear_kernel(%arg0: i32, %arg1: memref<32x512xf32, #tpu.memory_space<vmem>>, %arg2: memref<512x128xbf16, #tpu.memory_space<vmem>>, %arg3: memref<1x128xf32, #tpu.memory_space<vmem>>, %arg4: memref<32x128xf32, #tpu.memory_space<vmem>>, %arg5: memref<1x128xf32, #tpu.memory_space<vmem>>, %arg6: memref<1x128xf32, #tpu.memory_space<vmem>>, %arg7: memref<32x128xf32, #tpu.memory_space<vmem>>) attributes {dimension_semantics = [#tpu.dimension_semantics<parallel>], iteration_bounds = array<i64: 1>, scalar_prefetch = 0 : i64, scratch_operands = 0 : i64, tpu.core_type = #tpu.core_type<tc>, window_params = [{transform_indices = @transform_0, window_bounds = array<i64: 32, 512>}, {pipeline_mode = #tpu.pipeline_mode<synchronous>, transform_indices = @transform_1, window_bounds = array<i64: 512, 128>}, {pipeline_mode = #tpu.pipeline_mode<synchronous>, transform_indices = @transform_2, window_bounds = array<i64: 1, 128>}, {transform_indices = @transform_3, window_bounds = array<i64: 32, 128>}, {pipeline_mode = #tpu.pipeline_mode<synchronous>, transform_indices = @transform_4, window_bounds = array<i64: 1, 128>}, {pipeline_mode = #tpu.pipeline_mode<synchronous>, transform_indices = @transform_5, window_bounds = array<i64: 1, 128>}, {transform_indices = @transform_6, window_bounds = array<i64: 32, 128>}]} {
    %c0 = arith.constant 0 : index
    %c0_0 = arith.constant 0 : index
    %0 = vector.load %arg1[%c0, %c0_0] : memref<32x512xf32, #tpu.memory_space<vmem>>, vector<32x512xf32>
    %1 = arith.truncf %0 : vector<32x512xf32> to vector<32x512xbf16>
    %c0_1 = arith.constant 0 : index
    %c0_2 = arith.constant 0 : index
    %2 = vector.load %arg2[%c0_1, %c0_2] : memref<512x128xbf16, #tpu.memory_space<vmem>>, vector<512x128xbf16>
    %cst = arith.constant dense<0.000000e+00> : vector<32x128xf32>
    %3 = tpu.matmul %1, %2, %cst {dimension_numbers = #tpu.dot_dimension_numbers<[1], [0], [0], [1], [0, 0, 1, 1], [], []>} : vector<32x512xbf16>, vector<512x128xbf16>, vector<32x128xf32> -> vector<32x128xf32>
    %c0_3 = arith.constant 0 : index
    %c0_4 = arith.constant 0 : index
    %4 = vector.load %arg3[%c0_3, %c0_4] : memref<1x128xf32, #tpu.memory_space<vmem>>, vector<1x128xf32>
    %5 = vector.broadcast %4 : vector<1x128xf32> to vector<32x128xf32>
    %6 = arith.addf %3, %5 : vector<32x128xf32>
    %c0_5 = arith.constant 0 : index
    %c0_6 = arith.constant 0 : index
    %7 = vector.load %arg4[%c0_5, %c0_6] : memref<32x128xf32, #tpu.memory_space<vmem>>, vector<32x128xf32>
    %cst_7 = arith.constant 1.000000e+00 : f32
    %8 = vector.broadcast %cst_7 : f32 to vector<32x128xf32>
    %9 = arith.mulf %8, %6 : vector<32x128xf32>
    %10 = arith.addf %7, %9 : vector<32x128xf32>
    %cst_8 = arith.constant dense<0.000000e+00> : vector<32xf32>
    %11 = vector.multi_reduction <add>, %10, %cst_8 [1] : vector<32x128xf32> to vector<32xf32>
    %12 = vector.shape_cast %11 : vector<32xf32> to vector<32x1xf32>
    %cst_9 = arith.constant 1.280000e+02 : f32
    %13 = vector.broadcast %cst_9 : f32 to vector<32x1xf32>
    %14 = arith.divf %12, %13 : vector<32x1xf32>
    %15 = vector.broadcast %14 : vector<32x1xf32> to vector<32x128xf32>
    %16 = arith.subf %10, %15 : vector<32x128xf32>
    %17 = arith.mulf %16, %16 : vector<32x128xf32>
    %cst_10 = arith.constant dense<0.000000e+00> : vector<32xf32>
    %18 = vector.multi_reduction <add>, %17, %cst_10 [1] : vector<32x128xf32> to vector<32xf32>
    %19 = vector.shape_cast %18 : vector<32xf32> to vector<32x1xf32>
    %cst_11 = arith.constant 1.280000e+02 : f32
    %20 = vector.broadcast %cst_11 : f32 to vector<32x1xf32>
    %21 = arith.divf %19, %20 : vector<32x1xf32>
    %cst_12 = arith.constant 9.99999974E-6 : f32
    %22 = vector.broadcast %cst_12 : f32 to vector<32x1xf32>
    %23 = arith.addf %21, %22 : vector<32x1xf32>
    %24 = math.rsqrt %23 : vector<32x1xf32>
    %25 = vector.broadcast %24 : vector<32x1xf32> to vector<32x128xf32>
    %26 = arith.mulf %16, %25 : vector<32x128xf32>
    %c0_13 = arith.constant 0 : index
    %c0_14 = arith.constant 0 : index
    %27 = vector.load %arg5[%c0_13, %c0_14] : memref<1x128xf32, #tpu.memory_space<vmem>>, vector<1x128xf32>
    %28 = vector.broadcast %27 : vector<1x128xf32> to vector<32x128xf32>
    %29 = arith.mulf %26, %28 : vector<32x128xf32>
    %c0_15 = arith.constant 0 : index
    %c0_16 = arith.constant 0 : index
    %30 = vector.load %arg6[%c0_15, %c0_16] : memref<1x128xf32, #tpu.memory_space<vmem>>, vector<1x128xf32>
    %31 = vector.broadcast %30 : vector<1x128xf32> to vector<32x128xf32>
    %32 = arith.addf %29, %31 : vector<32x128xf32>
    %c0_17 = arith.constant 0 : index
    %c0_18 = arith.constant 0 : index
    %33 = vector.load %arg7[%c0_17, %c0_18] : memref<32x128xf32, #tpu.memory_space<vmem>>, vector<32x128xf32>
    tpu.vector_store %arg7[%c0_17, %c0_18], %32 {strides = array<i32>} : memref<32x128xf32, #tpu.memory_space<vmem>>, vector<32x128xf32>,
    return
  }
  func.func @transform_0(%arg0: i32) -> (i32, i32) {
    %c0_i32 = arith.constant 0 : i32
    %c0_i32_0 = arith.constant 0 : i32
    return %arg0, %c0_i32 : i32, i32
  }
  func.func @transform_1(%arg0: i32) -> (i32, i32) {
    %c0_i32 = arith.constant 0 : i32
    %c0_i32_0 = arith.constant 0 : i32
    %c0_i32_1 = arith.constant 0 : i32
    return %c0_i32, %c0_i32_0 : i32, i32
  }
  func.func @transform_2(%arg0: i32) -> (i32, i32) {
    %c0_i32 = arith.constant 0 : i32
    %c0_i32_0 = arith.constant 0 : i32
    %c0_i32_1 = arith.constant 0 : i32
    return %c0_i32, %c0_i32_0 : i32, i32
  }
  func.func @transform_3(%arg0: i32) -> (i32, i32) {
    %c0_i32 = arith.constant 0 : i32
    %c0_i32_0 = arith.constant 0 : i32
    return %arg0, %c0_i32 : i32, i32
  }
  func.func @transform_4(%arg0: i32) -> (i32, i32) {
    %c0_i32 = arith.constant 0 : i32
    %c0_i32_0 = arith.constant 0 : i32
    %c0_i32_1 = arith.constant 0 : i32
    return %c0_i32, %c0_i32_0 : i32, i32
  }
  func.func @transform_5(%arg0: i32) -> (i32, i32) {
    %c0_i32 = arith.constant 0 : i32
    %c0_i32_0 = arith.constant 0 : i32
    %c0_i32_1 = arith.constant 0 : i32
    return %c0_i32, %c0_i32_0 : i32, i32
  }
  func.func @transform_6(%arg0: i32) -> (i32, i32) {
    %c0_i32 = arith.constant 0 : i32
    %c0_i32_0 = arith.constant 0 : i32
    return %arg0, %c0_i32 : i32, i32
  }
}

module attributes {stable_mosaic.version = 11 : i64} {
  func.func @_dwconv1d_kernel(%arg0: i32, %arg1: i32, %arg2: memref<1x10x128xf32, #tpu.memory_space<vmem>>, %arg3: memref<1x10x128xf32, #tpu.memory_space<vmem>>, %arg4: memref<5x128xf32, #tpu.memory_space<vmem>>, %arg5: memref<1x128xf32, #tpu.memory_space<vmem>>, %arg6: memref<1x8x128xf32, #tpu.memory_space<vmem>>) attributes {dimension_semantics = [#tpu.dimension_semantics<parallel>, #tpu.dimension_semantics<parallel>], iteration_bounds = array<i64: 2, 1>, scalar_prefetch = 0 : i64, scratch_operands = 0 : i64, tpu.core_type = #tpu.core_type<tc>, window_params = [{transform_indices = @transform_0, window_bounds = array<i64: 1, 10, 128>}, {transform_indices = @transform_1, window_bounds = array<i64: 1, 10, 128>}, {transform_indices = @transform_2, window_bounds = array<i64: 5, 128>}, {transform_indices = @transform_3, window_bounds = array<i64: 1, 128>}, {transform_indices = @transform_4, window_bounds = array<i64: 1, 8, 128>}]} {
    %c0 = arith.constant 0 : index
    %c0_0 = arith.constant 0 : index
    %0 = vector.load %arg4[%c0, %c0_0] : memref<5x128xf32, #tpu.memory_space<vmem>>, vector<5x128xf32>
    %cst = arith.constant 0.000000e+00 : f32
    %1 = vector.broadcast %cst : f32 to vector<8x128xf32>
    %c0_1 = arith.constant 0 : index
    %c0_2 = arith.constant 0 : index
    %c0_3 = arith.constant 0 : index
    %2 = vector.load %arg2[%c0_1, %c0_2, %c0_3] : memref<1x10x128xf32, #tpu.memory_space<vmem>>, vector<1x8x128xf32>
    %3 = vector.shape_cast %2 : vector<1x8x128xf32> to vector<8x128xf32>
    %4 = vector.extract_strided_slice %0 {offsets = [0, 0], sizes = [1, 128], strides = [1, 1]} : vector<5x128xf32> to vector<1x128xf32>
    %5 = vector.broadcast %4 : vector<1x128xf32> to vector<8x128xf32>
    %6 = arith.mulf %3, %5 : vector<8x128xf32>
    %7 = arith.addf %1, %6 : vector<8x128xf32>
    %c0_4 = arith.constant 0 : index
    %c0_5 = arith.constant 0 : index
    %c0_6 = arith.constant 0 : index
    %8 = vector.load %arg3[%c0_4, %c0_5, %c0_6] : memref<1x10x128xf32, #tpu.memory_space<vmem>>, vector<1x8x128xf32>
    %9 = vector.shape_cast %8 : vector<1x8x128xf32> to vector<8x128xf32>
    %10 = vector.extract_strided_slice %0 {offsets = [1, 0], sizes = [1, 128], strides = [1, 1]} : vector<5x128xf32> to vector<1x128xf32>
    %11 = vector.broadcast %10 : vector<1x128xf32> to vector<8x128xf32>
    %12 = arith.mulf %9, %11 : vector<8x128xf32>
    %13 = arith.addf %7, %12 : vector<8x128xf32>
    %c0_7 = arith.constant 0 : index
    %c1 = arith.constant 1 : index
    %c0_8 = arith.constant 0 : index
    %14 = vector.load %arg2[%c0_7, %c1, %c0_8] : memref<1x10x128xf32, #tpu.memory_space<vmem>>, vector<1x8x128xf32>
    %15 = vector.shape_cast %14 : vector<1x8x128xf32> to vector<8x128xf32>
    %16 = vector.extract_strided_slice %0 {offsets = [2, 0], sizes = [1, 128], strides = [1, 1]} : vector<5x128xf32> to vector<1x128xf32>
    %17 = vector.broadcast %16 : vector<1x128xf32> to vector<8x128xf32>
    %18 = arith.mulf %15, %17 : vector<8x128xf32>
    %19 = arith.addf %13, %18 : vector<8x128xf32>
    %c0_9 = arith.constant 0 : index
    %c1_10 = arith.constant 1 : index
    %c0_11 = arith.constant 0 : index
    %20 = vector.load %arg3[%c0_9, %c1_10, %c0_11] : memref<1x10x128xf32, #tpu.memory_space<vmem>>, vector<1x8x128xf32>
    %21 = vector.shape_cast %20 : vector<1x8x128xf32> to vector<8x128xf32>
    %22 = vector.extract_strided_slice %0 {offsets = [3, 0], sizes = [1, 128], strides = [1, 1]} : vector<5x128xf32> to vector<1x128xf32>
    %23 = vector.broadcast %22 : vector<1x128xf32> to vector<8x128xf32>
    %24 = arith.mulf %21, %23 : vector<8x128xf32>
    %25 = arith.addf %19, %24 : vector<8x128xf32>
    %c0_12 = arith.constant 0 : index
    %c2 = arith.constant 2 : index
    %c0_13 = arith.constant 0 : index
    %26 = vector.load %arg2[%c0_12, %c2, %c0_13] : memref<1x10x128xf32, #tpu.memory_space<vmem>>, vector<1x8x128xf32>
    %27 = vector.shape_cast %26 : vector<1x8x128xf32> to vector<8x128xf32>
    %28 = vector.extract_strided_slice %0 {offsets = [4, 0], sizes = [1, 128], strides = [1, 1]} : vector<5x128xf32> to vector<1x128xf32>
    %29 = vector.broadcast %28 : vector<1x128xf32> to vector<8x128xf32>
    %30 = arith.mulf %27, %29 : vector<8x128xf32>
    %31 = arith.addf %25, %30 : vector<8x128xf32>
    %c0_14 = arith.constant 0 : index
    %c0_15 = arith.constant 0 : index
    %32 = vector.load %arg5[%c0_14, %c0_15] : memref<1x128xf32, #tpu.memory_space<vmem>>, vector<1x128xf32>
    %33 = vector.broadcast %32 : vector<1x128xf32> to vector<8x128xf32>
    %34 = arith.addf %31, %33 : vector<8x128xf32>
    %c0_16 = arith.constant 0 : index
    %c0_17 = arith.constant 0 : index
    %c0_18 = arith.constant 0 : index
    %35 = vector.load %arg6[%c0_16, %c0_17, %c0_18] : memref<1x8x128xf32, #tpu.memory_space<vmem>>, vector<1x8x128xf32>
    %36 = vector.shape_cast %35 : vector<1x8x128xf32> to vector<8x128xf32>
    %37 = vector.shape_cast %34 : vector<8x128xf32> to vector<1x8x128xf32>
    tpu.vector_store %arg6[%c0_16, %c0_17, %c0_18], %37 {strides = array<i32>} : memref<1x8x128xf32, #tpu.memory_space<vmem>>, vector<1x8x128xf32>,
    return
  }
  func.func @transform_0(%arg0: i32, %arg1: i32) -> (i32, i32, i32) {
    %c0_i32 = arith.constant 0 : i32
    %c0_i32_0 = arith.constant 0 : i32
    return %arg0, %c0_i32, %arg1 : i32, i32, i32
  }
  func.func @transform_1(%arg0: i32, %arg1: i32) -> (i32, i32, i32) {
    %c0_i32 = arith.constant 0 : i32
    %c0_i32_0 = arith.constant 0 : i32
    return %arg0, %c0_i32, %arg1 : i32, i32, i32
  }
  func.func @transform_2(%arg0: i32, %arg1: i32) -> (i32, i32) {
    %c0_i32 = arith.constant 0 : i32
    %c0_i32_0 = arith.constant 0 : i32
    return %c0_i32, %arg1 : i32, i32
  }
  func.func @transform_3(%arg0: i32, %arg1: i32) -> (i32, i32) {
    %c0_i32 = arith.constant 0 : i32
    %c0_i32_0 = arith.constant 0 : i32
    return %c0_i32, %arg1 : i32, i32
  }
  func.func @transform_4(%arg0: i32, %arg1: i32) -> (i32, i32, i32) {
    %c0_i32 = arith.constant 0 : i32
    %c0_i32_0 = arith.constant 0 : i32
    return %arg0, %c0_i32, %arg1 : i32, i32, i32
  }
}

module attributes {stable_mosaic.version = 11 : i64} {
  func.func @_fused_linear_kernel(%arg0: i32, %arg1: memref<16x128xf32, #tpu.memory_space<vmem>>, %arg2: memref<128x384xbf16, #tpu.memory_space<vmem>>, %arg3: memref<1x384xf32, #tpu.memory_space<vmem>>, %arg4: memref<1x128xf32, #tpu.memory_space<vmem>>, %arg5: memref<1x128xf32, #tpu.memory_space<vmem>>, %arg6: memref<16x128xf32, #tpu.memory_space<vmem>>, %arg7: memref<16x256xf32, #tpu.memory_space<vmem>>) attributes {dimension_semantics = [#tpu.dimension_semantics<parallel>], iteration_bounds = array<i64: 1>, scalar_prefetch = 0 : i64, scratch_operands = 0 : i64, tpu.core_type = #tpu.core_type<tc>, window_params = [{transform_indices = @transform_0, window_bounds = array<i64: 16, 128>}, {pipeline_mode = #tpu.pipeline_mode<synchronous>, transform_indices = @transform_1, window_bounds = array<i64: 128, 384>}, {pipeline_mode = #tpu.pipeline_mode<synchronous>, transform_indices = @transform_2, window_bounds = array<i64: 1, 384>}, {pipeline_mode = #tpu.pipeline_mode<synchronous>, transform_indices = @transform_3, window_bounds = array<i64: 1, 128>}, {pipeline_mode = #tpu.pipeline_mode<synchronous>, transform_indices = @transform_4, window_bounds = array<i64: 1, 128>}, {transform_indices = @transform_5, window_bounds = array<i64: 16, 128>}, {transform_indices = @transform_6, window_bounds = array<i64: 16, 256>}]} {
    %c0 = arith.constant 0 : index
    %c0_0 = arith.constant 0 : index
    %0 = vector.load %arg1[%c0, %c0_0] : memref<16x128xf32, #tpu.memory_space<vmem>>, vector<16x128xf32>
    %c0_1 = arith.constant 0 : index
    %c0_2 = arith.constant 0 : index
    %1 = vector.load %arg4[%c0_1, %c0_2] : memref<1x128xf32, #tpu.memory_space<vmem>>, vector<1x128xf32>
    %2 = vector.broadcast %1 : vector<1x128xf32> to vector<16x128xf32>
    %3 = arith.mulf %0, %2 : vector<16x128xf32>
    %c0_3 = arith.constant 0 : index
    %c0_4 = arith.constant 0 : index
    %4 = vector.load %arg5[%c0_3, %c0_4] : memref<1x128xf32, #tpu.memory_space<vmem>>, vector<1x128xf32>
    %5 = vector.broadcast %4 : vector<1x128xf32> to vector<16x128xf32>
    %6 = arith.addf %3, %5 : vector<16x128xf32>
    %7 = arith.truncf %6 : vector<16x128xf32> to vector<16x128xbf16>
    %c0_5 = arith.constant 0 : index
    %c0_6 = arith.constant 0 : index
    %8 = vector.load %arg2[%c0_5, %c0_6] : memref<128x384xbf16, #tpu.memory_space<vmem>>, vector<128x384xbf16>
    %cst = arith.constant dense<0.000000e+00> : vector<16x384xf32>
    %9 = tpu.matmul %7, %8, %cst {dimension_numbers = #tpu.dot_dimension_numbers<[1], [0], [0], [1], [0, 0, 1, 1], [], []>} : vector<16x128xbf16>, vector<128x384xbf16>, vector<16x384xf32> -> vector<16x384xf32>
    %c0_7 = arith.constant 0 : index
    %c0_8 = arith.constant 0 : index
    %10 = vector.load %arg3[%c0_7, %c0_8] : memref<1x384xf32, #tpu.memory_space<vmem>>, vector<1x384xf32>
    %11 = vector.broadcast %10 : vector<1x384xf32> to vector<16x384xf32>
    %12 = arith.addf %9, %11 : vector<16x384xf32>
    %13 = vector.extract_strided_slice %12 {offsets = [0, 0], sizes = [16, 128], strides = [1, 1]} : vector<16x384xf32> to vector<16x128xf32>
    %c0_9 = arith.constant 0 : index
    %c0_10 = arith.constant 0 : index
    %14 = vector.load %arg6[%c0_9, %c0_10] : memref<16x128xf32, #tpu.memory_space<vmem>>, vector<16x128xf32>
    tpu.vector_store %arg6[%c0_9, %c0_10], %13 {strides = array<i32>} : memref<16x128xf32, #tpu.memory_space<vmem>>, vector<16x128xf32>,
    %15 = vector.extract_strided_slice %12 {offsets = [0, 128], sizes = [16, 256], strides = [1, 1]} : vector<16x384xf32> to vector<16x256xf32>
    %c0_11 = arith.constant 0 : index
    %c0_12 = arith.constant 0 : index
    %16 = vector.load %arg7[%c0_11, %c0_12] : memref<16x256xf32, #tpu.memory_space<vmem>>, vector<16x256xf32>
    tpu.vector_store %arg7[%c0_11, %c0_12], %15 {strides = array<i32>} : memref<16x256xf32, #tpu.memory_space<vmem>>, vector<16x256xf32>,
    return
  }
  func.func @transform_0(%arg0: i32) -> (i32, i32) {
    %c0_i32 = arith.constant 0 : i32
    %c0_i32_0 = arith.constant 0 : i32
    return %arg0, %c0_i32 : i32, i32
  }
  func.func @transform_1(%arg0: i32) -> (i32, i32) {
    %c0_i32 = arith.constant 0 : i32
    %c0_i32_0 = arith.constant 0 : i32
    %c0_i32_1 = arith.constant 0 : i32
    return %c0_i32, %c0_i32_0 : i32, i32
  }
  func.func @transform_2(%arg0: i32) -> (i32, i32) {
    %c0_i32 = arith.constant 0 : i32
    %c0_i32_0 = arith.constant 0 : i32
    %c0_i32_1 = arith.constant 0 : i32
    return %c0_i32, %c0_i32_0 : i32, i32
  }
  func.func @transform_3(%arg0: i32) -> (i32, i32) {
    %c0_i32 = arith.constant 0 : i32
    %c0_i32_0 = arith.constant 0 : i32
    %c0_i32_1 = arith.constant 0 : i32
    return %c0_i32, %c0_i32_0 : i32, i32
  }
  func.func @transform_4(%arg0: i32) -> (i32, i32) {
    %c0_i32 = arith.constant 0 : i32
    %c0_i32_0 = arith.constant 0 : i32
    %c0_i32_1 = arith.constant 0 : i32
    return %c0_i32, %c0_i32_0 : i32, i32
  }
  func.func @transform_5(%arg0: i32) -> (i32, i32) {
    %c0_i32 = arith.constant 0 : i32
    %c0_i32_0 = arith.constant 0 : i32
    return %arg0, %c0_i32 : i32, i32
  }
  func.func @transform_6(%arg0: i32) -> (i32, i32) {
    %c0_i32 = arith.constant 0 : i32
    %c0_i32_0 = arith.constant 0 : i32
    return %arg0, %c0_i32 : i32, i32
  }
}

module attributes {stable_mosaic.version = 11 : i64} {
  func.func @_fused_linear_kernel(%arg0: i32, %arg1: memref<16x128xf32, #tpu.memory_space<vmem>>, %arg2: memref<128x128xbf16, #tpu.memory_space<vmem>>, %arg3: memref<1x128xf32, #tpu.memory_space<vmem>>, %arg4: memref<16x128xf32, #tpu.memory_space<vmem>>) attributes {dimension_semantics = [#tpu.dimension_semantics<parallel>], iteration_bounds = array<i64: 1>, scalar_prefetch = 0 : i64, scratch_operands = 0 : i64, tpu.core_type = #tpu.core_type<tc>, window_params = [{transform_indices = @transform_0, window_bounds = array<i64: 16, 128>}, {pipeline_mode = #tpu.pipeline_mode<synchronous>, transform_indices = @transform_1, window_bounds = array<i64: 128, 128>}, {pipeline_mode = #tpu.pipeline_mode<synchronous>, transform_indices = @transform_2, window_bounds = array<i64: 1, 128>}, {transform_indices = @transform_3, window_bounds = array<i64: 16, 128>}]} {
    %c0 = arith.constant 0 : index
    %c0_0 = arith.constant 0 : index
    %0 = vector.load %arg1[%c0, %c0_0] : memref<16x128xf32, #tpu.memory_space<vmem>>, vector<16x128xf32>
    %1 = arith.truncf %0 : vector<16x128xf32> to vector<16x128xbf16>
    %c0_1 = arith.constant 0 : index
    %c0_2 = arith.constant 0 : index
    %2 = vector.load %arg2[%c0_1, %c0_2] : memref<128x128xbf16, #tpu.memory_space<vmem>>, vector<128x128xbf16>
    %cst = arith.constant dense<0.000000e+00> : vector<16x128xf32>
    %3 = tpu.matmul %1, %2, %cst {dimension_numbers = #tpu.dot_dimension_numbers<[1], [0], [0], [1], [0, 0, 1, 1], [], []>} : vector<16x128xbf16>, vector<128x128xbf16>, vector<16x128xf32> -> vector<16x128xf32>
    %c0_3 = arith.constant 0 : index
    %c0_4 = arith.constant 0 : index
    %4 = vector.load %arg3[%c0_3, %c0_4] : memref<1x128xf32, #tpu.memory_space<vmem>>, vector<1x128xf32>
    %5 = vector.broadcast %4 : vector<1x128xf32> to vector<16x128xf32>
    %6 = arith.addf %3, %5 : vector<16x128xf32>
    %c0_5 = arith.constant 0 : index
    %c0_6 = arith.constant 0 : index
    %7 = vector.load %arg4[%c0_5, %c0_6] : memref<16x128xf32, #tpu.memory_space<vmem>>, vector<16x128xf32>
    tpu.vector_store %arg4[%c0_5, %c0_6], %6 {strides = array<i32>} : memref<16x128xf32, #tpu.memory_space<vmem>>, vector<16x128xf32>,
    return
  }
  func.func @transform_0(%arg0: i32) -> (i32, i32) {
    %c0_i32 = arith.constant 0 : i32
    %c0_i32_0 = arith.constant 0 : i32
    return %arg0, %c0_i32 : i32, i32
  }
  func.func @transform_1(%arg0: i32) -> (i32, i32) {
    %c0_i32 = arith.constant 0 : i32
    %c0_i32_0 = arith.constant 0 : i32
    %c0_i32_1 = arith.constant 0 : i32
    return %c0_i32, %c0_i32_0 : i32, i32
  }
  func.func @transform_2(%arg0: i32) -> (i32, i32) {
    %c0_i32 = arith.constant 0 : i32
    %c0_i32_0 = arith.constant 0 : i32
    %c0_i32_1 = arith.constant 0 : i32
    return %c0_i32, %c0_i32_0 : i32, i32
  }
  func.func @transform_3(%arg0: i32) -> (i32, i32) {
    %c0_i32 = arith.constant 0 : i32
    %c0_i32_0 = arith.constant 0 : i32
    return %arg0, %c0_i32 : i32, i32
  }
}

module attributes {stable_mosaic.version = 11 : i64} {
  func.func @_flash_mha_kernel(%arg0: i32, %arg1: i32, %arg2: i32, %arg3: memref<1x8x128xf32, #tpu.memory_space<vmem>>, %arg4: memref<1x8x256xf32, #tpu.memory_space<vmem>>, %arg5: memref<1x8x128xf32, #tpu.memory_space<vmem>>, %arg6: memref<4x8x1xf32, #tpu.memory_space<vmem>>, %arg7: memref<4x8x1xf32, #tpu.memory_space<vmem>>, %arg8: memref<4x8x32xf32, #tpu.memory_space<vmem>>) attributes {dimension_semantics = [#tpu.dimension_semantics<parallel>, #tpu.dimension_semantics<parallel>, #tpu.dimension_semantics<arbitrary>], iteration_bounds = array<i64: 2, 1, 1>, scalar_prefetch = 0 : i64, scratch_operands = 3 : i64, tpu.core_type = #tpu.core_type<tc>, window_params = [{transform_indices = @transform_0, window_bounds = array<i64: 1, 8, 128>}, {transform_indices = @transform_1, window_bounds = array<i64: 1, 8, 256>}, {transform_indices = @transform_2, window_bounds = array<i64: 1, 8, 128>}]} {
    %c0_i32 = arith.constant 0 : i32
    %0 = arith.cmpi eq, %arg2, %c0_i32 : i32
    %1 = arith.extui %0 : i1 to i32
    %c0_i32_0 = arith.constant 0 : i32
    %2 = arith.cmpi ne, %1, %c0_i32_0 : i32
    scf.if %2 {
      %cst_112 = arith.constant -1.000000e+30 : f32
      %196 = vector.broadcast %cst_112 : f32 to vector<4x8x1xf32>
      %c0_113 = arith.constant 0 : index
      %c0_114 = arith.constant 0 : index
      %c0_115 = arith.constant 0 : index
      %197 = vector.load %arg6[%c0_113, %c0_114, %c0_115] : memref<4x8x1xf32, #tpu.memory_space<vmem>>, vector<4x8x1xf32>
      tpu.vector_store %arg6[%c0_113, %c0_114, %c0_115], %196 {strides = array<i32>} : memref<4x8x1xf32, #tpu.memory_space<vmem>>, vector<4x8x1xf32>,
      %cst_116 = arith.constant 0.000000e+00 : f32
      %198 = vector.broadcast %cst_116 : f32 to vector<4x8x1xf32>
      %c0_117 = arith.constant 0 : index
      %c0_118 = arith.constant 0 : index
      %c0_119 = arith.constant 0 : index
      %199 = vector.load %arg7[%c0_117, %c0_118, %c0_119] : memref<4x8x1xf32, #tpu.memory_space<vmem>>, vector<4x8x1xf32>
      tpu.vector_store %arg7[%c0_117, %c0_118, %c0_119], %198 {strides = array<i32>} : memref<4x8x1xf32, #tpu.memory_space<vmem>>, vector<4x8x1xf32>,
      %cst_120 = arith.constant 0.000000e+00 : f32
      %200 = vector.broadcast %cst_120 : f32 to vector<4x8x32xf32>
      %c0_121 = arith.constant 0 : index
      %c0_122 = arith.constant 0 : index
      %c0_123 = arith.constant 0 : index
      %201 = vector.load %arg8[%c0_121, %c0_122, %c0_123] : memref<4x8x32xf32, #tpu.memory_space<vmem>>, vector<4x8x32xf32>
      tpu.vector_store %arg8[%c0_121, %c0_122, %c0_123], %200 {strides = array<i32>} : memref<4x8x32xf32, #tpu.memory_space<vmem>>, vector<4x8x32xf32>,
    } else {
    }
    %c8_i32 = arith.constant 8 : i32
    %3 = arith.muli %arg2, %c8_i32 : i32
    %4 = tpu.iota {dimensions = array<i32: 1>} : vector<1x8xi32>
    %5 = vector.broadcast %3 : i32 to vector<1x8xi32>
    %6 = arith.addi %5, %4 : vector<1x8xi32>
    %c8_i32_1 = arith.constant 8 : i32
    %7 = vector.broadcast %c8_i32_1 : i32 to vector<1x8xi32>
    %8 = arith.cmpi slt, %6, %7 : vector<1x8xi32>
    %c0 = arith.constant 0 : index
    %c0_2 = arith.constant 0 : index
    %c0_3 = arith.constant 0 : index
    %9 = vector.load %arg3[%c0, %c0_2, %c0_3] : memref<1x8x128xf32, #tpu.memory_space<vmem>>, vector<1x8x128xf32>
    %10 = vector.shape_cast %9 : vector<1x8x128xf32> to vector<8x128xf32>
    %cst = arith.constant 0.176776692 : f32
    %11 = vector.broadcast %cst : f32 to vector<8x128xf32>
    %12 = arith.mulf %10, %11 : vector<8x128xf32>
    %13 = vector.extract_strided_slice %12 {offsets = [0, 0], sizes = [8, 32], strides = [1, 1]} : vector<8x128xf32> to vector<8x32xf32>
    %c0_4 = arith.constant 0 : index
    %c0_5 = arith.constant 0 : index
    %c0_6 = arith.constant 0 : index
    %14 = vector.load %arg4[%c0_4, %c0_5, %c0_6] : memref<1x8x256xf32, #tpu.memory_space<vmem>>, vector<1x8x32xf32>
    %15 = vector.shape_cast %14 : vector<1x8x32xf32> to vector<8x32xf32>
    %c0_7 = arith.constant 0 : index
    %c0_8 = arith.constant 0 : index
    %c128 = arith.constant 128 : index
    %16 = vector.load %arg4[%c0_7, %c0_8, %c128] : memref<1x8x256xf32, #tpu.memory_space<vmem>>, vector<1x8x32xf32>
    %17 = vector.shape_cast %16 : vector<1x8x32xf32> to vector<8x32xf32>
    %18 = arith.truncf %13 : vector<8x32xf32> to vector<8x32xbf16>
    %19 = arith.truncf %15 : vector<8x32xf32> to vector<8x32xbf16>
    %cst_9 = arith.constant dense<0.000000e+00> : vector<8x8xf32>
    %20 = tpu.matmul %18, %19, %cst_9 {dimension_numbers = #tpu.dot_dimension_numbers<[1], [1], [0], [0], [0, 0, 1, 0], [], []>} : vector<8x32xbf16>, vector<8x32xbf16>, vector<8x8xf32> -> vector<8x8xf32>
    %cst_10 = arith.constant -1.000000e+30 : f32
    %21 = vector.shape_cast %8 : vector<1x8xi1> to vector<1x8xi1>
    %22 = vector.broadcast %21 : vector<1x8xi1> to vector<8x8xi1>
    %23 = vector.broadcast %cst_10 : f32 to vector<8x8xf32>
    %24 = arith.select %22, %20, %23 : vector<8x8xi1>, vector<8x8xf32>
    %c0_11 = arith.constant 0 : index
    %c0_12 = arith.constant 0 : index
    %c0_13 = arith.constant 0 : index
    %25 = vector.load %arg6[%c0_11, %c0_12, %c0_13] : memref<4x8x1xf32, #tpu.memory_space<vmem>>, vector<1x8x1xf32>
    %26 = vector.shape_cast %25 : vector<1x8x1xf32> to vector<8x1xf32>
    %cst_14 = arith.constant dense<0xFF800000> : vector<8xf32>
    %27 = vector.multi_reduction <maximumf>, %24, %cst_14 [1] : vector<8x8xf32> to vector<8xf32>
    %28 = vector.shape_cast %27 : vector<8xf32> to vector<8x1xf32>
    %29 = arith.maximumf %26, %28 : vector<8x1xf32>
    %30 = arith.subf %26, %29 : vector<8x1xf32>
    %31 = math.exp %30 : vector<8x1xf32>
    %32 = vector.broadcast %29 : vector<8x1xf32> to vector<8x8xf32>
    %33 = arith.subf %24, %32 : vector<8x8xf32>
    %34 = math.exp %33 : vector<8x8xf32>
    %c0_15 = arith.constant 0 : index
    %c0_16 = arith.constant 0 : index
    %c0_17 = arith.constant 0 : index
    %35 = vector.load %arg7[%c0_15, %c0_16, %c0_17] : memref<4x8x1xf32, #tpu.memory_space<vmem>>, vector<1x8x1xf32>
    %36 = vector.shape_cast %35 : vector<1x8x1xf32> to vector<8x1xf32>
    %37 = arith.mulf %31, %36 : vector<8x1xf32>
    %cst_18 = arith.constant dense<0.000000e+00> : vector<8xf32>
    %38 = vector.multi_reduction <add>, %34, %cst_18 [1] : vector<8x8xf32> to vector<8xf32>
    %39 = vector.shape_cast %38 : vector<8xf32> to vector<8x1xf32>
    %40 = arith.addf %37, %39 : vector<8x1xf32>
    %c0_19 = arith.constant 0 : index
    %c0_20 = arith.constant 0 : index
    %c0_21 = arith.constant 0 : index
    %41 = vector.load %arg7[%c0_19, %c0_20, %c0_21] : memref<4x8x1xf32, #tpu.memory_space<vmem>>, vector<1x8x1xf32>
    %42 = vector.shape_cast %41 : vector<1x8x1xf32> to vector<8x1xf32>
    %43 = vector.shape_cast %40 : vector<8x1xf32> to vector<1x8x1xf32>
    tpu.vector_store %arg7[%c0_19, %c0_20, %c0_21], %43 {strides = array<i32>} : memref<4x8x1xf32, #tpu.memory_space<vmem>>, vector<1x8x1xf32>,
    %c0_22 = arith.constant 0 : index
    %c0_23 = arith.constant 0 : index
    %c0_24 = arith.constant 0 : index
    %44 = vector.load %arg8[%c0_22, %c0_23, %c0_24] : memref<4x8x32xf32, #tpu.memory_space<vmem>>, vector<1x8x32xf32>
    %45 = vector.shape_cast %44 : vector<1x8x32xf32> to vector<8x32xf32>
    %46 = vector.broadcast %31 : vector<8x1xf32> to vector<8x32xf32>
    %47 = arith.mulf %46, %45 : vector<8x32xf32>
    %48 = arith.truncf %34 : vector<8x8xf32> to vector<8x8xbf16>
    %49 = arith.truncf %17 : vector<8x32xf32> to vector<8x32xbf16>
    %cst_25 = arith.constant dense<0.000000e+00> : vector<8x32xf32>
    %50 = tpu.matmul %48, %49, %cst_25 {dimension_numbers = #tpu.dot_dimension_numbers<[1], [0], [0], [1], [0, 0, 1, 1], [], []>} : vector<8x8xbf16>, vector<8x32xbf16>, vector<8x32xf32> -> vector<8x32xf32>
    %51 = arith.addf %47, %50 : vector<8x32xf32>
    %c0_26 = arith.constant 0 : index
    %c0_27 = arith.constant 0 : index
    %c0_28 = arith.constant 0 : index
    %52 = vector.load %arg8[%c0_26, %c0_27, %c0_28] : memref<4x8x32xf32, #tpu.memory_space<vmem>>, vector<1x8x32xf32>
    %53 = vector.shape_cast %52 : vector<1x8x32xf32> to vector<8x32xf32>
    %54 = vector.shape_cast %51 : vector<8x32xf32> to vector<1x8x32xf32>
    tpu.vector_store %arg8[%c0_26, %c0_27, %c0_28], %54 {strides = array<i32>} : memref<4x8x32xf32, #tpu.memory_space<vmem>>, vector<1x8x32xf32>,
    %c0_29 = arith.constant 0 : index
    %c0_30 = arith.constant 0 : index
    %c0_31 = arith.constant 0 : index
    %55 = vector.load %arg6[%c0_29, %c0_30, %c0_31] : memref<4x8x1xf32, #tpu.memory_space<vmem>>, vector<1x8x1xf32>
    %56 = vector.shape_cast %55 : vector<1x8x1xf32> to vector<8x1xf32>
    %57 = vector.shape_cast %29 : vector<8x1xf32> to vector<1x8x1xf32>
    tpu.vector_store %arg6[%c0_29, %c0_30, %c0_31], %57 {strides = array<i32>} : memref<4x8x1xf32, #tpu.memory_space<vmem>>, vector<1x8x1xf32>,
    %58 = vector.extract_strided_slice %12 {offsets = [0, 32], sizes = [8, 32], strides = [1, 1]} : vector<8x128xf32> to vector<8x32xf32>
    %c0_32 = arith.constant 0 : index
    %c0_33 = arith.constant 0 : index
    %c32 = arith.constant 32 : index
    %59 = vector.load %arg4[%c0_32, %c0_33, %c32] : memref<1x8x256xf32, #tpu.memory_space<vmem>>, vector<1x8x32xf32>
    %60 = vector.shape_cast %59 : vector<1x8x32xf32> to vector<8x32xf32>
    %c0_34 = arith.constant 0 : index
    %c0_35 = arith.constant 0 : index
    %c160 = arith.constant 160 : index
    %61 = vector.load %arg4[%c0_34, %c0_35, %c160] : memref<1x8x256xf32, #tpu.memory_space<vmem>>, vector<1x8x32xf32>
    %62 = vector.shape_cast %61 : vector<1x8x32xf32> to vector<8x32xf32>
    %63 = arith.truncf %58 : vector<8x32xf32> to vector<8x32xbf16>
    %64 = arith.truncf %60 : vector<8x32xf32> to vector<8x32xbf16>
    %cst_36 = arith.constant dense<0.000000e+00> : vector<8x8xf32>
    %65 = tpu.matmul %63, %64, %cst_36 {dimension_numbers = #tpu.dot_dimension_numbers<[1], [1], [0], [0], [0, 0, 1, 0], [], []>} : vector<8x32xbf16>, vector<8x32xbf16>, vector<8x8xf32> -> vector<8x8xf32>
    %cst_37 = arith.constant -1.000000e+30 : f32
    %66 = vector.shape_cast %8 : vector<1x8xi1> to vector<1x8xi1>
    %67 = vector.broadcast %66 : vector<1x8xi1> to vector<8x8xi1>
    %68 = vector.broadcast %cst_37 : f32 to vector<8x8xf32>
    %69 = arith.select %67, %65, %68 : vector<8x8xi1>, vector<8x8xf32>
    %c1 = arith.constant 1 : index
    %c0_38 = arith.constant 0 : index
    %c0_39 = arith.constant 0 : index
    %70 = vector.load %arg6[%c1, %c0_38, %c0_39] : memref<4x8x1xf32, #tpu.memory_space<vmem>>, vector<1x8x1xf32>
    %71 = vector.shape_cast %70 : vector<1x8x1xf32> to vector<8x1xf32>
    %cst_40 = arith.constant dense<0xFF800000> : vector<8xf32>
    %72 = vector.multi_reduction <maximumf>, %69, %cst_40 [1] : vector<8x8xf32> to vector<8xf32>
    %73 = vector.shape_cast %72 : vector<8xf32> to vector<8x1xf32>
    %74 = arith.maximumf %71, %73 : vector<8x1xf32>
    %75 = arith.subf %71, %74 : vector<8x1xf32>
    %76 = math.exp %75 : vector<8x1xf32>
    %77 = vector.broadcast %74 : vector<8x1xf32> to vector<8x8xf32>
    %78 = arith.subf %69, %77 : vector<8x8xf32>
    %79 = math.exp %78 : vector<8x8xf32>
    %c1_41 = arith.constant 1 : index
    %c0_42 = arith.constant 0 : index
    %c0_43 = arith.constant 0 : index
    %80 = vector.load %arg7[%c1_41, %c0_42, %c0_43] : memref<4x8x1xf32, #tpu.memory_space<vmem>>, vector<1x8x1xf32>
    %81 = vector.shape_cast %80 : vector<1x8x1xf32> to vector<8x1xf32>
    %82 = arith.mulf %76, %81 : vector<8x1xf32>
    %cst_44 = arith.constant dense<0.000000e+00> : vector<8xf32>
    %83 = vector.multi_reduction <add>, %79, %cst_44 [1] : vector<8x8xf32> to vector<8xf32>
    %84 = vector.shape_cast %83 : vector<8xf32> to vector<8x1xf32>
    %85 = arith.addf %82, %84 : vector<8x1xf32>
    %c1_45 = arith.constant 1 : index
    %c0_46 = arith.constant 0 : index
    %c0_47 = arith.constant 0 : index
    %86 = vector.load %arg7[%c1_45, %c0_46, %c0_47] : memref<4x8x1xf32, #tpu.memory_space<vmem>>, vector<1x8x1xf32>
    %87 = vector.shape_cast %86 : vector<1x8x1xf32> to vector<8x1xf32>
    %88 = vector.shape_cast %85 : vector<8x1xf32> to vector<1x8x1xf32>
    tpu.vector_store %arg7[%c1_45, %c0_46, %c0_47], %88 {strides = array<i32>} : memref<4x8x1xf32, #tpu.memory_space<vmem>>, vector<1x8x1xf32>,
    %c1_48 = arith.constant 1 : index
    %c0_49 = arith.constant 0 : index
    %c0_50 = arith.constant 0 : index
    %89 = vector.load %arg8[%c1_48, %c0_49, %c0_50] : memref<4x8x32xf32, #tpu.memory_space<vmem>>, vector<1x8x32xf32>
    %90 = vector.shape_cast %89 : vector<1x8x32xf32> to vector<8x32xf32>
    %91 = vector.broadcast %76 : vector<8x1xf32> to vector<8x32xf32>
    %92 = arith.mulf %91, %90 : vector<8x32xf32>
    %93 = arith.truncf %79 : vector<8x8xf32> to vector<8x8xbf16>
    %94 = arith.truncf %62 : vector<8x32xf32> to vector<8x32xbf16>
    %cst_51 = arith.constant dense<0.000000e+00> : vector<8x32xf32>
    %95 = tpu.matmul %93, %94, %cst_51 {dimension_numbers = #tpu.dot_dimension_numbers<[1], [0], [0], [1], [0, 0, 1, 1], [], []>} : vector<8x8xbf16>, vector<8x32xbf16>, vector<8x32xf32> -> vector<8x32xf32>
    %96 = arith.addf %92, %95 : vector<8x32xf32>
    %c1_52 = arith.constant 1 : index
    %c0_53 = arith.constant 0 : index
    %c0_54 = arith.constant 0 : index
    %97 = vector.load %arg8[%c1_52, %c0_53, %c0_54] : memref<4x8x32xf32, #tpu.memory_space<vmem>>, vector<1x8x32xf32>
    %98 = vector.shape_cast %97 : vector<1x8x32xf32> to vector<8x32xf32>
    %99 = vector.shape_cast %96 : vector<8x32xf32> to vector<1x8x32xf32>
    tpu.vector_store %arg8[%c1_52, %c0_53, %c0_54], %99 {strides = array<i32>} : memref<4x8x32xf32, #tpu.memory_space<vmem>>, vector<1x8x32xf32>,
    %c1_55 = arith.constant 1 : index
    %c0_56 = arith.constant 0 : index
    %c0_57 = arith.constant 0 : index
    %100 = vector.load %arg6[%c1_55, %c0_56, %c0_57] : memref<4x8x1xf32, #tpu.memory_space<vmem>>, vector<1x8x1xf32>
    %101 = vector.shape_cast %100 : vector<1x8x1xf32> to vector<8x1xf32>
    %102 = vector.shape_cast %74 : vector<8x1xf32> to vector<1x8x1xf32>
    tpu.vector_store %arg6[%c1_55, %c0_56, %c0_57], %102 {strides = array<i32>} : memref<4x8x1xf32, #tpu.memory_space<vmem>>, vector<1x8x1xf32>,
    %103 = vector.extract_strided_slice %12 {offsets = [0, 64], sizes = [8, 32], strides = [1, 1]} : vector<8x128xf32> to vector<8x32xf32>
    %c0_58 = arith.constant 0 : index
    %c0_59 = arith.constant 0 : index
    %c64 = arith.constant 64 : index
    %104 = vector.load %arg4[%c0_58, %c0_59, %c64] : memref<1x8x256xf32, #tpu.memory_space<vmem>>, vector<1x8x32xf32>
    %105 = vector.shape_cast %104 : vector<1x8x32xf32> to vector<8x32xf32>
    %c0_60 = arith.constant 0 : index
    %c0_61 = arith.constant 0 : index
    %c192 = arith.constant 192 : index
    %106 = vector.load %arg4[%c0_60, %c0_61, %c192] : memref<1x8x256xf32, #tpu.memory_space<vmem>>, vector<1x8x32xf32>
    %107 = vector.shape_cast %106 : vector<1x8x32xf32> to vector<8x32xf32>
    %108 = arith.truncf %103 : vector<8x32xf32> to vector<8x32xbf16>
    %109 = arith.truncf %105 : vector<8x32xf32> to vector<8x32xbf16>
    %cst_62 = arith.constant dense<0.000000e+00> : vector<8x8xf32>
    %110 = tpu.matmul %108, %109, %cst_62 {dimension_numbers = #tpu.dot_dimension_numbers<[1], [1], [0], [0], [0, 0, 1, 0], [], []>} : vector<8x32xbf16>, vector<8x32xbf16>, vector<8x8xf32> -> vector<8x8xf32>
    %cst_63 = arith.constant -1.000000e+30 : f32
    %111 = vector.shape_cast %8 : vector<1x8xi1> to vector<1x8xi1>
    %112 = vector.broadcast %111 : vector<1x8xi1> to vector<8x8xi1>
    %113 = vector.broadcast %cst_63 : f32 to vector<8x8xf32>
    %114 = arith.select %112, %110, %113 : vector<8x8xi1>, vector<8x8xf32>
    %c2 = arith.constant 2 : index
    %c0_64 = arith.constant 0 : index
    %c0_65 = arith.constant 0 : index
    %115 = vector.load %arg6[%c2, %c0_64, %c0_65] : memref<4x8x1xf32, #tpu.memory_space<vmem>>, vector<1x8x1xf32>
    %116 = vector.shape_cast %115 : vector<1x8x1xf32> to vector<8x1xf32>
    %cst_66 = arith.constant dense<0xFF800000> : vector<8xf32>
    %117 = vector.multi_reduction <maximumf>, %114, %cst_66 [1] : vector<8x8xf32> to vector<8xf32>
    %118 = vector.shape_cast %117 : vector<8xf32> to vector<8x1xf32>
    %119 = arith.maximumf %116, %118 : vector<8x1xf32>
    %120 = arith.subf %116, %119 : vector<8x1xf32>
    %121 = math.exp %120 : vector<8x1xf32>
    %122 = vector.broadcast %119 : vector<8x1xf32> to vector<8x8xf32>
    %123 = arith.subf %114, %122 : vector<8x8xf32>
    %124 = math.exp %123 : vector<8x8xf32>
    %c2_67 = arith.constant 2 : index
    %c0_68 = arith.constant 0 : index
    %c0_69 = arith.constant 0 : index
    %125 = vector.load %arg7[%c2_67, %c0_68, %c0_69] : memref<4x8x1xf32, #tpu.memory_space<vmem>>, vector<1x8x1xf32>
    %126 = vector.shape_cast %125 : vector<1x8x1xf32> to vector<8x1xf32>
    %127 = arith.mulf %121, %126 : vector<8x1xf32>
    %cst_70 = arith.constant dense<0.000000e+00> : vector<8xf32>
    %128 = vector.multi_reduction <add>, %124, %cst_70 [1] : vector<8x8xf32> to vector<8xf32>
    %129 = vector.shape_cast %128 : vector<8xf32> to vector<8x1xf32>
    %130 = arith.addf %127, %129 : vector<8x1xf32>
    %c2_71 = arith.constant 2 : index
    %c0_72 = arith.constant 0 : index
    %c0_73 = arith.constant 0 : index
    %131 = vector.load %arg7[%c2_71, %c0_72, %c0_73] : memref<4x8x1xf32, #tpu.memory_space<vmem>>, vector<1x8x1xf32>
    %132 = vector.shape_cast %131 : vector<1x8x1xf32> to vector<8x1xf32>
    %133 = vector.shape_cast %130 : vector<8x1xf32> to vector<1x8x1xf32>
    tpu.vector_store %arg7[%c2_71, %c0_72, %c0_73], %133 {strides = array<i32>} : memref<4x8x1xf32, #tpu.memory_space<vmem>>, vector<1x8x1xf32>,
    %c2_74 = arith.constant 2 : index
    %c0_75 = arith.constant 0 : index
    %c0_76 = arith.constant 0 : index
    %134 = vector.load %arg8[%c2_74, %c0_75, %c0_76] : memref<4x8x32xf32, #tpu.memory_space<vmem>>, vector<1x8x32xf32>
    %135 = vector.shape_cast %134 : vector<1x8x32xf32> to vector<8x32xf32>
    %136 = vector.broadcast %121 : vector<8x1xf32> to vector<8x32xf32>
    %137 = arith.mulf %136, %135 : vector<8x32xf32>
    %138 = arith.truncf %124 : vector<8x8xf32> to vector<8x8xbf16>
    %139 = arith.truncf %107 : vector<8x32xf32> to vector<8x32xbf16>
    %cst_77 = arith.constant dense<0.000000e+00> : vector<8x32xf32>
    %140 = tpu.matmul %138, %139, %cst_77 {dimension_numbers = #tpu.dot_dimension_numbers<[1], [0], [0], [1], [0, 0, 1, 1], [], []>} : vector<8x8xbf16>, vector<8x32xbf16>, vector<8x32xf32> -> vector<8x32xf32>
    %141 = arith.addf %137, %140 : vector<8x32xf32>
    %c2_78 = arith.constant 2 : index
    %c0_79 = arith.constant 0 : index
    %c0_80 = arith.constant 0 : index
    %142 = vector.load %arg8[%c2_78, %c0_79, %c0_80] : memref<4x8x32xf32, #tpu.memory_space<vmem>>, vector<1x8x32xf32>
    %143 = vector.shape_cast %142 : vector<1x8x32xf32> to vector<8x32xf32>
    %144 = vector.shape_cast %141 : vector<8x32xf32> to vector<1x8x32xf32>
    tpu.vector_store %arg8[%c2_78, %c0_79, %c0_80], %144 {strides = array<i32>} : memref<4x8x32xf32, #tpu.memory_space<vmem>>, vector<1x8x32xf32>,
    %c2_81 = arith.constant 2 : index
    %c0_82 = arith.constant 0 : index
    %c0_83 = arith.constant 0 : index
    %145 = vector.load %arg6[%c2_81, %c0_82, %c0_83] : memref<4x8x1xf32, #tpu.memory_space<vmem>>, vector<1x8x1xf32>
    %146 = vector.shape_cast %145 : vector<1x8x1xf32> to vector<8x1xf32>
    %147 = vector.shape_cast %119 : vector<8x1xf32> to vector<1x8x1xf32>
    tpu.vector_store %arg6[%c2_81, %c0_82, %c0_83], %147 {strides = array<i32>} : memref<4x8x1xf32, #tpu.memory_space<vmem>>, vector<1x8x1xf32>,
    %148 = vector.extract_strided_slice %12 {offsets = [0, 96], sizes = [8, 32], strides = [1, 1]} : vector<8x128xf32> to vector<8x32xf32>
    %c0_84 = arith.constant 0 : index
    %c0_85 = arith.constant 0 : index
    %c96 = arith.constant 96 : index
    %149 = vector.load %arg4[%c0_84, %c0_85, %c96] : memref<1x8x256xf32, #tpu.memory_space<vmem>>, vector<1x8x32xf32>
    %150 = vector.shape_cast %149 : vector<1x8x32xf32> to vector<8x32xf32>
    %c0_86 = arith.constant 0 : index
    %c0_87 = arith.constant 0 : index
    %c224 = arith.constant 224 : index
    %151 = vector.load %arg4[%c0_86, %c0_87, %c224] : memref<1x8x256xf32, #tpu.memory_space<vmem>>, vector<1x8x32xf32>
    %152 = vector.shape_cast %151 : vector<1x8x32xf32> to vector<8x32xf32>
    %153 = arith.truncf %148 : vector<8x32xf32> to vector<8x32xbf16>
    %154 = arith.truncf %150 : vector<8x32xf32> to vector<8x32xbf16>
    %cst_88 = arith.constant dense<0.000000e+00> : vector<8x8xf32>
    %155 = tpu.matmul %153, %154, %cst_88 {dimension_numbers = #tpu.dot_dimension_numbers<[1], [1], [0], [0], [0, 0, 1, 0], [], []>} : vector<8x32xbf16>, vector<8x32xbf16>, vector<8x8xf32> -> vector<8x8xf32>
    %cst_89 = arith.constant -1.000000e+30 : f32
    %156 = vector.shape_cast %8 : vector<1x8xi1> to vector<1x8xi1>
    %157 = vector.broadcast %156 : vector<1x8xi1> to vector<8x8xi1>
    %158 = vector.broadcast %cst_89 : f32 to vector<8x8xf32>
    %159 = arith.select %157, %155, %158 : vector<8x8xi1>, vector<8x8xf32>
    %c3 = arith.constant 3 : index
    %c0_90 = arith.constant 0 : index
    %c0_91 = arith.constant 0 : index
    %160 = vector.load %arg6[%c3, %c0_90, %c0_91] : memref<4x8x1xf32, #tpu.memory_space<vmem>>, vector<1x8x1xf32>
    %161 = vector.shape_cast %160 : vector<1x8x1xf32> to vector<8x1xf32>
    %cst_92 = arith.constant dense<0xFF800000> : vector<8xf32>
    %162 = vector.multi_reduction <maximumf>, %159, %cst_92 [1] : vector<8x8xf32> to vector<8xf32>
    %163 = vector.shape_cast %162 : vector<8xf32> to vector<8x1xf32>
    %164 = arith.maximumf %161, %163 : vector<8x1xf32>
    %165 = arith.subf %161, %164 : vector<8x1xf32>
    %166 = math.exp %165 : vector<8x1xf32>
    %167 = vector.broadcast %164 : vector<8x1xf32> to vector<8x8xf32>
    %168 = arith.subf %159, %167 : vector<8x8xf32>
    %169 = math.exp %168 : vector<8x8xf32>
    %c3_93 = arith.constant 3 : index
    %c0_94 = arith.constant 0 : index
    %c0_95 = arith.constant 0 : index
    %170 = vector.load %arg7[%c3_93, %c0_94, %c0_95] : memref<4x8x1xf32, #tpu.memory_space<vmem>>, vector<1x8x1xf32>
    %171 = vector.shape_cast %170 : vector<1x8x1xf32> to vector<8x1xf32>
    %172 = arith.mulf %166, %171 : vector<8x1xf32>
    %cst_96 = arith.constant dense<0.000000e+00> : vector<8xf32>
    %173 = vector.multi_reduction <add>, %169, %cst_96 [1] : vector<8x8xf32> to vector<8xf32>
    %174 = vector.shape_cast %173 : vector<8xf32> to vector<8x1xf32>
    %175 = arith.addf %172, %174 : vector<8x1xf32>
    %c3_97 = arith.constant 3 : index
    %c0_98 = arith.constant 0 : index
    %c0_99 = arith.constant 0 : index
    %176 = vector.load %arg7[%c3_97, %c0_98, %c0_99] : memref<4x8x1xf32, #tpu.memory_space<vmem>>, vector<1x8x1xf32>
    %177 = vector.shape_cast %176 : vector<1x8x1xf32> to vector<8x1xf32>
    %178 = vector.shape_cast %175 : vector<8x1xf32> to vector<1x8x1xf32>
    tpu.vector_store %arg7[%c3_97, %c0_98, %c0_99], %178 {strides = array<i32>} : memref<4x8x1xf32, #tpu.memory_space<vmem>>, vector<1x8x1xf32>,
    %c3_100 = arith.constant 3 : index
    %c0_101 = arith.constant 0 : index
    %c0_102 = arith.constant 0 : index
    %179 = vector.load %arg8[%c3_100, %c0_101, %c0_102] : memref<4x8x32xf32, #tpu.memory_space<vmem>>, vector<1x8x32xf32>
    %180 = vector.shape_cast %179 : vector<1x8x32xf32> to vector<8x32xf32>
    %181 = vector.broadcast %166 : vector<8x1xf32> to vector<8x32xf32>
    %182 = arith.mulf %181, %180 : vector<8x32xf32>
    %183 = arith.truncf %169 : vector<8x8xf32> to vector<8x8xbf16>
    %184 = arith.truncf %152 : vector<8x32xf32> to vector<8x32xbf16>
    %cst_103 = arith.constant dense<0.000000e+00> : vector<8x32xf32>
    %185 = tpu.matmul %183, %184, %cst_103 {dimension_numbers = #tpu.dot_dimension_numbers<[1], [0], [0], [1], [0, 0, 1, 1], [], []>} : vector<8x8xbf16>, vector<8x32xbf16>, vector<8x32xf32> -> vector<8x32xf32>
    %186 = arith.addf %182, %185 : vector<8x32xf32>
    %c3_104 = arith.constant 3 : index
    %c0_105 = arith.constant 0 : index
    %c0_106 = arith.constant 0 : index
    %187 = vector.load %arg8[%c3_104, %c0_105, %c0_106] : memref<4x8x32xf32, #tpu.memory_space<vmem>>, vector<1x8x32xf32>
    %188 = vector.shape_cast %187 : vector<1x8x32xf32> to vector<8x32xf32>
    %189 = vector.shape_cast %186 : vector<8x32xf32> to vector<1x8x32xf32>
    tpu.vector_store %arg8[%c3_104, %c0_105, %c0_106], %189 {strides = array<i32>} : memref<4x8x32xf32, #tpu.memory_space<vmem>>, vector<1x8x32xf32>,
    %c3_107 = arith.constant 3 : index
    %c0_108 = arith.constant 0 : index
    %c0_109 = arith.constant 0 : index
    %190 = vector.load %arg6[%c3_107, %c0_108, %c0_109] : memref<4x8x1xf32, #tpu.memory_space<vmem>>, vector<1x8x1xf32>
    %191 = vector.shape_cast %190 : vector<1x8x1xf32> to vector<8x1xf32>
    %192 = vector.shape_cast %164 : vector<8x1xf32> to vector<1x8x1xf32>
    tpu.vector_store %arg6[%c3_107, %c0_108, %c0_109], %192 {strides = array<i32>} : memref<4x8x1xf32, #tpu.memory_space<vmem>>, vector<1x8x1xf32>,
    %c0_i32_110 = arith.constant 0 : i32
    %193 = arith.cmpi eq, %arg2, %c0_i32_110 : i32
    %194 = arith.extui %193 : i1 to i32
    %c0_i32_111 = arith.constant 0 : i32
    %195 = arith.cmpi ne, %194, %c0_i32_111 : i32
    scf.if %195 {
      %c0_112 = arith.constant 0 : index
      %c0_113 = arith.constant 0 : index
      %c0_114 = arith.constant 0 : index
      %196 = vector.load %arg8[%c0_112, %c0_113, %c0_114] : memref<4x8x32xf32, #tpu.memory_space<vmem>>, vector<1x8x32xf32>
      %197 = vector.shape_cast %196 : vector<1x8x32xf32> to vector<8x32xf32>
      %c0_115 = arith.constant 0 : index
      %c0_116 = arith.constant 0 : index
      %c0_117 = arith.constant 0 : index
      %198 = vector.load %arg7[%c0_115, %c0_116, %c0_117] : memref<4x8x1xf32, #tpu.memory_space<vmem>>, vector<1x8x1xf32>
      %199 = vector.shape_cast %198 : vector<1x8x1xf32> to vector<8x1xf32>
      %200 = tpu.reciprocal %199 {approx = true} : vector<8x1xf32> -> vector<8x1xf32>
      %201 = vector.broadcast %200 : vector<8x1xf32> to vector<8x32xf32>
      %202 = arith.mulf %197, %201 : vector<8x32xf32>
      %c1_118 = arith.constant 1 : index
      %c0_119 = arith.constant 0 : index
      %c0_120 = arith.constant 0 : index
      %203 = vector.load %arg8[%c1_118, %c0_119, %c0_120] : memref<4x8x32xf32, #tpu.memory_space<vmem>>, vector<1x8x32xf32>
      %204 = vector.shape_cast %203 : vector<1x8x32xf32> to vector<8x32xf32>
      %c1_121 = arith.constant 1 : index
      %c0_122 = arith.constant 0 : index
      %c0_123 = arith.constant 0 : index
      %205 = vector.load %arg7[%c1_121, %c0_122, %c0_123] : memref<4x8x1xf32, #tpu.memory_space<vmem>>, vector<1x8x1xf32>
      %206 = vector.shape_cast %205 : vector<1x8x1xf32> to vector<8x1xf32>
      %207 = tpu.reciprocal %206 {approx = true} : vector<8x1xf32> -> vector<8x1xf32>
      %208 = vector.broadcast %207 : vector<8x1xf32> to vector<8x32xf32>
      %209 = arith.mulf %204, %208 : vector<8x32xf32>
      %c2_124 = arith.constant 2 : index
      %c0_125 = arith.constant 0 : index
      %c0_126 = arith.constant 0 : index
      %210 = vector.load %arg8[%c2_124, %c0_125, %c0_126] : memref<4x8x32xf32, #tpu.memory_space<vmem>>, vector<1x8x32xf32>
      %211 = vector.shape_cast %210 : vector<1x8x32xf32> to vector<8x32xf32>
      %c2_127 = arith.constant 2 : index
      %c0_128 = arith.constant 0 : index
      %c0_129 = arith.constant 0 : index
      %212 = vector.load %arg7[%c2_127, %c0_128, %c0_129] : memref<4x8x1xf32, #tpu.memory_space<vmem>>, vector<1x8x1xf32>
      %213 = vector.shape_cast %212 : vector<1x8x1xf32> to vector<8x1xf32>
      %214 = tpu.reciprocal %213 {approx = true} : vector<8x1xf32> -> vector<8x1xf32>
      %215 = vector.broadcast %214 : vector<8x1xf32> to vector<8x32xf32>
      %216 = arith.mulf %211, %215 : vector<8x32xf32>
      %c3_130 = arith.constant 3 : index
      %c0_131 = arith.constant 0 : index
      %c0_132 = arith.constant 0 : index
      %217 = vector.load %arg8[%c3_130, %c0_131, %c0_132] : memref<4x8x32xf32, #tpu.memory_space<vmem>>, vector<1x8x32xf32>
      %218 = vector.shape_cast %217 : vector<1x8x32xf32> to vector<8x32xf32>
      %c3_133 = arith.constant 3 : index
      %c0_134 = arith.constant 0 : index
      %c0_135 = arith.constant 0 : index
      %219 = vector.load %arg7[%c3_133, %c0_134, %c0_135] : memref<4x8x1xf32, #tpu.memory_space<vmem>>, vector<1x8x1xf32>
      %220 = vector.shape_cast %219 : vector<1x8x1xf32> to vector<8x1xf32>
      %221 = tpu.reciprocal %220 {approx = true} : vector<8x1xf32> -> vector<8x1xf32>
      %222 = vector.broadcast %221 : vector<8x1xf32> to vector<8x32xf32>
      %223 = arith.mulf %218, %222 : vector<8x32xf32>
      %224 = tpu.concatenate %202, %209, %216, %223 in 1 : vector<8x32xf32>, vector<8x32xf32>, vector<8x32xf32>, vector<8x32xf32> -> vector<8x128xf32>
      %c0_136 = arith.constant 0 : index
      %c0_137 = arith.constant 0 : index
      %c0_138 = arith.constant 0 : index
      %225 = vector.load %arg5[%c0_136, %c0_137, %c0_138] : memref<1x8x128xf32, #tpu.memory_space<vmem>>, vector<1x8x128xf32>
      %226 = vector.shape_cast %225 : vector<1x8x128xf32> to vector<8x128xf32>
      %227 = vector.shape_cast %224 : vector<8x128xf32> to vector<1x8x128xf32>
      tpu.vector_store %arg5[%c0_136, %c0_137, %c0_138], %227 {strides = array<i32>} : memref<1x8x128xf32, #tpu.memory_space<vmem>>, vector<1x8x128xf32>,
    } else {
    }
    return
  }
  func.func @transform_0(%arg0: i32, %arg1: i32, %arg2: i32) -> (i32, i32, i32) {
    %c0_i32 = arith.constant 0 : i32
    %c0_i32_0 = arith.constant 0 : i32
    return %arg0, %arg1, %c0_i32 : i32, i32, i32
  }
  func.func @transform_1(%arg0: i32, %arg1: i32, %arg2: i32) -> (i32, i32, i32) {
    %c0_i32 = arith.constant 0 : i32
    %c0_i32_0 = arith.constant 0 : i32
    return %arg0, %arg2, %c0_i32 : i32, i32, i32
  }
  func.func @transform_2(%arg0: i32, %arg1: i32, %arg2: i32) -> (i32, i32, i32) {
    %c0_i32 = arith.constant 0 : i32
    %c0_i32_0 = arith.constant 0 : i32
    return %arg0, %arg1, %c0_i32 : i32, i32, i32
  }
}

module attributes {stable_mosaic.version = 11 : i64} {
  func.func @_fused_linear_kernel(%arg0: i32, %arg1: memref<16x128xf32, #tpu.memory_space<vmem>>, %arg2: memref<128x128xbf16, #tpu.memory_space<vmem>>, %arg3: memref<1x128xf32, #tpu.memory_space<vmem>>, %arg4: memref<16x128xf32, #tpu.memory_space<vmem>>, %arg5: memref<1x128xf32, #tpu.memory_space<vmem>>, %arg6: memref<1x128xf32, #tpu.memory_space<vmem>>, %arg7: memref<16x128xf32, #tpu.memory_space<vmem>>) attributes {dimension_semantics = [#tpu.dimension_semantics<parallel>], iteration_bounds = array<i64: 1>, scalar_prefetch = 0 : i64, scratch_operands = 0 : i64, tpu.core_type = #tpu.core_type<tc>, window_params = [{transform_indices = @transform_0, window_bounds = array<i64: 16, 128>}, {pipeline_mode = #tpu.pipeline_mode<synchronous>, transform_indices = @transform_1, window_bounds = array<i64: 128, 128>}, {pipeline_mode = #tpu.pipeline_mode<synchronous>, transform_indices = @transform_2, window_bounds = array<i64: 1, 128>}, {transform_indices = @transform_3, window_bounds = array<i64: 16, 128>}, {pipeline_mode = #tpu.pipeline_mode<synchronous>, transform_indices = @transform_4, window_bounds = array<i64: 1, 128>}, {pipeline_mode = #tpu.pipeline_mode<synchronous>, transform_indices = @transform_5, window_bounds = array<i64: 1, 128>}, {transform_indices = @transform_6, window_bounds = array<i64: 16, 128>}]} {
    %c0 = arith.constant 0 : index
    %c0_0 = arith.constant 0 : index
    %0 = vector.load %arg1[%c0, %c0_0] : memref<16x128xf32, #tpu.memory_space<vmem>>, vector<16x128xf32>
    %1 = arith.truncf %0 : vector<16x128xf32> to vector<16x128xbf16>
    %c0_1 = arith.constant 0 : index
    %c0_2 = arith.constant 0 : index
    %2 = vector.load %arg2[%c0_1, %c0_2] : memref<128x128xbf16, #tpu.memory_space<vmem>>, vector<128x128xbf16>
    %cst = arith.constant dense<0.000000e+00> : vector<16x128xf32>
    %3 = tpu.matmul %1, %2, %cst {dimension_numbers = #tpu.dot_dimension_numbers<[1], [0], [0], [1], [0, 0, 1, 1], [], []>} : vector<16x128xbf16>, vector<128x128xbf16>, vector<16x128xf32> -> vector<16x128xf32>
    %c0_3 = arith.constant 0 : index
    %c0_4 = arith.constant 0 : index
    %4 = vector.load %arg3[%c0_3, %c0_4] : memref<1x128xf32, #tpu.memory_space<vmem>>, vector<1x128xf32>
    %5 = vector.broadcast %4 : vector<1x128xf32> to vector<16x128xf32>
    %6 = arith.addf %3, %5 : vector<16x128xf32>
    %c0_5 = arith.constant 0 : index
    %c0_6 = arith.constant 0 : index
    %7 = vector.load %arg4[%c0_5, %c0_6] : memref<16x128xf32, #tpu.memory_space<vmem>>, vector<16x128xf32>
    %cst_7 = arith.constant 1.000000e+00 : f32
    %8 = vector.broadcast %cst_7 : f32 to vector<16x128xf32>
    %9 = arith.mulf %8, %6 : vector<16x128xf32>
    %10 = arith.addf %7, %9 : vector<16x128xf32>
    %cst_8 = arith.constant dense<0.000000e+00> : vector<16xf32>
    %11 = vector.multi_reduction <add>, %10, %cst_8 [1] : vector<16x128xf32> to vector<16xf32>
    %12 = vector.shape_cast %11 : vector<16xf32> to vector<16x1xf32>
    %cst_9 = arith.constant 1.280000e+02 : f32
    %13 = vector.broadcast %cst_9 : f32 to vector<16x1xf32>
    %14 = arith.divf %12, %13 : vector<16x1xf32>
    %15 = vector.broadcast %14 : vector<16x1xf32> to vector<16x128xf32>
    %16 = arith.subf %10, %15 : vector<16x128xf32>
    %17 = arith.mulf %16, %16 : vector<16x128xf32>
    %cst_10 = arith.constant dense<0.000000e+00> : vector<16xf32>
    %18 = vector.multi_reduction <add>, %17, %cst_10 [1] : vector<16x128xf32> to vector<16xf32>
    %19 = vector.shape_cast %18 : vector<16xf32> to vector<16x1xf32>
    %cst_11 = arith.constant 1.280000e+02 : f32
    %20 = vector.broadcast %cst_11 : f32 to vector<16x1xf32>
    %21 = arith.divf %19, %20 : vector<16x1xf32>
    %cst_12 = arith.constant 9.99999974E-6 : f32
    %22 = vector.broadcast %cst_12 : f32 to vector<16x1xf32>
    %23 = arith.addf %21, %22 : vector<16x1xf32>
    %24 = math.rsqrt %23 : vector<16x1xf32>
    %25 = vector.broadcast %24 : vector<16x1xf32> to vector<16x128xf32>
    %26 = arith.mulf %16, %25 : vector<16x128xf32>
    %c0_13 = arith.constant 0 : index
    %c0_14 = arith.constant 0 : index
    %27 = vector.load %arg5[%c0_13, %c0_14] : memref<1x128xf32, #tpu.memory_space<vmem>>, vector<1x128xf32>
    %28 = vector.broadcast %27 : vector<1x128xf32> to vector<16x128xf32>
    %29 = arith.mulf %26, %28 : vector<16x128xf32>
    %c0_15 = arith.constant 0 : index
    %c0_16 = arith.constant 0 : index
    %30 = vector.load %arg6[%c0_15, %c0_16] : memref<1x128xf32, #tpu.memory_space<vmem>>, vector<1x128xf32>
    %31 = vector.broadcast %30 : vector<1x128xf32> to vector<16x128xf32>
    %32 = arith.addf %29, %31 : vector<16x128xf32>
    %c0_17 = arith.constant 0 : index
    %c0_18 = arith.constant 0 : index
    %33 = vector.load %arg7[%c0_17, %c0_18] : memref<16x128xf32, #tpu.memory_space<vmem>>, vector<16x128xf32>
    tpu.vector_store %arg7[%c0_17, %c0_18], %32 {strides = array<i32>} : memref<16x128xf32, #tpu.memory_space<vmem>>, vector<16x128xf32>,
    return
  }
  func.func @transform_0(%arg0: i32) -> (i32, i32) {
    %c0_i32 = arith.constant 0 : i32
    %c0_i32_0 = arith.constant 0 : i32
    return %arg0, %c0_i32 : i32, i32
  }
  func.func @transform_1(%arg0: i32) -> (i32, i32) {
    %c0_i32 = arith.constant 0 : i32
    %c0_i32_0 = arith.constant 0 : i32
    %c0_i32_1 = arith.constant 0 : i32
    return %c0_i32, %c0_i32_0 : i32, i32
  }
  func.func @transform_2(%arg0: i32) -> (i32, i32) {
    %c0_i32 = arith.constant 0 : i32
    %c0_i32_0 = arith.constant 0 : i32
    %c0_i32_1 = arith.constant 0 : i32
    return %c0_i32, %c0_i32_0 : i32, i32
  }
  func.func @transform_3(%arg0: i32) -> (i32, i32) {
    %c0_i32 = arith.constant 0 : i32
    %c0_i32_0 = arith.constant 0 : i32
    return %arg0, %c0_i32 : i32, i32
  }
  func.func @transform_4(%arg0: i32) -> (i32, i32) {
    %c0_i32 = arith.constant 0 : i32
    %c0_i32_0 = arith.constant 0 : i32
    %c0_i32_1 = arith.constant 0 : i32
    return %c0_i32, %c0_i32_0 : i32, i32
  }
  func.func @transform_5(%arg0: i32) -> (i32, i32) {
    %c0_i32 = arith.constant 0 : i32
    %c0_i32_0 = arith.constant 0 : i32
    %c0_i32_1 = arith.constant 0 : i32
    return %c0_i32, %c0_i32_0 : i32, i32
  }
  func.func @transform_6(%arg0: i32) -> (i32, i32) {
    %c0_i32 = arith.constant 0 : i32
    %c0_i32_0 = arith.constant 0 : i32
    return %arg0, %c0_i32 : i32, i32
  }
}

module attributes {stable_mosaic.version = 11 : i64} {
  func.func @_fused_linear_kernel(%arg0: i32, %arg1: memref<16x128xf32, #tpu.memory_space<vmem>>, %arg2: memref<128x512xbf16, #tpu.memory_space<vmem>>, %arg3: memref<1x512xf32, #tpu.memory_space<vmem>>, %arg4: memref<1x128xf32, #tpu.memory_space<vmem>>, %arg5: memref<1x128xf32, #tpu.memory_space<vmem>>, %arg6: memref<16x512xf32, #tpu.memory_space<vmem>>) attributes {dimension_semantics = [#tpu.dimension_semantics<parallel>], iteration_bounds = array<i64: 1>, scalar_prefetch = 0 : i64, scratch_operands = 0 : i64, tpu.core_type = #tpu.core_type<tc>, window_params = [{transform_indices = @transform_0, window_bounds = array<i64: 16, 128>}, {pipeline_mode = #tpu.pipeline_mode<synchronous>, transform_indices = @transform_1, window_bounds = array<i64: 128, 512>}, {pipeline_mode = #tpu.pipeline_mode<synchronous>, transform_indices = @transform_2, window_bounds = array<i64: 1, 512>}, {pipeline_mode = #tpu.pipeline_mode<synchronous>, transform_indices = @transform_3, window_bounds = array<i64: 1, 128>}, {pipeline_mode = #tpu.pipeline_mode<synchronous>, transform_indices = @transform_4, window_bounds = array<i64: 1, 128>}, {transform_indices = @transform_5, window_bounds = array<i64: 16, 512>}]} {
    %c0 = arith.constant 0 : index
    %c0_0 = arith.constant 0 : index
    %0 = vector.load %arg1[%c0, %c0_0] : memref<16x128xf32, #tpu.memory_space<vmem>>, vector<16x128xf32>
    %c0_1 = arith.constant 0 : index
    %c0_2 = arith.constant 0 : index
    %1 = vector.load %arg4[%c0_1, %c0_2] : memref<1x128xf32, #tpu.memory_space<vmem>>, vector<1x128xf32>
    %2 = vector.broadcast %1 : vector<1x128xf32> to vector<16x128xf32>
    %3 = arith.mulf %0, %2 : vector<16x128xf32>
    %c0_3 = arith.constant 0 : index
    %c0_4 = arith.constant 0 : index
    %4 = vector.load %arg5[%c0_3, %c0_4] : memref<1x128xf32, #tpu.memory_space<vmem>>, vector<1x128xf32>
    %5 = vector.broadcast %4 : vector<1x128xf32> to vector<16x128xf32>
    %6 = arith.addf %3, %5 : vector<16x128xf32>
    %7 = arith.truncf %6 : vector<16x128xf32> to vector<16x128xbf16>
    %c0_5 = arith.constant 0 : index
    %c0_6 = arith.constant 0 : index
    %8 = vector.load %arg2[%c0_5, %c0_6] : memref<128x512xbf16, #tpu.memory_space<vmem>>, vector<128x512xbf16>
    %cst = arith.constant dense<0.000000e+00> : vector<16x512xf32>
    %9 = tpu.matmul %7, %8, %cst {dimension_numbers = #tpu.dot_dimension_numbers<[1], [0], [0], [1], [0, 0, 1, 1], [], []>} : vector<16x128xbf16>, vector<128x512xbf16>, vector<16x512xf32> -> vector<16x512xf32>
    %c0_7 = arith.constant 0 : index
    %c0_8 = arith.constant 0 : index
    %10 = vector.load %arg3[%c0_7, %c0_8] : memref<1x512xf32, #tpu.memory_space<vmem>>, vector<1x512xf32>
    %11 = vector.broadcast %10 : vector<1x512xf32> to vector<16x512xf32>
    %12 = arith.addf %9, %11 : vector<16x512xf32>
    %13 = arith.negf %12 : vector<16x512xf32>
    %14 = math.exp %13 : vector<16x512xf32>
    %cst_9 = arith.constant 1.000000e+00 : f32
    %15 = vector.broadcast %cst_9 : f32 to vector<16x512xf32>
    %16 = arith.addf %15, %14 : vector<16x512xf32>
    %17 = arith.divf %15, %16 : vector<16x512xf32>
    %18 = arith.mulf %12, %17 : vector<16x512xf32>
    %c0_10 = arith.constant 0 : index
    %c0_11 = arith.constant 0 : index
    %19 = vector.load %arg6[%c0_10, %c0_11] : memref<16x512xf32, #tpu.memory_space<vmem>>, vector<16x512xf32>
    tpu.vector_store %arg6[%c0_10, %c0_11], %18 {strides = array<i32>} : memref<16x512xf32, #tpu.memory_space<vmem>>, vector<16x512xf32>,
    return
  }
  func.func @transform_0(%arg0: i32) -> (i32, i32) {
    %c0_i32 = arith.constant 0 : i32
    %c0_i32_0 = arith.constant 0 : i32
    return %arg0, %c0_i32 : i32, i32
  }
  func.func @transform_1(%arg0: i32) -> (i32, i32) {
    %c0_i32 = arith.constant 0 : i32
    %c0_i32_0 = arith.constant 0 : i32
    %c0_i32_1 = arith.constant 0 : i32
    return %c0_i32, %c0_i32_0 : i32, i32
  }
  func.func @transform_2(%arg0: i32) -> (i32, i32) {
    %c0_i32 = arith.constant 0 : i32
    %c0_i32_0 = arith.constant 0 : i32
    %c0_i32_1 = arith.constant 0 : i32
    return %c0_i32, %c0_i32_0 : i32, i32
  }
  func.func @transform_3(%arg0: i32) -> (i32, i32) {
    %c0_i32 = arith.constant 0 : i32
    %c0_i32_0 = arith.constant 0 : i32
    %c0_i32_1 = arith.constant 0 : i32
    return %c0_i32, %c0_i32_0 : i32, i32
  }
  func.func @transform_4(%arg0: i32) -> (i32, i32) {
    %c0_i32 = arith.constant 0 : i32
    %c0_i32_0 = arith.constant 0 : i32
    %c0_i32_1 = arith.constant 0 : i32
    return %c0_i32, %c0_i32_0 : i32, i32
  }
  func.func @transform_5(%arg0: i32) -> (i32, i32) {
    %c0_i32 = arith.constant 0 : i32
    %c0_i32_0 = arith.constant 0 : i32
    return %arg0, %c0_i32 : i32, i32
  }
}

module attributes {stable_mosaic.version = 11 : i64} {
  func.func @_fused_linear_kernel(%arg0: i32, %arg1: memref<16x512xf32, #tpu.memory_space<vmem>>, %arg2: memref<512x128xbf16, #tpu.memory_space<vmem>>, %arg3: memref<1x128xf32, #tpu.memory_space<vmem>>, %arg4: memref<16x128xf32, #tpu.memory_space<vmem>>, %arg5: memref<1x128xf32, #tpu.memory_space<vmem>>, %arg6: memref<1x128xf32, #tpu.memory_space<vmem>>, %arg7: memref<16x128xf32, #tpu.memory_space<vmem>>) attributes {dimension_semantics = [#tpu.dimension_semantics<parallel>], iteration_bounds = array<i64: 1>, scalar_prefetch = 0 : i64, scratch_operands = 0 : i64, tpu.core_type = #tpu.core_type<tc>, window_params = [{transform_indices = @transform_0, window_bounds = array<i64: 16, 512>}, {pipeline_mode = #tpu.pipeline_mode<synchronous>, transform_indices = @transform_1, window_bounds = array<i64: 512, 128>}, {pipeline_mode = #tpu.pipeline_mode<synchronous>, transform_indices = @transform_2, window_bounds = array<i64: 1, 128>}, {transform_indices = @transform_3, window_bounds = array<i64: 16, 128>}, {pipeline_mode = #tpu.pipeline_mode<synchronous>, transform_indices = @transform_4, window_bounds = array<i64: 1, 128>}, {pipeline_mode = #tpu.pipeline_mode<synchronous>, transform_indices = @transform_5, window_bounds = array<i64: 1, 128>}, {transform_indices = @transform_6, window_bounds = array<i64: 16, 128>}]} {
    %c0 = arith.constant 0 : index
    %c0_0 = arith.constant 0 : index
    %0 = vector.load %arg1[%c0, %c0_0] : memref<16x512xf32, #tpu.memory_space<vmem>>, vector<16x512xf32>
    %1 = arith.truncf %0 : vector<16x512xf32> to vector<16x512xbf16>
    %c0_1 = arith.constant 0 : index
    %c0_2 = arith.constant 0 : index
    %2 = vector.load %arg2[%c0_1, %c0_2] : memref<512x128xbf16, #tpu.memory_space<vmem>>, vector<512x128xbf16>
    %cst = arith.constant dense<0.000000e+00> : vector<16x128xf32>
    %3 = tpu.matmul %1, %2, %cst {dimension_numbers = #tpu.dot_dimension_numbers<[1], [0], [0], [1], [0, 0, 1, 1], [], []>} : vector<16x512xbf16>, vector<512x128xbf16>, vector<16x128xf32> -> vector<16x128xf32>
    %c0_3 = arith.constant 0 : index
    %c0_4 = arith.constant 0 : index
    %4 = vector.load %arg3[%c0_3, %c0_4] : memref<1x128xf32, #tpu.memory_space<vmem>>, vector<1x128xf32>
    %5 = vector.broadcast %4 : vector<1x128xf32> to vector<16x128xf32>
    %6 = arith.addf %3, %5 : vector<16x128xf32>
    %c0_5 = arith.constant 0 : index
    %c0_6 = arith.constant 0 : index
    %7 = vector.load %arg4[%c0_5, %c0_6] : memref<16x128xf32, #tpu.memory_space<vmem>>, vector<16x128xf32>
    %cst_7 = arith.constant 1.000000e+00 : f32
    %8 = vector.broadcast %cst_7 : f32 to vector<16x128xf32>
    %9 = arith.mulf %8, %6 : vector<16x128xf32>
    %10 = arith.addf %7, %9 : vector<16x128xf32>
    %cst_8 = arith.constant dense<0.000000e+00> : vector<16xf32>
    %11 = vector.multi_reduction <add>, %10, %cst_8 [1] : vector<16x128xf32> to vector<16xf32>
    %12 = vector.shape_cast %11 : vector<16xf32> to vector<16x1xf32>
    %cst_9 = arith.constant 1.280000e+02 : f32
    %13 = vector.broadcast %cst_9 : f32 to vector<16x1xf32>
    %14 = arith.divf %12, %13 : vector<16x1xf32>
    %15 = vector.broadcast %14 : vector<16x1xf32> to vector<16x128xf32>
    %16 = arith.subf %10, %15 : vector<16x128xf32>
    %17 = arith.mulf %16, %16 : vector<16x128xf32>
    %cst_10 = arith.constant dense<0.000000e+00> : vector<16xf32>
    %18 = vector.multi_reduction <add>, %17, %cst_10 [1] : vector<16x128xf32> to vector<16xf32>
    %19 = vector.shape_cast %18 : vector<16xf32> to vector<16x1xf32>
    %cst_11 = arith.constant 1.280000e+02 : f32
    %20 = vector.broadcast %cst_11 : f32 to vector<16x1xf32>
    %21 = arith.divf %19, %20 : vector<16x1xf32>
    %cst_12 = arith.constant 9.99999974E-6 : f32
    %22 = vector.broadcast %cst_12 : f32 to vector<16x1xf32>
    %23 = arith.addf %21, %22 : vector<16x1xf32>
    %24 = math.rsqrt %23 : vector<16x1xf32>
    %25 = vector.broadcast %24 : vector<16x1xf32> to vector<16x128xf32>
    %26 = arith.mulf %16, %25 : vector<16x128xf32>
    %c0_13 = arith.constant 0 : index
    %c0_14 = arith.constant 0 : index
    %27 = vector.load %arg5[%c0_13, %c0_14] : memref<1x128xf32, #tpu.memory_space<vmem>>, vector<1x128xf32>
    %28 = vector.broadcast %27 : vector<1x128xf32> to vector<16x128xf32>
    %29 = arith.mulf %26, %28 : vector<16x128xf32>
    %c0_15 = arith.constant 0 : index
    %c0_16 = arith.constant 0 : index
    %30 = vector.load %arg6[%c0_15, %c0_16] : memref<1x128xf32, #tpu.memory_space<vmem>>, vector<1x128xf32>
    %31 = vector.broadcast %30 : vector<1x128xf32> to vector<16x128xf32>
    %32 = arith.addf %29, %31 : vector<16x128xf32>
    %c0_17 = arith.constant 0 : index
    %c0_18 = arith.constant 0 : index
    %33 = vector.load %arg7[%c0_17, %c0_18] : memref<16x128xf32, #tpu.memory_space<vmem>>, vector<16x128xf32>
    tpu.vector_store %arg7[%c0_17, %c0_18], %32 {strides = array<i32>} : memref<16x128xf32, #tpu.memory_space<vmem>>, vector<16x128xf32>,
    return
  }
  func.func @transform_0(%arg0: i32) -> (i32, i32) {
    %c0_i32 = arith.constant 0 : i32
    %c0_i32_0 = arith.constant 0 : i32
    return %arg0, %c0_i32 : i32, i32
  }
  func.func @transform_1(%arg0: i32) -> (i32, i32) {
    %c0_i32 = arith.constant 0 : i32
    %c0_i32_0 = arith.constant 0 : i32
    %c0_i32_1 = arith.constant 0 : i32
    return %c0_i32, %c0_i32_0 : i32, i32
  }
  func.func @transform_2(%arg0: i32) -> (i32, i32) {
    %c0_i32 = arith.constant 0 : i32
    %c0_i32_0 = arith.constant 0 : i32
    %c0_i32_1 = arith.constant 0 : i32
    return %c0_i32, %c0_i32_0 : i32, i32
  }
  func.func @transform_3(%arg0: i32) -> (i32, i32) {
    %c0_i32 = arith.constant 0 : i32
    %c0_i32_0 = arith.constant 0 : i32
    return %arg0, %c0_i32 : i32, i32
  }
  func.func @transform_4(%arg0: i32) -> (i32, i32) {
    %c0_i32 = arith.constant 0 : i32
    %c0_i32_0 = arith.constant 0 : i32
    %c0_i32_1 = arith.constant 0 : i32
    return %c0_i32, %c0_i32_0 : i32, i32
  }
  func.func @transform_5(%arg0: i32) -> (i32, i32) {
    %c0_i32 = arith.constant 0 : i32
    %c0_i32_0 = arith.constant 0 : i32
    %c0_i32_1 = arith.constant 0 : i32
    return %c0_i32, %c0_i32_0 : i32, i32
  }
  func.func @transform_6(%arg0: i32) -> (i32, i32) {
    %c0_i32 = arith.constant 0 : i32
    %c0_i32_0 = arith.constant 0 : i32
    return %arg0, %c0_i32 : i32, i32
  }
}

module attributes {stable_mosaic.version = 11 : i64} {
  func.func @_fused_linear_kernel(%arg0: i32, %arg1: memref<16x128xf32, #tpu.memory_space<vmem>>, %arg2: memref<128x256xbf16, #tpu.memory_space<vmem>>, %arg3: memref<1x256xf32, #tpu.memory_space<vmem>>, %arg4: memref<1x128xf32, #tpu.memory_space<vmem>>, %arg5: memref<1x128xf32, #tpu.memory_space<vmem>>, %arg6: memref<16x256xf32, #tpu.memory_space<vmem>>) attributes {dimension_semantics = [#tpu.dimension_semantics<parallel>], iteration_bounds = array<i64: 1>, scalar_prefetch = 0 : i64, scratch_operands = 0 : i64, tpu.core_type = #tpu.core_type<tc>, window_params = [{transform_indices = @transform_0, window_bounds = array<i64: 16, 128>}, {pipeline_mode = #tpu.pipeline_mode<synchronous>, transform_indices = @transform_1, window_bounds = array<i64: 128, 256>}, {pipeline_mode = #tpu.pipeline_mode<synchronous>, transform_indices = @transform_2, window_bounds = array<i64: 1, 256>}, {pipeline_mode = #tpu.pipeline_mode<synchronous>, transform_indices = @transform_3, window_bounds = array<i64: 1, 128>}, {pipeline_mode = #tpu.pipeline_mode<synchronous>, transform_indices = @transform_4, window_bounds = array<i64: 1, 128>}, {transform_indices = @transform_5, window_bounds = array<i64: 16, 256>}]} {
    %c0 = arith.constant 0 : index
    %c0_0 = arith.constant 0 : index
    %0 = vector.load %arg1[%c0, %c0_0] : memref<16x128xf32, #tpu.memory_space<vmem>>, vector<16x128xf32>
    %c0_1 = arith.constant 0 : index
    %c0_2 = arith.constant 0 : index
    %1 = vector.load %arg4[%c0_1, %c0_2] : memref<1x128xf32, #tpu.memory_space<vmem>>, vector<1x128xf32>
    %2 = vector.broadcast %1 : vector<1x128xf32> to vector<16x128xf32>
    %3 = arith.mulf %0, %2 : vector<16x128xf32>
    %c0_3 = arith.constant 0 : index
    %c0_4 = arith.constant 0 : index
    %4 = vector.load %arg5[%c0_3, %c0_4] : memref<1x128xf32, #tpu.memory_space<vmem>>, vector<1x128xf32>
    %5 = vector.broadcast %4 : vector<1x128xf32> to vector<16x128xf32>
    %6 = arith.addf %3, %5 : vector<16x128xf32>
    %7 = arith.truncf %6 : vector<16x128xf32> to vector<16x128xbf16>
    %c0_5 = arith.constant 0 : index
    %c0_6 = arith.constant 0 : index
    %8 = vector.load %arg2[%c0_5, %c0_6] : memref<128x256xbf16, #tpu.memory_space<vmem>>, vector<128x256xbf16>
    %cst = arith.constant dense<0.000000e+00> : vector<16x256xf32>
    %9 = tpu.matmul %7, %8, %cst {dimension_numbers = #tpu.dot_dimension_numbers<[1], [0], [0], [1], [0, 0, 1, 1], [], []>} : vector<16x128xbf16>, vector<128x256xbf16>, vector<16x256xf32> -> vector<16x256xf32>
    %c0_7 = arith.constant 0 : index
    %c0_8 = arith.constant 0 : index
    %10 = vector.load %arg3[%c0_7, %c0_8] : memref<1x256xf32, #tpu.memory_space<vmem>>, vector<1x256xf32>
    %11 = vector.broadcast %10 : vector<1x256xf32> to vector<16x256xf32>
    %12 = arith.addf %9, %11 : vector<16x256xf32>
    %13 = arith.negf %12 : vector<16x256xf32>
    %14 = math.exp %13 : vector<16x256xf32>
    %cst_9 = arith.constant 1.000000e+00 : f32
    %15 = vector.broadcast %cst_9 : f32 to vector<16x256xf32>
    %16 = arith.addf %15, %14 : vector<16x256xf32>
    %17 = arith.divf %15, %16 : vector<16x256xf32>
    %18 = arith.mulf %12, %17 : vector<16x256xf32>
    %c0_10 = arith.constant 0 : index
    %c0_11 = arith.constant 0 : index
    %19 = vector.load %arg6[%c0_10, %c0_11] : memref<16x256xf32, #tpu.memory_space<vmem>>, vector<16x256xf32>
    tpu.vector_store %arg6[%c0_10, %c0_11], %18 {strides = array<i32>} : memref<16x256xf32, #tpu.memory_space<vmem>>, vector<16x256xf32>,
    return
  }
  func.func @transform_0(%arg0: i32) -> (i32, i32) {
    %c0_i32 = arith.constant 0 : i32
    %c0_i32_0 = arith.constant 0 : i32
    return %arg0, %c0_i32 : i32, i32
  }
  func.func @transform_1(%arg0: i32) -> (i32, i32) {
    %c0_i32 = arith.constant 0 : i32
    %c0_i32_0 = arith.constant 0 : i32
    %c0_i32_1 = arith.constant 0 : i32
    return %c0_i32, %c0_i32_0 : i32, i32
  }
  func.func @transform_2(%arg0: i32) -> (i32, i32) {
    %c0_i32 = arith.constant 0 : i32
    %c0_i32_0 = arith.constant 0 : i32
    %c0_i32_1 = arith.constant 0 : i32
    return %c0_i32, %c0_i32_0 : i32, i32
  }
  func.func @transform_3(%arg0: i32) -> (i32, i32) {
    %c0_i32 = arith.constant 0 : i32
    %c0_i32_0 = arith.constant 0 : i32
    %c0_i32_1 = arith.constant 0 : i32
    return %c0_i32, %c0_i32_0 : i32, i32
  }
  func.func @transform_4(%arg0: i32) -> (i32, i32) {
    %c0_i32 = arith.constant 0 : i32
    %c0_i32_0 = arith.constant 0 : i32
    %c0_i32_1 = arith.constant 0 : i32
    return %c0_i32, %c0_i32_0 : i32, i32
  }
  func.func @transform_5(%arg0: i32) -> (i32, i32) {
    %c0_i32 = arith.constant 0 : i32
    %c0_i32_0 = arith.constant 0 : i32
    return %arg0, %c0_i32 : i32, i32
  }
}

module attributes {stable_mosaic.version = 11 : i64} {
  func.func @_dwconv1d_kernel(%arg0: i32, %arg1: i32, %arg2: memref<1x14x256xf32, #tpu.memory_space<vmem>>, %arg3: memref<7x256xf32, #tpu.memory_space<vmem>>, %arg4: memref<1x256xf32, #tpu.memory_space<vmem>>, %arg5: memref<1x256xf32, #tpu.memory_space<vmem>>, %arg6: memref<1x256xf32, #tpu.memory_space<vmem>>, %arg7: memref<1x8x256xf32, #tpu.memory_space<vmem>>) attributes {dimension_semantics = [#tpu.dimension_semantics<parallel>, #tpu.dimension_semantics<parallel>], iteration_bounds = array<i64: 2, 1>, scalar_prefetch = 0 : i64, scratch_operands = 0 : i64, tpu.core_type = #tpu.core_type<tc>, window_params = [{transform_indices = @transform_0, window_bounds = array<i64: 1, 14, 256>}, {transform_indices = @transform_1, window_bounds = array<i64: 7, 256>}, {transform_indices = @transform_2, window_bounds = array<i64: 1, 256>}, {transform_indices = @transform_3, window_bounds = array<i64: 1, 256>}, {transform_indices = @transform_4, window_bounds = array<i64: 1, 256>}, {transform_indices = @transform_5, window_bounds = array<i64: 1, 8, 256>}]} {
    %c0 = arith.constant 0 : index
    %c0_0 = arith.constant 0 : index
    %0 = vector.load %arg3[%c0, %c0_0] : memref<7x256xf32, #tpu.memory_space<vmem>>, vector<7x256xf32>
    %cst = arith.constant 0.000000e+00 : f32
    %1 = vector.broadcast %cst : f32 to vector<8x256xf32>
    %c0_1 = arith.constant 0 : index
    %c0_2 = arith.constant 0 : index
    %c0_3 = arith.constant 0 : index
    %2 = vector.load %arg2[%c0_1, %c0_2, %c0_3] : memref<1x14x256xf32, #tpu.memory_space<vmem>>, vector<1x8x256xf32>
    %3 = vector.shape_cast %2 : vector<1x8x256xf32> to vector<8x256xf32>
    %4 = vector.extract_strided_slice %0 {offsets = [0, 0], sizes = [1, 256], strides = [1, 1]} : vector<7x256xf32> to vector<1x256xf32>
    %5 = vector.broadcast %4 : vector<1x256xf32> to vector<8x256xf32>
    %6 = arith.mulf %3, %5 : vector<8x256xf32>
    %7 = arith.addf %1, %6 : vector<8x256xf32>
    %c0_4 = arith.constant 0 : index
    %c1 = arith.constant 1 : index
    %c0_5 = arith.constant 0 : index
    %8 = vector.load %arg2[%c0_4, %c1, %c0_5] : memref<1x14x256xf32, #tpu.memory_space<vmem>>, vector<1x8x256xf32>
    %9 = vector.shape_cast %8 : vector<1x8x256xf32> to vector<8x256xf32>
    %10 = vector.extract_strided_slice %0 {offsets = [1, 0], sizes = [1, 256], strides = [1, 1]} : vector<7x256xf32> to vector<1x256xf32>
    %11 = vector.broadcast %10 : vector<1x256xf32> to vector<8x256xf32>
    %12 = arith.mulf %9, %11 : vector<8x256xf32>
    %13 = arith.addf %7, %12 : vector<8x256xf32>
    %c0_6 = arith.constant 0 : index
    %c2 = arith.constant 2 : index
    %c0_7 = arith.constant 0 : index
    %14 = vector.load %arg2[%c0_6, %c2, %c0_7] : memref<1x14x256xf32, #tpu.memory_space<vmem>>, vector<1x8x256xf32>
    %15 = vector.shape_cast %14 : vector<1x8x256xf32> to vector<8x256xf32>
    %16 = vector.extract_strided_slice %0 {offsets = [2, 0], sizes = [1, 256], strides = [1, 1]} : vector<7x256xf32> to vector<1x256xf32>
    %17 = vector.broadcast %16 : vector<1x256xf32> to vector<8x256xf32>
    %18 = arith.mulf %15, %17 : vector<8x256xf32>
    %19 = arith.addf %13, %18 : vector<8x256xf32>
    %c0_8 = arith.constant 0 : index
    %c3 = arith.constant 3 : index
    %c0_9 = arith.constant 0 : index
    %20 = vector.load %arg2[%c0_8, %c3, %c0_9] : memref<1x14x256xf32, #tpu.memory_space<vmem>>, vector<1x8x256xf32>
    %21 = vector.shape_cast %20 : vector<1x8x256xf32> to vector<8x256xf32>
    %22 = vector.extract_strided_slice %0 {offsets = [3, 0], sizes = [1, 256], strides = [1, 1]} : vector<7x256xf32> to vector<1x256xf32>
    %23 = vector.broadcast %22 : vector<1x256xf32> to vector<8x256xf32>
    %24 = arith.mulf %21, %23 : vector<8x256xf32>
    %25 = arith.addf %19, %24 : vector<8x256xf32>
    %c0_10 = arith.constant 0 : index
    %c4 = arith.constant 4 : index
    %c0_11 = arith.constant 0 : index
    %26 = vector.load %arg2[%c0_10, %c4, %c0_11] : memref<1x14x256xf32, #tpu.memory_space<vmem>>, vector<1x8x256xf32>
    %27 = vector.shape_cast %26 : vector<1x8x256xf32> to vector<8x256xf32>
    %28 = vector.extract_strided_slice %0 {offsets = [4, 0], sizes = [1, 256], strides = [1, 1]} : vector<7x256xf32> to vector<1x256xf32>
    %29 = vector.broadcast %28 : vector<1x256xf32> to vector<8x256xf32>
    %30 = arith.mulf %27, %29 : vector<8x256xf32>
    %31 = arith.addf %25, %30 : vector<8x256xf32>
    %c0_12 = arith.constant 0 : index
    %c5 = arith.constant 5 : index
    %c0_13 = arith.constant 0 : index
    %32 = vector.load %arg2[%c0_12, %c5, %c0_13] : memref<1x14x256xf32, #tpu.memory_space<vmem>>, vector<1x8x256xf32>
    %33 = vector.shape_cast %32 : vector<1x8x256xf32> to vector<8x256xf32>
    %34 = vector.extract_strided_slice %0 {offsets = [5, 0], sizes = [1, 256], strides = [1, 1]} : vector<7x256xf32> to vector<1x256xf32>
    %35 = vector.broadcast %34 : vector<1x256xf32> to vector<8x256xf32>
    %36 = arith.mulf %33, %35 : vector<8x256xf32>
    %37 = arith.addf %31, %36 : vector<8x256xf32>
    %c0_14 = arith.constant 0 : index
    %c6 = arith.constant 6 : index
    %c0_15 = arith.constant 0 : index
    %38 = vector.load %arg2[%c0_14, %c6, %c0_15] : memref<1x14x256xf32, #tpu.memory_space<vmem>>, vector<1x8x256xf32>
    %39 = vector.shape_cast %38 : vector<1x8x256xf32> to vector<8x256xf32>
    %40 = vector.extract_strided_slice %0 {offsets = [6, 0], sizes = [1, 256], strides = [1, 1]} : vector<7x256xf32> to vector<1x256xf32>
    %41 = vector.broadcast %40 : vector<1x256xf32> to vector<8x256xf32>
    %42 = arith.mulf %39, %41 : vector<8x256xf32>
    %43 = arith.addf %37, %42 : vector<8x256xf32>
    %c0_16 = arith.constant 0 : index
    %c0_17 = arith.constant 0 : index
    %44 = vector.load %arg4[%c0_16, %c0_17] : memref<1x256xf32, #tpu.memory_space<vmem>>, vector<1x256xf32>
    %45 = vector.broadcast %44 : vector<1x256xf32> to vector<8x256xf32>
    %46 = arith.addf %43, %45 : vector<8x256xf32>
    %c0_18 = arith.constant 0 : index
    %c0_19 = arith.constant 0 : index
    %47 = vector.load %arg5[%c0_18, %c0_19] : memref<1x256xf32, #tpu.memory_space<vmem>>, vector<1x256xf32>
    %48 = vector.broadcast %47 : vector<1x256xf32> to vector<8x256xf32>
    %49 = arith.mulf %46, %48 : vector<8x256xf32>
    %c0_20 = arith.constant 0 : index
    %c0_21 = arith.constant 0 : index
    %50 = vector.load %arg6[%c0_20, %c0_21] : memref<1x256xf32, #tpu.memory_space<vmem>>, vector<1x256xf32>
    %51 = vector.broadcast %50 : vector<1x256xf32> to vector<8x256xf32>
    %52 = arith.addf %49, %51 : vector<8x256xf32>
    %53 = arith.negf %52 : vector<8x256xf32>
    %54 = math.exp %53 : vector<8x256xf32>
    %cst_22 = arith.constant 1.000000e+00 : f32
    %55 = vector.broadcast %cst_22 : f32 to vector<8x256xf32>
    %56 = arith.addf %55, %54 : vector<8x256xf32>
    %57 = arith.divf %55, %56 : vector<8x256xf32>
    %58 = arith.mulf %52, %57 : vector<8x256xf32>
    %c0_23 = arith.constant 0 : index
    %c0_24 = arith.constant 0 : index
    %c0_25 = arith.constant 0 : index
    %59 = vector.load %arg7[%c0_23, %c0_24, %c0_25] : memref<1x8x256xf32, #tpu.memory_space<vmem>>, vector<1x8x256xf32>
    %60 = vector.shape_cast %59 : vector<1x8x256xf32> to vector<8x256xf32>
    %61 = vector.shape_cast %58 : vector<8x256xf32> to vector<1x8x256xf32>
    tpu.vector_store %arg7[%c0_23, %c0_24, %c0_25], %61 {strides = array<i32>} : memref<1x8x256xf32, #tpu.memory_space<vmem>>, vector<1x8x256xf32>,
    return
  }
  func.func @transform_0(%arg0: i32, %arg1: i32) -> (i32, i32, i32) {
    %c0_i32 = arith.constant 0 : i32
    %c0_i32_0 = arith.constant 0 : i32
    return %arg0, %c0_i32, %arg1 : i32, i32, i32
  }
  func.func @transform_1(%arg0: i32, %arg1: i32) -> (i32, i32) {
    %c0_i32 = arith.constant 0 : i32
    %c0_i32_0 = arith.constant 0 : i32
    return %c0_i32, %arg1 : i32, i32
  }
  func.func @transform_2(%arg0: i32, %arg1: i32) -> (i32, i32) {
    %c0_i32 = arith.constant 0 : i32
    %c0_i32_0 = arith.constant 0 : i32
    return %c0_i32, %arg1 : i32, i32
  }
  func.func @transform_3(%arg0: i32, %arg1: i32) -> (i32, i32) {
    %c0_i32 = arith.constant 0 : i32
    %c0_i32_0 = arith.constant 0 : i32
    return %c0_i32, %arg1 : i32, i32
  }
  func.func @transform_4(%arg0: i32, %arg1: i32) -> (i32, i32) {
    %c0_i32 = arith.constant 0 : i32
    %c0_i32_0 = arith.constant 0 : i32
    return %c0_i32, %arg1 : i32, i32
  }
  func.func @transform_5(%arg0: i32, %arg1: i32) -> (i32, i32, i32) {
    %c0_i32 = arith.constant 0 : i32
    %c0_i32_0 = arith.constant 0 : i32
    return %arg0, %c0_i32, %arg1 : i32, i32, i32
  }
}

module attributes {stable_mosaic.version = 11 : i64} {
  func.func @_fused_linear_kernel(%arg0: i32, %arg1: memref<16x256xf32, #tpu.memory_space<vmem>>, %arg2: memref<256x128xbf16, #tpu.memory_space<vmem>>, %arg3: memref<1x128xf32, #tpu.memory_space<vmem>>, %arg4: memref<16x128xf32, #tpu.memory_space<vmem>>, %arg5: memref<1x128xf32, #tpu.memory_space<vmem>>, %arg6: memref<1x128xf32, #tpu.memory_space<vmem>>, %arg7: memref<16x128xf32, #tpu.memory_space<vmem>>) attributes {dimension_semantics = [#tpu.dimension_semantics<parallel>], iteration_bounds = array<i64: 1>, scalar_prefetch = 0 : i64, scratch_operands = 0 : i64, tpu.core_type = #tpu.core_type<tc>, window_params = [{transform_indices = @transform_0, window_bounds = array<i64: 16, 256>}, {pipeline_mode = #tpu.pipeline_mode<synchronous>, transform_indices = @transform_1, window_bounds = array<i64: 256, 128>}, {pipeline_mode = #tpu.pipeline_mode<synchronous>, transform_indices = @transform_2, window_bounds = array<i64: 1, 128>}, {transform_indices = @transform_3, window_bounds = array<i64: 16, 128>}, {pipeline_mode = #tpu.pipeline_mode<synchronous>, transform_indices = @transform_4, window_bounds = array<i64: 1, 128>}, {pipeline_mode = #tpu.pipeline_mode<synchronous>, transform_indices = @transform_5, window_bounds = array<i64: 1, 128>}, {transform_indices = @transform_6, window_bounds = array<i64: 16, 128>}]} {
    %c0 = arith.constant 0 : index
    %c0_0 = arith.constant 0 : index
    %0 = vector.load %arg1[%c0, %c0_0] : memref<16x256xf32, #tpu.memory_space<vmem>>, vector<16x256xf32>
    %1 = arith.truncf %0 : vector<16x256xf32> to vector<16x256xbf16>
    %c0_1 = arith.constant 0 : index
    %c0_2 = arith.constant 0 : index
    %2 = vector.load %arg2[%c0_1, %c0_2] : memref<256x128xbf16, #tpu.memory_space<vmem>>, vector<256x128xbf16>
    %cst = arith.constant dense<0.000000e+00> : vector<16x128xf32>
    %3 = tpu.matmul %1, %2, %cst {dimension_numbers = #tpu.dot_dimension_numbers<[1], [0], [0], [1], [0, 0, 1, 1], [], []>} : vector<16x256xbf16>, vector<256x128xbf16>, vector<16x128xf32> -> vector<16x128xf32>
    %c0_3 = arith.constant 0 : index
    %c0_4 = arith.constant 0 : index
    %4 = vector.load %arg3[%c0_3, %c0_4] : memref<1x128xf32, #tpu.memory_space<vmem>>, vector<1x128xf32>
    %5 = vector.broadcast %4 : vector<1x128xf32> to vector<16x128xf32>
    %6 = arith.addf %3, %5 : vector<16x128xf32>
    %c0_5 = arith.constant 0 : index
    %c0_6 = arith.constant 0 : index
    %7 = vector.load %arg4[%c0_5, %c0_6] : memref<16x128xf32, #tpu.memory_space<vmem>>, vector<16x128xf32>
    %cst_7 = arith.constant 1.000000e+00 : f32
    %8 = vector.broadcast %cst_7 : f32 to vector<16x128xf32>
    %9 = arith.mulf %8, %6 : vector<16x128xf32>
    %10 = arith.addf %7, %9 : vector<16x128xf32>
    %cst_8 = arith.constant dense<0.000000e+00> : vector<16xf32>
    %11 = vector.multi_reduction <add>, %10, %cst_8 [1] : vector<16x128xf32> to vector<16xf32>
    %12 = vector.shape_cast %11 : vector<16xf32> to vector<16x1xf32>
    %cst_9 = arith.constant 1.280000e+02 : f32
    %13 = vector.broadcast %cst_9 : f32 to vector<16x1xf32>
    %14 = arith.divf %12, %13 : vector<16x1xf32>
    %15 = vector.broadcast %14 : vector<16x1xf32> to vector<16x128xf32>
    %16 = arith.subf %10, %15 : vector<16x128xf32>
    %17 = arith.mulf %16, %16 : vector<16x128xf32>
    %cst_10 = arith.constant dense<0.000000e+00> : vector<16xf32>
    %18 = vector.multi_reduction <add>, %17, %cst_10 [1] : vector<16x128xf32> to vector<16xf32>
    %19 = vector.shape_cast %18 : vector<16xf32> to vector<16x1xf32>
    %cst_11 = arith.constant 1.280000e+02 : f32
    %20 = vector.broadcast %cst_11 : f32 to vector<16x1xf32>
    %21 = arith.divf %19, %20 : vector<16x1xf32>
    %cst_12 = arith.constant 9.99999974E-6 : f32
    %22 = vector.broadcast %cst_12 : f32 to vector<16x1xf32>
    %23 = arith.addf %21, %22 : vector<16x1xf32>
    %24 = math.rsqrt %23 : vector<16x1xf32>
    %25 = vector.broadcast %24 : vector<16x1xf32> to vector<16x128xf32>
    %26 = arith.mulf %16, %25 : vector<16x128xf32>
    %c0_13 = arith.constant 0 : index
    %c0_14 = arith.constant 0 : index
    %27 = vector.load %arg5[%c0_13, %c0_14] : memref<1x128xf32, #tpu.memory_space<vmem>>, vector<1x128xf32>
    %28 = vector.broadcast %27 : vector<1x128xf32> to vector<16x128xf32>
    %29 = arith.mulf %26, %28 : vector<16x128xf32>
    %c0_15 = arith.constant 0 : index
    %c0_16 = arith.constant 0 : index
    %30 = vector.load %arg6[%c0_15, %c0_16] : memref<1x128xf32, #tpu.memory_space<vmem>>, vector<1x128xf32>
    %31 = vector.broadcast %30 : vector<1x128xf32> to vector<16x128xf32>
    %32 = arith.addf %29, %31 : vector<16x128xf32>
    %c0_17 = arith.constant 0 : index
    %c0_18 = arith.constant 0 : index
    %33 = vector.load %arg7[%c0_17, %c0_18] : memref<16x128xf32, #tpu.memory_space<vmem>>, vector<16x128xf32>
    tpu.vector_store %arg7[%c0_17, %c0_18], %32 {strides = array<i32>} : memref<16x128xf32, #tpu.memory_space<vmem>>, vector<16x128xf32>,
    return
  }
  func.func @transform_0(%arg0: i32) -> (i32, i32) {
    %c0_i32 = arith.constant 0 : i32
    %c0_i32_0 = arith.constant 0 : i32
    return %arg0, %c0_i32 : i32, i32
  }
  func.func @transform_1(%arg0: i32) -> (i32, i32) {
    %c0_i32 = arith.constant 0 : i32
    %c0_i32_0 = arith.constant 0 : i32
    %c0_i32_1 = arith.constant 0 : i32
    return %c0_i32, %c0_i32_0 : i32, i32
  }
  func.func @transform_2(%arg0: i32) -> (i32, i32) {
    %c0_i32 = arith.constant 0 : i32
    %c0_i32_0 = arith.constant 0 : i32
    %c0_i32_1 = arith.constant 0 : i32
    return %c0_i32, %c0_i32_0 : i32, i32
  }
  func.func @transform_3(%arg0: i32) -> (i32, i32) {
    %c0_i32 = arith.constant 0 : i32
    %c0_i32_0 = arith.constant 0 : i32
    return %arg0, %c0_i32 : i32, i32
  }
  func.func @transform_4(%arg0: i32) -> (i32, i32) {
    %c0_i32 = arith.constant 0 : i32
    %c0_i32_0 = arith.constant 0 : i32
    %c0_i32_1 = arith.constant 0 : i32
    return %c0_i32, %c0_i32_0 : i32, i32
  }
  func.func @transform_5(%arg0: i32) -> (i32, i32) {
    %c0_i32 = arith.constant 0 : i32
    %c0_i32_0 = arith.constant 0 : i32
    %c0_i32_1 = arith.constant 0 : i32
    return %c0_i32, %c0_i32_0 : i32, i32
  }
  func.func @transform_6(%arg0: i32) -> (i32, i32) {
    %c0_i32 = arith.constant 0 : i32
    %c0_i32_0 = arith.constant 0 : i32
    return %arg0, %c0_i32 : i32, i32
  }
}

module attributes {stable_mosaic.version = 11 : i64} {
  func.func @_fused_linear_kernel(%arg0: i32, %arg1: memref<32x128xf32, #tpu.memory_space<vmem>>, %arg2: memref<128x128xbf16, #tpu.memory_space<vmem>>, %arg3: memref<1x128xf32, #tpu.memory_space<vmem>>, %arg4: memref<32x128xf32, #tpu.memory_space<vmem>>, %arg5: memref<32x128xf32, #tpu.memory_space<vmem>>) attributes {dimension_semantics = [#tpu.dimension_semantics<parallel>], iteration_bounds = array<i64: 1>, scalar_prefetch = 0 : i64, scratch_operands = 0 : i64, tpu.core_type = #tpu.core_type<tc>, window_params = [{transform_indices = @transform_0, window_bounds = array<i64: 32, 128>}, {pipeline_mode = #tpu.pipeline_mode<synchronous>, transform_indices = @transform_1, window_bounds = array<i64: 128, 128>}, {pipeline_mode = #tpu.pipeline_mode<synchronous>, transform_indices = @transform_2, window_bounds = array<i64: 1, 128>}, {transform_indices = @transform_3, window_bounds = array<i64: 32, 128>}, {transform_indices = @transform_4, window_bounds = array<i64: 32, 128>}]} {
    %c0 = arith.constant 0 : index
    %c0_0 = arith.constant 0 : index
    %0 = vector.load %arg1[%c0, %c0_0] : memref<32x128xf32, #tpu.memory_space<vmem>>, vector<32x128xf32>
    %1 = arith.truncf %0 : vector<32x128xf32> to vector<32x128xbf16>
    %c0_1 = arith.constant 0 : index
    %c0_2 = arith.constant 0 : index
    %2 = vector.load %arg2[%c0_1, %c0_2] : memref<128x128xbf16, #tpu.memory_space<vmem>>, vector<128x128xbf16>
    %cst = arith.constant dense<0.000000e+00> : vector<32x128xf32>
    %3 = tpu.matmul %1, %2, %cst {dimension_numbers = #tpu.dot_dimension_numbers<[1], [0], [0], [1], [0, 0, 1, 1], [], []>} : vector<32x128xbf16>, vector<128x128xbf16>, vector<32x128xf32> -> vector<32x128xf32>
    %c0_3 = arith.constant 0 : index
    %c0_4 = arith.constant 0 : index
    %4 = vector.load %arg3[%c0_3, %c0_4] : memref<1x128xf32, #tpu.memory_space<vmem>>, vector<1x128xf32>
    %5 = vector.broadcast %4 : vector<1x128xf32> to vector<32x128xf32>
    %6 = arith.addf %3, %5 : vector<32x128xf32>
    %c0_5 = arith.constant 0 : index
    %c0_6 = arith.constant 0 : index
    %7 = vector.load %arg4[%c0_5, %c0_6] : memref<32x128xf32, #tpu.memory_space<vmem>>, vector<32x128xf32>
    %cst_7 = arith.constant 1.000000e+00 : f32
    %8 = vector.broadcast %cst_7 : f32 to vector<32x128xf32>
    %9 = arith.mulf %8, %6 : vector<32x128xf32>
    %10 = arith.addf %7, %9 : vector<32x128xf32>
    %c0_8 = arith.constant 0 : index
    %c0_9 = arith.constant 0 : index
    %11 = vector.load %arg5[%c0_8, %c0_9] : memref<32x128xf32, #tpu.memory_space<vmem>>, vector<32x128xf32>
    tpu.vector_store %arg5[%c0_8, %c0_9], %10 {strides = array<i32>} : memref<32x128xf32, #tpu.memory_space<vmem>>, vector<32x128xf32>,
    return
  }
  func.func @transform_0(%arg0: i32) -> (i32, i32) {
    %c0_i32 = arith.constant 0 : i32
    %c0_i32_0 = arith.constant 0 : i32
    return %arg0, %c0_i32 : i32, i32
  }
  func.func @transform_1(%arg0: i32) -> (i32, i32) {
    %c0_i32 = arith.constant 0 : i32
    %c0_i32_0 = arith.constant 0 : i32
    %c0_i32_1 = arith.constant 0 : i32
    return %c0_i32, %c0_i32_0 : i32, i32
  }
  func.func @transform_2(%arg0: i32) -> (i32, i32) {
    %c0_i32 = arith.constant 0 : i32
    %c0_i32_0 = arith.constant 0 : i32
    %c0_i32_1 = arith.constant 0 : i32
    return %c0_i32, %c0_i32_0 : i32, i32
  }
  func.func @transform_3(%arg0: i32) -> (i32, i32) {
    %c0_i32 = arith.constant 0 : i32
    %c0_i32_0 = arith.constant 0 : i32
    return %arg0, %c0_i32 : i32, i32
  }
  func.func @transform_4(%arg0: i32) -> (i32, i32) {
    %c0_i32 = arith.constant 0 : i32
    %c0_i32_0 = arith.constant 0 : i32
    return %arg0, %c0_i32 : i32, i32
  }
}

module attributes {stable_mosaic.version = 11 : i64} {
  func.func @_fused_linear_kernel(%arg0: i32, %arg1: memref<32x128xf32, #tpu.memory_space<vmem>>, %arg2: memref<128x384xbf16, #tpu.memory_space<vmem>>, %arg3: memref<1x384xf32, #tpu.memory_space<vmem>>, %arg4: memref<1x128xf32, #tpu.memory_space<vmem>>, %arg5: memref<1x128xf32, #tpu.memory_space<vmem>>, %arg6: memref<32x128xf32, #tpu.memory_space<vmem>>, %arg7: memref<32x256xf32, #tpu.memory_space<vmem>>) attributes {dimension_semantics = [#tpu.dimension_semantics<parallel>], iteration_bounds = array<i64: 1>, scalar_prefetch = 0 : i64, scratch_operands = 0 : i64, tpu.core_type = #tpu.core_type<tc>, window_params = [{transform_indices = @transform_0, window_bounds = array<i64: 32, 128>}, {pipeline_mode = #tpu.pipeline_mode<synchronous>, transform_indices = @transform_1, window_bounds = array<i64: 128, 384>}, {pipeline_mode = #tpu.pipeline_mode<synchronous>, transform_indices = @transform_2, window_bounds = array<i64: 1, 384>}, {pipeline_mode = #tpu.pipeline_mode<synchronous>, transform_indices = @transform_3, window_bounds = array<i64: 1, 128>}, {pipeline_mode = #tpu.pipeline_mode<synchronous>, transform_indices = @transform_4, window_bounds = array<i64: 1, 128>}, {transform_indices = @transform_5, window_bounds = array<i64: 32, 128>}, {transform_indices = @transform_6, window_bounds = array<i64: 32, 256>}]} {
    %c0 = arith.constant 0 : index
    %c0_0 = arith.constant 0 : index
    %0 = vector.load %arg1[%c0, %c0_0] : memref<32x128xf32, #tpu.memory_space<vmem>>, vector<32x128xf32>
    %c0_1 = arith.constant 0 : index
    %c0_2 = arith.constant 0 : index
    %1 = vector.load %arg4[%c0_1, %c0_2] : memref<1x128xf32, #tpu.memory_space<vmem>>, vector<1x128xf32>
    %2 = vector.broadcast %1 : vector<1x128xf32> to vector<32x128xf32>
    %3 = arith.mulf %0, %2 : vector<32x128xf32>
    %c0_3 = arith.constant 0 : index
    %c0_4 = arith.constant 0 : index
    %4 = vector.load %arg5[%c0_3, %c0_4] : memref<1x128xf32, #tpu.memory_space<vmem>>, vector<1x128xf32>
    %5 = vector.broadcast %4 : vector<1x128xf32> to vector<32x128xf32>
    %6 = arith.addf %3, %5 : vector<32x128xf32>
    %7 = arith.truncf %6 : vector<32x128xf32> to vector<32x128xbf16>
    %c0_5 = arith.constant 0 : index
    %c0_6 = arith.constant 0 : index
    %8 = vector.load %arg2[%c0_5, %c0_6] : memref<128x384xbf16, #tpu.memory_space<vmem>>, vector<128x384xbf16>
    %cst = arith.constant dense<0.000000e+00> : vector<32x384xf32>
    %9 = tpu.matmul %7, %8, %cst {dimension_numbers = #tpu.dot_dimension_numbers<[1], [0], [0], [1], [0, 0, 1, 1], [], []>} : vector<32x128xbf16>, vector<128x384xbf16>, vector<32x384xf32> -> vector<32x384xf32>
    %c0_7 = arith.constant 0 : index
    %c0_8 = arith.constant 0 : index
    %10 = vector.load %arg3[%c0_7, %c0_8] : memref<1x384xf32, #tpu.memory_space<vmem>>, vector<1x384xf32>
    %11 = vector.broadcast %10 : vector<1x384xf32> to vector<32x384xf32>
    %12 = arith.addf %9, %11 : vector<32x384xf32>
    %13 = vector.extract_strided_slice %12 {offsets = [0, 0], sizes = [32, 128], strides = [1, 1]} : vector<32x384xf32> to vector<32x128xf32>
    %c0_9 = arith.constant 0 : index
    %c0_10 = arith.constant 0 : index
    %14 = vector.load %arg6[%c0_9, %c0_10] : memref<32x128xf32, #tpu.memory_space<vmem>>, vector<32x128xf32>
    tpu.vector_store %arg6[%c0_9, %c0_10], %13 {strides = array<i32>} : memref<32x128xf32, #tpu.memory_space<vmem>>, vector<32x128xf32>,
    %15 = vector.extract_strided_slice %12 {offsets = [0, 128], sizes = [32, 256], strides = [1, 1]} : vector<32x384xf32> to vector<32x256xf32>
    %c0_11 = arith.constant 0 : index
    %c0_12 = arith.constant 0 : index
    %16 = vector.load %arg7[%c0_11, %c0_12] : memref<32x256xf32, #tpu.memory_space<vmem>>, vector<32x256xf32>
    tpu.vector_store %arg7[%c0_11, %c0_12], %15 {strides = array<i32>} : memref<32x256xf32, #tpu.memory_space<vmem>>, vector<32x256xf32>,
    return
  }
  func.func @transform_0(%arg0: i32) -> (i32, i32) {
    %c0_i32 = arith.constant 0 : i32
    %c0_i32_0 = arith.constant 0 : i32
    return %arg0, %c0_i32 : i32, i32
  }
  func.func @transform_1(%arg0: i32) -> (i32, i32) {
    %c0_i32 = arith.constant 0 : i32
    %c0_i32_0 = arith.constant 0 : i32
    %c0_i32_1 = arith.constant 0 : i32
    return %c0_i32, %c0_i32_0 : i32, i32
  }
  func.func @transform_2(%arg0: i32) -> (i32, i32) {
    %c0_i32 = arith.constant 0 : i32
    %c0_i32_0 = arith.constant 0 : i32
    %c0_i32_1 = arith.constant 0 : i32
    return %c0_i32, %c0_i32_0 : i32, i32
  }
  func.func @transform_3(%arg0: i32) -> (i32, i32) {
    %c0_i32 = arith.constant 0 : i32
    %c0_i32_0 = arith.constant 0 : i32
    %c0_i32_1 = arith.constant 0 : i32
    return %c0_i32, %c0_i32_0 : i32, i32
  }
  func.func @transform_4(%arg0: i32) -> (i32, i32) {
    %c0_i32 = arith.constant 0 : i32
    %c0_i32_0 = arith.constant 0 : i32
    %c0_i32_1 = arith.constant 0 : i32
    return %c0_i32, %c0_i32_0 : i32, i32
  }
  func.func @transform_5(%arg0: i32) -> (i32, i32) {
    %c0_i32 = arith.constant 0 : i32
    %c0_i32_0 = arith.constant 0 : i32
    return %arg0, %c0_i32 : i32, i32
  }
  func.func @transform_6(%arg0: i32) -> (i32, i32) {
    %c0_i32 = arith.constant 0 : i32
    %c0_i32_0 = arith.constant 0 : i32
    return %arg0, %c0_i32 : i32, i32
  }
}

module attributes {stable_mosaic.version = 11 : i64} {
  func.func @_flash_mha_kernel(%arg0: i32, %arg1: i32, %arg2: i32, %arg3: memref<1x16x128xf32, #tpu.memory_space<vmem>>, %arg4: memref<1x16x256xf32, #tpu.memory_space<vmem>>, %arg5: memref<1x16x128xf32, #tpu.memory_space<vmem>>, %arg6: memref<4x16x1xf32, #tpu.memory_space<vmem>>, %arg7: memref<4x16x1xf32, #tpu.memory_space<vmem>>, %arg8: memref<4x16x32xf32, #tpu.memory_space<vmem>>) attributes {dimension_semantics = [#tpu.dimension_semantics<parallel>, #tpu.dimension_semantics<parallel>, #tpu.dimension_semantics<arbitrary>], iteration_bounds = array<i64: 2, 1, 1>, scalar_prefetch = 0 : i64, scratch_operands = 3 : i64, tpu.core_type = #tpu.core_type<tc>, window_params = [{transform_indices = @transform_0, window_bounds = array<i64: 1, 16, 128>}, {transform_indices = @transform_1, window_bounds = array<i64: 1, 16, 256>}, {transform_indices = @transform_2, window_bounds = array<i64: 1, 16, 128>}]} {
    %c0_i32 = arith.constant 0 : i32
    %0 = arith.cmpi eq, %arg2, %c0_i32 : i32
    %1 = arith.extui %0 : i1 to i32
    %c0_i32_0 = arith.constant 0 : i32
    %2 = arith.cmpi ne, %1, %c0_i32_0 : i32
    scf.if %2 {
      %cst_112 = arith.constant -1.000000e+30 : f32
      %196 = vector.broadcast %cst_112 : f32 to vector<4x16x1xf32>
      %c0_113 = arith.constant 0 : index
      %c0_114 = arith.constant 0 : index
      %c0_115 = arith.constant 0 : index
      %197 = vector.load %arg6[%c0_113, %c0_114, %c0_115] : memref<4x16x1xf32, #tpu.memory_space<vmem>>, vector<4x16x1xf32>
      tpu.vector_store %arg6[%c0_113, %c0_114, %c0_115], %196 {strides = array<i32>} : memref<4x16x1xf32, #tpu.memory_space<vmem>>, vector<4x16x1xf32>,
      %cst_116 = arith.constant 0.000000e+00 : f32
      %198 = vector.broadcast %cst_116 : f32 to vector<4x16x1xf32>
      %c0_117 = arith.constant 0 : index
      %c0_118 = arith.constant 0 : index
      %c0_119 = arith.constant 0 : index
      %199 = vector.load %arg7[%c0_117, %c0_118, %c0_119] : memref<4x16x1xf32, #tpu.memory_space<vmem>>, vector<4x16x1xf32>
      tpu.vector_store %arg7[%c0_117, %c0_118, %c0_119], %198 {strides = array<i32>} : memref<4x16x1xf32, #tpu.memory_space<vmem>>, vector<4x16x1xf32>,
      %cst_120 = arith.constant 0.000000e+00 : f32
      %200 = vector.broadcast %cst_120 : f32 to vector<4x16x32xf32>
      %c0_121 = arith.constant 0 : index
      %c0_122 = arith.constant 0 : index
      %c0_123 = arith.constant 0 : index
      %201 = vector.load %arg8[%c0_121, %c0_122, %c0_123] : memref<4x16x32xf32, #tpu.memory_space<vmem>>, vector<4x16x32xf32>
      tpu.vector_store %arg8[%c0_121, %c0_122, %c0_123], %200 {strides = array<i32>} : memref<4x16x32xf32, #tpu.memory_space<vmem>>, vector<4x16x32xf32>,
    } else {
    }
    %c16_i32 = arith.constant 16 : i32
    %3 = arith.muli %arg2, %c16_i32 : i32
    %4 = tpu.iota {dimensions = array<i32: 1>} : vector<1x16xi32>
    %5 = vector.broadcast %3 : i32 to vector<1x16xi32>
    %6 = arith.addi %5, %4 : vector<1x16xi32>
    %c16_i32_1 = arith.constant 16 : i32
    %7 = vector.broadcast %c16_i32_1 : i32 to vector<1x16xi32>
    %8 = arith.cmpi slt, %6, %7 : vector<1x16xi32>
    %c0 = arith.constant 0 : index
    %c0_2 = arith.constant 0 : index
    %c0_3 = arith.constant 0 : index
    %9 = vector.load %arg3[%c0, %c0_2, %c0_3] : memref<1x16x128xf32, #tpu.memory_space<vmem>>, vector<1x16x128xf32>
    %10 = vector.shape_cast %9 : vector<1x16x128xf32> to vector<16x128xf32>
    %cst = arith.constant 0.176776692 : f32
    %11 = vector.broadcast %cst : f32 to vector<16x128xf32>
    %12 = arith.mulf %10, %11 : vector<16x128xf32>
    %13 = vector.extract_strided_slice %12 {offsets = [0, 0], sizes = [16, 32], strides = [1, 1]} : vector<16x128xf32> to vector<16x32xf32>
    %c0_4 = arith.constant 0 : index
    %c0_5 = arith.constant 0 : index
    %c0_6 = arith.constant 0 : index
    %14 = vector.load %arg4[%c0_4, %c0_5, %c0_6] : memref<1x16x256xf32, #tpu.memory_space<vmem>>, vector<1x16x32xf32>
    %15 = vector.shape_cast %14 : vector<1x16x32xf32> to vector<16x32xf32>
    %c0_7 = arith.constant 0 : index
    %c0_8 = arith.constant 0 : index
    %c128 = arith.constant 128 : index
    %16 = vector.load %arg4[%c0_7, %c0_8, %c128] : memref<1x16x256xf32, #tpu.memory_space<vmem>>, vector<1x16x32xf32>
    %17 = vector.shape_cast %16 : vector<1x16x32xf32> to vector<16x32xf32>
    %18 = arith.truncf %13 : vector<16x32xf32> to vector<16x32xbf16>
    %19 = arith.truncf %15 : vector<16x32xf32> to vector<16x32xbf16>
    %cst_9 = arith.constant dense<0.000000e+00> : vector<16x16xf32>
    %20 = tpu.matmul %18, %19, %cst_9 {dimension_numbers = #tpu.dot_dimension_numbers<[1], [1], [0], [0], [0, 0, 1, 0], [], []>} : vector<16x32xbf16>, vector<16x32xbf16>, vector<16x16xf32> -> vector<16x16xf32>
    %cst_10 = arith.constant -1.000000e+30 : f32
    %21 = vector.shape_cast %8 : vector<1x16xi1> to vector<1x16xi1>
    %22 = vector.broadcast %21 : vector<1x16xi1> to vector<16x16xi1>
    %23 = vector.broadcast %cst_10 : f32 to vector<16x16xf32>
    %24 = arith.select %22, %20, %23 : vector<16x16xi1>, vector<16x16xf32>
    %c0_11 = arith.constant 0 : index
    %c0_12 = arith.constant 0 : index
    %c0_13 = arith.constant 0 : index
    %25 = vector.load %arg6[%c0_11, %c0_12, %c0_13] : memref<4x16x1xf32, #tpu.memory_space<vmem>>, vector<1x16x1xf32>
    %26 = vector.shape_cast %25 : vector<1x16x1xf32> to vector<16x1xf32>
    %cst_14 = arith.constant dense<0xFF800000> : vector<16xf32>
    %27 = vector.multi_reduction <maximumf>, %24, %cst_14 [1] : vector<16x16xf32> to vector<16xf32>
    %28 = vector.shape_cast %27 : vector<16xf32> to vector<16x1xf32>
    %29 = arith.maximumf %26, %28 : vector<16x1xf32>
    %30 = arith.subf %26, %29 : vector<16x1xf32>
    %31 = math.exp %30 : vector<16x1xf32>
    %32 = vector.broadcast %29 : vector<16x1xf32> to vector<16x16xf32>
    %33 = arith.subf %24, %32 : vector<16x16xf32>
    %34 = math.exp %33 : vector<16x16xf32>
    %c0_15 = arith.constant 0 : index
    %c0_16 = arith.constant 0 : index
    %c0_17 = arith.constant 0 : index
    %35 = vector.load %arg7[%c0_15, %c0_16, %c0_17] : memref<4x16x1xf32, #tpu.memory_space<vmem>>, vector<1x16x1xf32>
    %36 = vector.shape_cast %35 : vector<1x16x1xf32> to vector<16x1xf32>
    %37 = arith.mulf %31, %36 : vector<16x1xf32>
    %cst_18 = arith.constant dense<0.000000e+00> : vector<16xf32>
    %38 = vector.multi_reduction <add>, %34, %cst_18 [1] : vector<16x16xf32> to vector<16xf32>
    %39 = vector.shape_cast %38 : vector<16xf32> to vector<16x1xf32>
    %40 = arith.addf %37, %39 : vector<16x1xf32>
    %c0_19 = arith.constant 0 : index
    %c0_20 = arith.constant 0 : index
    %c0_21 = arith.constant 0 : index
    %41 = vector.load %arg7[%c0_19, %c0_20, %c0_21] : memref<4x16x1xf32, #tpu.memory_space<vmem>>, vector<1x16x1xf32>
    %42 = vector.shape_cast %41 : vector<1x16x1xf32> to vector<16x1xf32>
    %43 = vector.shape_cast %40 : vector<16x1xf32> to vector<1x16x1xf32>
    tpu.vector_store %arg7[%c0_19, %c0_20, %c0_21], %43 {strides = array<i32>} : memref<4x16x1xf32, #tpu.memory_space<vmem>>, vector<1x16x1xf32>,
    %c0_22 = arith.constant 0 : index
    %c0_23 = arith.constant 0 : index
    %c0_24 = arith.constant 0 : index
    %44 = vector.load %arg8[%c0_22, %c0_23, %c0_24] : memref<4x16x32xf32, #tpu.memory_space<vmem>>, vector<1x16x32xf32>
    %45 = vector.shape_cast %44 : vector<1x16x32xf32> to vector<16x32xf32>
    %46 = vector.broadcast %31 : vector<16x1xf32> to vector<16x32xf32>
    %47 = arith.mulf %46, %45 : vector<16x32xf32>
    %48 = arith.truncf %34 : vector<16x16xf32> to vector<16x16xbf16>
    %49 = arith.truncf %17 : vector<16x32xf32> to vector<16x32xbf16>
    %cst_25 = arith.constant dense<0.000000e+00> : vector<16x32xf32>
    %50 = tpu.matmul %48, %49, %cst_25 {dimension_numbers = #tpu.dot_dimension_numbers<[1], [0], [0], [1], [0, 0, 1, 1], [], []>} : vector<16x16xbf16>, vector<16x32xbf16>, vector<16x32xf32> -> vector<16x32xf32>
    %51 = arith.addf %47, %50 : vector<16x32xf32>
    %c0_26 = arith.constant 0 : index
    %c0_27 = arith.constant 0 : index
    %c0_28 = arith.constant 0 : index
    %52 = vector.load %arg8[%c0_26, %c0_27, %c0_28] : memref<4x16x32xf32, #tpu.memory_space<vmem>>, vector<1x16x32xf32>
    %53 = vector.shape_cast %52 : vector<1x16x32xf32> to vector<16x32xf32>
    %54 = vector.shape_cast %51 : vector<16x32xf32> to vector<1x16x32xf32>
    tpu.vector_store %arg8[%c0_26, %c0_27, %c0_28], %54 {strides = array<i32>} : memref<4x16x32xf32, #tpu.memory_space<vmem>>, vector<1x16x32xf32>,
    %c0_29 = arith.constant 0 : index
    %c0_30 = arith.constant 0 : index
    %c0_31 = arith.constant 0 : index
    %55 = vector.load %arg6[%c0_29, %c0_30, %c0_31] : memref<4x16x1xf32, #tpu.memory_space<vmem>>, vector<1x16x1xf32>
    %56 = vector.shape_cast %55 : vector<1x16x1xf32> to vector<16x1xf32>
    %57 = vector.shape_cast %29 : vector<16x1xf32> to vector<1x16x1xf32>
    tpu.vector_store %arg6[%c0_29, %c0_30, %c0_31], %57 {strides = array<i32>} : memref<4x16x1xf32, #tpu.memory_space<vmem>>, vector<1x16x1xf32>,
    %58 = vector.extract_strided_slice %12 {offsets = [0, 32], sizes = [16, 32], strides = [1, 1]} : vector<16x128xf32> to vector<16x32xf32>
    %c0_32 = arith.constant 0 : index
    %c0_33 = arith.constant 0 : index
    %c32 = arith.constant 32 : index
    %59 = vector.load %arg4[%c0_32, %c0_33, %c32] : memref<1x16x256xf32, #tpu.memory_space<vmem>>, vector<1x16x32xf32>
    %60 = vector.shape_cast %59 : vector<1x16x32xf32> to vector<16x32xf32>
    %c0_34 = arith.constant 0 : index
    %c0_35 = arith.constant 0 : index
    %c160 = arith.constant 160 : index
    %61 = vector.load %arg4[%c0_34, %c0_35, %c160] : memref<1x16x256xf32, #tpu.memory_space<vmem>>, vector<1x16x32xf32>
    %62 = vector.shape_cast %61 : vector<1x16x32xf32> to vector<16x32xf32>
    %63 = arith.truncf %58 : vector<16x32xf32> to vector<16x32xbf16>
    %64 = arith.truncf %60 : vector<16x32xf32> to vector<16x32xbf16>
    %cst_36 = arith.constant dense<0.000000e+00> : vector<16x16xf32>
    %65 = tpu.matmul %63, %64, %cst_36 {dimension_numbers = #tpu.dot_dimension_numbers<[1], [1], [0], [0], [0, 0, 1, 0], [], []>} : vector<16x32xbf16>, vector<16x32xbf16>, vector<16x16xf32> -> vector<16x16xf32>
    %cst_37 = arith.constant -1.000000e+30 : f32
    %66 = vector.shape_cast %8 : vector<1x16xi1> to vector<1x16xi1>
    %67 = vector.broadcast %66 : vector<1x16xi1> to vector<16x16xi1>
    %68 = vector.broadcast %cst_37 : f32 to vector<16x16xf32>
    %69 = arith.select %67, %65, %68 : vector<16x16xi1>, vector<16x16xf32>
    %c1 = arith.constant 1 : index
    %c0_38 = arith.constant 0 : index
    %c0_39 = arith.constant 0 : index
    %70 = vector.load %arg6[%c1, %c0_38, %c0_39] : memref<4x16x1xf32, #tpu.memory_space<vmem>>, vector<1x16x1xf32>
    %71 = vector.shape_cast %70 : vector<1x16x1xf32> to vector<16x1xf32>
    %cst_40 = arith.constant dense<0xFF800000> : vector<16xf32>
    %72 = vector.multi_reduction <maximumf>, %69, %cst_40 [1] : vector<16x16xf32> to vector<16xf32>
    %73 = vector.shape_cast %72 : vector<16xf32> to vector<16x1xf32>
    %74 = arith.maximumf %71, %73 : vector<16x1xf32>
    %75 = arith.subf %71, %74 : vector<16x1xf32>
    %76 = math.exp %75 : vector<16x1xf32>
    %77 = vector.broadcast %74 : vector<16x1xf32> to vector<16x16xf32>
    %78 = arith.subf %69, %77 : vector<16x16xf32>
    %79 = math.exp %78 : vector<16x16xf32>
    %c1_41 = arith.constant 1 : index
    %c0_42 = arith.constant 0 : index
    %c0_43 = arith.constant 0 : index
    %80 = vector.load %arg7[%c1_41, %c0_42, %c0_43] : memref<4x16x1xf32, #tpu.memory_space<vmem>>, vector<1x16x1xf32>
    %81 = vector.shape_cast %80 : vector<1x16x1xf32> to vector<16x1xf32>
    %82 = arith.mulf %76, %81 : vector<16x1xf32>
    %cst_44 = arith.constant dense<0.000000e+00> : vector<16xf32>
    %83 = vector.multi_reduction <add>, %79, %cst_44 [1] : vector<16x16xf32> to vector<16xf32>
    %84 = vector.shape_cast %83 : vector<16xf32> to vector<16x1xf32>
    %85 = arith.addf %82, %84 : vector<16x1xf32>
    %c1_45 = arith.constant 1 : index
    %c0_46 = arith.constant 0 : index
    %c0_47 = arith.constant 0 : index
    %86 = vector.load %arg7[%c1_45, %c0_46, %c0_47] : memref<4x16x1xf32, #tpu.memory_space<vmem>>, vector<1x16x1xf32>
    %87 = vector.shape_cast %86 : vector<1x16x1xf32> to vector<16x1xf32>
    %88 = vector.shape_cast %85 : vector<16x1xf32> to vector<1x16x1xf32>
    tpu.vector_store %arg7[%c1_45, %c0_46, %c0_47], %88 {strides = array<i32>} : memref<4x16x1xf32, #tpu.memory_space<vmem>>, vector<1x16x1xf32>,
    %c1_48 = arith.constant 1 : index
    %c0_49 = arith.constant 0 : index
    %c0_50 = arith.constant 0 : index
    %89 = vector.load %arg8[%c1_48, %c0_49, %c0_50] : memref<4x16x32xf32, #tpu.memory_space<vmem>>, vector<1x16x32xf32>
    %90 = vector.shape_cast %89 : vector<1x16x32xf32> to vector<16x32xf32>
    %91 = vector.broadcast %76 : vector<16x1xf32> to vector<16x32xf32>
    %92 = arith.mulf %91, %90 : vector<16x32xf32>
    %93 = arith.truncf %79 : vector<16x16xf32> to vector<16x16xbf16>
    %94 = arith.truncf %62 : vector<16x32xf32> to vector<16x32xbf16>
    %cst_51 = arith.constant dense<0.000000e+00> : vector<16x32xf32>
    %95 = tpu.matmul %93, %94, %cst_51 {dimension_numbers = #tpu.dot_dimension_numbers<[1], [0], [0], [1], [0, 0, 1, 1], [], []>} : vector<16x16xbf16>, vector<16x32xbf16>, vector<16x32xf32> -> vector<16x32xf32>
    %96 = arith.addf %92, %95 : vector<16x32xf32>
    %c1_52 = arith.constant 1 : index
    %c0_53 = arith.constant 0 : index
    %c0_54 = arith.constant 0 : index
    %97 = vector.load %arg8[%c1_52, %c0_53, %c0_54] : memref<4x16x32xf32, #tpu.memory_space<vmem>>, vector<1x16x32xf32>
    %98 = vector.shape_cast %97 : vector<1x16x32xf32> to vector<16x32xf32>
    %99 = vector.shape_cast %96 : vector<16x32xf32> to vector<1x16x32xf32>
    tpu.vector_store %arg8[%c1_52, %c0_53, %c0_54], %99 {strides = array<i32>} : memref<4x16x32xf32, #tpu.memory_space<vmem>>, vector<1x16x32xf32>,
    %c1_55 = arith.constant 1 : index
    %c0_56 = arith.constant 0 : index
    %c0_57 = arith.constant 0 : index
    %100 = vector.load %arg6[%c1_55, %c0_56, %c0_57] : memref<4x16x1xf32, #tpu.memory_space<vmem>>, vector<1x16x1xf32>
    %101 = vector.shape_cast %100 : vector<1x16x1xf32> to vector<16x1xf32>
    %102 = vector.shape_cast %74 : vector<16x1xf32> to vector<1x16x1xf32>
    tpu.vector_store %arg6[%c1_55, %c0_56, %c0_57], %102 {strides = array<i32>} : memref<4x16x1xf32, #tpu.memory_space<vmem>>, vector<1x16x1xf32>,
    %103 = vector.extract_strided_slice %12 {offsets = [0, 64], sizes = [16, 32], strides = [1, 1]} : vector<16x128xf32> to vector<16x32xf32>
    %c0_58 = arith.constant 0 : index
    %c0_59 = arith.constant 0 : index
    %c64 = arith.constant 64 : index
    %104 = vector.load %arg4[%c0_58, %c0_59, %c64] : memref<1x16x256xf32, #tpu.memory_space<vmem>>, vector<1x16x32xf32>
    %105 = vector.shape_cast %104 : vector<1x16x32xf32> to vector<16x32xf32>
    %c0_60 = arith.constant 0 : index
    %c0_61 = arith.constant 0 : index
    %c192 = arith.constant 192 : index
    %106 = vector.load %arg4[%c0_60, %c0_61, %c192] : memref<1x16x256xf32, #tpu.memory_space<vmem>>, vector<1x16x32xf32>
    %107 = vector.shape_cast %106 : vector<1x16x32xf32> to vector<16x32xf32>
    %108 = arith.truncf %103 : vector<16x32xf32> to vector<16x32xbf16>
    %109 = arith.truncf %105 : vector<16x32xf32> to vector<16x32xbf16>
    %cst_62 = arith.constant dense<0.000000e+00> : vector<16x16xf32>
    %110 = tpu.matmul %108, %109, %cst_62 {dimension_numbers = #tpu.dot_dimension_numbers<[1], [1], [0], [0], [0, 0, 1, 0], [], []>} : vector<16x32xbf16>, vector<16x32xbf16>, vector<16x16xf32> -> vector<16x16xf32>
    %cst_63 = arith.constant -1.000000e+30 : f32
    %111 = vector.shape_cast %8 : vector<1x16xi1> to vector<1x16xi1>
    %112 = vector.broadcast %111 : vector<1x16xi1> to vector<16x16xi1>
    %113 = vector.broadcast %cst_63 : f32 to vector<16x16xf32>
    %114 = arith.select %112, %110, %113 : vector<16x16xi1>, vector<16x16xf32>
    %c2 = arith.constant 2 : index
    %c0_64 = arith.constant 0 : index
    %c0_65 = arith.constant 0 : index
    %115 = vector.load %arg6[%c2, %c0_64, %c0_65] : memref<4x16x1xf32, #tpu.memory_space<vmem>>, vector<1x16x1xf32>
    %116 = vector.shape_cast %115 : vector<1x16x1xf32> to vector<16x1xf32>
    %cst_66 = arith.constant dense<0xFF800000> : vector<16xf32>
    %117 = vector.multi_reduction <maximumf>, %114, %cst_66 [1] : vector<16x16xf32> to vector<16xf32>
    %118 = vector.shape_cast %117 : vector<16xf32> to vector<16x1xf32>
    %119 = arith.maximumf %116, %118 : vector<16x1xf32>
    %120 = arith.subf %116, %119 : vector<16x1xf32>
    %121 = math.exp %120 : vector<16x1xf32>
    %122 = vector.broadcast %119 : vector<16x1xf32> to vector<16x16xf32>
    %123 = arith.subf %114, %122 : vector<16x16xf32>
    %124 = math.exp %123 : vector<16x16xf32>
    %c2_67 = arith.constant 2 : index
    %c0_68 = arith.constant 0 : index
    %c0_69 = arith.constant 0 : index
    %125 = vector.load %arg7[%c2_67, %c0_68, %c0_69] : memref<4x16x1xf32, #tpu.memory_space<vmem>>, vector<1x16x1xf32>
    %126 = vector.shape_cast %125 : vector<1x16x1xf32> to vector<16x1xf32>
    %127 = arith.mulf %121, %126 : vector<16x1xf32>
    %cst_70 = arith.constant dense<0.000000e+00> : vector<16xf32>
    %128 = vector.multi_reduction <add>, %124, %cst_70 [1] : vector<16x16xf32> to vector<16xf32>
    %129 = vector.shape_cast %128 : vector<16xf32> to vector<16x1xf32>
    %130 = arith.addf %127, %129 : vector<16x1xf32>
    %c2_71 = arith.constant 2 : index
    %c0_72 = arith.constant 0 : index
    %c0_73 = arith.constant 0 : index
    %131 = vector.load %arg7[%c2_71, %c0_72, %c0_73] : memref<4x16x1xf32, #tpu.memory_space<vmem>>, vector<1x16x1xf32>
    %132 = vector.shape_cast %131 : vector<1x16x1xf32> to vector<16x1xf32>
    %133 = vector.shape_cast %130 : vector<16x1xf32> to vector<1x16x1xf32>
    tpu.vector_store %arg7[%c2_71, %c0_72, %c0_73], %133 {strides = array<i32>} : memref<4x16x1xf32, #tpu.memory_space<vmem>>, vector<1x16x1xf32>,
    %c2_74 = arith.constant 2 : index
    %c0_75 = arith.constant 0 : index
    %c0_76 = arith.constant 0 : index
    %134 = vector.load %arg8[%c2_74, %c0_75, %c0_76] : memref<4x16x32xf32, #tpu.memory_space<vmem>>, vector<1x16x32xf32>
    %135 = vector.shape_cast %134 : vector<1x16x32xf32> to vector<16x32xf32>
    %136 = vector.broadcast %121 : vector<16x1xf32> to vector<16x32xf32>
    %137 = arith.mulf %136, %135 : vector<16x32xf32>
    %138 = arith.truncf %124 : vector<16x16xf32> to vector<16x16xbf16>
    %139 = arith.truncf %107 : vector<16x32xf32> to vector<16x32xbf16>
    %cst_77 = arith.constant dense<0.000000e+00> : vector<16x32xf32>
    %140 = tpu.matmul %138, %139, %cst_77 {dimension_numbers = #tpu.dot_dimension_numbers<[1], [0], [0], [1], [0, 0, 1, 1], [], []>} : vector<16x16xbf16>, vector<16x32xbf16>, vector<16x32xf32> -> vector<16x32xf32>
    %141 = arith.addf %137, %140 : vector<16x32xf32>
    %c2_78 = arith.constant 2 : index
    %c0_79 = arith.constant 0 : index
    %c0_80 = arith.constant 0 : index
    %142 = vector.load %arg8[%c2_78, %c0_79, %c0_80] : memref<4x16x32xf32, #tpu.memory_space<vmem>>, vector<1x16x32xf32>
    %143 = vector.shape_cast %142 : vector<1x16x32xf32> to vector<16x32xf32>
    %144 = vector.shape_cast %141 : vector<16x32xf32> to vector<1x16x32xf32>
    tpu.vector_store %arg8[%c2_78, %c0_79, %c0_80], %144 {strides = array<i32>} : memref<4x16x32xf32, #tpu.memory_space<vmem>>, vector<1x16x32xf32>,
    %c2_81 = arith.constant 2 : index
    %c0_82 = arith.constant 0 : index
    %c0_83 = arith.constant 0 : index
    %145 = vector.load %arg6[%c2_81, %c0_82, %c0_83] : memref<4x16x1xf32, #tpu.memory_space<vmem>>, vector<1x16x1xf32>
    %146 = vector.shape_cast %145 : vector<1x16x1xf32> to vector<16x1xf32>
    %147 = vector.shape_cast %119 : vector<16x1xf32> to vector<1x16x1xf32>
    tpu.vector_store %arg6[%c2_81, %c0_82, %c0_83], %147 {strides = array<i32>} : memref<4x16x1xf32, #tpu.memory_space<vmem>>, vector<1x16x1xf32>,
    %148 = vector.extract_strided_slice %12 {offsets = [0, 96], sizes = [16, 32], strides = [1, 1]} : vector<16x128xf32> to vector<16x32xf32>
    %c0_84 = arith.constant 0 : index
    %c0_85 = arith.constant 0 : index
    %c96 = arith.constant 96 : index
    %149 = vector.load %arg4[%c0_84, %c0_85, %c96] : memref<1x16x256xf32, #tpu.memory_space<vmem>>, vector<1x16x32xf32>
    %150 = vector.shape_cast %149 : vector<1x16x32xf32> to vector<16x32xf32>
    %c0_86 = arith.constant 0 : index
    %c0_87 = arith.constant 0 : index
    %c224 = arith.constant 224 : index
    %151 = vector.load %arg4[%c0_86, %c0_87, %c224] : memref<1x16x256xf32, #tpu.memory_space<vmem>>, vector<1x16x32xf32>
    %152 = vector.shape_cast %151 : vector<1x16x32xf32> to vector<16x32xf32>
    %153 = arith.truncf %148 : vector<16x32xf32> to vector<16x32xbf16>
    %154 = arith.truncf %150 : vector<16x32xf32> to vector<16x32xbf16>
    %cst_88 = arith.constant dense<0.000000e+00> : vector<16x16xf32>
    %155 = tpu.matmul %153, %154, %cst_88 {dimension_numbers = #tpu.dot_dimension_numbers<[1], [1], [0], [0], [0, 0, 1, 0], [], []>} : vector<16x32xbf16>, vector<16x32xbf16>, vector<16x16xf32> -> vector<16x16xf32>
    %cst_89 = arith.constant -1.000000e+30 : f32
    %156 = vector.shape_cast %8 : vector<1x16xi1> to vector<1x16xi1>
    %157 = vector.broadcast %156 : vector<1x16xi1> to vector<16x16xi1>
    %158 = vector.broadcast %cst_89 : f32 to vector<16x16xf32>
    %159 = arith.select %157, %155, %158 : vector<16x16xi1>, vector<16x16xf32>
    %c3 = arith.constant 3 : index
    %c0_90 = arith.constant 0 : index
    %c0_91 = arith.constant 0 : index
    %160 = vector.load %arg6[%c3, %c0_90, %c0_91] : memref<4x16x1xf32, #tpu.memory_space<vmem>>, vector<1x16x1xf32>
    %161 = vector.shape_cast %160 : vector<1x16x1xf32> to vector<16x1xf32>
    %cst_92 = arith.constant dense<0xFF800000> : vector<16xf32>
    %162 = vector.multi_reduction <maximumf>, %159, %cst_92 [1] : vector<16x16xf32> to vector<16xf32>
    %163 = vector.shape_cast %162 : vector<16xf32> to vector<16x1xf32>
    %164 = arith.maximumf %161, %163 : vector<16x1xf32>
    %165 = arith.subf %161, %164 : vector<16x1xf32>
    %166 = math.exp %165 : vector<16x1xf32>
    %167 = vector.broadcast %164 : vector<16x1xf32> to vector<16x16xf32>
    %168 = arith.subf %159, %167 : vector<16x16xf32>
    %169 = math.exp %168 : vector<16x16xf32>
    %c3_93 = arith.constant 3 : index
    %c0_94 = arith.constant 0 : index
    %c0_95 = arith.constant 0 : index
    %170 = vector.load %arg7[%c3_93, %c0_94, %c0_95] : memref<4x16x1xf32, #tpu.memory_space<vmem>>, vector<1x16x1xf32>
    %171 = vector.shape_cast %170 : vector<1x16x1xf32> to vector<16x1xf32>
    %172 = arith.mulf %166, %171 : vector<16x1xf32>
    %cst_96 = arith.constant dense<0.000000e+00> : vector<16xf32>
    %173 = vector.multi_reduction <add>, %169, %cst_96 [1] : vector<16x16xf32> to vector<16xf32>
    %174 = vector.shape_cast %173 : vector<16xf32> to vector<16x1xf32>
    %175 = arith.addf %172, %174 : vector<16x1xf32>
    %c3_97 = arith.constant 3 : index
    %c0_98 = arith.constant 0 : index
    %c0_99 = arith.constant 0 : index
    %176 = vector.load %arg7[%c3_97, %c0_98, %c0_99] : memref<4x16x1xf32, #tpu.memory_space<vmem>>, vector<1x16x1xf32>
    %177 = vector.shape_cast %176 : vector<1x16x1xf32> to vector<16x1xf32>
    %178 = vector.shape_cast %175 : vector<16x1xf32> to vector<1x16x1xf32>
    tpu.vector_store %arg7[%c3_97, %c0_98, %c0_99], %178 {strides = array<i32>} : memref<4x16x1xf32, #tpu.memory_space<vmem>>, vector<1x16x1xf32>,
    %c3_100 = arith.constant 3 : index
    %c0_101 = arith.constant 0 : index
    %c0_102 = arith.constant 0 : index
    %179 = vector.load %arg8[%c3_100, %c0_101, %c0_102] : memref<4x16x32xf32, #tpu.memory_space<vmem>>, vector<1x16x32xf32>
    %180 = vector.shape_cast %179 : vector<1x16x32xf32> to vector<16x32xf32>
    %181 = vector.broadcast %166 : vector<16x1xf32> to vector<16x32xf32>
    %182 = arith.mulf %181, %180 : vector<16x32xf32>
    %183 = arith.truncf %169 : vector<16x16xf32> to vector<16x16xbf16>
    %184 = arith.truncf %152 : vector<16x32xf32> to vector<16x32xbf16>
    %cst_103 = arith.constant dense<0.000000e+00> : vector<16x32xf32>
    %185 = tpu.matmul %183, %184, %cst_103 {dimension_numbers = #tpu.dot_dimension_numbers<[1], [0], [0], [1], [0, 0, 1, 1], [], []>} : vector<16x16xbf16>, vector<16x32xbf16>, vector<16x32xf32> -> vector<16x32xf32>
    %186 = arith.addf %182, %185 : vector<16x32xf32>
    %c3_104 = arith.constant 3 : index
    %c0_105 = arith.constant 0 : index
    %c0_106 = arith.constant 0 : index
    %187 = vector.load %arg8[%c3_104, %c0_105, %c0_106] : memref<4x16x32xf32, #tpu.memory_space<vmem>>, vector<1x16x32xf32>
    %188 = vector.shape_cast %187 : vector<1x16x32xf32> to vector<16x32xf32>
    %189 = vector.shape_cast %186 : vector<16x32xf32> to vector<1x16x32xf32>
    tpu.vector_store %arg8[%c3_104, %c0_105, %c0_106], %189 {strides = array<i32>} : memref<4x16x32xf32, #tpu.memory_space<vmem>>, vector<1x16x32xf32>,
    %c3_107 = arith.constant 3 : index
    %c0_108 = arith.constant 0 : index
    %c0_109 = arith.constant 0 : index
    %190 = vector.load %arg6[%c3_107, %c0_108, %c0_109] : memref<4x16x1xf32, #tpu.memory_space<vmem>>, vector<1x16x1xf32>
    %191 = vector.shape_cast %190 : vector<1x16x1xf32> to vector<16x1xf32>
    %192 = vector.shape_cast %164 : vector<16x1xf32> to vector<1x16x1xf32>
    tpu.vector_store %arg6[%c3_107, %c0_108, %c0_109], %192 {strides = array<i32>} : memref<4x16x1xf32, #tpu.memory_space<vmem>>, vector<1x16x1xf32>,
    %c0_i32_110 = arith.constant 0 : i32
    %193 = arith.cmpi eq, %arg2, %c0_i32_110 : i32
    %194 = arith.extui %193 : i1 to i32
    %c0_i32_111 = arith.constant 0 : i32
    %195 = arith.cmpi ne, %194, %c0_i32_111 : i32
    scf.if %195 {
      %c0_112 = arith.constant 0 : index
      %c0_113 = arith.constant 0 : index
      %c0_114 = arith.constant 0 : index
      %196 = vector.load %arg8[%c0_112, %c0_113, %c0_114] : memref<4x16x32xf32, #tpu.memory_space<vmem>>, vector<1x16x32xf32>
      %197 = vector.shape_cast %196 : vector<1x16x32xf32> to vector<16x32xf32>
      %c0_115 = arith.constant 0 : index
      %c0_116 = arith.constant 0 : index
      %c0_117 = arith.constant 0 : index
      %198 = vector.load %arg7[%c0_115, %c0_116, %c0_117] : memref<4x16x1xf32, #tpu.memory_space<vmem>>, vector<1x16x1xf32>
      %199 = vector.shape_cast %198 : vector<1x16x1xf32> to vector<16x1xf32>
      %200 = tpu.reciprocal %199 {approx = true} : vector<16x1xf32> -> vector<16x1xf32>
      %201 = vector.broadcast %200 : vector<16x1xf32> to vector<16x32xf32>
      %202 = arith.mulf %197, %201 : vector<16x32xf32>
      %c1_118 = arith.constant 1 : index
      %c0_119 = arith.constant 0 : index
      %c0_120 = arith.constant 0 : index
      %203 = vector.load %arg8[%c1_118, %c0_119, %c0_120] : memref<4x16x32xf32, #tpu.memory_space<vmem>>, vector<1x16x32xf32>
      %204 = vector.shape_cast %203 : vector<1x16x32xf32> to vector<16x32xf32>
      %c1_121 = arith.constant 1 : index
      %c0_122 = arith.constant 0 : index
      %c0_123 = arith.constant 0 : index
      %205 = vector.load %arg7[%c1_121, %c0_122, %c0_123] : memref<4x16x1xf32, #tpu.memory_space<vmem>>, vector<1x16x1xf32>
      %206 = vector.shape_cast %205 : vector<1x16x1xf32> to vector<16x1xf32>
      %207 = tpu.reciprocal %206 {approx = true} : vector<16x1xf32> -> vector<16x1xf32>
      %208 = vector.broadcast %207 : vector<16x1xf32> to vector<16x32xf32>
      %209 = arith.mulf %204, %208 : vector<16x32xf32>
      %c2_124 = arith.constant 2 : index
      %c0_125 = arith.constant 0 : index
      %c0_126 = arith.constant 0 : index
      %210 = vector.load %arg8[%c2_124, %c0_125, %c0_126] : memref<4x16x32xf32, #tpu.memory_space<vmem>>, vector<1x16x32xf32>
      %211 = vector.shape_cast %210 : vector<1x16x32xf32> to vector<16x32xf32>
      %c2_127 = arith.constant 2 : index
      %c0_128 = arith.constant 0 : index
      %c0_129 = arith.constant 0 : index
      %212 = vector.load %arg7[%c2_127, %c0_128, %c0_129] : memref<4x16x1xf32, #tpu.memory_space<vmem>>, vector<1x16x1xf32>
      %213 = vector.shape_cast %212 : vector<1x16x1xf32> to vector<16x1xf32>
      %214 = tpu.reciprocal %213 {approx = true} : vector<16x1xf32> -> vector<16x1xf32>
      %215 = vector.broadcast %214 : vector<16x1xf32> to vector<16x32xf32>
      %216 = arith.mulf %211, %215 : vector<16x32xf32>
      %c3_130 = arith.constant 3 : index
      %c0_131 = arith.constant 0 : index
      %c0_132 = arith.constant 0 : index
      %217 = vector.load %arg8[%c3_130, %c0_131, %c0_132] : memref<4x16x32xf32, #tpu.memory_space<vmem>>, vector<1x16x32xf32>
      %218 = vector.shape_cast %217 : vector<1x16x32xf32> to vector<16x32xf32>
      %c3_133 = arith.constant 3 : index
      %c0_134 = arith.constant 0 : index
      %c0_135 = arith.constant 0 : index
      %219 = vector.load %arg7[%c3_133, %c0_134, %c0_135] : memref<4x16x1xf32, #tpu.memory_space<vmem>>, vector<1x16x1xf32>
      %220 = vector.shape_cast %219 : vector<1x16x1xf32> to vector<16x1xf32>
      %221 = tpu.reciprocal %220 {approx = true} : vector<16x1xf32> -> vector<16x1xf32>
      %222 = vector.broadcast %221 : vector<16x1xf32> to vector<16x32xf32>
      %223 = arith.mulf %218, %222 : vector<16x32xf32>
      %224 = tpu.concatenate %202, %209, %216, %223 in 1 : vector<16x32xf32>, vector<16x32xf32>, vector<16x32xf32>, vector<16x32xf32> -> vector<16x128xf32>
      %c0_136 = arith.constant 0 : index
      %c0_137 = arith.constant 0 : index
      %c0_138 = arith.constant 0 : index
      %225 = vector.load %arg5[%c0_136, %c0_137, %c0_138] : memref<1x16x128xf32, #tpu.memory_space<vmem>>, vector<1x16x128xf32>
      %226 = vector.shape_cast %225 : vector<1x16x128xf32> to vector<16x128xf32>
      %227 = vector.shape_cast %224 : vector<16x128xf32> to vector<1x16x128xf32>
      tpu.vector_store %arg5[%c0_136, %c0_137, %c0_138], %227 {strides = array<i32>} : memref<1x16x128xf32, #tpu.memory_space<vmem>>, vector<1x16x128xf32>,
    } else {
    }
    return
  }
  func.func @transform_0(%arg0: i32, %arg1: i32, %arg2: i32) -> (i32, i32, i32) {
    %c0_i32 = arith.constant 0 : i32
    %c0_i32_0 = arith.constant 0 : i32
    return %arg0, %arg1, %c0_i32 : i32, i32, i32
  }
  func.func @transform_1(%arg0: i32, %arg1: i32, %arg2: i32) -> (i32, i32, i32) {
    %c0_i32 = arith.constant 0 : i32
    %c0_i32_0 = arith.constant 0 : i32
    return %arg0, %arg2, %c0_i32 : i32, i32, i32
  }
  func.func @transform_2(%arg0: i32, %arg1: i32, %arg2: i32) -> (i32, i32, i32) {
    %c0_i32 = arith.constant 0 : i32
    %c0_i32_0 = arith.constant 0 : i32
    return %arg0, %arg1, %c0_i32 : i32, i32, i32
  }
}

module attributes {stable_mosaic.version = 11 : i64} {
  func.func @_fused_linear_kernel(%arg0: i32, %arg1: memref<32x128xf32, #tpu.memory_space<vmem>>, %arg2: memref<128x128xbf16, #tpu.memory_space<vmem>>, %arg3: memref<1x128xf32, #tpu.memory_space<vmem>>, %arg4: memref<32x128xf32, #tpu.memory_space<vmem>>, %arg5: memref<1x128xf32, #tpu.memory_space<vmem>>, %arg6: memref<1x128xf32, #tpu.memory_space<vmem>>, %arg7: memref<32x128xf32, #tpu.memory_space<vmem>>) attributes {dimension_semantics = [#tpu.dimension_semantics<parallel>], iteration_bounds = array<i64: 1>, scalar_prefetch = 0 : i64, scratch_operands = 0 : i64, tpu.core_type = #tpu.core_type<tc>, window_params = [{transform_indices = @transform_0, window_bounds = array<i64: 32, 128>}, {pipeline_mode = #tpu.pipeline_mode<synchronous>, transform_indices = @transform_1, window_bounds = array<i64: 128, 128>}, {pipeline_mode = #tpu.pipeline_mode<synchronous>, transform_indices = @transform_2, window_bounds = array<i64: 1, 128>}, {transform_indices = @transform_3, window_bounds = array<i64: 32, 128>}, {pipeline_mode = #tpu.pipeline_mode<synchronous>, transform_indices = @transform_4, window_bounds = array<i64: 1, 128>}, {pipeline_mode = #tpu.pipeline_mode<synchronous>, transform_indices = @transform_5, window_bounds = array<i64: 1, 128>}, {transform_indices = @transform_6, window_bounds = array<i64: 32, 128>}]} {
    %c0 = arith.constant 0 : index
    %c0_0 = arith.constant 0 : index
    %0 = vector.load %arg1[%c0, %c0_0] : memref<32x128xf32, #tpu.memory_space<vmem>>, vector<32x128xf32>
    %1 = arith.truncf %0 : vector<32x128xf32> to vector<32x128xbf16>
    %c0_1 = arith.constant 0 : index
    %c0_2 = arith.constant 0 : index
    %2 = vector.load %arg2[%c0_1, %c0_2] : memref<128x128xbf16, #tpu.memory_space<vmem>>, vector<128x128xbf16>
    %cst = arith.constant dense<0.000000e+00> : vector<32x128xf32>
    %3 = tpu.matmul %1, %2, %cst {dimension_numbers = #tpu.dot_dimension_numbers<[1], [0], [0], [1], [0, 0, 1, 1], [], []>} : vector<32x128xbf16>, vector<128x128xbf16>, vector<32x128xf32> -> vector<32x128xf32>
    %c0_3 = arith.constant 0 : index
    %c0_4 = arith.constant 0 : index
    %4 = vector.load %arg3[%c0_3, %c0_4] : memref<1x128xf32, #tpu.memory_space<vmem>>, vector<1x128xf32>
    %5 = vector.broadcast %4 : vector<1x128xf32> to vector<32x128xf32>
    %6 = arith.addf %3, %5 : vector<32x128xf32>
    %c0_5 = arith.constant 0 : index
    %c0_6 = arith.constant 0 : index
    %7 = vector.load %arg4[%c0_5, %c0_6] : memref<32x128xf32, #tpu.memory_space<vmem>>, vector<32x128xf32>
    %cst_7 = arith.constant 1.000000e+00 : f32
    %8 = vector.broadcast %cst_7 : f32 to vector<32x128xf32>
    %9 = arith.mulf %8, %6 : vector<32x128xf32>
    %10 = arith.addf %7, %9 : vector<32x128xf32>
    %cst_8 = arith.constant dense<0.000000e+00> : vector<32xf32>
    %11 = vector.multi_reduction <add>, %10, %cst_8 [1] : vector<32x128xf32> to vector<32xf32>
    %12 = vector.shape_cast %11 : vector<32xf32> to vector<32x1xf32>
    %cst_9 = arith.constant 1.280000e+02 : f32
    %13 = vector.broadcast %cst_9 : f32 to vector<32x1xf32>
    %14 = arith.divf %12, %13 : vector<32x1xf32>
    %15 = vector.broadcast %14 : vector<32x1xf32> to vector<32x128xf32>
    %16 = arith.subf %10, %15 : vector<32x128xf32>
    %17 = arith.mulf %16, %16 : vector<32x128xf32>
    %cst_10 = arith.constant dense<0.000000e+00> : vector<32xf32>
    %18 = vector.multi_reduction <add>, %17, %cst_10 [1] : vector<32x128xf32> to vector<32xf32>
    %19 = vector.shape_cast %18 : vector<32xf32> to vector<32x1xf32>
    %cst_11 = arith.constant 1.280000e+02 : f32
    %20 = vector.broadcast %cst_11 : f32 to vector<32x1xf32>
    %21 = arith.divf %19, %20 : vector<32x1xf32>
    %cst_12 = arith.constant 9.99999974E-6 : f32
    %22 = vector.broadcast %cst_12 : f32 to vector<32x1xf32>
    %23 = arith.addf %21, %22 : vector<32x1xf32>
    %24 = math.rsqrt %23 : vector<32x1xf32>
    %25 = vector.broadcast %24 : vector<32x1xf32> to vector<32x128xf32>
    %26 = arith.mulf %16, %25 : vector<32x128xf32>
    %c0_13 = arith.constant 0 : index
    %c0_14 = arith.constant 0 : index
    %27 = vector.load %arg5[%c0_13, %c0_14] : memref<1x128xf32, #tpu.memory_space<vmem>>, vector<1x128xf32>
    %28 = vector.broadcast %27 : vector<1x128xf32> to vector<32x128xf32>
    %29 = arith.mulf %26, %28 : vector<32x128xf32>
    %c0_15 = arith.constant 0 : index
    %c0_16 = arith.constant 0 : index
    %30 = vector.load %arg6[%c0_15, %c0_16] : memref<1x128xf32, #tpu.memory_space<vmem>>, vector<1x128xf32>
    %31 = vector.broadcast %30 : vector<1x128xf32> to vector<32x128xf32>
    %32 = arith.addf %29, %31 : vector<32x128xf32>
    %c0_17 = arith.constant 0 : index
    %c0_18 = arith.constant 0 : index
    %33 = vector.load %arg7[%c0_17, %c0_18] : memref<32x128xf32, #tpu.memory_space<vmem>>, vector<32x128xf32>
    tpu.vector_store %arg7[%c0_17, %c0_18], %32 {strides = array<i32>} : memref<32x128xf32, #tpu.memory_space<vmem>>, vector<32x128xf32>,
    return
  }
  func.func @transform_0(%arg0: i32) -> (i32, i32) {
    %c0_i32 = arith.constant 0 : i32
    %c0_i32_0 = arith.constant 0 : i32
    return %arg0, %c0_i32 : i32, i32
  }
  func.func @transform_1(%arg0: i32) -> (i32, i32) {
    %c0_i32 = arith.constant 0 : i32
    %c0_i32_0 = arith.constant 0 : i32
    %c0_i32_1 = arith.constant 0 : i32
    return %c0_i32, %c0_i32_0 : i32, i32
  }
  func.func @transform_2(%arg0: i32) -> (i32, i32) {
    %c0_i32 = arith.constant 0 : i32
    %c0_i32_0 = arith.constant 0 : i32
    %c0_i32_1 = arith.constant 0 : i32
    return %c0_i32, %c0_i32_0 : i32, i32
  }
  func.func @transform_3(%arg0: i32) -> (i32, i32) {
    %c0_i32 = arith.constant 0 : i32
    %c0_i32_0 = arith.constant 0 : i32
    return %arg0, %c0_i32 : i32, i32
  }
  func.func @transform_4(%arg0: i32) -> (i32, i32) {
    %c0_i32 = arith.constant 0 : i32
    %c0_i32_0 = arith.constant 0 : i32
    %c0_i32_1 = arith.constant 0 : i32
    return %c0_i32, %c0_i32_0 : i32, i32
  }
  func.func @transform_5(%arg0: i32) -> (i32, i32) {
    %c0_i32 = arith.constant 0 : i32
    %c0_i32_0 = arith.constant 0 : i32
    %c0_i32_1 = arith.constant 0 : i32
    return %c0_i32, %c0_i32_0 : i32, i32
  }
  func.func @transform_6(%arg0: i32) -> (i32, i32) {
    %c0_i32 = arith.constant 0 : i32
    %c0_i32_0 = arith.constant 0 : i32
    return %arg0, %c0_i32 : i32, i32
  }
}

module attributes {stable_mosaic.version = 11 : i64} {
  func.func @_fused_linear_kernel(%arg0: i32, %arg1: memref<32x128xf32, #tpu.memory_space<vmem>>, %arg2: memref<128x512xbf16, #tpu.memory_space<vmem>>, %arg3: memref<1x512xf32, #tpu.memory_space<vmem>>, %arg4: memref<1x128xf32, #tpu.memory_space<vmem>>, %arg5: memref<1x128xf32, #tpu.memory_space<vmem>>, %arg6: memref<32x512xf32, #tpu.memory_space<vmem>>) attributes {dimension_semantics = [#tpu.dimension_semantics<parallel>], iteration_bounds = array<i64: 1>, scalar_prefetch = 0 : i64, scratch_operands = 0 : i64, tpu.core_type = #tpu.core_type<tc>, window_params = [{transform_indices = @transform_0, window_bounds = array<i64: 32, 128>}, {pipeline_mode = #tpu.pipeline_mode<synchronous>, transform_indices = @transform_1, window_bounds = array<i64: 128, 512>}, {pipeline_mode = #tpu.pipeline_mode<synchronous>, transform_indices = @transform_2, window_bounds = array<i64: 1, 512>}, {pipeline_mode = #tpu.pipeline_mode<synchronous>, transform_indices = @transform_3, window_bounds = array<i64: 1, 128>}, {pipeline_mode = #tpu.pipeline_mode<synchronous>, transform_indices = @transform_4, window_bounds = array<i64: 1, 128>}, {transform_indices = @transform_5, window_bounds = array<i64: 32, 512>}]} {
    %c0 = arith.constant 0 : index
    %c0_0 = arith.constant 0 : index
    %0 = vector.load %arg1[%c0, %c0_0] : memref<32x128xf32, #tpu.memory_space<vmem>>, vector<32x128xf32>
    %c0_1 = arith.constant 0 : index
    %c0_2 = arith.constant 0 : index
    %1 = vector.load %arg4[%c0_1, %c0_2] : memref<1x128xf32, #tpu.memory_space<vmem>>, vector<1x128xf32>
    %2 = vector.broadcast %1 : vector<1x128xf32> to vector<32x128xf32>
    %3 = arith.mulf %0, %2 : vector<32x128xf32>
    %c0_3 = arith.constant 0 : index
    %c0_4 = arith.constant 0 : index
    %4 = vector.load %arg5[%c0_3, %c0_4] : memref<1x128xf32, #tpu.memory_space<vmem>>, vector<1x128xf32>
    %5 = vector.broadcast %4 : vector<1x128xf32> to vector<32x128xf32>
    %6 = arith.addf %3, %5 : vector<32x128xf32>
    %7 = arith.truncf %6 : vector<32x128xf32> to vector<32x128xbf16>
    %c0_5 = arith.constant 0 : index
    %c0_6 = arith.constant 0 : index
    %8 = vector.load %arg2[%c0_5, %c0_6] : memref<128x512xbf16, #tpu.memory_space<vmem>>, vector<128x512xbf16>
    %cst = arith.constant dense<0.000000e+00> : vector<32x512xf32>
    %9 = tpu.matmul %7, %8, %cst {dimension_numbers = #tpu.dot_dimension_numbers<[1], [0], [0], [1], [0, 0, 1, 1], [], []>} : vector<32x128xbf16>, vector<128x512xbf16>, vector<32x512xf32> -> vector<32x512xf32>
    %c0_7 = arith.constant 0 : index
    %c0_8 = arith.constant 0 : index
    %10 = vector.load %arg3[%c0_7, %c0_8] : memref<1x512xf32, #tpu.memory_space<vmem>>, vector<1x512xf32>
    %11 = vector.broadcast %10 : vector<1x512xf32> to vector<32x512xf32>
    %12 = arith.addf %9, %11 : vector<32x512xf32>
    %13 = arith.negf %12 : vector<32x512xf32>
    %14 = math.exp %13 : vector<32x512xf32>
    %cst_9 = arith.constant 1.000000e+00 : f32
    %15 = vector.broadcast %cst_9 : f32 to vector<32x512xf32>
    %16 = arith.addf %15, %14 : vector<32x512xf32>
    %17 = arith.divf %15, %16 : vector<32x512xf32>
    %18 = arith.mulf %12, %17 : vector<32x512xf32>
    %c0_10 = arith.constant 0 : index
    %c0_11 = arith.constant 0 : index
    %19 = vector.load %arg6[%c0_10, %c0_11] : memref<32x512xf32, #tpu.memory_space<vmem>>, vector<32x512xf32>
    tpu.vector_store %arg6[%c0_10, %c0_11], %18 {strides = array<i32>} : memref<32x512xf32, #tpu.memory_space<vmem>>, vector<32x512xf32>,
    return
  }
  func.func @transform_0(%arg0: i32) -> (i32, i32) {
    %c0_i32 = arith.constant 0 : i32
    %c0_i32_0 = arith.constant 0 : i32
    return %arg0, %c0_i32 : i32, i32
  }
  func.func @transform_1(%arg0: i32) -> (i32, i32) {
    %c0_i32 = arith.constant 0 : i32
    %c0_i32_0 = arith.constant 0 : i32
    %c0_i32_1 = arith.constant 0 : i32
    return %c0_i32, %c0_i32_0 : i32, i32
  }
  func.func @transform_2(%arg0: i32) -> (i32, i32) {
    %c0_i32 = arith.constant 0 : i32
    %c0_i32_0 = arith.constant 0 : i32
    %c0_i32_1 = arith.constant 0 : i32
    return %c0_i32, %c0_i32_0 : i32, i32
  }
  func.func @transform_3(%arg0: i32) -> (i32, i32) {
    %c0_i32 = arith.constant 0 : i32
    %c0_i32_0 = arith.constant 0 : i32
    %c0_i32_1 = arith.constant 0 : i32
    return %c0_i32, %c0_i32_0 : i32, i32
  }
  func.func @transform_4(%arg0: i32) -> (i32, i32) {
    %c0_i32 = arith.constant 0 : i32
    %c0_i32_0 = arith.constant 0 : i32
    %c0_i32_1 = arith.constant 0 : i32
    return %c0_i32, %c0_i32_0 : i32, i32
  }
  func.func @transform_5(%arg0: i32) -> (i32, i32) {
    %c0_i32 = arith.constant 0 : i32
    %c0_i32_0 = arith.constant 0 : i32
    return %arg0, %c0_i32 : i32, i32
  }
}

module attributes {stable_mosaic.version = 11 : i64} {
  func.func @_fused_linear_kernel(%arg0: i32, %arg1: memref<32x128xf32, #tpu.memory_space<vmem>>, %arg2: memref<128x256xbf16, #tpu.memory_space<vmem>>, %arg3: memref<1x256xf32, #tpu.memory_space<vmem>>, %arg4: memref<1x128xf32, #tpu.memory_space<vmem>>, %arg5: memref<1x128xf32, #tpu.memory_space<vmem>>, %arg6: memref<32x256xf32, #tpu.memory_space<vmem>>) attributes {dimension_semantics = [#tpu.dimension_semantics<parallel>], iteration_bounds = array<i64: 1>, scalar_prefetch = 0 : i64, scratch_operands = 0 : i64, tpu.core_type = #tpu.core_type<tc>, window_params = [{transform_indices = @transform_0, window_bounds = array<i64: 32, 128>}, {pipeline_mode = #tpu.pipeline_mode<synchronous>, transform_indices = @transform_1, window_bounds = array<i64: 128, 256>}, {pipeline_mode = #tpu.pipeline_mode<synchronous>, transform_indices = @transform_2, window_bounds = array<i64: 1, 256>}, {pipeline_mode = #tpu.pipeline_mode<synchronous>, transform_indices = @transform_3, window_bounds = array<i64: 1, 128>}, {pipeline_mode = #tpu.pipeline_mode<synchronous>, transform_indices = @transform_4, window_bounds = array<i64: 1, 128>}, {transform_indices = @transform_5, window_bounds = array<i64: 32, 256>}]} {
    %c0 = arith.constant 0 : index
    %c0_0 = arith.constant 0 : index
    %0 = vector.load %arg1[%c0, %c0_0] : memref<32x128xf32, #tpu.memory_space<vmem>>, vector<32x128xf32>
    %c0_1 = arith.constant 0 : index
    %c0_2 = arith.constant 0 : index
    %1 = vector.load %arg4[%c0_1, %c0_2] : memref<1x128xf32, #tpu.memory_space<vmem>>, vector<1x128xf32>
    %2 = vector.broadcast %1 : vector<1x128xf32> to vector<32x128xf32>
    %3 = arith.mulf %0, %2 : vector<32x128xf32>
    %c0_3 = arith.constant 0 : index
    %c0_4 = arith.constant 0 : index
    %4 = vector.load %arg5[%c0_3, %c0_4] : memref<1x128xf32, #tpu.memory_space<vmem>>, vector<1x128xf32>
    %5 = vector.broadcast %4 : vector<1x128xf32> to vector<32x128xf32>
    %6 = arith.addf %3, %5 : vector<32x128xf32>
    %7 = arith.truncf %6 : vector<32x128xf32> to vector<32x128xbf16>
    %c0_5 = arith.constant 0 : index
    %c0_6 = arith.constant 0 : index
    %8 = vector.load %arg2[%c0_5, %c0_6] : memref<128x256xbf16, #tpu.memory_space<vmem>>, vector<128x256xbf16>
    %cst = arith.constant dense<0.000000e+00> : vector<32x256xf32>
    %9 = tpu.matmul %7, %8, %cst {dimension_numbers = #tpu.dot_dimension_numbers<[1], [0], [0], [1], [0, 0, 1, 1], [], []>} : vector<32x128xbf16>, vector<128x256xbf16>, vector<32x256xf32> -> vector<32x256xf32>
    %c0_7 = arith.constant 0 : index
    %c0_8 = arith.constant 0 : index
    %10 = vector.load %arg3[%c0_7, %c0_8] : memref<1x256xf32, #tpu.memory_space<vmem>>, vector<1x256xf32>
    %11 = vector.broadcast %10 : vector<1x256xf32> to vector<32x256xf32>
    %12 = arith.addf %9, %11 : vector<32x256xf32>
    %13 = arith.negf %12 : vector<32x256xf32>
    %14 = math.exp %13 : vector<32x256xf32>
    %cst_9 = arith.constant 1.000000e+00 : f32
    %15 = vector.broadcast %cst_9 : f32 to vector<32x256xf32>
    %16 = arith.addf %15, %14 : vector<32x256xf32>
    %17 = arith.divf %15, %16 : vector<32x256xf32>
    %18 = arith.mulf %12, %17 : vector<32x256xf32>
    %c0_10 = arith.constant 0 : index
    %c0_11 = arith.constant 0 : index
    %19 = vector.load %arg6[%c0_10, %c0_11] : memref<32x256xf32, #tpu.memory_space<vmem>>, vector<32x256xf32>
    tpu.vector_store %arg6[%c0_10, %c0_11], %18 {strides = array<i32>} : memref<32x256xf32, #tpu.memory_space<vmem>>, vector<32x256xf32>,
    return
  }
  func.func @transform_0(%arg0: i32) -> (i32, i32) {
    %c0_i32 = arith.constant 0 : i32
    %c0_i32_0 = arith.constant 0 : i32
    return %arg0, %c0_i32 : i32, i32
  }
  func.func @transform_1(%arg0: i32) -> (i32, i32) {
    %c0_i32 = arith.constant 0 : i32
    %c0_i32_0 = arith.constant 0 : i32
    %c0_i32_1 = arith.constant 0 : i32
    return %c0_i32, %c0_i32_0 : i32, i32
  }
  func.func @transform_2(%arg0: i32) -> (i32, i32) {
    %c0_i32 = arith.constant 0 : i32
    %c0_i32_0 = arith.constant 0 : i32
    %c0_i32_1 = arith.constant 0 : i32
    return %c0_i32, %c0_i32_0 : i32, i32
  }
  func.func @transform_3(%arg0: i32) -> (i32, i32) {
    %c0_i32 = arith.constant 0 : i32
    %c0_i32_0 = arith.constant 0 : i32
    %c0_i32_1 = arith.constant 0 : i32
    return %c0_i32, %c0_i32_0 : i32, i32
  }
  func.func @transform_4(%arg0: i32) -> (i32, i32) {
    %c0_i32 = arith.constant 0 : i32
    %c0_i32_0 = arith.constant 0 : i32
    %c0_i32_1 = arith.constant 0 : i32
    return %c0_i32, %c0_i32_0 : i32, i32
  }
  func.func @transform_5(%arg0: i32) -> (i32, i32) {
    %c0_i32 = arith.constant 0 : i32
    %c0_i32_0 = arith.constant 0 : i32
    return %arg0, %c0_i32 : i32, i32
  }
}

module attributes {stable_mosaic.version = 11 : i64} {
  func.func @_dwconv1d_kernel(%arg0: i32, %arg1: i32, %arg2: memref<1x22x256xf32, #tpu.memory_space<vmem>>, %arg3: memref<7x256xf32, #tpu.memory_space<vmem>>, %arg4: memref<1x256xf32, #tpu.memory_space<vmem>>, %arg5: memref<1x256xf32, #tpu.memory_space<vmem>>, %arg6: memref<1x256xf32, #tpu.memory_space<vmem>>, %arg7: memref<1x16x256xf32, #tpu.memory_space<vmem>>) attributes {dimension_semantics = [#tpu.dimension_semantics<parallel>, #tpu.dimension_semantics<parallel>], iteration_bounds = array<i64: 2, 1>, scalar_prefetch = 0 : i64, scratch_operands = 0 : i64, tpu.core_type = #tpu.core_type<tc>, window_params = [{transform_indices = @transform_0, window_bounds = array<i64: 1, 22, 256>}, {transform_indices = @transform_1, window_bounds = array<i64: 7, 256>}, {transform_indices = @transform_2, window_bounds = array<i64: 1, 256>}, {transform_indices = @transform_3, window_bounds = array<i64: 1, 256>}, {transform_indices = @transform_4, window_bounds = array<i64: 1, 256>}, {transform_indices = @transform_5, window_bounds = array<i64: 1, 16, 256>}]} {
    %c0 = arith.constant 0 : index
    %c0_0 = arith.constant 0 : index
    %0 = vector.load %arg3[%c0, %c0_0] : memref<7x256xf32, #tpu.memory_space<vmem>>, vector<7x256xf32>
    %cst = arith.constant 0.000000e+00 : f32
    %1 = vector.broadcast %cst : f32 to vector<16x256xf32>
    %c0_1 = arith.constant 0 : index
    %c0_2 = arith.constant 0 : index
    %c0_3 = arith.constant 0 : index
    %2 = vector.load %arg2[%c0_1, %c0_2, %c0_3] : memref<1x22x256xf32, #tpu.memory_space<vmem>>, vector<1x16x256xf32>
    %3 = vector.shape_cast %2 : vector<1x16x256xf32> to vector<16x256xf32>
    %4 = vector.extract_strided_slice %0 {offsets = [0, 0], sizes = [1, 256], strides = [1, 1]} : vector<7x256xf32> to vector<1x256xf32>
    %5 = vector.broadcast %4 : vector<1x256xf32> to vector<16x256xf32>
    %6 = arith.mulf %3, %5 : vector<16x256xf32>
    %7 = arith.addf %1, %6 : vector<16x256xf32>
    %c0_4 = arith.constant 0 : index
    %c1 = arith.constant 1 : index
    %c0_5 = arith.constant 0 : index
    %8 = vector.load %arg2[%c0_4, %c1, %c0_5] : memref<1x22x256xf32, #tpu.memory_space<vmem>>, vector<1x16x256xf32>
    %9 = vector.shape_cast %8 : vector<1x16x256xf32> to vector<16x256xf32>
    %10 = vector.extract_strided_slice %0 {offsets = [1, 0], sizes = [1, 256], strides = [1, 1]} : vector<7x256xf32> to vector<1x256xf32>
    %11 = vector.broadcast %10 : vector<1x256xf32> to vector<16x256xf32>
    %12 = arith.mulf %9, %11 : vector<16x256xf32>
    %13 = arith.addf %7, %12 : vector<16x256xf32>
    %c0_6 = arith.constant 0 : index
    %c2 = arith.constant 2 : index
    %c0_7 = arith.constant 0 : index
    %14 = vector.load %arg2[%c0_6, %c2, %c0_7] : memref<1x22x256xf32, #tpu.memory_space<vmem>>, vector<1x16x256xf32>
    %15 = vector.shape_cast %14 : vector<1x16x256xf32> to vector<16x256xf32>
    %16 = vector.extract_strided_slice %0 {offsets = [2, 0], sizes = [1, 256], strides = [1, 1]} : vector<7x256xf32> to vector<1x256xf32>
    %17 = vector.broadcast %16 : vector<1x256xf32> to vector<16x256xf32>
    %18 = arith.mulf %15, %17 : vector<16x256xf32>
    %19 = arith.addf %13, %18 : vector<16x256xf32>
    %c0_8 = arith.constant 0 : index
    %c3 = arith.constant 3 : index
    %c0_9 = arith.constant 0 : index
    %20 = vector.load %arg2[%c0_8, %c3, %c0_9] : memref<1x22x256xf32, #tpu.memory_space<vmem>>, vector<1x16x256xf32>
    %21 = vector.shape_cast %20 : vector<1x16x256xf32> to vector<16x256xf32>
    %22 = vector.extract_strided_slice %0 {offsets = [3, 0], sizes = [1, 256], strides = [1, 1]} : vector<7x256xf32> to vector<1x256xf32>
    %23 = vector.broadcast %22 : vector<1x256xf32> to vector<16x256xf32>
    %24 = arith.mulf %21, %23 : vector<16x256xf32>
    %25 = arith.addf %19, %24 : vector<16x256xf32>
    %c0_10 = arith.constant 0 : index
    %c4 = arith.constant 4 : index
    %c0_11 = arith.constant 0 : index
    %26 = vector.load %arg2[%c0_10, %c4, %c0_11] : memref<1x22x256xf32, #tpu.memory_space<vmem>>, vector<1x16x256xf32>
    %27 = vector.shape_cast %26 : vector<1x16x256xf32> to vector<16x256xf32>
    %28 = vector.extract_strided_slice %0 {offsets = [4, 0], sizes = [1, 256], strides = [1, 1]} : vector<7x256xf32> to vector<1x256xf32>
    %29 = vector.broadcast %28 : vector<1x256xf32> to vector<16x256xf32>
    %30 = arith.mulf %27, %29 : vector<16x256xf32>
    %31 = arith.addf %25, %30 : vector<16x256xf32>
    %c0_12 = arith.constant 0 : index
    %c5 = arith.constant 5 : index
    %c0_13 = arith.constant 0 : index
    %32 = vector.load %arg2[%c0_12, %c5, %c0_13] : memref<1x22x256xf32, #tpu.memory_space<vmem>>, vector<1x16x256xf32>
    %33 = vector.shape_cast %32 : vector<1x16x256xf32> to vector<16x256xf32>
    %34 = vector.extract_strided_slice %0 {offsets = [5, 0], sizes = [1, 256], strides = [1, 1]} : vector<7x256xf32> to vector<1x256xf32>
    %35 = vector.broadcast %34 : vector<1x256xf32> to vector<16x256xf32>
    %36 = arith.mulf %33, %35 : vector<16x256xf32>
    %37 = arith.addf %31, %36 : vector<16x256xf32>
    %c0_14 = arith.constant 0 : index
    %c6 = arith.constant 6 : index
    %c0_15 = arith.constant 0 : index
    %38 = vector.load %arg2[%c0_14, %c6, %c0_15] : memref<1x22x256xf32, #tpu.memory_space<vmem>>, vector<1x16x256xf32>
    %39 = vector.shape_cast %38 : vector<1x16x256xf32> to vector<16x256xf32>
    %40 = vector.extract_strided_slice %0 {offsets = [6, 0], sizes = [1, 256], strides = [1, 1]} : vector<7x256xf32> to vector<1x256xf32>
    %41 = vector.broadcast %40 : vector<1x256xf32> to vector<16x256xf32>
    %42 = arith.mulf %39, %41 : vector<16x256xf32>
    %43 = arith.addf %37, %42 : vector<16x256xf32>
    %c0_16 = arith.constant 0 : index
    %c0_17 = arith.constant 0 : index
    %44 = vector.load %arg4[%c0_16, %c0_17] : memref<1x256xf32, #tpu.memory_space<vmem>>, vector<1x256xf32>
    %45 = vector.broadcast %44 : vector<1x256xf32> to vector<16x256xf32>
    %46 = arith.addf %43, %45 : vector<16x256xf32>
    %c0_18 = arith.constant 0 : index
    %c0_19 = arith.constant 0 : index
    %47 = vector.load %arg5[%c0_18, %c0_19] : memref<1x256xf32, #tpu.memory_space<vmem>>, vector<1x256xf32>
    %48 = vector.broadcast %47 : vector<1x256xf32> to vector<16x256xf32>
    %49 = arith.mulf %46, %48 : vector<16x256xf32>
    %c0_20 = arith.constant 0 : index
    %c0_21 = arith.constant 0 : index
    %50 = vector.load %arg6[%c0_20, %c0_21] : memref<1x256xf32, #tpu.memory_space<vmem>>, vector<1x256xf32>
    %51 = vector.broadcast %50 : vector<1x256xf32> to vector<16x256xf32>
    %52 = arith.addf %49, %51 : vector<16x256xf32>
    %53 = arith.negf %52 : vector<16x256xf32>
    %54 = math.exp %53 : vector<16x256xf32>
    %cst_22 = arith.constant 1.000000e+00 : f32
    %55 = vector.broadcast %cst_22 : f32 to vector<16x256xf32>
    %56 = arith.addf %55, %54 : vector<16x256xf32>
    %57 = arith.divf %55, %56 : vector<16x256xf32>
    %58 = arith.mulf %52, %57 : vector<16x256xf32>
    %c0_23 = arith.constant 0 : index
    %c0_24 = arith.constant 0 : index
    %c0_25 = arith.constant 0 : index
    %59 = vector.load %arg7[%c0_23, %c0_24, %c0_25] : memref<1x16x256xf32, #tpu.memory_space<vmem>>, vector<1x16x256xf32>
    %60 = vector.shape_cast %59 : vector<1x16x256xf32> to vector<16x256xf32>
    %61 = vector.shape_cast %58 : vector<16x256xf32> to vector<1x16x256xf32>
    tpu.vector_store %arg7[%c0_23, %c0_24, %c0_25], %61 {strides = array<i32>} : memref<1x16x256xf32, #tpu.memory_space<vmem>>, vector<1x16x256xf32>,
    return
  }
  func.func @transform_0(%arg0: i32, %arg1: i32) -> (i32, i32, i32) {
    %c0_i32 = arith.constant 0 : i32
    %c0_i32_0 = arith.constant 0 : i32
    return %arg0, %c0_i32, %arg1 : i32, i32, i32
  }
  func.func @transform_1(%arg0: i32, %arg1: i32) -> (i32, i32) {
    %c0_i32 = arith.constant 0 : i32
    %c0_i32_0 = arith.constant 0 : i32
    return %c0_i32, %arg1 : i32, i32
  }
  func.func @transform_2(%arg0: i32, %arg1: i32) -> (i32, i32) {
    %c0_i32 = arith.constant 0 : i32
    %c0_i32_0 = arith.constant 0 : i32
    return %c0_i32, %arg1 : i32, i32
  }
  func.func @transform_3(%arg0: i32, %arg1: i32) -> (i32, i32) {
    %c0_i32 = arith.constant 0 : i32
    %c0_i32_0 = arith.constant 0 : i32
    return %c0_i32, %arg1 : i32, i32
  }
  func.func @transform_4(%arg0: i32, %arg1: i32) -> (i32, i32) {
    %c0_i32 = arith.constant 0 : i32
    %c0_i32_0 = arith.constant 0 : i32
    return %c0_i32, %arg1 : i32, i32
  }
  func.func @transform_5(%arg0: i32, %arg1: i32) -> (i32, i32, i32) {
    %c0_i32 = arith.constant 0 : i32
    %c0_i32_0 = arith.constant 0 : i32
    return %arg0, %c0_i32, %arg1 : i32, i32, i32
  }
}

module attributes {stable_mosaic.version = 11 : i64} {
  func.func @_fused_linear_kernel(%arg0: i32, %arg1: memref<32x256xf32, #tpu.memory_space<vmem>>, %arg2: memref<256x128xbf16, #tpu.memory_space<vmem>>, %arg3: memref<1x128xf32, #tpu.memory_space<vmem>>, %arg4: memref<32x128xf32, #tpu.memory_space<vmem>>, %arg5: memref<1x128xf32, #tpu.memory_space<vmem>>, %arg6: memref<1x128xf32, #tpu.memory_space<vmem>>, %arg7: memref<32x128xf32, #tpu.memory_space<vmem>>) attributes {dimension_semantics = [#tpu.dimension_semantics<parallel>], iteration_bounds = array<i64: 1>, scalar_prefetch = 0 : i64, scratch_operands = 0 : i64, tpu.core_type = #tpu.core_type<tc>, window_params = [{transform_indices = @transform_0, window_bounds = array<i64: 32, 256>}, {pipeline_mode = #tpu.pipeline_mode<synchronous>, transform_indices = @transform_1, window_bounds = array<i64: 256, 128>}, {pipeline_mode = #tpu.pipeline_mode<synchronous>, transform_indices = @transform_2, window_bounds = array<i64: 1, 128>}, {transform_indices = @transform_3, window_bounds = array<i64: 32, 128>}, {pipeline_mode = #tpu.pipeline_mode<synchronous>, transform_indices = @transform_4, window_bounds = array<i64: 1, 128>}, {pipeline_mode = #tpu.pipeline_mode<synchronous>, transform_indices = @transform_5, window_bounds = array<i64: 1, 128>}, {transform_indices = @transform_6, window_bounds = array<i64: 32, 128>}]} {
    %c0 = arith.constant 0 : index
    %c0_0 = arith.constant 0 : index
    %0 = vector.load %arg1[%c0, %c0_0] : memref<32x256xf32, #tpu.memory_space<vmem>>, vector<32x256xf32>
    %1 = arith.truncf %0 : vector<32x256xf32> to vector<32x256xbf16>
    %c0_1 = arith.constant 0 : index
    %c0_2 = arith.constant 0 : index
    %2 = vector.load %arg2[%c0_1, %c0_2] : memref<256x128xbf16, #tpu.memory_space<vmem>>, vector<256x128xbf16>
    %cst = arith.constant dense<0.000000e+00> : vector<32x128xf32>
    %3 = tpu.matmul %1, %2, %cst {dimension_numbers = #tpu.dot_dimension_numbers<[1], [0], [0], [1], [0, 0, 1, 1], [], []>} : vector<32x256xbf16>, vector<256x128xbf16>, vector<32x128xf32> -> vector<32x128xf32>
    %c0_3 = arith.constant 0 : index
    %c0_4 = arith.constant 0 : index
    %4 = vector.load %arg3[%c0_3, %c0_4] : memref<1x128xf32, #tpu.memory_space<vmem>>, vector<1x128xf32>
    %5 = vector.broadcast %4 : vector<1x128xf32> to vector<32x128xf32>
    %6 = arith.addf %3, %5 : vector<32x128xf32>
    %c0_5 = arith.constant 0 : index
    %c0_6 = arith.constant 0 : index
    %7 = vector.load %arg4[%c0_5, %c0_6] : memref<32x128xf32, #tpu.memory_space<vmem>>, vector<32x128xf32>
    %cst_7 = arith.constant 1.000000e+00 : f32
    %8 = vector.broadcast %cst_7 : f32 to vector<32x128xf32>
    %9 = arith.mulf %8, %6 : vector<32x128xf32>
    %10 = arith.addf %7, %9 : vector<32x128xf32>
    %cst_8 = arith.constant dense<0.000000e+00> : vector<32xf32>
    %11 = vector.multi_reduction <add>, %10, %cst_8 [1] : vector<32x128xf32> to vector<32xf32>
    %12 = vector.shape_cast %11 : vector<32xf32> to vector<32x1xf32>
    %cst_9 = arith.constant 1.280000e+02 : f32
    %13 = vector.broadcast %cst_9 : f32 to vector<32x1xf32>
    %14 = arith.divf %12, %13 : vector<32x1xf32>
    %15 = vector.broadcast %14 : vector<32x1xf32> to vector<32x128xf32>
    %16 = arith.subf %10, %15 : vector<32x128xf32>
    %17 = arith.mulf %16, %16 : vector<32x128xf32>
    %cst_10 = arith.constant dense<0.000000e+00> : vector<32xf32>
    %18 = vector.multi_reduction <add>, %17, %cst_10 [1] : vector<32x128xf32> to vector<32xf32>
    %19 = vector.shape_cast %18 : vector<32xf32> to vector<32x1xf32>
    %cst_11 = arith.constant 1.280000e+02 : f32
    %20 = vector.broadcast %cst_11 : f32 to vector<32x1xf32>
    %21 = arith.divf %19, %20 : vector<32x1xf32>
    %cst_12 = arith.constant 9.99999974E-6 : f32
    %22 = vector.broadcast %cst_12 : f32 to vector<32x1xf32>
    %23 = arith.addf %21, %22 : vector<32x1xf32>
    %24 = math.rsqrt %23 : vector<32x1xf32>
    %25 = vector.broadcast %24 : vector<32x1xf32> to vector<32x128xf32>
    %26 = arith.mulf %16, %25 : vector<32x128xf32>
    %c0_13 = arith.constant 0 : index
    %c0_14 = arith.constant 0 : index
    %27 = vector.load %arg5[%c0_13, %c0_14] : memref<1x128xf32, #tpu.memory_space<vmem>>, vector<1x128xf32>
    %28 = vector.broadcast %27 : vector<1x128xf32> to vector<32x128xf32>
    %29 = arith.mulf %26, %28 : vector<32x128xf32>
    %c0_15 = arith.constant 0 : index
    %c0_16 = arith.constant 0 : index
    %30 = vector.load %arg6[%c0_15, %c0_16] : memref<1x128xf32, #tpu.memory_space<vmem>>, vector<1x128xf32>
    %31 = vector.broadcast %30 : vector<1x128xf32> to vector<32x128xf32>
    %32 = arith.addf %29, %31 : vector<32x128xf32>
    %c0_17 = arith.constant 0 : index
    %c0_18 = arith.constant 0 : index
    %33 = vector.load %arg7[%c0_17, %c0_18] : memref<32x128xf32, #tpu.memory_space<vmem>>, vector<32x128xf32>
    tpu.vector_store %arg7[%c0_17, %c0_18], %32 {strides = array<i32>} : memref<32x128xf32, #tpu.memory_space<vmem>>, vector<32x128xf32>,
    return
  }
  func.func @transform_0(%arg0: i32) -> (i32, i32) {
    %c0_i32 = arith.constant 0 : i32
    %c0_i32_0 = arith.constant 0 : i32
    return %arg0, %c0_i32 : i32, i32
  }
  func.func @transform_1(%arg0: i32) -> (i32, i32) {
    %c0_i32 = arith.constant 0 : i32
    %c0_i32_0 = arith.constant 0 : i32
    %c0_i32_1 = arith.constant 0 : i32
    return %c0_i32, %c0_i32_0 : i32, i32
  }
  func.func @transform_2(%arg0: i32) -> (i32, i32) {
    %c0_i32 = arith.constant 0 : i32
    %c0_i32_0 = arith.constant 0 : i32
    %c0_i32_1 = arith.constant 0 : i32
    return %c0_i32, %c0_i32_0 : i32, i32
  }
  func.func @transform_3(%arg0: i32) -> (i32, i32) {
    %c0_i32 = arith.constant 0 : i32
    %c0_i32_0 = arith.constant 0 : i32
    return %arg0, %c0_i32 : i32, i32
  }
  func.func @transform_4(%arg0: i32) -> (i32, i32) {
    %c0_i32 = arith.constant 0 : i32
    %c0_i32_0 = arith.constant 0 : i32
    %c0_i32_1 = arith.constant 0 : i32
    return %c0_i32, %c0_i32_0 : i32, i32
  }
  func.func @transform_5(%arg0: i32) -> (i32, i32) {
    %c0_i32 = arith.constant 0 : i32
    %c0_i32_0 = arith.constant 0 : i32
    %c0_i32_1 = arith.constant 0 : i32
    return %c0_i32, %c0_i32_0 : i32, i32
  }
  func.func @transform_6(%arg0: i32) -> (i32, i32) {
    %c0_i32 = arith.constant 0 : i32
    %c0_i32_0 = arith.constant 0 : i32
    return %arg0, %c0_i32 : i32, i32
  }
}

module attributes {stable_mosaic.version = 11 : i64} {
  func.func @_fused_linear_kernel(%arg0: i32, %arg1: memref<32x512xf32, #tpu.memory_space<vmem>>, %arg2: memref<512x128xbf16, #tpu.memory_space<vmem>>, %arg3: memref<1x128xf32, #tpu.memory_space<vmem>>, %arg4: memref<32x128xf32, #tpu.memory_space<vmem>>, %arg5: memref<1x128xf32, #tpu.memory_space<vmem>>, %arg6: memref<1x128xf32, #tpu.memory_space<vmem>>, %arg7: memref<32x128xf32, #tpu.memory_space<vmem>>) attributes {dimension_semantics = [#tpu.dimension_semantics<parallel>], iteration_bounds = array<i64: 1>, scalar_prefetch = 0 : i64, scratch_operands = 0 : i64, tpu.core_type = #tpu.core_type<tc>, window_params = [{transform_indices = @transform_0, window_bounds = array<i64: 32, 512>}, {pipeline_mode = #tpu.pipeline_mode<synchronous>, transform_indices = @transform_1, window_bounds = array<i64: 512, 128>}, {pipeline_mode = #tpu.pipeline_mode<synchronous>, transform_indices = @transform_2, window_bounds = array<i64: 1, 128>}, {transform_indices = @transform_3, window_bounds = array<i64: 32, 128>}, {pipeline_mode = #tpu.pipeline_mode<synchronous>, transform_indices = @transform_4, window_bounds = array<i64: 1, 128>}, {pipeline_mode = #tpu.pipeline_mode<synchronous>, transform_indices = @transform_5, window_bounds = array<i64: 1, 128>}, {transform_indices = @transform_6, window_bounds = array<i64: 32, 128>}]} {
    %c0 = arith.constant 0 : index
    %c0_0 = arith.constant 0 : index
    %0 = vector.load %arg1[%c0, %c0_0] : memref<32x512xf32, #tpu.memory_space<vmem>>, vector<32x512xf32>
    %1 = arith.truncf %0 : vector<32x512xf32> to vector<32x512xbf16>
    %c0_1 = arith.constant 0 : index
    %c0_2 = arith.constant 0 : index
    %2 = vector.load %arg2[%c0_1, %c0_2] : memref<512x128xbf16, #tpu.memory_space<vmem>>, vector<512x128xbf16>
    %cst = arith.constant dense<0.000000e+00> : vector<32x128xf32>
    %3 = tpu.matmul %1, %2, %cst {dimension_numbers = #tpu.dot_dimension_numbers<[1], [0], [0], [1], [0, 0, 1, 1], [], []>} : vector<32x512xbf16>, vector<512x128xbf16>, vector<32x128xf32> -> vector<32x128xf32>
    %c0_3 = arith.constant 0 : index
    %c0_4 = arith.constant 0 : index
    %4 = vector.load %arg3[%c0_3, %c0_4] : memref<1x128xf32, #tpu.memory_space<vmem>>, vector<1x128xf32>
    %5 = vector.broadcast %4 : vector<1x128xf32> to vector<32x128xf32>
    %6 = arith.addf %3, %5 : vector<32x128xf32>
    %c0_5 = arith.constant 0 : index
    %c0_6 = arith.constant 0 : index
    %7 = vector.load %arg4[%c0_5, %c0_6] : memref<32x128xf32, #tpu.memory_space<vmem>>, vector<32x128xf32>
    %cst_7 = arith.constant 1.000000e+00 : f32
    %8 = vector.broadcast %cst_7 : f32 to vector<32x128xf32>
    %9 = arith.mulf %8, %6 : vector<32x128xf32>
    %10 = arith.addf %7, %9 : vector<32x128xf32>
    %cst_8 = arith.constant dense<0.000000e+00> : vector<32xf32>
    %11 = vector.multi_reduction <add>, %10, %cst_8 [1] : vector<32x128xf32> to vector<32xf32>
    %12 = vector.shape_cast %11 : vector<32xf32> to vector<32x1xf32>
    %cst_9 = arith.constant 1.280000e+02 : f32
    %13 = vector.broadcast %cst_9 : f32 to vector<32x1xf32>
    %14 = arith.divf %12, %13 : vector<32x1xf32>
    %15 = vector.broadcast %14 : vector<32x1xf32> to vector<32x128xf32>
    %16 = arith.subf %10, %15 : vector<32x128xf32>
    %17 = arith.mulf %16, %16 : vector<32x128xf32>
    %cst_10 = arith.constant dense<0.000000e+00> : vector<32xf32>
    %18 = vector.multi_reduction <add>, %17, %cst_10 [1] : vector<32x128xf32> to vector<32xf32>
    %19 = vector.shape_cast %18 : vector<32xf32> to vector<32x1xf32>
    %cst_11 = arith.constant 1.280000e+02 : f32
    %20 = vector.broadcast %cst_11 : f32 to vector<32x1xf32>
    %21 = arith.divf %19, %20 : vector<32x1xf32>
    %cst_12 = arith.constant 9.99999974E-6 : f32
    %22 = vector.broadcast %cst_12 : f32 to vector<32x1xf32>
    %23 = arith.addf %21, %22 : vector<32x1xf32>
    %24 = math.rsqrt %23 : vector<32x1xf32>
    %25 = vector.broadcast %24 : vector<32x1xf32> to vector<32x128xf32>
    %26 = arith.mulf %16, %25 : vector<32x128xf32>
    %c0_13 = arith.constant 0 : index
    %c0_14 = arith.constant 0 : index
    %27 = vector.load %arg5[%c0_13, %c0_14] : memref<1x128xf32, #tpu.memory_space<vmem>>, vector<1x128xf32>
    %28 = vector.broadcast %27 : vector<1x128xf32> to vector<32x128xf32>
    %29 = arith.mulf %26, %28 : vector<32x128xf32>
    %c0_15 = arith.constant 0 : index
    %c0_16 = arith.constant 0 : index
    %30 = vector.load %arg6[%c0_15, %c0_16] : memref<1x128xf32, #tpu.memory_space<vmem>>, vector<1x128xf32>
    %31 = vector.broadcast %30 : vector<1x128xf32> to vector<32x128xf32>
    %32 = arith.addf %29, %31 : vector<32x128xf32>
    %c0_17 = arith.constant 0 : index
    %c0_18 = arith.constant 0 : index
    %33 = vector.load %arg7[%c0_17, %c0_18] : memref<32x128xf32, #tpu.memory_space<vmem>>, vector<32x128xf32>
    tpu.vector_store %arg7[%c0_17, %c0_18], %32 {strides = array<i32>} : memref<32x128xf32, #tpu.memory_space<vmem>>, vector<32x128xf32>,
    return
  }
  func.func @transform_0(%arg0: i32) -> (i32, i32) {
    %c0_i32 = arith.constant 0 : i32
    %c0_i32_0 = arith.constant 0 : i32
    return %arg0, %c0_i32 : i32, i32
  }
  func.func @transform_1(%arg0: i32) -> (i32, i32) {
    %c0_i32 = arith.constant 0 : i32
    %c0_i32_0 = arith.constant 0 : i32
    %c0_i32_1 = arith.constant 0 : i32
    return %c0_i32, %c0_i32_0 : i32, i32
  }
  func.func @transform_2(%arg0: i32) -> (i32, i32) {
    %c0_i32 = arith.constant 0 : i32
    %c0_i32_0 = arith.constant 0 : i32
    %c0_i32_1 = arith.constant 0 : i32
    return %c0_i32, %c0_i32_0 : i32, i32
  }
  func.func @transform_3(%arg0: i32) -> (i32, i32) {
    %c0_i32 = arith.constant 0 : i32
    %c0_i32_0 = arith.constant 0 : i32
    return %arg0, %c0_i32 : i32, i32
  }
  func.func @transform_4(%arg0: i32) -> (i32, i32) {
    %c0_i32 = arith.constant 0 : i32
    %c0_i32_0 = arith.constant 0 : i32
    %c0_i32_1 = arith.constant 0 : i32
    return %c0_i32, %c0_i32_0 : i32, i32
  }
  func.func @transform_5(%arg0: i32) -> (i32, i32) {
    %c0_i32 = arith.constant 0 : i32
    %c0_i32_0 = arith.constant 0 : i32
    %c0_i32_1 = arith.constant 0 : i32
    return %c0_i32, %c0_i32_0 : i32, i32
  }
  func.func @transform_6(%arg0: i32) -> (i32, i32) {
    %c0_i32 = arith.constant 0 : i32
    %c0_i32_0 = arith.constant 0 : i32
    return %arg0, %c0_i32 : i32, i32
  }
}

</mosaic_0001>

<bundles_post_ra>
// kernel: squeezeformer_encoder.27
= control target key start
LH: loop header
LB: loop body
LE: loop exit
PB: predicated region body
PF: predicated region fallthrough
CT: control target
= control target key end

     0   :  { %s695_s12 = smov 0   ;;  %s843_s0 = inlined_call_operand.vmem [shape: f32[512,9], index: 0, kind: input, shape index: {}]   ;;  %s844_s1 = inlined_call_operand.vmem [shape: bf16[9,128], index: 1, kind: input, shape index: {}]   ;;  %s845_s2 = inlined_call_operand.vmem [shape: f32[1,128], index: 2, kind: input, shape index: {}]   ;;  %s846_s3 = inlined_call_operand.vmem [shape: f32[512,128], index: 3, kind: output, shape index: {}]  }
   0x1 LB: > { %s574_s13 = sadd.s32 4294967295, %s672_s12   ;;  %p578_p0 = scmp.ge.s32.totalorder %s672_s12, 1  ;;  %s672_s12 = sphi %s695_s12, %s13_s12  }
   0x2   : > { %p138_p1 = scmp.lt.s32.totalorder %s672_s12, 3 }
   0x4   : > { %p139_p2 = pnand %p578_p0, %p138_p1 }
   0x5   : > { %s579_s16 = sshll.u32 (!%p139_p2), %s574_s13, 5 }
   0x6   : > { %142 = sbr.rel (%p139_p2) target bundleno = 248 (0xf8), region = 32  ;;  %p163_p3 = scmp.lt.s32.totalorder (!%p139_p2), %s579_s16, 63 }
   0xb   : > { %v665_v0 = vld [vmem:[%s844_s1] sm:$0x1f]   ;;  %vm286_vm0 = vcmask 1043456   ;;  %vm287_vm1 = vcmask 1044480   ;;  %v674_v1 = vmov 65535   ;;  %s848_s16 = smov (!%p163_p3, %s579_s16), 63 }
   0xc   : > { %v288_v2 = vsel %vm286_vm0, 4294967295, %v674_v1  ;;  %s580_s17 = sshll.u32 %s848_s16, 3  ;;  %vm237_vm2 = vcmask 72704   ;;  %v767_v53 = vld [vmem:[%s845_s2] ss:$0 sm:$0xff] }
   0xd   : > { %v289_v3 = vsel %vm287_vm1, %v288_v2, 0  ;;  %s714_s20 = scalar_lea.vmem %s843_s0, %s580_s17  ;;  %s775_s25 = scalar_lea.vmem %s846_s3, %s580_s17 }
   0xe   : > { %v291_v4 = vand.u32 %v665_v0, %v289_v3  ;;  %v175_v5 = vld [vmem:[%s714_s20] sm:$0xff]  ;;  %v176_v6 = vld [vmem:[%s714_s20 + $0x8] sm:$0xff]  ;;  %v177_v10 = vld [vmem:[%s714_s20 + $0x10] sm:$0xff] }
   0xf   : > { %v191_v7 = vld [vmem:[%s714_s20 + $0x80] sm:$0xff]  ;;  %v207_v8 = vpack.c.bf16 %v176_v6, %v175_v5  ;;  %v192_v9 = vld [vmem:[%s714_s20 + $0x88] sm:$0xff]  ;;  %v178_v11 = vld [vmem:[%s714_s20 + $0x18] sm:$0xff] }
  0x10   : > { %620 = vmatprep.subr.bf16.mxu0 %v291_v4  ;;  %654 = vmatprep.subr.bf16.mxu1 %v291_v4  ;;  %v215_v12 = vpack.c.bf16 %v192_v9, %v191_v7  ;;  %v208_v13 = vpack.c.bf16 %v178_v11, %v177_v10  ;;  %v193_v14 = vld [vmem:[%s714_s20 + $0x90] sm:$0xff]  ;;  %v194_v15 = vld [vmem:[%s714_s20 + $0x98] sm:$0xff]  ;;  %v179_v16 = vld [vmem:[%s714_s20 + $0x20] sm:$0xff] }
  0x11   : > { %621 = vmatpush3.bf16.msra.mxu0 %v291_v4  ;;  %655 = vmatpush3.bf16.msra.mxu1 %v291_v4  ;;  %v216_v17 = vpack.c.bf16 %v194_v15, %v193_v14  ;;  %v180_v18 = vld [vmem:[%s714_s20 + $0x28] sm:$0xff]  ;;  %v195_v19 = vld [vmem:[%s714_s20 + $0xa0] sm:$0xff]  ;;  %v181_v23 = vld [vmem:[%s714_s20 + $0x30] sm:$0xff] }
  0x12   : > { %622 = vmatprep.mubr.msk.bf16.mxu0 %vm237_vm2, %v207_v8  ;;  %v196_v20 = vld [vmem:[%s714_s20 + $0xa8] sm:$0xff]  ;;  %638 = vmatprep.mubr.msk.bf16.mxu1 %vm237_vm2, %v215_v12  ;;  %v209_v21 = vpack.c.bf16 %v180_v18, %v179_v16  ;;  %v182_v24 = vld [vmem:[%s714_s20 + $0x38] sm:$0xff]  ;;  %v197_v25 = vld [vmem:[%s714_s20 + $0xb0] sm:$0xff] }
  0x13   : > { %v217_v22 = vpack.c.bf16 %v196_v20, %v195_v19  ;;  %v198_v26 = vld [vmem:[%s714_s20 + $0xb8] sm:$0xff]  ;;  %v183_v27 = vld [vmem:[%s714_s20 + $0x40] sm:$0xff]  ;;  %v184_v28 = vld [vmem:[%s714_s20 + $0x48] sm:$0xff]  ;;  %v210_v31 = vpack.c.bf16 %v182_v24, %v181_v23 }
  0x14   : > { %623 = vmatmul.mubr.msk.bf16.vlgmr.msra.gmra.mxu0 %vm237_vm2, %v208_v13  ;;  %639 = vmatmul.mubr.msk.bf16.vlgmr.msra.gmra.mxu1 %vm237_vm2, %v216_v17  ;;  %v199_v29 = vld [vmem:[%s714_s20 + $0xc0] sm:$0xff]  ;;  %v200_v30 = vld [vmem:[%s714_s20 + $0xc8] sm:$0xff]  ;;  %v218_v32 = vpack.c.bf16 %v198_v26, %v197_v25  ;;  %v211_v33 = vpack.c.bf16 %v184_v28, %v183_v27  ;;  %v185_v35 = vld [vmem:[%s714_s20 + $0x50] sm:$0xff] }
  0x15   : > { %626 = vmatprep.mubr.msk.bf16.mxu0 %vm237_vm2, %v209_v21  ;;  %642 = vmatprep.mubr.msk.bf16.mxu1 %vm237_vm2, %v217_v22  ;;  %v219_v34 = vpack.c.bf16 %v200_v30, %v199_v29  ;;  %v186_v36 = vld [vmem:[%s714_s20 + $0x58] sm:$0xff]  ;;  %v201_v37 = vld [vmem:[%s714_s20 + $0xd0] sm:$0xff]  ;;  %v187_v39 = vld [vmem:[%s714_s20 + $0x60] sm:$0xff] }
  0x16   : > { %v202_v38 = vld [vmem:[%s714_s20 + $0xd8] sm:$0xff]  ;;  %v188_v40 = vld [vmem:[%s714_s20 + $0x68] sm:$0xff]  ;;  %v203_v41 = vld [vmem:[%s714_s20 + $0xe0] sm:$0xff]  ;;  %v212_v43 = vpack.c.bf16 %v186_v36, %v185_v35 }
  0x17   : > { %v204_v42 = vld [vmem:[%s714_s20 + $0xe8] sm:$0xff]  ;;  %v220_v44 = vpack.c.bf16 %v202_v38, %v201_v37  ;;  %v213_v45 = vpack.c.bf16 %v188_v40, %v187_v39  ;;  %v189_v47 = vld [vmem:[%s714_s20 + $0x70] sm:$0xff]  ;;  %v190_v48 = vld [vmem:[%s714_s20 + $0x78] sm:$0xff] }
  0x18   : > { %v221_v46 = vpack.c.bf16 %v204_v42, %v203_v41  ;;  %v205_v49 = vld [vmem:[%s714_s20 + $0xf0] sm:$0xff]  ;;  %v206_v50 = vld [vmem:[%s714_s20 + $0xf8] sm:$0xff]  ;;  %v214_v51 = vpack.c.bf16 %v190_v48, %v189_v47 }
  0x19   : > { %v222_v52 = vpack.c.bf16 %v206_v50, %v205_v49 }
  0x1c   : > { %627 = vmatmul.mubr.msk.bf16.gmra.mxu0 %vm237_vm2, %v210_v31  ;;  %643 = vmatmul.mubr.msk.bf16.gmra.mxu1 %vm237_vm2, %v218_v32 }
  0x1d   : > { %630 = vmatprep.mubr.msk.bf16.mxu0 %vm237_vm2, %v211_v33  ;;  %646 = vmatprep.mubr.msk.bf16.mxu1 %vm237_vm2, %v219_v34 }
  0x24   : > { %631 = vmatmul.mubr.msk.bf16.gmra.mxu0 %vm237_vm2, %v212_v43  ;;  %647 = vmatmul.mubr.msk.bf16.gmra.mxu1 %vm237_vm2, %v220_v44 }
  0x25   : > { %634 = vmatprep.mubr.msk.bf16.mxu0 %vm237_vm2, %v213_v45  ;;  %650 = vmatprep.mubr.msk.bf16.mxu1 %vm237_vm2, %v221_v46 }
  0x2c   : > { %635 = vmatmul.mubr.msk.bf16.gmra.mxu0 %vm237_vm2, %v214_v51  ;;  %651 = vmatmul.mubr.msk.bf16.gmra.mxu1 %vm237_vm2, %v222_v52 }
  0xd4   : > { %v624_v54 = vpop.f32.mrf.mxu0  ;;  %v640_v56 = vpop.f32.mrf.mxu1 }
  0xd5   : > { %v336_v55 = vadd.f32 %v624_v54, %v767_v53  ;;  %v400_v57 = vadd.f32 %v640_v56, %v767_v53 }
  0xd6   : > { %v327_v58 = vpop.f32.mrf.mxu0  ;;  %v391_v61 = vpop.f32.mrf.mxu1 }
  0xd7   : > { %v456_v59 = vmax.f32 %v336_v55, 0.0  ;;  %v328_v60 = vadd.f32 %v767_v53, %v327_v58  ;;  %v472_v62 = vmax.f32 %v400_v57, 0.0  ;;  %v392_v63 = vadd.f32 %v767_v53, %v391_v61 }
  0xd8   : > { %v625_v0 = vpop.f32.mrf.mxu0  ;;  %v641_v3 = vpop.f32.mrf.mxu1 }
  0xd9   : > { %488 = vst [vmem:[%s775_s25 + $0x10] sm:$0xff] %v456_v59  ;;  %v454_v1 = vmax.f32 %v328_v60, 0.0  ;;  %v339_v2 = vadd.f32 %v625_v0, %v767_v53  ;;  %504 = vst [vmem:[%s775_s25 + $0x90] sm:$0xff] %v472_v62  ;;  %v470_v4 = vmax.f32 %v392_v63, 0.0  ;;  %v403_v5 = vadd.f32 %v641_v3, %v767_v53 }
  0xda   : > { %v330_v6 = vpop.f32.mrf.mxu0  ;;  %v394_v9 = vpop.f32.mrf.mxu1 }
  0xdb   : > { %486 = vst [vmem:[%s775_s25] sm:$0xff] %v454_v1  ;;  %v457_v7 = vmax.f32 %v339_v2, 0.0  ;;  %v331_v8 = vadd.f32 %v767_v53, %v330_v6  ;;  %502 = vst [vmem:[%s775_s25 + $0x80] sm:$0xff] %v470_v4  ;;  %v473_v10 = vmax.f32 %v403_v5, 0.0  ;;  %v395_v11 = vadd.f32 %v767_v53, %v394_v9 }
  0xdc   : > { %v628_v12 = vpop.f32.mrf.mxu0  ;;  %v644_v15 = vpop.f32.mrf.mxu1 }
  0xdd   : > { %489 = vst [vmem:[%s775_s25 + $0x18] sm:$0xff] %v457_v7  ;;  %v455_v13 = vmax.f32 %v331_v8, 0.0  ;;  %v352_v14 = vadd.f32 %v628_v12, %v767_v53  ;;  %505 = vst [vmem:[%s775_s25 + $0x98] sm:$0xff] %v473_v10  ;;  %v471_v16 = vmax.f32 %v395_v11, 0.0  ;;  %v416_v17 = vadd.f32 %v644_v15, %v767_v53 }
  0xde   : > { %v343_v18 = vpop.f32.mrf.mxu0  ;;  %v407_v21 = vpop.f32.mrf.mxu1 }
  0xdf   : > { %487 = vst [vmem:[%s775_s25 + $0x8] sm:$0xff] %v455_v13  ;;  %v460_v19 = vmax.f32 %v352_v14, 0.0  ;;  %v344_v20 = vadd.f32 %v767_v53, %v343_v18  ;;  %503 = vst [vmem:[%s775_s25 + $0x88] sm:$0xff] %v471_v16  ;;  %v476_v22 = vmax.f32 %v416_v17, 0.0  ;;  %v408_v23 = vadd.f32 %v767_v53, %v407_v21 }
  0xe0   : > { %v629_v24 = vpop.f32.mrf.mxu0  ;;  %v645_v27 = vpop.f32.mrf.mxu1 }
  0xe1   : > { %492 = vst [vmem:[%s775_s25 + $0x30] sm:$0xff] %v460_v19  ;;  %v458_v25 = vmax.f32 %v344_v20, 0.0  ;;  %v355_v26 = vadd.f32 %v629_v24, %v767_v53  ;;  %508 = vst [vmem:[%s775_s25 + $0xb0] sm:$0xff] %v476_v22  ;;  %v474_v28 = vmax.f32 %v408_v23, 0.0  ;;  %v419_v29 = vadd.f32 %v645_v27, %v767_v53 }
  0xe2   : > { %v346_v30 = vpop.f32.mrf.mxu0  ;;  %v410_v33 = vpop.f32.mrf.mxu1 }
  0xe3   : > { %490 = vst [vmem:[%s775_s25 + $0x20] sm:$0xff] %v458_v25  ;;  %v461_v31 = vmax.f32 %v355_v26, 0.0  ;;  %v347_v32 = vadd.f32 %v767_v53, %v346_v30  ;;  %506 = vst [vmem:[%s775_s25 + $0xa0] sm:$0xff] %v474_v28  ;;  %v477_v34 = vmax.f32 %v419_v29, 0.0  ;;  %v411_v35 = vadd.f32 %v767_v53, %v410_v33 }
  0xe4   : > { %v632_v36 = vpop.f32.mrf.mxu0  ;;  %v648_v39 = vpop.f32.mrf.mxu1 }
  0xe5   : > { %493 = vst [vmem:[%s775_s25 + $0x38] sm:$0xff] %v461_v31  ;;  %v459_v37 = vmax.f32 %v347_v32, 0.0  ;;  %v368_v38 = vadd.f32 %v632_v36, %v767_v53  ;;  %509 = vst [vmem:[%s775_s25 + $0xb8] sm:$0xff] %v477_v34  ;;  %v475_v40 = vmax.f32 %v411_v35, 0.0  ;;  %v432_v41 = vadd.f32 %v648_v39, %v767_v53 }
  0xe6   : > { %v359_v42 = vpop.f32.mrf.mxu0  ;;  %v423_v45 = vpop.f32.mrf.mxu1 }
  0xe7   : > { %491 = vst [vmem:[%s775_s25 + $0x28] sm:$0xff] %v459_v37  ;;  %v464_v43 = vmax.f32 %v368_v38, 0.0  ;;  %v360_v44 = vadd.f32 %v767_v53, %v359_v42  ;;  %507 = vst [vmem:[%s775_s25 + $0xa8] sm:$0xff] %v475_v40  ;;  %v480_v46 = vmax.f32 %v432_v41, 0.0  ;;  %v424_v47 = vadd.f32 %v767_v53, %v423_v45 }
  0xe8   : > { %v633_v48 = vpop.f32.mrf.mxu0  ;;  %v649_v51 = vpop.f32.mrf.mxu1 }
  0xe9   : > { %496 = vst [vmem:[%s775_s25 + $0x50] sm:$0xff] %v464_v43  ;;  %v462_v49 = vmax.f32 %v360_v44, 0.0  ;;  %v371_v50 = vadd.f32 %v633_v48, %v767_v53  ;;  %512 = vst [vmem:[%s775_s25 + $0xd0] sm:$0xff] %v480_v46  ;;  %v478_v52 = vmax.f32 %v424_v47, 0.0  ;;  %v435_v54 = vadd.f32 %v649_v51, %v767_v53 }
  0xea   : > { %v362_v55 = vpop.f32.mrf.mxu0  ;;  %v426_v58 = vpop.f32.mrf.mxu1 }
  0xeb   : > { %494 = vst [vmem:[%s775_s25 + $0x40] sm:$0xff] %v462_v49  ;;  %v465_v56 = vmax.f32 %v371_v50, 0.0  ;;  %v363_v57 = vadd.f32 %v767_v53, %v362_v55  ;;  %510 = vst [vmem:[%s775_s25 + $0xc0] sm:$0xff] %v478_v52  ;;  %v481_v59 = vmax.f32 %v435_v54, 0.0  ;;  %v427_v60 = vadd.f32 %v767_v53, %v426_v58 }
  0xec   : > { %v636_v61 = vpop.f32.mrf.mxu0  ;;  %v652_v0 = vpop.f32.mrf.mxu1 }
  0xed   : > { %497 = vst [vmem:[%s775_s25 + $0x58] sm:$0xff] %v465_v56  ;;  %v463_v62 = vmax.f32 %v363_v57, 0.0  ;;  %v384_v63 = vadd.f32 %v636_v61, %v767_v53  ;;  %513 = vst [vmem:[%s775_s25 + $0xd8] sm:$0xff] %v481_v59  ;;  %v479_v1 = vmax.f32 %v427_v60, 0.0  ;;  %v448_v2 = vadd.f32 %v652_v0, %v767_v53 }
  0xee   : > { %v375_v3 = vpop.f32.mrf.mxu0  ;;  %v439_v6 = vpop.f32.mrf.mxu1 }
  0xef   : > { %495 = vst [vmem:[%s775_s25 + $0x48] sm:$0xff] %v463_v62  ;;  %v468_v4 = vmax.f32 %v384_v63, 0.0  ;;  %v376_v5 = vadd.f32 %v767_v53, %v375_v3  ;;  %511 = vst [vmem:[%s775_s25 + $0xc8] sm:$0xff] %v479_v1  ;;  %v484_v7 = vmax.f32 %v448_v2, 0.0  ;;  %v440_v8 = vadd.f32 %v767_v53, %v439_v6 }
  0xf0   : > { %v637_v9 = vpop.f32.mrf.mxu0  ;;  %v653_v12 = vpop.f32.mrf.mxu1 }
  0xf1   : > { %500 = vst [vmem:[%s775_s25 + $0x70] sm:$0xff] %v468_v4  ;;  %v466_v10 = vmax.f32 %v376_v5, 0.0  ;;  %v387_v11 = vadd.f32 %v637_v9, %v767_v53  ;;  %516 = vst [vmem:[%s775_s25 + $0xf0] sm:$0xff] %v484_v7  ;;  %v482_v13 = vmax.f32 %v440_v8, 0.0  ;;  %v451_v14 = vadd.f32 %v653_v12, %v767_v53 }
  0xf2   : > { %v378_v15 = vpop.f32.mrf.mxu0  ;;  %v442_v18 = vpop.f32.mrf.mxu1 }
  0xf3   : > { %498 = vst [vmem:[%s775_s25 + $0x60] sm:$0xff] %v466_v10  ;;  %v469_v16 = vmax.f32 %v387_v11, 0.0  ;;  %v379_v17 = vadd.f32 %v767_v53, %v378_v15  ;;  %514 = vst [vmem:[%s775_s25 + $0xe0] sm:$0xff] %v482_v13  ;;  %v485_v19 = vmax.f32 %v451_v14, 0.0  ;;  %v443_v20 = vadd.f32 %v767_v53, %v442_v18 }
  0xf5   : > { %501 = vst [vmem:[%s775_s25 + $0x78] sm:$0xff] %v469_v16  ;;  %v467_v21 = vmax.f32 %v379_v17, 0.0  ;;  %517 = vst [vmem:[%s775_s25 + $0xf8] sm:$0xff] %v485_v19  ;;  %v483_v22 = vmax.f32 %v443_v20, 0.0 }
  0xf7   : > { %499 = vst [vmem:[%s775_s25 + $0x68] sm:$0xff] %v467_v21  ;;  %515 = vst [vmem:[%s775_s25 + $0xe8] sm:$0xff] %v483_v22 }
  0xf8 PF: > { %s13_s12 = sadd.s32 1, %s672_s12  }
  0xf9   : > { %p10_p4 = scmp.ge.s32.totalorder %s13_s12, 4  }
  0xfb   :  { %12 = sbr.rel (!%p10_p4) target bundleno = 1 (0x1), region = 62 }

// kernel: squeezeformer_encoder.29
= control target key start
LH: loop header
LB: loop body
LE: loop exit
PB: predicated region body
PF: predicated region fallthrough
CT: control target
= control target key end

     0   :  { %s467_s1 = inlined_call_operand.vmem [shape: bf16[128,128], index: 1, kind: input, shape index: {}]   ;;  %s468_s0 = inlined_call_operand.vmem [shape: f32[128,128], index: 0, kind: input, shape index: {}]   ;;  %s469_s2 = inlined_call_operand.vmem [shape: f32[1,128], index: 2, kind: input, shape index: {}]   ;;  %s470_s3 = inlined_call_operand.vmem [shape: f32[128,128], index: 3, kind: output, shape index: {}]  }
   0x1   :  { %v316_v0 = vld [vmem:[%s467_s1 + $0x38] sm:$0xff]   ;;  %v317_v1 = vld [vmem:[%s467_s1 + $0x30] sm:$0xff]   ;;  %v318_v2 = vld [vmem:[%s467_s1 + $0x28] sm:$0xff]  }
   0x2   :  { %268 = vmatprep.subr.bf16.mxu0 %v316_v0  ;;  %300 = vmatprep.subr.bf16.mxu1 %v316_v0  ;;  %v319_v3 = vld [vmem:[%s467_s1 + $0x20] sm:$0xff]   ;;  %v16_v5 = vld [vmem:[%s468_s0 + $0x8] sm:$0xff]  ;;  %v320_v10 = vld [vmem:[%s467_s1 + $0x18] sm:$0xff]  }
   0x3   :  { %269 = vmatpush3.bf16.msra.mxu0 %v316_v0  ;;  %308 = vmatpush3.bf16.msra.mxu1 %v316_v0  ;;  %v15_v4 = vld [vmem:[%s468_s0] sm:$0xff]  ;;  %v24_v8 = vld [vmem:[%s468_s0 + $0x48] sm:$0xff]  ;;  %v321_v11 = vld [vmem:[%s467_s1 + $0x10] sm:$0xff]  }
   0x4   :  { %270 = vmatprep.subr.bf16.mxu0 %v317_v1  ;;  %301 = vmatprep.subr.bf16.mxu1 %v317_v1  ;;  %v23_v6 = vld [vmem:[%s468_s0 + $0x40] sm:$0xff]  ;;  %v31_v7 = vpack.c.bf16 %v16_v5, %v15_v4  ;;  %v322_v12 = vld [vmem:[%s467_s1 + $0x8] sm:$0xff]   ;;  %v17_v14 = vld [vmem:[%s468_s0 + $0x10] sm:$0xff] }
   0x5   :  { %v35_v9 = vpack.c.bf16 %v24_v8, %v23_v6  ;;  %v323_v13 = vld [vmem:[%s467_s1] sm:$0xff]   ;;  %v18_v15 = vld [vmem:[%s468_s0 + $0x18] sm:$0xff]  ;;  %v25_v16 = vld [vmem:[%s468_s0 + $0x50] sm:$0xff] }
   0x6   :  { %284 = vmatprep.mubr.bf16.mxu0 %v31_v7  ;;  %v26_v17 = vld [vmem:[%s468_s0 + $0x58] sm:$0xff]  ;;  %v19_v18 = vld [vmem:[%s468_s0 + $0x20] sm:$0xff]  ;;  %v20_v19 = vld [vmem:[%s468_s0 + $0x28] sm:$0xff]  ;;  %v32_v22 = vpack.c.bf16 %v18_v15, %v17_v14 }
   0x7   :  { %271 = vmatpush3.bf16.msra.mxu0 %v317_v1  ;;  %309 = vmatpush3.bf16.msra.mxu1 %v317_v1  ;;  %v27_v20 = vld [vmem:[%s468_s0 + $0x60] sm:$0xff]  ;;  %v28_v21 = vld [vmem:[%s468_s0 + $0x68] sm:$0xff]  ;;  %v36_v23 = vpack.c.bf16 %v26_v17, %v25_v16  ;;  %v33_v24 = vpack.c.bf16 %v20_v19, %v19_v18  ;;  %v21_v26 = vld [vmem:[%s468_s0 + $0x30] sm:$0xff] }
   0x8   :  { %272 = vmatprep.subr.bf16.mxu0 %v318_v2  ;;  %302 = vmatprep.subr.bf16.mxu1 %v318_v2  ;;  %v37_v25 = vpack.c.bf16 %v28_v21, %v27_v20  ;;  %v22_v27 = vld [vmem:[%s468_s0 + $0x38] sm:$0xff]  ;;  %v29_v28 = vld [vmem:[%s468_s0 + $0x70] sm:$0xff]  ;;  %v243_v32 = vld [vmem:[%s469_s2] ss:$0 sm:$0xff] }
   0x9   :  { %292 = vmatprep.mubr.bf16.mxu1 %v35_v9  ;;  %v30_v29 = vld [vmem:[%s468_s0 + $0x78] sm:$0xff]  ;;  %v34_v30 = vpack.c.bf16 %v22_v27, %v21_v26 }
   0xa   :  { %v38_v31 = vpack.c.bf16 %v30_v29, %v29_v28 }
   0xb   :  { %273 = vmatpush3.bf16.msra.mxu0 %v318_v2  ;;  %310 = vmatpush3.bf16.msra.mxu1 %v318_v2 }
   0xc   :  { %274 = vmatprep.subr.bf16.mxu0 %v319_v3  ;;  %303 = vmatprep.subr.bf16.mxu1 %v319_v3 }
   0xf   :  { %275 = vmatpush3.bf16.msra.mxu0 %v319_v3  ;;  %311 = vmatpush3.bf16.msra.mxu1 %v319_v3 }
  0x10   :  { %276 = vmatprep.subr.bf16.mxu0 %v320_v10  ;;  %304 = vmatprep.subr.bf16.mxu1 %v320_v10 }
  0x13   :  { %277 = vmatpush3.bf16.msra.mxu0 %v320_v10  ;;  %312 = vmatpush3.bf16.msra.mxu1 %v320_v10 }
  0x14   :  { %278 = vmatprep.subr.bf16.mxu0 %v321_v11  ;;  %305 = vmatprep.subr.bf16.mxu1 %v321_v11 }
  0x17   :  { %279 = vmatpush3.bf16.msra.mxu0 %v321_v11  ;;  %313 = vmatpush3.bf16.msra.mxu1 %v321_v11 }
  0x18   :  { %280 = vmatprep.subr.bf16.mxu0 %v322_v12  ;;  %306 = vmatprep.subr.bf16.mxu1 %v322_v12 }
  0x1b   :  { %281 = vmatpush3.bf16.msra.mxu0 %v322_v12  ;;  %314 = vmatpush3.bf16.msra.mxu1 %v322_v12 }
  0x1c   :  { %282 = vmatprep.subr.bf16.mxu0 %v323_v13  ;;  %307 = vmatprep.subr.bf16.mxu1 %v323_v13 }
  0x1f   :  { %283 = vmatpush3.bf16.msra.mxu0 %v323_v13  ;;  %315 = vmatpush3.bf16.msra.mxu1 %v323_v13 }
  0x22   :  { %285 = vmatmul.mubr.bf16.vlgmr.msra.gmra.mxu0 %v32_v22  ;;  %293 = vmatmul.mubr.bf16.vlgmr.msra.gmra.mxu1 %v36_v23 }
  0x23   :  { %288 = vmatprep.mubr.bf16.mxu0 %v33_v24  ;;  %296 = vmatprep.mubr.bf16.mxu1 %v37_v25 }
  0x2a   :  { %289 = vmatmul.mubr.bf16.gmra.mxu0 %v34_v30  ;;  %297 = vmatmul.mubr.bf16.gmra.mxu1 %v38_v31 }
  0xe2   :  { %v286_v33 = vpop.f32.mrf.mxu0  ;;  %v294_v34 = vpop.f32.mrf.mxu1 }
  0xe3   :  { %v153_v35 = vadd.f32 %v286_v33, %v243_v32  ;;  %v185_v36 = vadd.f32 %v294_v34, %v243_v32 }
  0xe4   :  { %v144_v37 = vpop.f32.mrf.mxu0  ;;  %v176_v38 = vpop.f32.mrf.mxu1 }
  0xe5   :  { %v209_v39 = vmax.f32 %v153_v35, 0.0  ;;  %v217_v40 = vmax.f32 %v185_v36, 0.0  ;;  %v145_v41 = vadd.f32 %v243_v32, %v144_v37  ;;  %v177_v42 = vadd.f32 %v243_v32, %v176_v38 }
  0xe6   :  { %v287_v43 = vpop.f32.mrf.mxu0  ;;  %v295_v44 = vpop.f32.mrf.mxu1 }
  0xe7   :  { %225 = vst [vmem:[%s470_s3 + $0x10] sm:$0xff] %v209_v39  ;;  %233 = vst [vmem:[%s470_s3 + $0x50] sm:$0xff] %v217_v40  ;;  %v207_v45 = vmax.f32 %v145_v41, 0.0  ;;  %v215_v46 = vmax.f32 %v177_v42, 0.0  ;;  %v156_v47 = vadd.f32 %v287_v43, %v243_v32  ;;  %v188_v48 = vadd.f32 %v295_v44, %v243_v32 }
  0xe8   :  { %v147_v49 = vpop.f32.mrf.mxu0  ;;  %v179_v50 = vpop.f32.mrf.mxu1 }
  0xe9   :  { %223 = vst [vmem:[%s470_s3] sm:$0xff] %v207_v45  ;;  %231 = vst [vmem:[%s470_s3 + $0x40] sm:$0xff] %v215_v46  ;;  %v210_v51 = vmax.f32 %v156_v47, 0.0  ;;  %v218_v52 = vmax.f32 %v188_v48, 0.0  ;;  %v148_v53 = vadd.f32 %v243_v32, %v147_v49  ;;  %v180_v54 = vadd.f32 %v243_v32, %v179_v50 }
  0xea   :  { %v290_v55 = vpop.f32.mrf.mxu0  ;;  %v298_v56 = vpop.f32.mrf.mxu1 }
  0xeb   :  { %226 = vst [vmem:[%s470_s3 + $0x18] sm:$0xff] %v210_v51  ;;  %234 = vst [vmem:[%s470_s3 + $0x58] sm:$0xff] %v218_v52  ;;  %v208_v57 = vmax.f32 %v148_v53, 0.0  ;;  %v216_v58 = vmax.f32 %v180_v54, 0.0  ;;  %v169_v59 = vadd.f32 %v290_v55, %v243_v32  ;;  %v201_v60 = vadd.f32 %v298_v56, %v243_v32 }
  0xec   :  { %v160_v61 = vpop.f32.mrf.mxu0  ;;  %v192_v62 = vpop.f32.mrf.mxu1 }
  0xed   :  { %224 = vst [vmem:[%s470_s3 + $0x8] sm:$0xff] %v208_v57  ;;  %232 = vst [vmem:[%s470_s3 + $0x48] sm:$0xff] %v216_v58  ;;  %v213_v63 = vmax.f32 %v169_v59, 0.0  ;;  %v221_v0 = vmax.f32 %v201_v60, 0.0  ;;  %v161_v1 = vadd.f32 %v243_v32, %v160_v61  ;;  %v193_v2 = vadd.f32 %v243_v32, %v192_v62 }
  0xee   :  { %v291_v3 = vpop.f32.mrf.mxu0  ;;  %v299_v4 = vpop.f32.mrf.mxu1 }
  0xef   :  { %229 = vst [vmem:[%s470_s3 + $0x30] sm:$0xff] %v213_v63  ;;  %237 = vst [vmem:[%s470_s3 + $0x70] sm:$0xff] %v221_v0  ;;  %v211_v5 = vmax.f32 %v161_v1, 0.0  ;;  %v219_v6 = vmax.f32 %v193_v2, 0.0  ;;  %v172_v7 = vadd.f32 %v291_v3, %v243_v32  ;;  %v204_v8 = vadd.f32 %v299_v4, %v243_v32 }
  0xf0   :  { %v163_v9 = vpop.f32.mrf.mxu0  ;;  %v195_v10 = vpop.f32.mrf.mxu1 }
  0xf1   :  { %227 = vst [vmem:[%s470_s3 + $0x20] sm:$0xff] %v211_v5  ;;  %235 = vst [vmem:[%s470_s3 + $0x60] sm:$0xff] %v219_v6  ;;  %v214_v11 = vmax.f32 %v172_v7, 0.0  ;;  %v222_v12 = vmax.f32 %v204_v8, 0.0  ;;  %v164_v13 = vadd.f32 %v243_v32, %v163_v9  ;;  %v196_v14 = vadd.f32 %v243_v32, %v195_v10 }
  0xf3   :  { %230 = vst [vmem:[%s470_s3 + $0x38] sm:$0xff] %v214_v11  ;;  %238 = vst [vmem:[%s470_s3 + $0x78] sm:$0xff] %v222_v12  ;;  %v212_v15 = vmax.f32 %v164_v13, 0.0  ;;  %v220_v16 = vmax.f32 %v196_v14, 0.0 }
  0xf5   :  { %228 = vst [vmem:[%s470_s3 + $0x28] sm:$0xff] %v212_v15  ;;  %236 = vst [vmem:[%s470_s3 + $0x68] sm:$0xff] %v220_v16 }

// kernel: squeezeformer_encoder.28
= control target key start
LH: loop header
LB: loop body
LE: loop exit
PB: predicated region body
PF: predicated region fallthrough
CT: control target
= control target key end

     0   :  { %v32_v0 = vlaneseq  ;;  %s1369_s1 = inlined_call_operand.vmem [shape: f32[9,128], index: 1, kind: input, shape index: {}]   ;;  %s1370_s0 = inlined_call_operand.vmem [shape: f32[9,128,128], index: 0, kind: input, shape index: {}]   ;;  %s1371_s2 = inlined_call_operand.vmem [shape: f32[1,128], index: 2, kind: input, shape index: {}]   ;;  %s1372_s3 = inlined_call_operand.vmem [shape: f32[128,128], index: 3, kind: output, shape index: {}]  }
   0x1   :  { %v14_v2 = vld [vmem:[%s1369_s1] sm:$0xff]  ;;  %v700_v14 = vld [vmem:[%s1369_s1 + $0x8] ss:$0 sm:$0xff]  ;;  %v18_v44 = vld [vmem:[%s1370_s0 + $0x10] sm:$0xff] }
   0x2   :  { %v33_v1 = vshrl.u32 %v32_v0, 7  ;;  %v16_v3 = vld [vmem:[%s1370_s0] sm:$0xff]  ;;  %v17_v27 = vld [vmem:[%s1370_s0 + $0x8] sm:$0xff]  ;;  %v537_v45 = vld [vmem:[%s1370_s0 + $0x90] sm:$0xff] }
   0x3   :  { %v535_v8 = vld [vmem:[%s1370_s0 + $0x80] sm:$0xff]  ;;  %v536_v28 = vld [vmem:[%s1370_s0 + $0x88] sm:$0xff]  ;;  %v553_v46 = vld [vmem:[%s1370_s0 + $0x110] sm:$0xff] }
   0x4   :  { %v34_v4 = vsub.s32 0, %v33_v1  ;;  %v87_v5 = vsub.s32 1, %v33_v1  ;;  %v140_v6 = vsub.s32 2, %v33_v1  ;;  %v193_v7 = vsub.s32 3, %v33_v1  ;;  %v551_v9 = vld [vmem:[%s1370_s0 + $0x100] sm:$0xff]  ;;  %v552_v34 = vld [vmem:[%s1370_s0 + $0x108] sm:$0xff] }
   0x5   :  { %v246_v10 = vsub.s32 4, %v33_v1  ;;  %v299_v11 = vsub.s32 5, %v33_v1  ;;  %v352_v12 = vsub.s32 6, %v33_v1  ;;  %v405_v13 = vsub.s32 7, %v33_v1  ;;  %v567_v18 = vld [vmem:[%s1370_s0 + $0x180] sm:$0xff]  ;;  %v568_v37 = vld [vmem:[%s1370_s0 + $0x188] sm:$0xff] }
   0x6   :  { %v702_v15 = vrot.slane %v14_v2, %v34_v4  ;;  %v704_v16 = vrot.slane %v14_v2, %v87_v5  ;;  %v706_v17 = vrot.slane %v14_v2, %v140_v6  ;;  %v711_v19 = vrot.slane %v14_v2, %v193_v7  ;;  %v583_v20 = vld [vmem:[%s1370_s0 + $0x200] sm:$0xff]  ;;  %v584_v38 = vld [vmem:[%s1370_s0 + $0x208] sm:$0xff]  ;;  %v569_v58 = vld [vmem:[%s1370_s0 + $0x190] sm:$0xff] }
   0x7   :  { %v599_v21 = vld [vmem:[%s1370_s0 + $0x280] sm:$0xff]  ;;  %v719_v22 = vrot.slane %v14_v2, %v246_v10  ;;  %v721_v23 = vrot.slane %v14_v2, %v299_v11  ;;  %v726_v25 = vrot.slane %v14_v2, %v352_v12  ;;  %v728_v26 = vrot.slane %v14_v2, %v405_v13  ;;  %v600_v39 = vld [vmem:[%s1370_s0 + $0x288] sm:$0xff]  ;;  %v585_v59 = vld [vmem:[%s1370_s0 + $0x210] sm:$0xff] }
   0x8   :  { %v615_v24 = vld [vmem:[%s1370_s0 + $0x300] sm:$0xff]  ;;  %v36_v29 = vmul.f32 %v702_v15, %v16_v3  ;;  %v89_v30 = vmul.f32 %v535_v8, %v704_v16  ;;  %v142_v31 = vmul.f32 %v551_v9, %v706_v17  ;;  %v195_v35 = vmul.f32 %v567_v18, %v711_v19  ;;  %v616_v51 = vld [vmem:[%s1370_s0 + $0x308] sm:$0xff]  ;;  %v601_v0 = vld [vmem:[%s1370_s0 + $0x290] sm:$0xff] }
   0x9   :  { %v631_v32 = vld [vmem:[%s1370_s0 + $0x380] sm:$0xff]  ;;  %v248_v36 = vmul.f32 %v583_v20, %v719_v22  ;;  %v301_v41 = vmul.f32 %v599_v21, %v721_v23  ;;  %v37_v42 = vmul.f32 %v702_v15, %v17_v27  ;;  %v90_v43 = vmul.f32 %v536_v28, %v704_v16  ;;  %v632_v52 = vld [vmem:[%s1370_s0 + $0x388] sm:$0xff]  ;;  %v19_v1 = vld [vmem:[%s1370_s0 + $0x18] sm:$0xff] }
   0xa   :  { %v647_v33 = vld [vmem:[%s1370_s0 + $0x400] sm:$0xff]  ;;  %v105_v40 = vadd.f32 %v89_v30, %v36_v29  ;;  %v354_v47 = vmul.f32 %v615_v24, %v726_v25  ;;  %v773_v48 = vmul.f32 %v631_v32, %v728_v26  ;;  %v143_v50 = vmul.f32 %v552_v34, %v706_v17  ;;  %v648_v57 = vld [vmem:[%s1370_s0 + $0x408] sm:$0xff]  ;;  %v617_v6 = vld [vmem:[%s1370_s0 + $0x310] sm:$0xff] }
   0xb   :  { %v776_v49 = vmul.f32 %v700_v14, %v647_v33  ;;  %v106_v54 = vadd.f32 %v90_v43, %v37_v42  ;;  %v196_v55 = vmul.f32 %v568_v37, %v711_v19  ;;  %v249_v56 = vmul.f32 %v584_v38, %v719_v22  ;;  %v538_v7 = vld [vmem:[%s1370_s0 + $0x98] sm:$0xff]  ;;  %v633_v13 = vld [vmem:[%s1370_s0 + $0x390] sm:$0xff]  ;;  %v555_v42 = vld [vmem:[%s1370_s0 + $0x120] sm:$0xff] }
   0xc   :  { %v158_v53 = vadd.f32 %v142_v31, %v105_v40  ;;  %v302_v60 = vmul.f32 %v600_v39, %v721_v23  ;;  %v38_v61 = vmul.f32 %v702_v15, %v18_v44  ;;  %v91_v62 = vmul.f32 %v537_v45, %v704_v16  ;;  %v554_v8 = vld [vmem:[%s1370_s0 + $0x118] sm:$0xff]  ;;  %v649_v18 = vld [vmem:[%s1370_s0 + $0x410] sm:$0xff]  ;;  %v539_v40 = vld [vmem:[%s1370_s0 + $0xa0] sm:$0xff] }
   0xd   :  { %v144_v63 = vmul.f32 %v553_v46, %v706_v17  ;;  %v159_v3 = vadd.f32 %v143_v50, %v106_v54  ;;  %v355_v4 = vmul.f32 %v616_v51, %v726_v25  ;;  %v408_v5 = vmul.f32 %v632_v52, %v728_v26  ;;  %v570_v28 = vld [vmem:[%s1370_s0 + $0x198] sm:$0xff] }
   0xe   :  { %v211_v2 = vadd.f32 %v195_v35, %v158_v53  ;;  %v818_v9 = vmul.f32 %v700_v14, %v648_v57  ;;  %v107_v10 = vadd.f32 %v91_v62, %v38_v61  ;;  %v197_v11 = vmul.f32 %v569_v58, %v711_v19  ;;  %v586_v29 = vld [vmem:[%s1370_s0 + $0x218] sm:$0xff]  ;;  %v20_v35 = vld [vmem:[%s1370_s0 + $0x20] sm:$0xff] }
   0xf   :  { %v250_v12 = vmul.f32 %v585_v59, %v719_v22  ;;  %v212_v21 = vadd.f32 %v196_v55, %v159_v3  ;;  %v303_v24 = vmul.f32 %v601_v0, %v721_v23  ;;  %v39_v27 = vmul.f32 %v702_v15, %v19_v1  ;;  %v602_v34 = vld [vmem:[%s1370_s0 + $0x298] sm:$0xff]  ;;  %v571_v55 = vld [vmem:[%s1370_s0 + $0x1a0] sm:$0xff] }
  0x10   :  { %v264_v20 = vadd.f32 %v248_v36, %v211_v2  ;;  %v160_v30 = vadd.f32 %v144_v63, %v107_v10  ;;  %v356_v31 = vmul.f32 %v617_v6, %v726_v25  ;;  %v92_v32 = vmul.f32 %v538_v7, %v704_v16  ;;  %v618_v46 = vld [vmem:[%s1370_s0 + $0x318] sm:$0xff]  ;;  %v603_v1 = vld [vmem:[%s1370_s0 + $0x2a0] sm:$0xff] }
  0x11   :  { %v145_v33 = vmul.f32 %v554_v8, %v706_v17  ;;  %v265_v37 = vadd.f32 %v249_v56, %v212_v21  ;;  %v409_v38 = vmul.f32 %v633_v13, %v728_v26  ;;  %v847_v39 = vmul.f32 %v700_v14, %v649_v18  ;;  %v634_v50 = vld [vmem:[%s1370_s0 + $0x398] sm:$0xff]  ;;  %v885_v2 = vld [vmem:[%s1371_s2] ss:$0 sm:$0xff]  ;;  %v556_v18 = vld [vmem:[%s1370_s0 + $0x128] sm:$0xff] }
  0x12   :  { %v317_v36 = vadd.f32 %v301_v41, %v264_v20  ;;  %v213_v43 = vadd.f32 %v197_v11, %v160_v30  ;;  %v108_v44 = vadd.f32 %v92_v32, %v39_v27  ;;  %v198_v45 = vmul.f32 %v570_v28, %v711_v19  ;;  %v650_v58 = vld [vmem:[%s1370_s0 + $0x418] sm:$0xff]  ;;  %v619_v28 = vld [vmem:[%s1370_s0 + $0x320] sm:$0xff] }
  0x13   :  { %v251_v41 = vmul.f32 %v586_v29, %v719_v22  ;;  %v318_v52 = vadd.f32 %v302_v60, %v265_v37  ;;  %v304_v53 = vmul.f32 %v602_v34, %v721_v23  ;;  %v40_v54 = vmul.f32 %v702_v15, %v20_v35  ;;  %v635_v30 = vld [vmem:[%s1370_s0 + $0x3a0] sm:$0xff] }
  0x14   :  { %v370_v51 = vadd.f32 %v354_v47, %v317_v36  ;;  %v266_v56 = vadd.f32 %v250_v12, %v213_v43  ;;  %v161_v57 = vadd.f32 %v145_v33, %v108_v44  ;;  %v93_v59 = vmul.f32 %v539_v40, %v704_v16  ;;  %v587_v47 = vld [vmem:[%s1370_s0 + $0x220] sm:$0xff]  ;;  %v604_v40 = vld [vmem:[%s1370_s0 + $0x2a8] sm:$0xff] }
  0x15   :  { %v146_v61 = vmul.f32 %v555_v42, %v706_v17  ;;  %v371_v62 = vadd.f32 %v355_v4, %v318_v52  ;;  %v357_v63 = vmul.f32 %v618_v46, %v726_v25  ;;  %v410_v0 = vmul.f32 %v634_v50, %v728_v26  ;;  %v540_v4 = vld [vmem:[%s1370_s0 + $0xa8] sm:$0xff]  ;;  %v651_v36 = vld [vmem:[%s1370_s0 + $0x420] sm:$0xff] }
  0x16   :  { %v423_v60 = vadd.f32 %v773_v48, %v370_v51  ;;  %v319_v3 = vadd.f32 %v303_v24, %v266_v56  ;;  %v214_v6 = vadd.f32 %v198_v45, %v161_v57  ;;  %v109_v7 = vadd.f32 %v93_v59, %v40_v54  ;;  %v21_v48 = vld [vmem:[%s1370_s0 + $0x28] sm:$0xff]  ;;  %v22_v45 = vld [vmem:[%s1370_s0 + $0x30] sm:$0xff] }
  0x17   :  { %v199_v8 = vmul.f32 %v571_v55, %v711_v19  ;;  %v424_v11 = vadd.f32 %v408_v5, %v371_v62  ;;  %v463_v12 = vmul.f32 %v700_v14, %v650_v58  ;;  %v252_v13 = vmul.f32 %v587_v47, %v719_v22  ;;  %v620_v52 = vld [vmem:[%s1370_s0 + $0x328] sm:$0xff]  ;;  %v557_v54 = vld [vmem:[%s1370_s0 + $0x130] sm:$0xff] }
  0x18   :  { %v476_v10 = vadd.f32 %v776_v49, %v423_v60  ;;  %v372_v20 = vadd.f32 %v356_v31, %v319_v3  ;;  %v267_v21 = vadd.f32 %v251_v41, %v214_v6  ;;  %v162_v24 = vadd.f32 %v146_v61, %v109_v7  ;;  %v572_v49 = vld [vmem:[%s1370_s0 + $0x1a8] sm:$0xff] }
  0x19   :  { %v305_v27 = vmul.f32 %v603_v1, %v721_v23  ;;  %v477_v29 = vadd.f32 %v818_v9, %v424_v11  ;;  %v41_v31 = vmul.f32 %v702_v15, %v21_v48  ;;  %v94_v32 = vmul.f32 %v540_v4, %v704_v16  ;;  %v588_v9 = vld [vmem:[%s1370_s0 + $0x228] sm:$0xff]  ;;  %v589_v1 = vld [vmem:[%s1370_s0 + $0x230] sm:$0xff]  ;;  %v23_v48 = vld [vmem:[%s1370_s0 + $0x38] sm:$0xff] }
  0x1a   :  { %v499_v5 = vadd.f32 %v885_v2, %v476_v10  ;;  %v425_v33 = vadd.f32 %v409_v38, %v372_v20  ;;  %v320_v34 = vadd.f32 %v304_v53, %v267_v21  ;;  %v215_v35 = vadd.f32 %v199_v8, %v162_v24  ;;  %v541_v53 = vld [vmem:[%s1370_s0 + $0xb0] sm:$0xff]  ;;  %v636_v58 = vld [vmem:[%s1370_s0 + $0x3a8] sm:$0xff]  ;;  %v558_v20 = vld [vmem:[%s1370_s0 + $0x138] sm:$0xff] }
  0x1b   :  { %v147_v37 = vmul.f32 %v556_v18, %v706_v17  ;;  %v500_v38 = vadd.f32 %v885_v2, %v477_v29  ;;  %v358_v42 = vmul.f32 %v619_v28, %v726_v25  ;;  %v110_v43 = vadd.f32 %v94_v32, %v41_v31  ;;  %v652_v59 = vld [vmem:[%s1370_s0 + $0x428] sm:$0xff]  ;;  %v542_v18 = vld [vmem:[%s1370_s0 + $0xb8] sm:$0xff] }
  0x1c   :  { %515 = vst [vmem:[%s1372_s3] sm:$0xff] %v499_v5  ;;  %v200_v44 = vmul.f32 %v572_v49, %v711_v19  ;;  %v478_v41 = vadd.f32 %v847_v39, %v425_v33  ;;  %v373_v46 = vadd.f32 %v357_v63, %v320_v34  ;;  %v268_v50 = vadd.f32 %v252_v13, %v215_v35  ;;  %v573_v63 = vld [vmem:[%s1370_s0 + $0x1b0] sm:$0xff]  ;;  %v574_v33 = vld [vmem:[%s1370_s0 + $0x1b8] sm:$0xff] }
  0x1d   :  { %v411_v51 = vmul.f32 %v635_v30, %v728_v26  ;;  %516 = vst [vmem:[%s1372_s3 + $0x8] sm:$0xff] %v500_v38  ;;  %v464_v39 = vmul.f32 %v700_v14, %v651_v36  ;;  %v163_v55 = vadd.f32 %v147_v37, %v110_v43  ;;  %v253_v56 = vmul.f32 %v588_v9, %v719_v22  ;;  %v637_v49 = vld [vmem:[%s1370_s0 + $0x3b0] sm:$0xff]  ;;  %v590_v9 = vld [vmem:[%s1370_s0 + $0x238] sm:$0xff]  ;;  %v24_v38 = vld [vmem:[%s1370_s0 + $0x40] sm:$0xff] }
  0x1e   :  { %v306_v57 = vmul.f32 %v604_v40, %v721_v23  ;;  %v501_v61 = vadd.f32 %v885_v2, %v478_v41  ;;  %v426_v47 = vadd.f32 %v410_v0, %v373_v46  ;;  %v321_v60 = vadd.f32 %v305_v27, %v268_v50  ;;  %v605_v0 = vld [vmem:[%s1370_s0 + $0x2b0] sm:$0xff]  ;;  %v606_v40 = vld [vmem:[%s1370_s0 + $0x2b8] sm:$0xff]  ;;  %v543_v46 = vld [vmem:[%s1370_s0 + $0xc0] sm:$0xff] }
  0x1f   :  { %v42_v62 = vmul.f32 %v702_v15, %v22_v45  ;;  %v216_v3 = vadd.f32 %v200_v44, %v163_v55  ;;  %v359_v6 = vmul.f32 %v620_v52, %v726_v25  ;;  %v95_v7 = vmul.f32 %v541_v53, %v704_v16  ;;  %v653_v5 = vld [vmem:[%s1370_s0 + $0x430] sm:$0xff]  ;;  %v622_v41 = vld [vmem:[%s1370_s0 + $0x338] sm:$0xff]  ;;  %v575_v55 = vld [vmem:[%s1370_s0 + $0x1c0] sm:$0xff] }
  0x20   :  { %v148_v8 = vmul.f32 %v557_v54, %v706_v17  ;;  %517 = vst [vmem:[%s1372_s3 + $0x10] sm:$0xff] %v501_v61  ;;  %v479_v4 = vadd.f32 %v463_v12, %v426_v47  ;;  %v374_v10 = vadd.f32 %v358_v42, %v321_v60  ;;  %v412_v11 = vmul.f32 %v636_v58, %v728_v26  ;;  %v621_v12 = vld [vmem:[%s1370_s0 + $0x330] sm:$0xff]  ;;  %v638_v54 = vld [vmem:[%s1370_s0 + $0x3b8] sm:$0xff] }
  0x21   :  { %v465_v13 = vmul.f32 %v700_v14, %v652_v59  ;;  %v269_v21 = vadd.f32 %v253_v56, %v216_v3  ;;  %v111_v24 = vadd.f32 %v95_v7, %v42_v62  ;;  %v201_v27 = vmul.f32 %v573_v63, %v711_v19  ;;  %v654_v59 = vld [vmem:[%s1370_s0 + $0x438] sm:$0xff]  ;;  %v607_v3 = vld [vmem:[%s1370_s0 + $0x2c0] sm:$0xff] }
  0x22   :  { %v254_v28 = vmul.f32 %v589_v1, %v719_v22  ;;  %v502_v29 = vadd.f32 %v885_v2, %v479_v4  ;;  %v427_v30 = vadd.f32 %v411_v51, %v374_v10  ;;  %v307_v31 = vmul.f32 %v605_v0, %v721_v23  ;;  %v591_v1 = vld [vmem:[%s1370_s0 + $0x240] sm:$0xff] }
  0x23   :  { %v43_v32 = vmul.f32 %v702_v15, %v23_v48  ;;  %v322_v34 = vadd.f32 %v306_v57, %v269_v21  ;;  %v164_v35 = vadd.f32 %v148_v8, %v111_v24  ;;  %v96_v36 = vmul.f32 %v542_v18, %v704_v16  ;;  %v623_v4 = vld [vmem:[%s1370_s0 + $0x340] sm:$0xff]  ;;  %v544_v24 = vld [vmem:[%s1370_s0 + $0xc8] sm:$0xff] }
  0x24   :  { %v149_v37 = vmul.f32 %v558_v20, %v706_v17  ;;  %518 = vst [vmem:[%s1372_s3 + $0x18] sm:$0xff] %v502_v29  ;;  %v480_v42 = vadd.f32 %v464_v39, %v427_v30  ;;  %v360_v43 = vmul.f32 %v621_v12, %v726_v25  ;;  %v413_v44 = vmul.f32 %v637_v49, %v728_v26  ;;  %v559_v39 = vld [vmem:[%s1370_s0 + $0x140] sm:$0xff] }
  0x25   :  { %v1018_v45 = vmul.f32 %v700_v14, %v653_v5  ;;  %v375_v50 = vadd.f32 %v359_v6, %v322_v34  ;;  %v217_v51 = vadd.f32 %v201_v27, %v164_v35  ;;  %v112_v52 = vadd.f32 %v96_v36, %v43_v32  ;;  %v25_v6 = vld [vmem:[%s1370_s0 + $0x48] sm:$0xff]  ;;  %v639_v21 = vld [vmem:[%s1370_s0 + $0x3c0] sm:$0xff] }
  0x26   :  { %v202_v53 = vmul.f32 %v574_v33, %v711_v19  ;;  %v503_v56 = vadd.f32 %v885_v2, %v480_v42  ;;  %v255_v57 = vmul.f32 %v590_v9, %v719_v22  ;;  %v308_v58 = vmul.f32 %v606_v40, %v721_v23  ;;  %v560_v27 = vld [vmem:[%s1370_s0 + $0x148] sm:$0xff]  ;;  %v655_v49 = vld [vmem:[%s1370_s0 + $0x440] sm:$0xff] }
  0x27   :  { %v44_v61 = vmul.f32 %v702_v15, %v24_v38  ;;  %v428_v47 = vadd.f32 %v412_v11, %v375_v50  ;;  %v270_v60 = vadd.f32 %v254_v28, %v217_v51  ;;  %v165_v62 = vadd.f32 %v149_v37, %v112_v52  ;;  %v576_v33 = vld [vmem:[%s1370_s0 + $0x1c8] sm:$0xff]  ;;  %v26_v38 = vld [vmem:[%s1370_s0 + $0x50] sm:$0xff] }
  0x28   :  { %v97_v63 = vmul.f32 %v543_v46, %v704_v16  ;;  %519 = vst [vmem:[%s1372_s3 + $0x20] sm:$0xff] %v503_v56  ;;  %v361_v7 = vmul.f32 %v622_v41, %v726_v25  ;;  %v414_v8 = vmul.f32 %v638_v54, %v728_v26  ;;  %v150_v0 = vmul.f32 %v559_v39, %v706_v17  ;;  %v592_v34 = vld [vmem:[%s1370_s0 + $0x248] sm:$0xff]  ;;  %v545_v51 = vld [vmem:[%s1370_s0 + $0xd0] sm:$0xff] }
  0x29   :  { %v203_v48 = vmul.f32 %v575_v55, %v711_v19  ;;  %v481_v10 = vadd.f32 %v465_v13, %v428_v47  ;;  %v323_v11 = vadd.f32 %v307_v31, %v270_v60  ;;  %v218_v18 = vadd.f32 %v202_v53, %v165_v62  ;;  %v608_v35 = vld [vmem:[%s1370_s0 + $0x2c8] sm:$0xff]  ;;  %v561_v52 = vld [vmem:[%s1370_s0 + $0x150] sm:$0xff] }
  0x2a   :  { %v113_v20 = vadd.f32 %v97_v63, %v44_v61  ;;  %v467_v28 = vmul.f32 %v700_v14, %v654_v59  ;;  %v256_v12 = vmul.f32 %v591_v1, %v719_v22  ;;  %v309_v13 = vmul.f32 %v607_v3, %v721_v23  ;;  %v624_v50 = vld [vmem:[%s1370_s0 + $0x348] sm:$0xff]  ;;  %v577_v47 = vld [vmem:[%s1370_s0 + $0x1d0] sm:$0xff] }
  0x2b   :  { %v45_v5 = vmul.f32 %v702_v15, %v25_v6  ;;  %v504_v29 = vadd.f32 %v885_v2, %v481_v10  ;;  %v376_v30 = vadd.f32 %v360_v43, %v323_v11  ;;  %v271_v31 = vadd.f32 %v255_v57, %v218_v18  ;;  %v640_v55 = vld [vmem:[%s1370_s0 + $0x3c8] sm:$0xff]  ;;  %v609_v3 = vld [vmem:[%s1370_s0 + $0x2d0] sm:$0xff]  ;;  %v546_v10 = vld [vmem:[%s1370_s0 + $0xd8] sm:$0xff] }
  0x2c   :  { %v166_v32 = vadd.f32 %v150_v0, %v113_v20  ;;  %v362_v36 = vmul.f32 %v623_v4, %v726_v25  ;;  %v415_v37 = vmul.f32 %v639_v21, %v728_v26  ;;  %v98_v9 = vmul.f32 %v544_v24, %v704_v16  ;;  %v656_v59 = vld [vmem:[%s1370_s0 + $0x448] sm:$0xff]  ;;  %v27_v4 = vld [vmem:[%s1370_s0 + $0x58] sm:$0xff] }
  0x2d   :  { %v151_v40 = vmul.f32 %v560_v27, %v706_v17  ;;  %520 = vst [vmem:[%s1372_s3 + $0x28] sm:$0xff] %v504_v29  ;;  %v429_v42 = vadd.f32 %v413_v44, %v376_v30  ;;  %v324_v43 = vadd.f32 %v308_v58, %v271_v31  ;;  %v468_v46 = vmul.f32 %v700_v14, %v655_v49  ;;  %v562_v24 = vld [vmem:[%s1370_s0 + $0x158] sm:$0xff]  ;;  %v641_v31 = vld [vmem:[%s1370_s0 + $0x3d0] sm:$0xff] }
  0x2e   :  { %v219_v41 = vadd.f32 %v203_v48, %v166_v32  ;;  %v114_v53 = vadd.f32 %v98_v9, %v45_v5  ;;  %v204_v54 = vmul.f32 %v576_v33, %v711_v19  ;;  %v257_v44 = vmul.f32 %v592_v34, %v719_v22  ;;  %v578_v5 = vld [vmem:[%s1370_s0 + $0x1d8] sm:$0xff]  ;;  %v657_v32 = vld [vmem:[%s1370_s0 + $0x450] sm:$0xff] }
  0x2f   :  { %v310_v39 = vmul.f32 %v608_v35, %v721_v23  ;;  %v482_v56 = vadd.f32 %v1018_v45, %v429_v42  ;;  %v377_v57 = vadd.f32 %v361_v7, %v324_v43  ;;  %v46_v61 = vmul.f32 %v702_v15, %v26_v38  ;;  %v593_v45 = vld [vmem:[%s1370_s0 + $0x250] sm:$0xff]  ;;  %v594_v34 = vld [vmem:[%s1370_s0 + $0x258] sm:$0xff] }
  0x30   :  { %v272_v58 = vadd.f32 %v256_v12, %v219_v41  ;;  %v167_v60 = vadd.f32 %v151_v40, %v114_v53  ;;  %v363_v62 = vmul.f32 %v624_v50, %v726_v25  ;;  %v99_v63 = vmul.f32 %v545_v51, %v704_v16  ;;  %v610_v38 = vld [vmem:[%s1370_s0 + $0x2d8] sm:$0xff]  ;;  %v28_v51 = vld [vmem:[%s1370_s0 + $0x60] sm:$0xff] }
  0x31   :  { %v152_v1 = vmul.f32 %v561_v52, %v706_v17  ;;  %v505_v6 = vadd.f32 %v885_v2, %v482_v56  ;;  %v430_v7 = vadd.f32 %v414_v8, %v377_v57  ;;  %v416_v48 = vmul.f32 %v640_v55, %v728_v26  ;;  %v625_v8 = vld [vmem:[%s1370_s0 + $0x350] sm:$0xff]  ;;  %v563_v52 = vld [vmem:[%s1370_s0 + $0x160] sm:$0xff]  ;;  %v626_v55 = vld [vmem:[%s1370_s0 + $0x358] sm:$0xff] }
  0x32   :  { %v325_v0 = vadd.f32 %v309_v13, %v272_v58  ;;  %v220_v11 = vadd.f32 %v204_v54, %v167_v60  ;;  %v469_v18 = vmul.f32 %v700_v14, %v656_v59  ;;  %v115_v20 = vadd.f32 %v99_v63, %v46_v61  ;;  %v642_v61 = vld [vmem:[%s1370_s0 + $0x3d8] sm:$0xff] }
  0x33   :  { %v205_v21 = vmul.f32 %v577_v47, %v711_v19  ;;  %521 = vst [vmem:[%s1372_s3 + $0x30] sm:$0xff] %v505_v6  ;;  %v483_v27 = vadd.f32 %v467_v28, %v430_v7  ;;  %v258_v13 = vmul.f32 %v593_v45, %v719_v22  ;;  %v311_v49 = vmul.f32 %v609_v3, %v721_v23  ;;  %v579_v47 = vld [vmem:[%s1370_s0 + $0x1e0] sm:$0xff] }
  0x34   :  { %v378_v12 = vadd.f32 %v362_v36, %v325_v0  ;;  %v273_v29 = vadd.f32 %v257_v44, %v220_v11  ;;  %v168_v30 = vadd.f32 %v152_v1, %v115_v20  ;;  %v47_v28 = vmul.f32 %v702_v15, %v27_v4  ;;  %v595_v45 = vld [vmem:[%s1370_s0 + $0x260] sm:$0xff]  ;;  %v548_v11 = vld [vmem:[%s1370_s0 + $0xe8] sm:$0xff] }
  0x35   :  { %v100_v33 = vmul.f32 %v546_v10, %v704_v16  ;;  %v506_v35 = vadd.f32 %v885_v2, %v483_v27  ;;  %v364_v9 = vmul.f32 %v625_v8, %v726_v25  ;;  %v153_v40 = vmul.f32 %v562_v24, %v706_v17  ;;  %v611_v4 = vld [vmem:[%s1370_s0 + $0x2e0] sm:$0xff]  ;;  %v29_v10 = vld [vmem:[%s1370_s0 + $0x68] sm:$0xff] }
  0x36   :  { %v431_v36 = vadd.f32 %v415_v37, %v378_v12  ;;  %v326_v42 = vadd.f32 %v310_v39, %v273_v29  ;;  %v221_v43 = vadd.f32 %v205_v21, %v168_v30  ;;  %v206_v50 = vmul.f32 %v578_v5, %v711_v19  ;;  %v547_v37 = vld [vmem:[%s1370_s0 + $0xe0] sm:$0xff]  ;;  %v564_v24 = vld [vmem:[%s1370_s0 + $0x168] sm:$0xff] }
  0x37   :  { %v116_v41 = vadd.f32 %v100_v33, %v47_v28  ;;  %522 = vst [vmem:[%s1372_s3 + $0x38] sm:$0xff] %v506_v35  ;;  %v417_v54 = vmul.f32 %v641_v31, %v728_v26  ;;  %v470_v44 = vmul.f32 %v700_v14, %v657_v32  ;;  %v259_v39 = vmul.f32 %v594_v34, %v719_v22  ;;  %v627_v5 = vld [vmem:[%s1370_s0 + $0x360] sm:$0xff]  ;;  %v580_v29 = vld [vmem:[%s1370_s0 + $0x1e8] sm:$0xff] }
  0x38   :  { %v484_v53 = vadd.f32 %v468_v46, %v431_v36  ;;  %v379_v56 = vadd.f32 %v363_v62, %v326_v42  ;;  %v274_v57 = vadd.f32 %v258_v13, %v221_v43  ;;  %v312_v59 = vmul.f32 %v610_v38, %v721_v23  ;;  %v658_v46 = vld [vmem:[%s1370_s0 + $0x458] sm:$0xff]  ;;  %v643_v32 = vld [vmem:[%s1370_s0 + $0x3e0] sm:$0xff]  ;;  %v612_v38 = vld [vmem:[%s1370_s0 + $0x2e8] sm:$0xff] }
  0x39   :  { %v169_v58 = vadd.f32 %v153_v40, %v116_v41  ;;  %v48_v62 = vmul.f32 %v702_v15, %v28_v51  ;;  %v101_v63 = vmul.f32 %v547_v37, %v704_v16  ;;  %v154_v1 = vmul.f32 %v563_v52, %v706_v17  ;;  %v596_v40 = vld [vmem:[%s1370_s0 + $0x268] sm:$0xff]  ;;  %v30_v51 = vld [vmem:[%s1370_s0 + $0x70] sm:$0xff] }
  0x3a   :  { %v507_v60 = vadd.f32 %v885_v2, %v484_v53  ;;  %v432_v3 = vadd.f32 %v416_v48, %v379_v56  ;;  %v327_v6 = vadd.f32 %v311_v49, %v274_v57  ;;  %v365_v0 = vmul.f32 %v626_v55, %v726_v25  ;;  %v549_v37 = vld [vmem:[%s1370_s0 + $0xf0] sm:$0xff]  ;;  %v628_v55 = vld [vmem:[%s1370_s0 + $0x368] sm:$0xff] }
  0x3b   :  { %v222_v7 = vadd.f32 %v206_v50, %v169_v58  ;;  %v418_v48 = vmul.f32 %v642_v61, %v728_v26  ;;  %v471_v20 = vmul.f32 %v700_v14, %v658_v46  ;;  %v117_v21 = vadd.f32 %v101_v63, %v48_v62  ;;  %v565_v56 = vld [vmem:[%s1370_s0 + $0x170] sm:$0xff]  ;;  %v660_v62 = vld [vmem:[%s1370_s0 + $0x468] sm:$0xff] }
  0x3c   :  { %523 = vst [vmem:[%s1372_s3 + $0x40] sm:$0xff] %v507_v60  ;;  %v207_v8 = vmul.f32 %v579_v47, %v711_v19  ;;  %v485_v27 = vadd.f32 %v469_v18, %v432_v3  ;;  %v380_v12 = vadd.f32 %v364_v9, %v327_v6  ;;  %v260_v49 = vmul.f32 %v595_v45, %v719_v22  ;;  %v659_v18 = vld [vmem:[%s1370_s0 + $0x460] sm:$0xff]  ;;  %v581_v46 = vld [vmem:[%s1370_s0 + $0x1f0] sm:$0xff] }
  0x3d   :  { %v275_v13 = vadd.f32 %v259_v39, %v222_v7  ;;  %v170_v30 = vadd.f32 %v154_v1, %v117_v21  ;;  %v313_v31 = vmul.f32 %v611_v4, %v721_v23  ;;  %v49_v28 = vmul.f32 %v702_v15, %v29_v10  ;;  %v597_v45 = vld [vmem:[%s1370_s0 + $0x270] sm:$0xff]  ;;  %v31_v10 = vld [vmem:[%s1370_s0 + $0x78] sm:$0xff] }
  0x3e   :  { %v102_v33 = vmul.f32 %v548_v11, %v704_v16  ;;  %v508_v34 = vadd.f32 %v885_v2, %v485_v27  ;;  %v433_v35 = vadd.f32 %v417_v54, %v380_v12  ;;  %v155_v9 = vmul.f32 %v564_v24, %v706_v17  ;;  %v613_v4 = vld [vmem:[%s1370_s0 + $0x2f0] sm:$0xff]  ;;  %v550_v24 = vld [vmem:[%s1370_s0 + $0xf8] sm:$0xff] }
  0x3f   :  { %v328_v36 = vadd.f32 %v312_v59, %v275_v13  ;;  %v223_v42 = vadd.f32 %v207_v8, %v170_v30  ;;  %v366_v43 = vmul.f32 %v627_v5, %v726_v25  ;;  %v208_v50 = vmul.f32 %v580_v29, %v711_v19  ;;  %v566_v27 = vld [vmem:[%s1370_s0 + $0x178] sm:$0xff] }
  0x40   :  { %v118_v41 = vadd.f32 %v102_v33, %v49_v28  ;;  %524 = vst [vmem:[%s1372_s3 + $0x48] sm:$0xff] %v508_v34  ;;  %v486_v52 = vadd.f32 %v470_v44, %v433_v35  ;;  %v419_v54 = vmul.f32 %v643_v32, %v728_v26  ;;  %v472_v39 = vmul.f32 %v700_v14, %v659_v18  ;;  %v644_v44 = vld [vmem:[%s1370_s0 + $0x3e8] sm:$0xff]  ;;  %v598_v29 = vld [vmem:[%s1370_s0 + $0x278] sm:$0xff] }
  0x41   :  { %v381_v53 = vadd.f32 %v365_v0, %v328_v36  ;;  %v276_v57 = vadd.f32 %v260_v49, %v223_v42  ;;  %v261_v59 = vmul.f32 %v596_v40, %v719_v22  ;;  %v314_v61 = vmul.f32 %v612_v38, %v721_v23  ;;  %v614_v30 = vld [vmem:[%s1370_s0 + $0x2f8] sm:$0xff]  ;;  %v629_v36 = vld [vmem:[%s1370_s0 + $0x370] sm:$0xff] }
  0x42   :  { %v171_v58 = vadd.f32 %v155_v9, %v118_v41  ;;  %v509_v47 = vadd.f32 %v885_v2, %v486_v52  ;;  %v50_v63 = vmul.f32 %v702_v15, %v30_v51  ;;  %v103_v1 = vmul.f32 %v549_v37, %v704_v16  ;;  %v630_v33 = vld [vmem:[%s1370_s0 + $0x378] sm:$0xff]  ;;  %v645_v51 = vld [vmem:[%s1370_s0 + $0x3f0] sm:$0xff] }
  0x43   :  { %v434_v60 = vadd.f32 %v418_v48, %v381_v53  ;;  %v329_v3 = vadd.f32 %v313_v31, %v276_v57  ;;  %v367_v7 = vmul.f32 %v628_v55, %v726_v25  ;;  %v156_v0 = vmul.f32 %v565_v56, %v706_v17  ;;  %v646_v38 = vld [vmem:[%s1370_s0 + $0x3f8] sm:$0xff] }
  0x44   :  { %v224_v6 = vadd.f32 %v208_v50, %v171_v58  ;;  %525 = vst [vmem:[%s1372_s3 + $0x50] sm:$0xff] %v509_v47  ;;  %v420_v48 = vmul.f32 %v644_v44, %v728_v26  ;;  %v119_v21 = vadd.f32 %v103_v1, %v50_v63  ;;  %v209_v8 = vmul.f32 %v581_v46, %v711_v19 }
  0x45   :  { %v487_v11 = vadd.f32 %v471_v20, %v434_v60  ;;  %v382_v12 = vadd.f32 %v366_v43, %v329_v3  ;;  %v473_v49 = vmul.f32 %v700_v14, %v660_v62  ;;  %v262_v5 = vmul.f32 %v597_v45, %v719_v22  ;;  %v582_v20 = vld [vmem:[%s1370_s0 + $0x1f8] sm:$0xff] }
  0x46   :  { %v277_v13 = vadd.f32 %v261_v59, %v224_v6  ;;  %v172_v32 = vadd.f32 %v156_v0, %v119_v21  ;;  %v315_v18 = vmul.f32 %v613_v4, %v721_v23  ;;  %v51_v28 = vmul.f32 %v702_v15, %v31_v10  ;;  %v662_v15 = vld [vmem:[%s1370_s0 + $0x478] sm:$0xff] }
  0x47   :  { %v510_v31 = vadd.f32 %v885_v2, %v487_v11  ;;  %v435_v34 = vadd.f32 %v419_v54, %v382_v12  ;;  %v104_v9 = vmul.f32 %v550_v24, %v704_v16  ;;  %v157_v40 = vmul.f32 %v566_v27, %v706_v17 }
  0x48   :  { %v330_v35 = vadd.f32 %v314_v61, %v277_v13  ;;  %v225_v42 = vadd.f32 %v209_v8, %v172_v32  ;;  %v210_v43 = vmul.f32 %v582_v20, %v711_v19  ;;  %v263_v41 = vmul.f32 %v598_v29, %v719_v22 }
  0x49   :  { %526 = vst [vmem:[%s1372_s3 + $0x58] sm:$0xff] %v510_v31  ;;  %v316_v16 = vmul.f32 %v614_v30, %v721_v23  ;;  %v488_v17 = vadd.f32 %v472_v39, %v435_v34  ;;  %v120_v37 = vadd.f32 %v104_v9, %v51_v28  ;;  %v369_v52 = vmul.f32 %v630_v33, %v726_v25  ;;  %v661_v23 = vld [vmem:[%s1370_s0 + $0x470] sm:$0xff] }
  0x4a   :  { %v383_v50 = vadd.f32 %v367_v7, %v330_v35  ;;  %v278_v53 = vadd.f32 %v262_v5, %v225_v42  ;;  %v368_v54 = vmul.f32 %v629_v36, %v726_v25  ;;  %v422_v55 = vmul.f32 %v646_v38, %v728_v26 }
  0x4b   :  { %v475_v19 = vmul.f32 %v700_v14, %v662_v15  ;;  %v511_v22 = vadd.f32 %v885_v2, %v488_v17  ;;  %v173_v39 = vadd.f32 %v157_v40, %v120_v37  ;;  %v421_v58 = vmul.f32 %v645_v51, %v728_v26 }
  0x4c   :  { %v436_v56 = vadd.f32 %v420_v48, %v383_v50  ;;  %v331_v57 = vadd.f32 %v315_v18, %v278_v53  ;;  %v474_v44 = vmul.f32 %v700_v14, %v661_v23 }
  0x4d   :  { %527 = vst [vmem:[%s1372_s3 + $0x60] sm:$0xff] %v511_v22  ;;  %v226_v59 = vadd.f32 %v210_v43, %v173_v39 }
  0x4e   :  { %v489_v25 = vadd.f32 %v473_v49, %v436_v56  ;;  %v384_v61 = vadd.f32 %v368_v54, %v331_v57 }
  0x4f   :  { %v279_v47 = vadd.f32 %v263_v41, %v226_v59 }
  0x50   :  { %v512_v46 = vadd.f32 %v885_v2, %v489_v25  ;;  %v437_v60 = vadd.f32 %v421_v58, %v384_v61 }
  0x51   :  { %v332_v62 = vadd.f32 %v316_v16, %v279_v47 }
  0x52   :  { %528 = vst [vmem:[%s1372_s3 + $0x68] sm:$0xff] %v512_v46  ;;  %v490_v63 = vadd.f32 %v474_v44, %v437_v60 }
  0x53   :  { %v385_v26 = vadd.f32 %v369_v52, %v332_v62 }
  0x54   :  { %v513_v1 = vadd.f32 %v885_v2, %v490_v63 }
  0x55   :  { %v438_v45 = vadd.f32 %v422_v55, %v385_v26 }
  0x56   :  { %529 = vst [vmem:[%s1372_s3 + $0x70] sm:$0xff] %v513_v1 }
  0x57   :  { %v491_v3 = vadd.f32 %v475_v19, %v438_v45 }
  0x59   :  { %v514_v14 = vadd.f32 %v885_v2, %v491_v3 }
  0x5b   :  { %530 = vst [vmem:[%s1372_s3 + $0x78] sm:$0xff] %v514_v14 }

// kernel: squeezeformer_encoder.30
= control target key start
LH: loop header
LB: loop body
LE: loop exit
PB: predicated region body
PF: predicated region fallthrough
CT: control target
= control target key end

     0   :  { %s835_s1 = inlined_call_operand.vmem [shape: bf16[512,128], index: 1, kind: input, shape index: {}]   ;;  %s836_s0 = inlined_call_operand.vmem [shape: f32[32,512], index: 0, kind: input, shape index: {}]   ;;  %s837_s2 = inlined_call_operand.vmem [shape: f32[1,128], index: 2, kind: input, shape index: {}]   ;;  %s838_s3 = inlined_call_operand.vmem [shape: f32[32,128], index: 3, kind: input, shape index: {}]   ;;  %s839_s4 = inlined_call_operand.vmem [shape: f32[1,128], index: 4, kind: input, shape index: {}]   ;;  %s840_s5 = inlined_call_operand.vmem [shape: f32[1,128], index: 5, kind: input, shape index: {}]   ;;  %s841_s6 = inlined_call_operand.vmem [shape: f32[32,128], index: 6, kind: output, shape index: {}]  }
   0x1   :  { %v583_v0 = vld [vmem:[%s835_s1 + $0x78] sm:$0xff]   ;;  %v587_v4 = vld [vmem:[%s835_s1 + $0x70] sm:$0xff]   ;;  %v591_v8 = vld [vmem:[%s835_s1 + $0x68] sm:$0xff]  }
   0x2   :  { %v584_v1 = vld [vmem:[%s835_s1 + $0xf8] sm:$0xff]   ;;  %527 = vmatprep.subr.bf16.mxu0 %v583_v0  ;;  %v588_v5 = vld [vmem:[%s835_s1 + $0xf0] sm:$0xff]   ;;  %v592_v9 = vld [vmem:[%s835_s1 + $0xe8] sm:$0xff]  }
   0x3   :  { %v585_v2 = vld [vmem:[%s835_s1 + $0x38] sm:$0xff]   ;;  %555 = vmatprep.subr.bf16.mxu1 %v584_v1  ;;  %v589_v6 = vld [vmem:[%s835_s1 + $0x30] sm:$0xff]   ;;  %v593_v10 = vld [vmem:[%s835_s1 + $0x28] sm:$0xff]  }
   0x4   :  { %v586_v3 = vld [vmem:[%s835_s1 + $0xb8] sm:$0xff]   ;;  %528 = vmatpush3.bf16.msra.mxu0 %v585_v2  ;;  %v590_v7 = vld [vmem:[%s835_s1 + $0xb0] sm:$0xff]   ;;  %v594_v11 = vld [vmem:[%s835_s1 + $0xa8] sm:$0xff]  }
   0x5   :  { %556 = vmatpush3.bf16.msra.mxu1 %v586_v3  ;;  %529 = vmatprep.subr.bf16.mxu0 %v587_v4  ;;  %v595_v12 = vld [vmem:[%s835_s1 + $0x60] sm:$0xff]   ;;  %v599_v16 = vld [vmem:[%s835_s1 + $0x58] sm:$0xff]   ;;  %v603_v20 = vld [vmem:[%s835_s1 + $0x50] sm:$0xff]  }
   0x6   :  { %557 = vmatprep.subr.bf16.mxu1 %v588_v5  ;;  %v596_v13 = vld [vmem:[%s835_s1 + $0xe0] sm:$0xff]   ;;  %v600_v17 = vld [vmem:[%s835_s1 + $0xd8] sm:$0xff]   ;;  %v604_v21 = vld [vmem:[%s835_s1 + $0xd0] sm:$0xff]  }
   0x7   :  { %v597_v14 = vld [vmem:[%s835_s1 + $0x20] sm:$0xff]   ;;  %v601_v18 = vld [vmem:[%s835_s1 + $0x18] sm:$0xff]   ;;  %v605_v22 = vld [vmem:[%s835_s1 + $0x10] sm:$0xff]  }
   0x8   :  { %530 = vmatpush3.bf16.msra.mxu0 %v589_v6  ;;  %v598_v15 = vld [vmem:[%s835_s1 + $0xa0] sm:$0xff]   ;;  %v602_v19 = vld [vmem:[%s835_s1 + $0x98] sm:$0xff]   ;;  %v606_v23 = vld [vmem:[%s835_s1 + $0x90] sm:$0xff]  }
   0x9   :  { %558 = vmatpush3.bf16.msra.mxu1 %v590_v7  ;;  %531 = vmatprep.subr.bf16.mxu0 %v591_v8  ;;  %v607_v24 = vld [vmem:[%s835_s1 + $0x48] sm:$0xff]   ;;  %v611_v28 = vld [vmem:[%s835_s1 + $0x40] sm:$0xff]   ;;  %v27_v34 = vld [vmem:[%s836_s0 + $0x18] sm:$0xff] }
   0xa   :  { %559 = vmatprep.subr.bf16.mxu1 %v592_v9  ;;  %v608_v25 = vld [vmem:[%s835_s1 + $0xc8] sm:$0xff]   ;;  %v612_v29 = vld [vmem:[%s835_s1 + $0xc0] sm:$0xff]   ;;  %v31_v36 = vld [vmem:[%s836_s0 + $0x38] sm:$0xff] }
   0xb   :  { %v609_v26 = vld [vmem:[%s835_s1 + $0x8] sm:$0xff]   ;;  %v613_v30 = vld [vmem:[%s835_s1] sm:$0xff]   ;;  %v43_v39 = vpack.c.bf16 %v31_v36, %v27_v34  ;;  %v26_v41 = vld [vmem:[%s836_s0 + $0x10] sm:$0xff] }
   0xc   :  { %532 = vmatpush3.bf16.msra.mxu0 %v593_v10  ;;  %v610_v27 = vld [vmem:[%s835_s1 + $0x88] sm:$0xff]   ;;  %v614_v31 = vld [vmem:[%s835_s1 + $0x80] sm:$0xff]   ;;  %v30_v42 = vld [vmem:[%s836_s0 + $0x30] sm:$0xff] }
   0xd   :  { %560 = vmatpush3.bf16.msra.mxu1 %v594_v11  ;;  %533 = vmatprep.subr.bf16.mxu0 %v595_v12  ;;  %v25_v32 = vld [vmem:[%s836_s0 + $0x8] sm:$0xff]  ;;  %v24_v37 = vld [vmem:[%s836_s0] sm:$0xff]  ;;  %v42_v44 = vpack.c.bf16 %v30_v42, %v26_v41  ;;  %v35_v46 = vld [vmem:[%s836_s0 + $0x58] sm:$0xff] }
   0xe   :  { %561 = vmatprep.subr.bf16.mxu1 %v596_v13  ;;  %v29_v33 = vld [vmem:[%s836_s0 + $0x28] sm:$0xff]  ;;  %v28_v38 = vld [vmem:[%s836_s0 + $0x20] sm:$0xff]  ;;  %v39_v47 = vld [vmem:[%s836_s0 + $0x78] sm:$0xff]  ;;  %392 = vmatprep.mubr.bf16.mxu1 %v43_v39 }
   0xf   :  { %v41_v35 = vpack.c.bf16 %v29_v33, %v25_v32  ;;  %v40_v40 = vpack.c.bf16 %v28_v38, %v24_v37  ;;  %v33_v43 = vld [vmem:[%s836_s0 + $0x48] sm:$0xff]  ;;  %v47_v49 = vpack.c.bf16 %v39_v47, %v35_v46  ;;  %v32_v50 = vld [vmem:[%s836_s0 + $0x40] sm:$0xff]  ;;  %v34_v52 = vld [vmem:[%s836_s0 + $0x50] sm:$0xff] }
  0x10   :  { %534 = vmatpush3.bf16.msra.mxu0 %v597_v14  ;;  %v37_v45 = vld [vmem:[%s836_s0 + $0x68] sm:$0xff]  ;;  %v36_v51 = vld [vmem:[%s836_s0 + $0x60] sm:$0xff]  ;;  %v38_v53 = vld [vmem:[%s836_s0 + $0x70] sm:$0xff] }
  0x11   :  { %562 = vmatpush3.bf16.msra.mxu1 %v598_v15  ;;  %535 = vmatprep.subr.bf16.mxu0 %v599_v16  ;;  %v45_v48 = vpack.c.bf16 %v37_v45, %v33_v43  ;;  %v44_v54 = vpack.c.bf16 %v36_v51, %v32_v50  ;;  %v46_v55 = vpack.c.bf16 %v38_v53, %v34_v52  ;;  %v492_v58 = vld [vmem:[%s837_s2] ss:$0 sm:$0xff]  ;;  %v410_v13 = vld [vmem:[%s838_s3 + $0x8] sm:$0xff] }
  0x12   :  { %563 = vmatprep.subr.bf16.mxu1 %v600_v17  ;;  %343 = vmatprep.mubr.bf16.mxu0 %v41_v35  ;;  %v409_v3 = vld [vmem:[%s838_s3] sm:$0xff] }
  0x14   :  { %536 = vmatpush3.bf16.msra.mxu0 %v601_v18 }
  0x15   :  { %564 = vmatpush3.bf16.msra.mxu1 %v602_v19  ;;  %537 = vmatprep.subr.bf16.mxu0 %v603_v20 }
  0x16   :  { %565 = vmatprep.subr.bf16.mxu1 %v604_v21 }
  0x18   :  { %538 = vmatpush3.bf16.msra.mxu0 %v605_v22 }
  0x19   :  { %566 = vmatpush3.bf16.msra.mxu1 %v606_v23  ;;  %539 = vmatprep.subr.bf16.mxu0 %v607_v24  ;;  %v411_v23 = vld [vmem:[%s838_s3 + $0x10] sm:$0xff] }
  0x1a   :  { %567 = vmatprep.subr.bf16.mxu1 %v608_v25 }
  0x1c   :  { %540 = vmatpush3.bf16.msra.mxu0 %v609_v26 }
  0x1d   :  { %568 = vmatpush3.bf16.msra.mxu1 %v610_v27  ;;  %541 = vmatprep.subr.bf16.mxu0 %v611_v28 }
  0x1e   :  { %569 = vmatprep.subr.bf16.mxu1 %v612_v29 }
  0x20   :  { %542 = vmatpush3.bf16.msra.mxu0 %v613_v30  ;;  %v412_v30 = vld [vmem:[%s838_s3 + $0x18] sm:$0xff] }
  0x21   :  { %570 = vmatpush3.bf16.msra.mxu1 %v614_v31 }
  0x23   :  { %344 = vmatmul.mubr.bf16.vlgmr.msra.gmra.mxu0 %v40_v40 }
  0x24   :  { %393 = vmatmul.mubr.bf16.vlgmr.msra.gmra.mxu1 %v42_v44  ;;  %351 = vmatprep.mubr.bf16.mxu0 %v45_v48 }
  0x25   :  { %400 = vmatprep.mubr.bf16.mxu1 %v47_v49 }
  0x2b   :  { %352 = vmatmul.mubr.bf16.gmra.mxu0 %v44_v54 }
  0x2c   :  { %401 = vmatmul.mubr.bf16.gmra.mxu1 %v46_v55 }
  0xe3   :  { %v543_v56 = vpop.f32.mrf.mxu0 }
  0xe4   :  { %v571_v57 = vpop.f32.mrf.mxu1 }
  0xe5   :  { %v544_v59 = vpop.f32.mrf.mxu0 }
  0xe6   :  { %v545_v60 = vadd.f32 %v544_v59, %v543_v56  ;;  %v572_v61 = vpop.f32.mrf.mxu1 }
  0xe7   :  { %v546_v62 = vpop.f32.mrf.mxu0  ;;  %v573_v0 = vadd.f32 %v572_v61, %v571_v57 }
  0xe8   :  { %v346_v63 = vadd.f32 %v545_v60, %v492_v58  ;;  %v574_v1 = vpop.f32.mrf.mxu1 }
  0xe9   :  { %v547_v2 = vpop.f32.mrf.mxu0 }
  0xea   :  { %v395_v4 = vadd.f32 %v573_v0, %v346_v63  ;;  %v548_v5 = vadd.f32 %v547_v2, %v546_v62  ;;  %v575_v6 = vpop.f32.mrf.mxu1  ;;  %v525_v62 = vld [vmem:[%s839_s4] ss:$0 sm:$0xff] }
  0xeb   :  { %v549_v7 = vpop.f32.mrf.mxu0  ;;  %v576_v9 = vadd.f32 %v575_v6, %v574_v1  ;;  %v526_v0 = vld [vmem:[%s840_s5] ss:$0 sm:$0xff] }
  0xec   :  { %v349_v8 = vadd.f32 %v548_v5, %v492_v58  ;;  %v577_v10 = vpop.f32.mrf.mxu1  ;;  %v413_v11 = vadd.f32 %v409_v3, %v395_v4 }
  0xed   :  { %v550_v12 = vpop.f32.mrf.mxu0 }
  0xee   :  { %v398_v14 = vadd.f32 %v576_v9, %v349_v8  ;;  %v551_v15 = vadd.f32 %v550_v12, %v549_v7  ;;  %v578_v16 = vpop.f32.mrf.mxu1  ;;  %417 = vadd.xlane.f32.xlu0 %v413_v11 }
  0xef   :  { %v552_v17 = vpop.f32.mrf.mxu0  ;;  %v579_v19 = vadd.f32 %v578_v16, %v577_v10 }
  0xf0   :  { %v354_v18 = vadd.f32 %v551_v15, %v492_v58  ;;  %v580_v20 = vpop.f32.mrf.mxu1  ;;  %v414_v21 = vadd.f32 %v410_v13, %v398_v14 }
  0xf1   :  { %v553_v22 = vpop.f32.mrf.mxu0 }
  0xf2   :  { %v403_v24 = vadd.f32 %v579_v19, %v354_v18  ;;  %v554_v25 = vadd.f32 %v553_v22, %v552_v17  ;;  %v581_v26 = vpop.f32.mrf.mxu1  ;;  %419 = vadd.xlane.f32.xlu0 %v414_v21 }
  0xf3   :  { %v582_v28 = vadd.f32 %v581_v26, %v580_v20 }
  0xf4   :  { %v357_v27 = vadd.f32 %v554_v25, %v492_v58  ;;  %v415_v29 = vadd.f32 %v411_v23, %v403_v24 }
  0xf6   :  { %v406_v31 = vadd.f32 %v582_v28, %v357_v27  ;;  %421 = vadd.xlane.f32.xlu1 %v415_v29 }
  0xf8   :  { %v416_v32 = vadd.f32 %v412_v30, %v406_v31 }
  0xfa   :  { %423 = vadd.xlane.f32.xlu1 %v416_v32 }
 0x177   :  { %v418_v33 = vpop.xlane.xlu0 %417 }
 0x178   :  { %v426_v34 = vmul.f32 0.0078125, %v418_v33 }
 0x17a   :  { %v430_v35 = vsub.f32 %v413_v11, %v426_v34 }
 0x17b   :  { %v420_v36 = vpop.xlane.xlu0 %419 }
 0x17c   :  { %v427_v37 = vmul.f32 0.0078125, %v420_v36  ;;  %v434_v38 = vmul.f32 %v430_v35, %v430_v35 }
 0x17e   :  { %v431_v39 = vsub.f32 %v414_v21, %v427_v37  ;;  %438 = vadd.xlane.f32.xlu0 %v434_v38 }
 0x17f   :  { %v422_v40 = vpop.xlane.xlu1 %421 }
 0x180   :  { %v428_v41 = vmul.f32 0.0078125, %v422_v40  ;;  %v435_v42 = vmul.f32 %v431_v39, %v431_v39 }
 0x182   :  { %v432_v43 = vsub.f32 %v415_v29, %v428_v41  ;;  %440 = vadd.xlane.f32.xlu1 %v435_v42 }
 0x183   :  { %v424_v44 = vpop.xlane.xlu1 %423 }
 0x184   :  { %v429_v45 = vmul.f32 0.0078125, %v424_v44  ;;  %v436_v46 = vmul.f32 %v432_v43, %v432_v43 }
 0x186   :  { %v433_v47 = vsub.f32 %v416_v32, %v429_v45  ;;  %442 = vadd.xlane.f32.xlu0 %v436_v46 }
 0x188   :  { %v437_v48 = vmul.f32 %v433_v47, %v433_v47 }
 0x18a   :  { %444 = vadd.xlane.f32.xlu1 %v437_v48 }
 0x207   :  { %v439_v49 = vpop.xlane.xlu0 %438 }
 0x208   :  { %v446_v50 = vmul.f32 0.0078125, %v439_v49 }
 0x20a   :  { %v450_v51 = vadd.f32 1e-05, %v446_v50 }
 0x20b   :  { %v441_v52 = vpop.xlane.xlu1 %440 }
 0x20c   :  { %615 = vrsqrt.f32 %v450_v51  ;;  %v447_v53 = vmul.f32 0.0078125, %v441_v52 }
 0x20e   :  { %v451_v54 = vadd.f32 1e-05, %v447_v53 }
 0x20f   :  { %v443_v55 = vpop.xlane.xlu0 %442 }
 0x210   :  { %617 = vrsqrt.f32 %v451_v54  ;;  %v448_v56 = vmul.f32 0.0078125, %v443_v55 }
 0x212   :  { %v452_v57 = vadd.f32 1e-05, %v448_v56 }
 0x213   :  { %v445_v58 = vpop.xlane.xlu1 %444 }
 0x214   :  { %619 = vrsqrt.f32 %v452_v57  ;;  %v449_v59 = vmul.f32 0.0078125, %v445_v58 }
 0x216   :  { %v453_v60 = vadd.f32 1e-05, %v449_v59 }
 0x218   :  { %621 = vrsqrt.f32 %v453_v60 }
 0x219   :  { %v616_v61 = vpop.eup %615 }
 0x21a   :  { %v458_v63 = vmul.f32 %v616_v61, %v430_v35 }
 0x21c   :  { %v469_v1 = vmul.f32 %v525_v62, %v458_v63 }
 0x21d   :  { %v618_v2 = vpop.eup %617 }
 0x21e   :  { %v480_v3 = vadd.f32 %v526_v0, %v469_v1  ;;  %v459_v4 = vmul.f32 %v618_v2, %v431_v39 }
 0x220   :  { %484 = vst [vmem:[%s841_s6] sm:$0xff] %v480_v3  ;;  %v470_v5 = vmul.f32 %v525_v62, %v459_v4 }
 0x221   :  { %v620_v6 = vpop.eup %619 }
 0x222   :  { %v481_v7 = vadd.f32 %v526_v0, %v470_v5  ;;  %v460_v8 = vmul.f32 %v620_v6, %v432_v43 }
 0x224   :  { %485 = vst [vmem:[%s841_s6 + $0x8] sm:$0xff] %v481_v7  ;;  %v471_v9 = vmul.f32 %v525_v62, %v460_v8 }
 0x225   :  { %v622_v10 = vpop.eup %621 }
 0x226   :  { %v482_v11 = vadd.f32 %v526_v0, %v471_v9  ;;  %v461_v12 = vmul.f32 %v622_v10, %v433_v47 }
 0x228   :  { %486 = vst [vmem:[%s841_s6 + $0x10] sm:$0xff] %v482_v11  ;;  %v472_v13 = vmul.f32 %v525_v62, %v461_v12 }
 0x22a   :  { %v483_v14 = vadd.f32 %v526_v0, %v472_v13 }
 0x22c   :  { %487 = vst [vmem:[%s841_s6 + $0x18] sm:$0xff] %v483_v14 }

// kernel: squeezeformer_encoder.31
= control target key start
LH: loop header
LB: loop body
LE: loop exit
PB: predicated region body
PF: predicated region fallthrough
CT: control target
= control target key end

     0   :  { %s547_s15 = smov 0   ;;  %s549_s16 = smov 0   ;;  %s593_s0 = inlined_call_operand.vmem [shape: f32[2,10,128], index: 0, kind: input, shape index: {}]   ;;  %s594_s1 = inlined_call_operand.vmem [shape: f32[2,10,128], index: 1, kind: input, shape index: {}]   ;;  %s595_s2 = inlined_call_operand.vmem [shape: f32[5,128], index: 2, kind: input, shape index: {}]   ;;  %s596_s3 = inlined_call_operand.vmem [shape: f32[1,128], index: 3, kind: input, shape index: {}]   ;;  %s597_s4 = inlined_call_operand.vmem [shape: f32[2,8,128], index: 4, kind: output, shape index: {}]  }
   0x1   :  { %s551_s17 = smov 0  }
   0x2 LB: > { %s26_s18 = sadd.s32 1, %s516_s16  ;;  %p463_p0 = scmp.ge.s32.totalorder %s520_s17, 1  ;;  %s520_s17 = sphi %s551_s17, %s14_s17   ;;  %s516_s16 = sphi %s549_s16, %s599_s16   ;;  %s512_s15 = sphi %s547_s15, %s598_s15  }
   0x3   : > { %p28_p1 = scmp.ge.s32.totalorder %s26_s18, 2  ;;  %p213_p2 = scmp.lt.s32.totalorder %s520_s17, 3 }
   0x5   : > { %s601_s18 = smov (%p28_p1, %s26_s18), 0  ;;  %p214_p3 = pnand %p463_p0, %p213_p2 }
   0x6   : > { %p259_p4 = scmp.lt.s32.totalorder (!%p214_p3), %s512_s15, 1 }
   0x7   : > { %217 = sbr.rel (%p214_p3) target bundleno = 33 (0x21), region = 36 }
   0xc   : > { %v291_v0 = vlaneseq  ;;  %s603_s15 = smov (!%p259_p4, %s512_s15), 1  ;;  %v289_v2 = vld [vmem:[%s595_s2] sm:$0x1f] }
   0xd   : > { %s472_s21 = sshll.u32 %s603_s15, 4  ;;  %s468_s28 = sshll.u32 %s603_s15, 3  ;;  %v469_v26 = vld [vmem:[%s596_s3] ss:$0 sm:$0xff] }
   0xe   : > { %v292_v1 = vshrl.u32 %v291_v0, 7  ;;  %s266_s24 = scalar_lea.vmem %s593_s0, %s472_s21  ;;  %s274_s27 = scalar_lea.vmem %s594_s1, %s472_s21 }
   0xf   : > { %v290_v8 = vld [vmem:[%s266_s24] sm:$0xff]  ;;  %s288_s7 = scalar_lea.vmem %s597_s4, %s468_s28 }
  0x10   : > { %v293_v3 = vsub.s32 0, %v292_v1  ;;  %v300_v4 = vsub.s32 1, %v292_v1  ;;  %v307_v5 = vsub.s32 2, %v292_v1  ;;  %v314_v6 = vsub.s32 3, %v292_v1  ;;  %v297_v10 = vld [vmem:[%s274_s27] sm:$0xff] }
  0x11   : > { %v321_v7 = vsub.s32 4, %v292_v1  ;;  %v304_v12 = vld [vmem:[%s266_s24 + $0x1] sm:$0xff] }
  0x12   : > { %v294_v9 = vrot.slane %v289_v2, %v293_v3  ;;  %v301_v11 = vrot.slane %v289_v2, %v300_v4  ;;  %v308_v13 = vrot.slane %v289_v2, %v307_v5  ;;  %v315_v14 = vrot.slane %v289_v2, %v314_v6  ;;  %v311_v15 = vld [vmem:[%s274_s27 + $0x1] sm:$0xff] }
  0x13   : > { %v322_v19 = vrot.slane %v289_v2, %v321_v7  ;;  %v318_v20 = vld [vmem:[%s266_s24 + $0x2] sm:$0xff] }
  0x14   : > { %v295_v16 = vmul.f32 %v294_v9, %v290_v8  ;;  %v302_v17 = vmul.f32 %v301_v11, %v297_v10  ;;  %v309_v18 = vmul.f32 %v308_v13, %v304_v12  ;;  %v316_v22 = vmul.f32 %v315_v14, %v311_v15 }
  0x15   : > { %v323_v24 = vmul.f32 %v322_v19, %v318_v20 }
  0x16   : > { %v303_v21 = vadd.f32 %v302_v17, %v295_v16 }
  0x18   : > { %v310_v23 = vadd.f32 %v309_v18, %v303_v21 }
  0x1a   : > { %v317_v25 = vadd.f32 %v316_v22, %v310_v23 }
  0x1c   : > { %v324_v27 = vadd.f32 %v323_v24, %v317_v25 }
  0x1e   : > { %v332_v28 = vadd.f32 %v469_v26, %v324_v27 }
  0x20   : > { %333 = vst [vmem:[%s288_s7] sm:$0xff] %v332_v28 }
  0x21 PF: > { %s14_s17 = sadd.s32 1, %s520_s17   ;;  %s598_s15 = smov %s516_s16 }
  0x22   : > { %p11_p5 = scmp.ge.s32.totalorder %s14_s17, 4   ;;  %s599_s16 = smov %s601_s18 }
  0x24   :  { %13 = sbr.rel (!%p11_p5) target bundleno = 2 (0x2), region = 75 }

// kernel: squeezeformer_encoder.32
= control target key start
LH: loop header
LB: loop body
LE: loop exit
PB: predicated region body
PF: predicated region fallthrough
CT: control target
= control target key end

     0   :  { %v184_v0 = vmov 0.0   ;;  %vm185_vm0 = vmmov 0   ;;  %s245_s1 = inlined_call_operand.vmem [shape: bf16[128,128], index: 1, kind: input, shape index: {}]   ;;  %s246_s0 = inlined_call_operand.vmem [shape: f32[16,128], index: 0, kind: input, shape index: {}]   ;;  %s247_s2 = inlined_call_operand.vmem [shape: f32[1,128], index: 2, kind: input, shape index: {}]   ;;  %s248_s3 = inlined_call_operand.vmem [shape: f32[16,128], index: 3, kind: output, shape index: {}]  }
   0x1   :  { %154 = vmatprep.subr.bf16.mxu0 %v184_v0  ;;  %v176_v1 = vld [vmem:[%s245_s1 + $0x38] sm:$0xff]   ;;  %170 = vmatprep.mubr.msk.bf16.mxu0 %vm185_vm0, %v184_v0  ;;  %v177_v2 = vld [vmem:[%s245_s1 + $0x30] sm:$0xff]   ;;  %v178_v3 = vld [vmem:[%s245_s1 + $0x28] sm:$0xff]  }
   0x2   :  { %155 = vmatpush3.bf16.msra.mxu0 %v176_v1  ;;  %v179_v4 = vld [vmem:[%s245_s1 + $0x20] sm:$0xff]   ;;  %v180_v5 = vld [vmem:[%s245_s1 + $0x18] sm:$0xff]   ;;  %v181_v6 = vld [vmem:[%s245_s1 + $0x10] sm:$0xff]  }
   0x3   :  { %156 = vmatprep.subr.bf16.mxu0 %v184_v0  ;;  %v182_v7 = vld [vmem:[%s245_s1 + $0x8] sm:$0xff]   ;;  %v183_v8 = vld [vmem:[%s245_s1] sm:$0xff]  }
   0x4   :  { %v15_v9 = vld [vmem:[%s246_s0] sm:$0xff]  ;;  %v16_v10 = vld [vmem:[%s246_s0 + $0x8] sm:$0xff] }
   0x5   :  { %v17_v11 = vpack.c.bf16 %v16_v10, %v15_v9  ;;  %v136_v12 = vld [vmem:[%s247_s2] ss:$0 sm:$0xff] }
   0x6   :  { %157 = vmatpush3.bf16.msra.mxu0 %v177_v2 }
   0x7   :  { %158 = vmatprep.subr.bf16.mxu0 %v184_v0 }
   0xa   :  { %159 = vmatpush3.bf16.msra.mxu0 %v178_v3 }
   0xb   :  { %160 = vmatprep.subr.bf16.mxu0 %v184_v0 }
   0xe   :  { %161 = vmatpush3.bf16.msra.mxu0 %v179_v4 }
   0xf   :  { %162 = vmatprep.subr.bf16.mxu0 %v184_v0 }
  0x12   :  { %163 = vmatpush3.bf16.msra.mxu0 %v180_v5 }
  0x13   :  { %164 = vmatprep.subr.bf16.mxu0 %v184_v0 }
  0x16   :  { %165 = vmatpush3.bf16.msra.mxu0 %v181_v6 }
  0x17   :  { %166 = vmatprep.subr.bf16.mxu0 %v184_v0 }
  0x1a   :  { %167 = vmatpush3.bf16.msra.mxu0 %v182_v7 }
  0x1b   :  { %168 = vmatprep.subr.bf16.mxu0 %v184_v0 }
  0x1e   :  { %169 = vmatpush3.bf16.msra.mxu0 %v183_v8 }
  0x21   :  { %171 = vmatmul.mubr.bf16.vlgmr.msra.gmra.mxu0 %v17_v11 }
  0xe1   :  { %v123_v13 = vpop.f32.mrf.mxu0 }
  0xe2   :  { %v124_v14 = vadd.f32 %v136_v12, %v123_v13 }
  0xe3   :  { %v172_v15 = vpop.f32.mrf.mxu0 }
  0xe4   :  { %130 = vst [vmem:[%s248_s3] sm:$0xff] %v124_v14 }
  0xe5   :  { %v126_v16 = vpop.f32.mrf.mxu0 }
  0xe6   :  { %v127_v17 = vadd.f32 %v136_v12, %v126_v16 }
  0xe7   :  { %v173_v18 = vpop.f32.mrf.mxu0 }
  0xe8   :  { %131 = vst [vmem:[%s248_s3 + $0x8] sm:$0xff] %v127_v17 }

// kernel: squeezeformer_encoder.33
= control target key start
LH: loop header
LB: loop body
LE: loop exit
PB: predicated region body
PF: predicated region fallthrough
CT: control target
= control target key end

     0   :  { %v409_v0 = vmov 0.0   ;;  %vm410_vm0 = vmmov 0   ;;  %v411_v3 = vmov 0   ;;  %v78_v35 = vlaneseq  ;;  %s561_s1 = inlined_call_operand.vmem [shape: bf16[128,384], index: 1, kind: input, shape index: {}]   ;;  %s562_s0 = inlined_call_operand.vmem [shape: f32[16,128], index: 0, kind: input, shape index: {}]   ;;  %s563_s3 = inlined_call_operand.vmem [shape: f32[1,128], index: 3, kind: input, shape index: {}]   ;;  %s564_s4 = inlined_call_operand.vmem [shape: f32[1,128], index: 4, kind: input, shape index: {}]   ;;  %s565_s2 = inlined_call_operand.vmem [shape: f32[1,384], index: 2, kind: input, shape index: {}]   ;;  %s566_s6 = inlined_call_operand.vmem [shape: f32[16,256], index: 6, kind: output, shape index: {1}]   ;;  %s567_s5 = inlined_call_operand.vmem [shape: f32[16,128], index: 5, kind: output, shape index: {0}]  }
   0x1   :  { %354 = vmatprep.subr.bf16.mxu1 %v409_v0  ;;  %v377_v1 = vld [vmem:[%s561_s1 + $0xac] ss:$12 sps:$4 sm:$0xff]   ;;  %370 = vmatprep.mubr.msk.bf16.mxu1 %vm410_vm0, %v409_v0  ;;  %v379_v2 = vld [vmem:[%s561_s1 + $0xb0] ss:$12 sps:$4 sm:$0xff]   ;;  %v380_v4 = vld [vmem:[%s561_s1 + $0xa8] ss:$12 sps:$4 sm:$0xff]  }
   0x2   :  { %253 = vmatprep.mubr.bf16.mxu0 %v411_v3  ;;  %221 = vmatprep.subr.bf16.mxu0 %v377_v1  ;;  %v381_v5 = vld [vmem:[%s561_s1 + $0x94] ss:$12 sps:$4 sm:$0xff]   ;;  %v383_v6 = vld [vmem:[%s561_s1 + $0x98] ss:$12 sps:$4 sm:$0xff]   ;;  %v384_v7 = vld [vmem:[%s561_s1 + $0x90] ss:$12 sps:$4 sm:$0xff]  }
   0x3   :  { %355 = vmatpush3.bf16.msra.mxu1 %v379_v2  ;;  %222 = vmatpush1.bf16.msra.mxu0 %v380_v4  ;;  %v385_v8 = vld [vmem:[%s561_s1 + $0x7c] ss:$12 sps:$4 sm:$0xff]   ;;  %v387_v9 = vld [vmem:[%s561_s1 + $0x80] ss:$12 sps:$4 sm:$0xff]   ;;  %v388_v10 = vld [vmem:[%s561_s1 + $0x78] ss:$12 sps:$4 sm:$0xff]  }
   0x4   :  { %356 = vmatprep.subr.bf16.mxu1 %v409_v0  ;;  %223 = vmatprep.subr.bf16.mxu0 %v381_v5  ;;  %v389_v11 = vld [vmem:[%s561_s1 + $0x64] ss:$12 sps:$4 sm:$0xff]   ;;  %v391_v12 = vld [vmem:[%s561_s1 + $0x68] ss:$12 sps:$4 sm:$0xff]   ;;  %v392_v13 = vld [vmem:[%s561_s1 + $0x60] ss:$12 sps:$4 sm:$0xff]  }
   0x5   :  { %v393_v14 = vld [vmem:[%s561_s1 + $0x4c] ss:$12 sps:$4 sm:$0xff]   ;;  %v395_v15 = vld [vmem:[%s561_s1 + $0x50] ss:$12 sps:$4 sm:$0xff]   ;;  %v396_v16 = vld [vmem:[%s561_s1 + $0x48] ss:$12 sps:$4 sm:$0xff]  }
   0x6   :  { %v397_v17 = vld [vmem:[%s561_s1 + $0x34] ss:$12 sps:$4 sm:$0xff]   ;;  %v399_v18 = vld [vmem:[%s561_s1 + $0x38] ss:$12 sps:$4 sm:$0xff]   ;;  %v24_v20 = vld [vmem:[%s562_s0 + $0x8] sm:$0xff]  ;;  %v79_v36 = vshrl.u32 %v78_v35, 7 }
   0x7   :  { %357 = vmatpush3.bf16.msra.mxu1 %v383_v6  ;;  %224 = vmatpush1.bf16.msra.mxu0 %v384_v7  ;;  %v23_v19 = vld [vmem:[%s562_s0] sm:$0xff]  ;;  %v400_v22 = vld [vmem:[%s561_s1 + $0x30] ss:$12 sps:$4 sm:$0xff]   ;;  %v407_v32 = vld [vmem:[%s561_s1 + $0x8] ss:$12 sps:$4 sm:$0xff]  }
   0x8   :  { %358 = vmatprep.subr.bf16.mxu1 %v409_v0  ;;  %225 = vmatprep.subr.bf16.mxu0 %v385_v8  ;;  %v319_v21 = vld [vmem:[%s563_s3] ss:$0 sm:$0xff]  ;;  %v401_v23 = vld [vmem:[%s561_s1 + $0x1c] ss:$12 sps:$4 sm:$0xff]   ;;  %v404_v28 = vld [vmem:[%s561_s1 + $0x18] ss:$12 sps:$4 sm:$0xff]  }
   0x9   :  { %v32_v24 = vmul.f32 %v319_v21, %v23_v19  ;;  %v33_v25 = vmul.f32 %v319_v21, %v24_v20  ;;  %v403_v26 = vld [vmem:[%s561_s1 + $0x20] ss:$12 sps:$4 sm:$0xff]   ;;  %v405_v29 = vld [vmem:[%s561_s1 + $0x4] ss:$12 sps:$4 sm:$0xff]   ;;  %v88_v37 = vsub.s32 2, %v79_v36  ;;  %v80_v38 = vsub.s32 0, %v79_v36 }
   0xa   :  { %v320_v27 = vld [vmem:[%s564_s4] ss:$0 sm:$0xff]  ;;  %v84_v40 = vsub.s32 1, %v79_v36 }
   0xb   :  { %359 = vmatpush3.bf16.msra.mxu1 %v387_v9  ;;  %226 = vmatpush1.bf16.msra.mxu0 %v388_v10  ;;  %v41_v30 = vadd.f32 %v320_v27, %v32_v24  ;;  %v42_v31 = vadd.f32 %v320_v27, %v33_v25  ;;  %v408_v33 = vld [vmem:[%s561_s1] ss:$12 sps:$4 sm:$0xff]  }
   0xc   :  { %360 = vmatprep.subr.bf16.mxu1 %v409_v0  ;;  %227 = vmatprep.subr.bf16.mxu0 %v389_v11  ;;  %v76_v39 = vld [vmem:[%s565_s2] sm:$0x7] }
   0xd   :  { %v43_v34 = vpack.c.bf16 %v42_v31, %v41_v30  ;;  %v89_v41 = vrot.slane %v76_v39, %v88_v37  ;;  %v81_v42 = vrot.slane %v76_v39, %v80_v38  ;;  %v85_v44 = vrot.slane %v76_v39, %v84_v40 }
   0xf   :  { %361 = vmatpush3.bf16.msra.mxu1 %v391_v12  ;;  %228 = vmatpush1.bf16.msra.mxu0 %v392_v13 }
  0x10   :  { %362 = vmatprep.subr.bf16.mxu1 %v409_v0  ;;  %229 = vmatprep.subr.bf16.mxu0 %v393_v14 }
  0x13   :  { %363 = vmatpush3.bf16.msra.mxu1 %v395_v15  ;;  %230 = vmatpush1.bf16.msra.mxu0 %v396_v16 }
  0x14   :  { %364 = vmatprep.subr.bf16.mxu1 %v409_v0  ;;  %231 = vmatprep.subr.bf16.mxu0 %v397_v17 }
  0x17   :  { %365 = vmatpush3.bf16.msra.mxu1 %v399_v18  ;;  %232 = vmatpush1.bf16.msra.mxu0 %v400_v22 }
  0x18   :  { %366 = vmatprep.subr.bf16.mxu1 %v409_v0  ;;  %233 = vmatprep.subr.bf16.mxu0 %v401_v23 }
  0x1b   :  { %367 = vmatpush3.bf16.msra.mxu1 %v403_v26  ;;  %234 = vmatpush1.bf16.msra.mxu0 %v404_v28 }
  0x1c   :  { %368 = vmatprep.subr.bf16.mxu1 %v409_v0  ;;  %235 = vmatprep.subr.bf16.mxu0 %v405_v29 }
  0x1f   :  { %369 = vmatpush3.bf16.msra.mxu1 %v407_v32  ;;  %236 = vmatpush1.bf16.msra.mxu0 %v408_v33 }
  0x22   :  { %371 = vmatmul.mubr.bf16.vlgmr.msra.gmra.mxu1 %v43_v34  ;;  %254 = vmatmul.mubr.bf16.vlgmr.msra.gmra.mxu0 %v43_v34 }
  0xe2   :  { %v298_v43 = vpop.f32.mrf.mxu1  ;;  %v255_v46 = vpop.f32.mrf.mxu0 }
  0xe3   :  { %v299_v45 = vadd.f32 %v298_v43, %v89_v41  ;;  %v256_v47 = vadd.f32 %v255_v46, %v81_v42 }
  0xe4   :  { %v372_v48 = vpop.f32.mrf.mxu1  ;;  %v257_v49 = vpop.f32.mrf.mxu0 }
  0xe5   :  { %308 = vst [vmem:[%s566_s6 + $0x8] sm:$0xff] %v299_v45  ;;  %305 = vst [vmem:[%s567_s5] sm:$0xff] %v256_v47  ;;  %v258_v50 = vadd.f32 %v257_v49, %v85_v44 }
  0xe6   :  { %v301_v51 = vpop.f32.mrf.mxu1  ;;  %v259_v53 = vpop.f32.mrf.mxu0 }
  0xe7   :  { %v302_v52 = vadd.f32 %v301_v51, %v89_v41  ;;  %307 = vst [vmem:[%s566_s6] sm:$0xff] %v258_v50  ;;  %v260_v54 = vadd.f32 %v259_v53, %v81_v42 }
  0xe8   :  { %v373_v55 = vpop.f32.mrf.mxu1  ;;  %v261_v56 = vpop.f32.mrf.mxu0 }
  0xe9   :  { %310 = vst [vmem:[%s566_s6 + $0x18] sm:$0xff] %v302_v52  ;;  %306 = vst [vmem:[%s567_s5 + $0x8] sm:$0xff] %v260_v54  ;;  %v262_v57 = vadd.f32 %v261_v56, %v85_v44 }
  0xeb   :  { %309 = vst [vmem:[%s566_s6 + $0x10] sm:$0xff] %v262_v57 }

// kernel: squeezeformer_encoder.34
= control target key start
LH: loop header
LB: loop body
LE: loop exit
PB: predicated region body
PF: predicated region fallthrough
CT: control target
= control target key end

     0   :  { %s1145_s9 = smov 0   ;;  %s1147_s10 = smov 0   ;;  %s1327_s0 = inlined_call_operand.vmem [shape: f32[2,8,128], index: 0, kind: input, shape index: {}]   ;;  %s1328_s1 = inlined_call_operand.vmem [shape: f32[2,8,256], index: 1, kind: input, shape index: {}]   ;;  %s1329_s2 = inlined_call_operand.vmem [shape: f32[2,8,128], index: 2, kind: output, shape index: {}]  }
   0x1   :  { %s1149_s11 = smov 0  }
   0x2 LB: > { %s31_s12 = sadd.s32 1, %s1117_s10  ;;  %p962_p0 = scmp.ge.s32.totalorder %s1121_s11, 1  ;;  %s1121_s11 = sphi %s1149_s11, %s12_s11   ;;  %s1117_s10 = sphi %s1147_s10, %s1331_s10   ;;  %s1113_s9 = sphi %s1145_s9, %s1330_s9  }
   0x3   : > { %p33_p1 = scmp.ge.s32.totalorder %s31_s12, 2  ;;  %p153_p2 = scmp.lt.s32.totalorder %s1121_s11, 3 }
   0x5   : > { %s1333_s12 = smov (%p33_p1, %s31_s12), 0  ;;  %p154_p3 = pnand %p962_p0, %p153_p2 }
   0x6   : > { %p188_p4 = scmp.lt.s32.totalorder (!%p154_p3), %s1113_s9, 1  ;;  %s1127_s21 = smov (!%p154_p3), 96  }
   0x7   : > { %157 = sbr.rel (%p154_p3) target bundleno = 1412 (0x584), region = 28  ;;  %s1128_s22 = smov (!%p154_p3), 64  }
   0x8   : > { %s1129_s23 = smov (!%p154_p3), 32  }
   0xc   : > { %vm225_vm0 = vcmask 261120   ;;  %v1123_v0 = vmov 0.0   ;;  %vm1124_vm1 = vmmov 0   ;;  %s1335_s9 = smov (!%p188_p4, %s1113_s9), 1  ;;  %vm216_vm2 = vcmask 7168  }
   0xd   : > { %994 = vmatprep.subr.bf16.mxu0 %v1123_v0  ;;  %226 = vst.msk [vmem:[#allocation4] sm:$0xff] %vm225_vm0, %v1123_v0  ;;  %227 = vst.msk [vmem:[#allocation4 + $0x8] sm:$0xff] %vm225_vm0, %v1123_v0  ;;  %996 = vmatprep.mubr.msk.bf16.mxu0 %vm1124_vm1, %v1123_v0  ;;  %s977_s13 = sshll.u32 %s1335_s9, 4  ;;  %s963_s14 = sshll.u32 %s1335_s9, 3  ;;  %v1125_v7 = vmov -1e+30   ;;  %v231_v8 = vlaneseq }
   0xe   : > { %228 = vst.msk [vmem:[#allocation4 + $0x10] sm:$0xff] %vm225_vm0, %v1123_v0  ;;  %229 = vst.msk [vmem:[#allocation4 + $0x18] sm:$0xff] %vm225_vm0, %v1123_v0  ;;  %1000 = vmatprep.subr.bf16.mxu1 %v1123_v0  ;;  %1002 = vmatprep.mubr.msk.bf16.mxu1 %vm1124_vm1, %v1123_v0  ;;  %s1184_s17 = scalar_lea.vmem %s1328_s1, %s977_s13  ;;  %s194_s20 = scalar_lea.vmem %s1327_s0, %s963_s14  ;;  %vm293_vm4 = vcmask 64512   ;;  %v1126_v16 = vmov 0   ;;  %vm329_vm5 = vcmask 1043456   ;;  %vm855_vm6 = vcmask 523264  }
   0xf   : > { %v238_v1 = vld [vmem:[%s1184_s17] sm:$0xff]  ;;  %217 = vst.msk [vmem:[#allocation2] sm:$0xff] %vm216_vm2, %v1125_v7  ;;  %218 = vst.msk [vmem:[#allocation2 + $0x8] sm:$0xff] %vm216_vm2, %v1125_v7  ;;  %v1209_v9 = vand.u32 127, %v231_v8  ;;  %1073 = vset.pattern.permute.xlu0 %v1126_v16  ;;  %1074 = vset.pattern.permute.xlu1 %v1126_v16  ;;  %v239_v21 = vld [vmem:[%s1184_s17 + $0x8] sm:$0xff]  ;;  %vm857_vm7 = vcmask 785408   ;;  %s210_s26 = scalar_lea.vmem %s1329_s2, %s963_s14 }
  0x10   : > { %v236_v2 = vld [vmem:[%s194_s20] sm:$0xff]  ;;  %v241_v3 = vpack.c.bf16 %v238_v1, %v238_v1  ;;  %219 = vst.msk [vmem:[#allocation2 + $0x10] sm:$0xff] %vm216_vm2, %v1125_v7  ;;  %220 = vst.msk [vmem:[#allocation2 + $0x18] sm:$0xff] %vm216_vm2, %v1125_v7  ;;  %v1232_v22 = vpack.c.bf16 %v239_v21, %v239_v21 }
  0x11   : > { %v237_v5 = vmul.f32 0.17677669, %v236_v2  ;;  %221 = vst.msk [vmem:[#allocation3] sm:$0xff] %vm216_vm2, %v1123_v0  ;;  %222 = vst.msk [vmem:[#allocation3 + $0x8] sm:$0xff] %vm216_vm2, %v1123_v0  ;;  %vm235_vm3 = vcmp.lt.s32.totalorder %v1209_v9, 8 }
  0x12   : > { %v247_v4 = vsel %vm225_vm0, %v241_v3, 0  ;;  %223 = vst.msk [vmem:[#allocation3 + $0x10] sm:$0xff] %vm216_vm2, %v1123_v0  ;;  %224 = vst.msk [vmem:[#allocation3 + $0x18] sm:$0xff] %vm216_vm2, %v1123_v0  ;;  %383 = vrot.lane.b32.xlu1 %v241_v3, %s1127_s21  ;;  %v331_v23 = vsel %vm329_vm5, %v1232_v22, 0 }
  0x13   : > { %995 = vmatpush3.bf16.xpose.msra.mxu0 %v247_v4  ;;  %v240_v6 = vpack.c.bf16 %v237_v5, %v237_v5  ;;  %1001 = vmatpush3.bf16.msra.mxu1 %v331_v23 }
  0x14   : > { %1012 = vmatprep.subr.bf16.mxu0 %v1123_v0  ;;  %1006 = vmatprep.subr.bf16.mxu1 %v1123_v0 }
  0x16   : > { %380 = vrot.lane.b32.xlu1 %v240_v6, %s1127_s21  ;;  %v1221_v17 = vld [vmem:[#allocation2] sm:$0xff]  ;;  %v433_v60 = vld [vmem:[#allocation2 + $0x8] sm:$0xff] }
  0x17   : > { %v1268_v1 = vld [vmem:[#allocation2 + $0x10] sm:$0xff]  ;;  %v717_v5 = vld [vmem:[#allocation2 + $0x18] sm:$0xff] }
  0x1a   : > { %997 = vmatmul.mubr.msk.bf16.vlgmr.msra.gmra.mxu0 %vm225_vm0, %v240_v6  ;;  %525 = vrot.lane.b32.xlu1 %v241_v3, %s1128_s22 }
  0x1b   : > { %1014 = vmatprep.mubr.msk.bf16.mxu0 %vm1124_vm1, %v1123_v0 }
  0x1e   : > { %522 = vrot.lane.b32.xlu1 %v240_v6, %s1128_s22 }
  0x22   : > { %667 = vrot.lane.b32.xlu1 %v241_v3, %s1129_s23 }
  0x26   : > { %664 = vrot.lane.b32.xlu1 %v240_v6, %s1129_s23 }
  0x84   : > { %v384_v27 = vpop.permute.xlu1 %383 }
  0x85   : > { %v389_v30 = vsel %vm225_vm0, %v384_v27, 0 }
  0x88   : > { %v381_v28 = vpop.permute.xlu1 %380 }
  0x8c   : > { %v526_v32 = vpop.permute.xlu1 %525 }
  0x8d   : > { %v531_v34 = vsel %vm225_vm0, %v526_v32, 0 }
  0x90   : > { %v523_v33 = vpop.permute.xlu1 %522 }
  0x94   : > { %v668_v35 = vpop.permute.xlu1 %667 }
  0x95   : > { %v673_v36 = vsel %vm225_vm0, %v668_v35, 0 }
  0x98   : > { %v665_v37 = vpop.permute.xlu1 %664 }
  0xda   : > { %v283_v10 = vpop.f32.mrf.mxu0 }
  0xdb   : > { %v291_v11 = vsel %vm235_vm3, %v283_v10, -1e+30 }
  0xdc   : > { %v998_v12 = vpop.f32.mrf.mxu0  ;;  %v294_v13 = vsel %vm293_vm4, %v291_v11, -inf }
  0xdd   : > { %295 = vmax.xlane.f32.xlu0 %v294_v13 }
  0xde   : > { %v286_v14 = vpop.f32.mrf.mxu0 }
  0xe0   : > { %v999_v15 = vpop.f32.mrf.mxu0 }
 0x166   : > { %v296_v18 = vpop.xlane.xlu0 %295 }
 0x167   : > { %v1224_v19 = vmax.f32 %v1221_v17, %v296_v18 }
 0x169   : > { %v298_v20 = vsub.f32 %v1221_v17, %v1224_v19  ;;  %375 = vst.msk [vmem:[#allocation2] sm:$0xff] %vm216_vm2, %v1224_v19  ;;  %303 = vperm.xlu0 %1073, %v1224_v19  }
 0x1e4   : > { %v304_v24 = vpop.permute.xlu0 %303 }
 0x1e5   : > { %v306_v25 = vsub.f32 %v291_v11, %v304_v24 }
 0x1e7   : > { %v307_v26 = vmul.f32 1.442695, %v306_v25 }
 0x1e9   : > { %1075 = vpow2.f32 %v307_v26 }
 0x1f6   : > { %v1237_v29 = vpop.eup %1075 }
 0x1f7   : > { %v324_v31 = vpack.c.bf16 %v1237_v29, %v1237_v29  ;;  %v311_v9 = vsel %vm293_vm4, %v1237_v29, 0.0 }
 0x1f9   : > { %1003 = vmatmul.mubr.msk.bf16.vlgmr.msra.gmra.mxu1 %vm293_vm4, %v324_v31 }
 0x1fa   : > { %1007 = vmatpush3.bf16.xpose.msra.mxu1 %v389_v30  ;;  %1008 = vmatprep.mubr.msk.bf16.mxu1 %vm1124_vm1, %v1123_v0 }
 0x1fb   : > { %1018 = vmatprep.subr.bf16.mxu1 %v1123_v0 }
 0x201   : > { %1009 = vmatmul.mubr.msk.bf16.vlgmr.msra.gmra.mxu1 %vm225_vm0, %v381_v28 }
 0x202   : > { %1019 = vmatpush3.bf16.xpose.msra.mxu1 %v531_v34  ;;  %1020 = vmatprep.mubr.msk.bf16.mxu1 %vm1124_vm1, %v1123_v0 }
 0x203   : > { %1030 = vmatprep.subr.bf16.mxu1 %v1123_v0 }
 0x209   : > { %1021 = vmatmul.mubr.msk.bf16.vlgmr.msra.gmra.mxu1 %vm225_vm0, %v523_v33 }
 0x20a   : > { %1031 = vmatpush3.bf16.xpose.msra.mxu1 %v673_v36  ;;  %1032 = vmatprep.mubr.msk.bf16.mxu1 %vm1124_vm1, %v1123_v0 }
 0x211   : > { %1033 = vmatmul.mubr.msk.bf16.vlgmr.msra.gmra.mxu1 %vm225_vm0, %v665_v37 }
 0x2b9   : > { %v1256_v38 = vpop.f32.mrf.mxu1 }
 0x2bb   : > { %v1004_v39 = vpop.f32.mrf.mxu1 }
 0x2bd   : > { %v370_v40 = vpop.f32.mrf.mxu1 }
 0x2be   : > { %v299_v40 = vmul.f32 1.442695, %v298_v20  ;;  %v450_v20 = vld [vmem:[#allocation3 + $0x8] sm:$0xff] }
 0x2bf   : > { %v1005_v41 = vpop.f32.mrf.mxu1 }
 0x2c1   : > { %v425_v42 = vpop.f32.mrf.mxu1 }
 0x2c2   : > { %v431_v43 = vsel %vm235_vm3, %v425_v42, -1e+30 }
 0x2c3   : > { %v1010_v44 = vpop.f32.mrf.mxu1  ;;  %v434_v45 = vsel %vm293_vm4, %v431_v43, -inf }
 0x2c4   : > { %435 = vmax.xlane.f32.xlu1 %v434_v45  ;;  %v309_v45 = vld [vmem:[#allocation3] sm:$0xff] }
 0x2c5   : > { %v428_v46 = vpop.f32.mrf.mxu1 }
 0x2c7   : > { %v1011_v47 = vpop.f32.mrf.mxu1 }
 0x2c9   : > { %v567_v48 = vpop.f32.mrf.mxu1 }
 0x2ca   : > { %v573_v49 = vsel %vm235_vm3, %v567_v48, -1e+30 }
 0x2cb   : > { %v1022_v50 = vpop.f32.mrf.mxu1  ;;  %v576_v51 = vsel %vm293_vm4, %v573_v49, -inf }
 0x2cc   : > { %577 = vmax.xlane.f32.xlu0 %v576_v51 }
 0x2cd   : > { %v570_v52 = vpop.f32.mrf.mxu1 }
 0x2ce   : > { %v592_v52 = vld [vmem:[#allocation3 + $0x10] sm:$0xff] }
 0x2cf   : > { %v1023_v53 = vpop.f32.mrf.mxu1 }
 0x2d1   : > { %v709_v54 = vpop.f32.mrf.mxu1 }
 0x2d2   : > { %v715_v55 = vsel %vm235_vm3, %v709_v54, -1e+30 }
 0x2d3   : > { %v1034_v56 = vpop.f32.mrf.mxu1  ;;  %v718_v57 = vsel %vm293_vm4, %v715_v55, -inf }
 0x2d4   : > { %719 = vmax.xlane.f32.xlu1 %v718_v57  ;;  %v734_v57 = vld [vmem:[#allocation3 + $0x18] sm:$0xff] }
 0x2d5   : > { %v712_v58 = vpop.f32.mrf.mxu1 }
 0x2d7   : > { %v1035_v59 = vpop.f32.mrf.mxu1 }
 0x34d   : > { %v436_v61 = vpop.xlane.xlu1 %435 }
 0x34e   : > { %v437_v62 = vmax.f32 %v433_v60, %v436_v61 }
 0x350   : > { %v438_v63 = vsub.f32 %v433_v60, %v437_v62  ;;  %518 = vst.msk [vmem:[#allocation2 + $0x8] sm:$0xff] %vm216_vm2, %v437_v62  ;;  %443 = vperm.xlu1 %1074, %v437_v62   ;;  %v317_v62 = vld [vmem:[#allocation4] sm:$0xff] }
 0x352   : > { %v439_v30 = vmul.f32 1.442695, %v438_v63 }
 0x355   : > { %v578_v2 = vpop.xlane.xlu0 %577 }
 0x356   : > { %v579_v3 = vmax.f32 %v1268_v1, %v578_v2 }
 0x358   : > { %v580_v4 = vsub.f32 %v1268_v1, %v579_v3  ;;  %660 = vst.msk [vmem:[#allocation2 + $0x10] sm:$0xff] %vm216_vm2, %v579_v3  ;;  %585 = vperm.xlu0 %1073, %v579_v3  }
 0x35a   : > { %v581_v42 = vmul.f32 1.442695, %v580_v4 }
 0x35d   : > { %v720_v6 = vpop.xlane.xlu1 %719 }
 0x35e   : > { %v721_v7 = vmax.f32 %v717_v5, %v720_v6 }
 0x360   : > { %v722_v8 = vsub.f32 %v717_v5, %v721_v7  ;;  %802 = vst.msk [vmem:[#allocation2 + $0x18] sm:$0xff] %vm216_vm2, %v721_v7  ;;  %727 = vperm.xlu1 %1074, %v721_v7   ;;  %v458_v7 = vld [vmem:[#allocation4 + $0x8] sm:$0xff] }
 0x362   : > { %v723_v33 = vmul.f32 1.442695, %v722_v8 }
 0x364   : > { %468 = vrot.lane.b32.xlu1 %v1232_v22, %s1127_s21 }
 0x368   : > { %610 = vrot.lane.b32.xlu1 %v1232_v22, %s1128_s22 }
 0x36c   : > { %752 = vrot.lane.b32.xlu1 %v1232_v22, %s1129_s23 }
 0x390   : > { %312 = vadd.xlane.f32.xlu1 %v311_v9 }
 0x3cb   : > { %v444_v10 = vpop.permute.xlu1 %443 }
 0x3cc   : > { %v446_v11 = vsub.f32 %v431_v43, %v444_v10 }
 0x3ce   : > { %v447_v12 = vmul.f32 1.442695, %v446_v11 }
 0x3d0   : > { %1077 = vpow2.f32 %v447_v12 }
 0x3d3   : > { %v586_v13 = vpop.permute.xlu0 %585 }
 0x3d4   : > { %v588_v14 = vsub.f32 %v573_v49, %v586_v13  ;;  %v600_v13 = vld [vmem:[#allocation4 + $0x10] sm:$0xff] }
 0x3d6   : > { %v589_v15 = vmul.f32 1.442695, %v588_v14 }
 0x3d8   : > { %1079 = vpow2.f32 %v589_v15 }
 0x3db   : > { %v728_v16 = vpop.permute.xlu1 %727 }
 0x3dc   : > { %v730_v18 = vsub.f32 %v715_v55, %v728_v16 }
 0x3dd   : > { %v1078_v21 = vpop.eup %1077 }
 0x3de   : > { %v731_v23 = vmul.f32 1.442695, %v730_v18  ;;  %v452_v24 = vsel %vm293_vm4, %v1078_v21, 0.0  ;;  %v465_v26 = vpack.c.bf16 %v1078_v21, %v1078_v21 }
 0x3df   : > { %453 = vadd.xlane.f32.xlu0 %v452_v24  ;;  %v469_v22 = vpop.permute.xlu1 %468  ;;  %v742_v24 = vld [vmem:[#allocation4 + $0x18] sm:$0xff] }
 0x3e0   : > { %1081 = vpow2.f32 %v731_v23  ;;  %v474_v25 = vsel %vm329_vm5, %v469_v22, 0 }
 0x3e1   : > { %1013 = vmatpush3.bf16.msra.mxu0 %v474_v25  ;;  %1083 = vpow2.f32 %v439_v30 }
 0x3e2   : > { %1024 = vmatprep.subr.bf16.mxu0 %v1123_v0  ;;  %1085 = vpow2.f32 %v723_v33 }
 0x3e3   : > { %v611_v27 = vpop.permute.xlu1 %610  ;;  %1087 = vpow2.f32 %v299_v40 }
 0x3e4   : > { %1015 = vmatmul.mubr.msk.bf16.vlgmr.msra.gmra.mxu0 %vm293_vm4, %v465_v26  ;;  %v616_v28 = vsel %vm329_vm5, %v611_v27, 0  ;;  %1089 = vpow2.f32 %v581_v42 }
 0x3e5   : > { %v1080_v29 = vpop.eup %1079  ;;  %1025 = vmatpush3.bf16.msra.mxu0 %v616_v28  ;;  %1026 = vmatprep.mubr.msk.bf16.mxu0 %vm1124_vm1, %v1123_v0 }
 0x3e6   : > { %v594_v31 = vsel %vm293_vm4, %v1080_v29, 0.0  ;;  %1036 = vmatprep.subr.bf16.mxu0 %v1123_v0  ;;  %v607_v34 = vpack.c.bf16 %v1080_v29, %v1080_v29 }
 0x3e7   : > { %595 = vadd.xlane.f32.xlu1 %v594_v31  ;;  %v753_v32 = vpop.permute.xlu1 %752 }
 0x3e8   : > { %v758_v35 = vsel %vm329_vm5, %v753_v32, 0 }
 0x3ec   : > { %1027 = vmatmul.mubr.msk.bf16.vlgmr.msra.gmra.mxu0 %vm293_vm4, %v607_v34 }
 0x3ed   : > { %v1082_v36 = vpop.eup %1081  ;;  %1037 = vmatpush3.bf16.msra.mxu0 %v758_v35  ;;  %1038 = vmatprep.mubr.msk.bf16.mxu0 %vm1124_vm1, %v1123_v0 }
 0x3ee   : > { %v736_v37 = vsel %vm293_vm4, %v1082_v36, 0.0  ;;  %v749_v39 = vpack.c.bf16 %v1082_v36, %v1082_v36  ;;  %v1084_v41 = vpop.eup %1083 }
 0x3ef   : > { %737 = vadd.xlane.f32.xlu0 %v736_v37  ;;  %v1086_v43 = vpop.eup %1085  ;;  %v451_v49 = vmul.f32 %v1084_v41, %v450_v20 }
 0x3f0   : > { %v1088_v44 = vpop.eup %1087  ;;  %v735_v58 = vmul.f32 %v1086_v43, %v734_v57 }
 0x3f1   : > { %v1090_v0 = vpop.eup %1089  ;;  %v310_v46 = vmul.f32 %v1088_v44, %v309_v45 }
 0x3f2   : > { %v593_v53 = vmul.f32 %v1090_v0, %v592_v52 }
 0x3f4   : > { %1039 = vmatmul.mubr.msk.bf16.vlgmr.msra.gmra.mxu0 %vm293_vm4, %v749_v39 }
 0x3f8   : > { %461 = vperm.xlu1 %1074, %v1084_v41  }
 0x3fc   : > { %745 = vperm.xlu1 %1074, %v1086_v43  }
 0x405   : > { %320 = vperm.xlu0 %1073, %v1088_v44  }
 0x409   : > { %603 = vperm.xlu0 %1073, %v1090_v0  }
 0x419   : > { %v313_v47 = vpop.xlane.xlu1 %312 }
 0x41a   : > { %v314_v48 = vadd.f32 %v313_v47, %v310_v46 }
 0x41c   : > { %316 = vst.msk [vmem:[#allocation3] sm:$0xff] %vm216_vm2, %v314_v48 }
 0x423   : > { %v807_v17 = vld [vmem:[#allocation3] sm:$0xff] }
 0x424   : > { %1091 = vrcp.f32 %v807_v17 }
 0x431   : > { %v1092_v19 = vpop.eup %1091 }
 0x432   : > { %811 = vperm.xlu1 %1074, %v1092_v19  }
 0x468   : > { %v454_v50 = vpop.xlane.xlu0 %453 }
 0x469   : > { %v455_v51 = vadd.f32 %v454_v50, %v451_v49 }
 0x46b   : > { %456 = vst.msk [vmem:[#allocation3 + $0x8] sm:$0xff] %vm216_vm2, %v455_v51 }
 0x470   : > { %v596_v54 = vpop.xlane.xlu1 %595 }
 0x471   : > { %v597_v55 = vadd.f32 %v596_v54, %v593_v53 }
 0x472   : > { %v816_v56 = vld [vmem:[#allocation3 + $0x8] sm:$0xff] }
 0x473   : > { %598 = vst.msk [vmem:[#allocation3 + $0x10] sm:$0xff] %vm216_vm2, %v597_v55  ;;  %1093 = vrcp.f32 %v816_v56 }
 0x474   : > { %v462_v8 = vpop.permute.xlu1 %461 }
 0x475   : > { %v464_v9 = vmul.f32 %v462_v8, %v458_v7 }
 0x478   : > { %v738_v59 = vpop.xlane.xlu0 %737  ;;  %v746_v22 = vpop.permute.xlu1 %745 }
 0x479   : > { %v739_v60 = vadd.f32 %v738_v59, %v735_v58  ;;  %v748_v27 = vmul.f32 %v746_v22, %v742_v24 }
 0x47a   : > { %v825_v61 = vld [vmem:[#allocation3 + $0x10] sm:$0xff] }
 0x47b   : > { %740 = vst.msk [vmem:[#allocation3 + $0x18] sm:$0xff] %vm216_vm2, %v739_v60  ;;  %1095 = vrcp.f32 %v825_v61 }
 0x480   : > { %v1094_v63 = vpop.eup %1093  ;;  %v321_v1 = vpop.permute.xlu0 %320 }
 0x481   : > { %v323_v2 = vmul.f32 %v321_v1, %v317_v62  ;;  %820 = vperm.xlu0 %1073, %v1094_v63  }
 0x482   : > { %v834_v3 = vld [vmem:[#allocation3 + $0x18] sm:$0xff] }
 0x483   : > { %v373_v4 = vadd.f32 %v1256_v38, %v323_v2  ;;  %1097 = vrcp.f32 %v834_v3 }
 0x484   : > { %v604_v14 = vpop.permute.xlu0 %603 }
 0x485   : > { %374 = vst.msk [vmem:[#allocation4] sm:$0xff] %vm225_vm0, %v373_v4  ;;  %v606_v38 = vmul.f32 %v604_v14, %v600_v13 }
 0x488   : > { %v1096_v5 = vpop.eup %1095 }
 0x489   : > { %829 = vperm.xlu1 %1074, %v1096_v5  }
 0x48c   : > { %v806_v44 = vld [vmem:[#allocation4] sm:$0xff] }
 0x490   : > { %v1098_v6 = vpop.eup %1097 }
 0x491   : > { %838 = vperm.xlu0 %1073, %v1098_v6  }
 0x4a4   : > { %v510_v10 = vpop.f32.mrf.mxu0 }
 0x4a5   : > { %v516_v11 = vadd.f32 %v510_v10, %v464_v9 }
 0x4a6   : > { %v1016_v12 = vpop.f32.mrf.mxu0 }
 0x4a7   : > { %517 = vst.msk [vmem:[#allocation4 + $0x8] sm:$0xff] %vm225_vm0, %v516_v11 }
 0x4a8   : > { %v513_v15 = vpop.f32.mrf.mxu0 }
 0x4aa   : > { %v1017_v16 = vpop.f32.mrf.mxu0 }
 0x4ac   : > { %v652_v18 = vpop.f32.mrf.mxu0 }
 0x4ad   : > { %v658_v21 = vadd.f32 %v652_v18, %v606_v38  ;;  %v812_v36 = vpop.permute.xlu1 %811 }
 0x4ae   : > { %v1028_v23 = vpop.f32.mrf.mxu0  ;;  %v815_v34 = vld [vmem:[#allocation4 + $0x8] sm:$0xff]  ;;  %v814_v45 = vmul.f32 %v812_v36, %v806_v44 }
 0x4af   : > { %659 = vst.msk [vmem:[#allocation4 + $0x10] sm:$0xff] %vm225_vm0, %v658_v21 }
 0x4b0   : > { %v655_v25 = vpop.f32.mrf.mxu0 }
 0x4b2   : > { %v1029_v26 = vpop.f32.mrf.mxu0 }
 0x4b4   : > { %v794_v28 = vpop.f32.mrf.mxu0 }
 0x4b5   : > { %v800_v29 = vadd.f32 %v794_v28, %v748_v27 }
 0x4b6   : > { %v1040_v30 = vpop.f32.mrf.mxu0  ;;  %v824_v39 = vld [vmem:[#allocation4 + $0x10] sm:$0xff] }
 0x4b7   : > { %801 = vst.msk [vmem:[#allocation4 + $0x18] sm:$0xff] %vm225_vm0, %v800_v29 }
 0x4b8   : > { %v797_v31 = vpop.f32.mrf.mxu0 }
 0x4ba   : > { %v1041_v32 = vpop.f32.mrf.mxu0 }
 0x4be   : > { %v833_v42 = vld [vmem:[#allocation4 + $0x18] sm:$0xff] }
 0x4fc   : > { %v821_v33 = vpop.permute.xlu0 %820 }
 0x4fd   : > { %v823_v35 = vmul.f32 %v821_v33, %v815_v34 }
 0x4ff   : > { %843 = vrot.lane.b32.xlu1 %v823_v35, %s1129_s23 }
 0x504   : > { %v830_v37 = vpop.permute.xlu1 %829 }
 0x505   : > { %v832_v40 = vmul.f32 %v830_v37, %v824_v39 }
 0x507   : > { %847 = vrot.lane.b32.xlu0 %v832_v40, %s1128_s22 }
 0x50c   : > { %v839_v41 = vpop.permute.xlu0 %838 }
 0x50d   : > { %v841_v43 = vmul.f32 %v839_v41, %v833_v42 }
 0x50f   : > { %851 = vrot.lane.b32.xlu1 %v841_v43, %s1127_s21 }
 0x571   : > { %v844_v0 = vpop.permute.xlu1 %843 }
 0x572   : > { %v854_v47 = vsel %vm225_vm0, %v814_v45, %v844_v0 }
 0x579   : > { %v848_v46 = vpop.permute.xlu0 %847 }
 0x57a   : > { %v856_v48 = vsel %vm855_vm6, %v854_v47, %v848_v46 }
 0x581   : > { %v852_v17 = vpop.permute.xlu1 %851 }
 0x582   : > { %v858_v19 = vsel %vm857_vm7, %v856_v48, %v852_v17 }
 0x583   : > { %859 = vst [vmem:[%s210_s26] sm:$0xff] %v858_v19 }
 0x584 PF: > { %s12_s11 = sadd.s32 1, %s1121_s11   ;;  %s1330_s9 = smov %s1117_s10 }
 0x585   : > { %p9_p5 = scmp.ge.s32.totalorder %s12_s11, 4   ;;  %s1331_s10 = smov %s1333_s12 }
 0x587   :  { %11 = sbr.rel (!%p9_p5) target bundleno = 2 (0x2), region = 78 }

// kernel: squeezeformer_encoder.35
= control target key start
LH: loop header
LB: loop body
LE: loop exit
PB: predicated region body
PF: predicated region fallthrough
CT: control target
= control target key end

     0   :  { %v244_v0 = vmov 0.0   ;;  %vm245_vm0 = vmmov 0   ;;  %s332_s1 = inlined_call_operand.vmem [shape: bf16[128,128], index: 1, kind: input, shape index: {}]   ;;  %s333_s0 = inlined_call_operand.vmem [shape: f32[16,128], index: 0, kind: input, shape index: {}]   ;;  %s334_s2 = inlined_call_operand.vmem [shape: f32[1,128], index: 2, kind: input, shape index: {}]   ;;  %s335_s3 = inlined_call_operand.vmem [shape: f32[16,128], index: 3, kind: input, shape index: {}]   ;;  %s336_s4 = inlined_call_operand.vmem [shape: f32[1,128], index: 4, kind: input, shape index: {}]   ;;  %s337_s5 = inlined_call_operand.vmem [shape: f32[1,128], index: 5, kind: input, shape index: {}]   ;;  %s338_s6 = inlined_call_operand.vmem [shape: f32[16,128], index: 6, kind: output, shape index: {}]  }
   0x1   :  { %210 = vmatprep.subr.bf16.mxu0 %v244_v0  ;;  %v232_v1 = vld [vmem:[%s332_s1 + $0x38] sm:$0xff]   ;;  %226 = vmatprep.mubr.msk.bf16.mxu0 %vm245_vm0, %v244_v0  ;;  %v233_v2 = vld [vmem:[%s332_s1 + $0x30] sm:$0xff]   ;;  %v234_v3 = vld [vmem:[%s332_s1 + $0x28] sm:$0xff]  }
   0x2   :  { %211 = vmatpush3.bf16.msra.mxu0 %v232_v1  ;;  %v235_v4 = vld [vmem:[%s332_s1 + $0x20] sm:$0xff]   ;;  %v236_v5 = vld [vmem:[%s332_s1 + $0x18] sm:$0xff]   ;;  %v237_v6 = vld [vmem:[%s332_s1 + $0x10] sm:$0xff]  }
   0x3   :  { %212 = vmatprep.subr.bf16.mxu0 %v244_v0  ;;  %v238_v7 = vld [vmem:[%s332_s1 + $0x8] sm:$0xff]   ;;  %v239_v8 = vld [vmem:[%s332_s1] sm:$0xff]  }
   0x4   :  { %v24_v9 = vld [vmem:[%s333_s0] sm:$0xff]  ;;  %v25_v10 = vld [vmem:[%s333_s0 + $0x8] sm:$0xff] }
   0x5   :  { %v26_v11 = vpack.c.bf16 %v25_v10, %v24_v9  ;;  %v190_v12 = vld [vmem:[%s334_s2] ss:$0 sm:$0xff]  ;;  %v140_v19 = vld [vmem:[%s335_s3 + $0x8] sm:$0xff] }
   0x6   :  { %213 = vmatpush3.bf16.msra.mxu0 %v233_v2  ;;  %v139_v14 = vld [vmem:[%s335_s3] sm:$0xff] }
   0x7   :  { %214 = vmatprep.subr.bf16.mxu0 %v244_v0  ;;  %v199_v38 = vld [vmem:[%s336_s4] ss:$0 sm:$0xff] }
   0x8   :  { %v200_v40 = vld [vmem:[%s337_s5] ss:$0 sm:$0xff] }
   0xa   :  { %215 = vmatpush3.bf16.msra.mxu0 %v234_v3 }
   0xb   :  { %216 = vmatprep.subr.bf16.mxu0 %v244_v0 }
   0xe   :  { %217 = vmatpush3.bf16.msra.mxu0 %v235_v4 }
   0xf   :  { %218 = vmatprep.subr.bf16.mxu0 %v244_v0 }
  0x12   :  { %219 = vmatpush3.bf16.msra.mxu0 %v236_v5 }
  0x13   :  { %220 = vmatprep.subr.bf16.mxu0 %v244_v0 }
  0x16   :  { %221 = vmatpush3.bf16.msra.mxu0 %v237_v6 }
  0x17   :  { %222 = vmatprep.subr.bf16.mxu0 %v244_v0 }
  0x1a   :  { %223 = vmatpush3.bf16.msra.mxu0 %v238_v7 }
  0x1b   :  { %224 = vmatprep.subr.bf16.mxu0 %v244_v0 }
  0x1e   :  { %225 = vmatpush3.bf16.msra.mxu0 %v239_v8 }
  0x21   :  { %227 = vmatmul.mubr.bf16.vlgmr.msra.gmra.mxu0 %v26_v11 }
  0xe1   :  { %v132_v13 = vpop.f32.mrf.mxu0 }
  0xe2   :  { %v133_v15 = vadd.f32 %v190_v12, %v132_v13 }
  0xe3   :  { %v228_v16 = vpop.f32.mrf.mxu0 }
  0xe4   :  { %v141_v17 = vadd.f32 %v139_v14, %v133_v15 }
  0xe5   :  { %v135_v18 = vpop.f32.mrf.mxu0 }
  0xe6   :  { %v136_v20 = vadd.f32 %v190_v12, %v135_v18  ;;  %143 = vadd.xlane.f32.xlu0 %v141_v17 }
  0xe7   :  { %v229_v21 = vpop.f32.mrf.mxu0 }
  0xe8   :  { %v142_v22 = vadd.f32 %v140_v19, %v136_v20 }
  0xea   :  { %145 = vadd.xlane.f32.xlu0 %v142_v22 }
 0x16f   :  { %v144_v23 = vpop.xlane.xlu0 %143 }
 0x170   :  { %v148_v24 = vmul.f32 0.0078125, %v144_v23 }
 0x172   :  { %v150_v25 = vsub.f32 %v141_v17, %v148_v24 }
 0x173   :  { %v146_v26 = vpop.xlane.xlu0 %145 }
 0x174   :  { %v149_v27 = vmul.f32 0.0078125, %v146_v26  ;;  %v152_v28 = vmul.f32 %v150_v25, %v150_v25 }
 0x176   :  { %v151_v29 = vsub.f32 %v142_v22, %v149_v27  ;;  %154 = vadd.xlane.f32.xlu1 %v152_v28 }
 0x178   :  { %v153_v30 = vmul.f32 %v151_v29, %v151_v29 }
 0x17a   :  { %156 = vadd.xlane.f32.xlu1 %v153_v30 }
 0x1ff   :  { %v155_v31 = vpop.xlane.xlu1 %154 }
 0x200   :  { %v158_v32 = vmul.f32 0.0078125, %v155_v31 }
 0x202   :  { %v160_v33 = vadd.f32 1e-05, %v158_v32 }
 0x203   :  { %v157_v34 = vpop.xlane.xlu1 %156 }
 0x204   :  { %240 = vrsqrt.f32 %v160_v33  ;;  %v159_v35 = vmul.f32 0.0078125, %v157_v34 }
 0x206   :  { %v161_v36 = vadd.f32 1e-05, %v159_v35 }
 0x208   :  { %242 = vrsqrt.f32 %v161_v36 }
 0x211   :  { %v241_v37 = vpop.eup %240 }
 0x212   :  { %v164_v39 = vmul.f32 %v241_v37, %v150_v25 }
 0x214   :  { %v173_v41 = vmul.f32 %v199_v38, %v164_v39 }
 0x215   :  { %v243_v42 = vpop.eup %242 }
 0x216   :  { %v182_v43 = vadd.f32 %v200_v40, %v173_v41  ;;  %v165_v44 = vmul.f32 %v243_v42, %v151_v29 }
 0x218   :  { %184 = vst [vmem:[%s338_s6] sm:$0xff] %v182_v43  ;;  %v174_v45 = vmul.f32 %v199_v38, %v165_v44 }
 0x21a   :  { %v183_v46 = vadd.f32 %v200_v40, %v174_v45 }
 0x21c   :  { %185 = vst [vmem:[%s338_s6 + $0x8] sm:$0xff] %v183_v46 }

// kernel: squeezeformer_encoder.36
= control target key start
LH: loop header
LB: loop body
LE: loop exit
PB: predicated region body
PF: predicated region fallthrough
CT: control target
= control target key end

     0   :  { %v533_v1 = vmov 0   ;;  %v76_v42 = vlaneseq  ;;  %s699_s1 = inlined_call_operand.vmem [shape: bf16[128,512], index: 1, kind: input, shape index: {}]   ;;  %s700_s0 = inlined_call_operand.vmem [shape: f32[16,128], index: 0, kind: input, shape index: {}]   ;;  %s701_s3 = inlined_call_operand.vmem [shape: f32[1,128], index: 3, kind: input, shape index: {}]   ;;  %s702_s4 = inlined_call_operand.vmem [shape: f32[1,128], index: 4, kind: input, shape index: {}]   ;;  %s703_s2 = inlined_call_operand.vmem [shape: f32[1,512], index: 2, kind: input, shape index: {}]   ;;  %s704_s5 = inlined_call_operand.vmem [shape: f32[16,512], index: 5, kind: output, shape index: {}]  }
   0x1   :  { %v453_v0 = vld [vmem:[%s699_s1 + $0xe4] ss:$16 sps:$4 sm:$0xff]   ;;  %288 = vmatprep.mubr.bf16.mxu0 %v533_v1  ;;  %331 = vmatprep.mubr.bf16.mxu1 %v533_v1  ;;  %v455_v2 = vld [vmem:[%s699_s1 + $0xec] ss:$16 sps:$4 sm:$0xff]   ;;  %v457_v3 = vld [vmem:[%s699_s1 + $0xe0] ss:$16 sps:$4 sm:$0xff]  }
   0x2   :  { %256 = vmatprep.subr.bf16.mxu0 %v453_v0  ;;  %v458_v4 = vld [vmem:[%s699_s1 + $0xe8] ss:$16 sps:$4 sm:$0xff]   ;;  %299 = vmatprep.subr.bf16.mxu1 %v455_v2  ;;  %v459_v5 = vld [vmem:[%s699_s1 + $0xc4] ss:$16 sps:$4 sm:$0xff]   ;;  %v461_v6 = vld [vmem:[%s699_s1 + $0xcc] ss:$16 sps:$4 sm:$0xff]  }
   0x3   :  { %257 = vmatpush1.bf16.msra.mxu0 %v457_v3  ;;  %300 = vmatpush1.bf16.msra.mxu1 %v458_v4  ;;  %v463_v7 = vld [vmem:[%s699_s1 + $0xc0] ss:$16 sps:$4 sm:$0xff]   ;;  %v464_v8 = vld [vmem:[%s699_s1 + $0xc8] ss:$16 sps:$4 sm:$0xff]   ;;  %v465_v9 = vld [vmem:[%s699_s1 + $0xa4] ss:$16 sps:$4 sm:$0xff]  }
   0x4   :  { %258 = vmatprep.subr.bf16.mxu0 %v459_v5  ;;  %301 = vmatprep.subr.bf16.mxu1 %v461_v6  ;;  %v467_v10 = vld [vmem:[%s699_s1 + $0xac] ss:$16 sps:$4 sm:$0xff]   ;;  %v469_v11 = vld [vmem:[%s699_s1 + $0xa0] ss:$16 sps:$4 sm:$0xff]   ;;  %v470_v12 = vld [vmem:[%s699_s1 + $0xa8] ss:$16 sps:$4 sm:$0xff]  }
   0x5   :  { %v471_v13 = vld [vmem:[%s699_s1 + $0x84] ss:$16 sps:$4 sm:$0xff]   ;;  %v473_v14 = vld [vmem:[%s699_s1 + $0x8c] ss:$16 sps:$4 sm:$0xff]   ;;  %v475_v15 = vld [vmem:[%s699_s1 + $0x80] ss:$16 sps:$4 sm:$0xff]  }
   0x6   :  { %v476_v16 = vld [vmem:[%s699_s1 + $0x88] ss:$16 sps:$4 sm:$0xff]   ;;  %v477_v17 = vld [vmem:[%s699_s1 + $0x64] ss:$16 sps:$4 sm:$0xff]   ;;  %v479_v18 = vld [vmem:[%s699_s1 + $0x6c] ss:$16 sps:$4 sm:$0xff]  }
   0x7   :  { %259 = vmatpush1.bf16.msra.mxu0 %v463_v7  ;;  %302 = vmatpush1.bf16.msra.mxu1 %v464_v8  ;;  %v481_v19 = vld [vmem:[%s699_s1 + $0x60] ss:$16 sps:$4 sm:$0xff]   ;;  %v482_v20 = vld [vmem:[%s699_s1 + $0x68] ss:$16 sps:$4 sm:$0xff]   ;;  %v483_v21 = vld [vmem:[%s699_s1 + $0x44] ss:$16 sps:$4 sm:$0xff]  }
   0x8   :  { %260 = vmatprep.subr.bf16.mxu0 %v465_v9  ;;  %303 = vmatprep.subr.bf16.mxu1 %v467_v10  ;;  %v485_v22 = vld [vmem:[%s699_s1 + $0x4c] ss:$16 sps:$4 sm:$0xff]   ;;  %v487_v23 = vld [vmem:[%s699_s1 + $0x40] ss:$16 sps:$4 sm:$0xff]   ;;  %v488_v24 = vld [vmem:[%s699_s1 + $0x48] ss:$16 sps:$4 sm:$0xff]  }
   0x9   :  { %v489_v25 = vld [vmem:[%s699_s1 + $0x24] ss:$16 sps:$4 sm:$0xff]   ;;  %v491_v26 = vld [vmem:[%s699_s1 + $0x2c] ss:$16 sps:$4 sm:$0xff]   ;;  %v410_v29 = vld [vmem:[%s701_s3] ss:$0 sm:$0xff] }
   0xa   :  { %v21_v27 = vld [vmem:[%s700_s0] sm:$0xff]  ;;  %v22_v28 = vld [vmem:[%s700_s0 + $0x8] sm:$0xff]  ;;  %v77_v43 = vshrl.u32 %v76_v42, 7 }
   0xb   :  { %261 = vmatpush1.bf16.msra.mxu0 %v469_v11  ;;  %304 = vmatpush1.bf16.msra.mxu1 %v470_v12  ;;  %v30_v30 = vmul.f32 %v410_v29, %v21_v27  ;;  %v31_v31 = vmul.f32 %v410_v29, %v22_v28  ;;  %v493_v32 = vld [vmem:[%s699_s1 + $0x20] ss:$16 sps:$4 sm:$0xff]   ;;  %v494_v33 = vld [vmem:[%s699_s1 + $0x28] ss:$16 sps:$4 sm:$0xff]   ;;  %v495_v35 = vld [vmem:[%s699_s1 + $0x4] ss:$16 sps:$4 sm:$0xff]  }
   0xc   :  { %262 = vmatprep.subr.bf16.mxu0 %v471_v13  ;;  %305 = vmatprep.subr.bf16.mxu1 %v473_v14  ;;  %v411_v34 = vld [vmem:[%s702_s4] ss:$0 sm:$0xff]  ;;  %v497_v36 = vld [vmem:[%s699_s1 + $0xc] ss:$16 sps:$4 sm:$0xff]   ;;  %v500_v40 = vld [vmem:[%s699_s1 + $0x8] ss:$16 sps:$4 sm:$0xff]  }
   0xd   :  { %v39_v37 = vadd.f32 %v411_v34, %v30_v30  ;;  %v40_v38 = vadd.f32 %v411_v34, %v31_v31  ;;  %v499_v39 = vld [vmem:[%s699_s1] ss:$16 sps:$4 sm:$0xff]   ;;  %v78_v44 = vsub.s32 0, %v77_v43  ;;  %v86_v45 = vsub.s32 2, %v77_v43 }
   0xe   :  { %v74_v46 = vld [vmem:[%s703_s2] sm:$0xf]  ;;  %v82_v47 = vsub.s32 1, %v77_v43  ;;  %v90_v48 = vsub.s32 3, %v77_v43 }
   0xf   :  { %263 = vmatpush1.bf16.msra.mxu0 %v475_v15  ;;  %306 = vmatpush1.bf16.msra.mxu1 %v476_v16  ;;  %v41_v41 = vpack.c.bf16 %v40_v38, %v39_v37  ;;  %v79_v49 = vrot.slane %v74_v46, %v78_v44  ;;  %v87_v50 = vrot.slane %v74_v46, %v86_v45 }
  0x10   :  { %264 = vmatprep.subr.bf16.mxu0 %v477_v17  ;;  %307 = vmatprep.subr.bf16.mxu1 %v479_v18  ;;  %v83_v51 = vrot.slane %v74_v46, %v82_v47  ;;  %v91_v52 = vrot.slane %v74_v46, %v90_v48 }
  0x13   :  { %265 = vmatpush1.bf16.msra.mxu0 %v481_v19  ;;  %308 = vmatpush1.bf16.msra.mxu1 %v482_v20 }
  0x14   :  { %266 = vmatprep.subr.bf16.mxu0 %v483_v21  ;;  %309 = vmatprep.subr.bf16.mxu1 %v485_v22 }
  0x17   :  { %267 = vmatpush1.bf16.msra.mxu0 %v487_v23  ;;  %310 = vmatpush1.bf16.msra.mxu1 %v488_v24 }
  0x18   :  { %268 = vmatprep.subr.bf16.mxu0 %v489_v25  ;;  %311 = vmatprep.subr.bf16.mxu1 %v491_v26 }
  0x1b   :  { %269 = vmatpush1.bf16.msra.mxu0 %v493_v32  ;;  %312 = vmatpush1.bf16.msra.mxu1 %v494_v33 }
  0x1c   :  { %270 = vmatprep.subr.bf16.mxu0 %v495_v35  ;;  %313 = vmatprep.subr.bf16.mxu1 %v497_v36 }
  0x1f   :  { %271 = vmatpush1.bf16.msra.mxu0 %v499_v39  ;;  %314 = vmatpush1.bf16.msra.mxu1 %v500_v40 }
  0x22   :  { %289 = vmatmul.mubr.bf16.vlgmr.msra.gmra.mxu0 %v41_v41  ;;  %332 = vmatmul.mubr.bf16.vlgmr.msra.gmra.mxu1 %v41_v41 }
  0xe2   :  { %v290_v53 = vpop.f32.mrf.mxu0  ;;  %v333_v54 = vpop.f32.mrf.mxu1 }
  0xe3   :  { %v291_v55 = vadd.f32 %v290_v53, %v79_v49  ;;  %v334_v56 = vadd.f32 %v333_v54, %v87_v50 }
  0xe4   :  { %v292_v57 = vpop.f32.mrf.mxu0  ;;  %v335_v58 = vpop.f32.mrf.mxu1 }
  0xe5   :  { %v444_v59 = vmul.f32 -1.442695, %v291_v55  ;;  %v446_v60 = vmul.f32 -1.442695, %v334_v56  ;;  %v293_v61 = vadd.f32 %v292_v57, %v83_v51  ;;  %v336_v62 = vadd.f32 %v335_v58, %v91_v52 }
  0xe6   :  { %v294_v63 = vpop.f32.mrf.mxu0  ;;  %v337_v0 = vpop.f32.mrf.mxu1 }
  0xe7   :  { %501 = vpow2.f32 %v444_v59  ;;  %v445_v1 = vmul.f32 -1.442695, %v293_v61  ;;  %v447_v2 = vmul.f32 -1.442695, %v336_v62  ;;  %v295_v3 = vadd.f32 %v294_v63, %v79_v49 }
  0xe8   :  { %503 = vpow2.f32 %v446_v60  ;;  %v338_v4 = vadd.f32 %v337_v0, %v87_v50  ;;  %v296_v5 = vpop.f32.mrf.mxu0  ;;  %v339_v6 = vpop.f32.mrf.mxu1 }
  0xe9   :  { %505 = vpow2.f32 %v445_v1  ;;  %v448_v7 = vmul.f32 -1.442695, %v295_v3  ;;  %v297_v8 = vadd.f32 %v296_v5, %v83_v51  ;;  %v340_v9 = vadd.f32 %v339_v6, %v91_v52 }
  0xea   :  { %507 = vpow2.f32 %v447_v2  ;;  %v450_v10 = vmul.f32 -1.442695, %v338_v4 }
  0xeb   :  { %509 = vpow2.f32 %v448_v7  ;;  %v449_v11 = vmul.f32 -1.442695, %v297_v8  ;;  %v451_v12 = vmul.f32 -1.442695, %v340_v9 }
  0xec   :  { %511 = vpow2.f32 %v450_v10 }
  0xed   :  { %513 = vpow2.f32 %v449_v11 }
  0xee   :  { %515 = vpow2.f32 %v451_v12 }
  0xf4   :  { %v502_v13 = vpop.eup %501 }
  0xf5   :  { %v504_v14 = vpop.eup %503  ;;  %v366_v15 = vadd.f32 1.0, %v502_v13 }
  0xf6   :  { %v506_v16 = vpop.eup %505  ;;  %v368_v17 = vadd.f32 1.0, %v504_v14 }
  0xf7   :  { %v508_v18 = vpop.eup %507  ;;  %517 = vrcp.f32 %v366_v15  ;;  %v367_v19 = vadd.f32 1.0, %v506_v16 }
  0xf8   :  { %v510_v20 = vpop.eup %509  ;;  %519 = vrcp.f32 %v368_v17  ;;  %v369_v21 = vadd.f32 1.0, %v508_v18 }
  0xf9   :  { %v512_v22 = vpop.eup %511  ;;  %521 = vrcp.f32 %v367_v19  ;;  %v370_v23 = vadd.f32 1.0, %v510_v20 }
  0xfa   :  { %v514_v24 = vpop.eup %513  ;;  %523 = vrcp.f32 %v369_v21  ;;  %v372_v25 = vadd.f32 1.0, %v512_v22 }
  0xfb   :  { %v516_v26 = vpop.eup %515  ;;  %525 = vrcp.f32 %v370_v23  ;;  %v371_v27 = vadd.f32 1.0, %v514_v24 }
  0xfc   :  { %527 = vrcp.f32 %v372_v25  ;;  %v373_v28 = vadd.f32 1.0, %v516_v26 }
  0xfd   :  { %529 = vrcp.f32 %v371_v27 }
  0xfe   :  { %531 = vrcp.f32 %v373_v28 }
 0x104   :  { %v518_v29 = vpop.eup %517 }
 0x105   :  { %v520_v30 = vpop.eup %519  ;;  %v390_v31 = vmul.f32 %v518_v29, %v291_v55 }
 0x106   :  { %v522_v32 = vpop.eup %521  ;;  %v392_v33 = vmul.f32 %v520_v30, %v334_v56 }
 0x107   :  { %v524_v34 = vpop.eup %523  ;;  %398 = vst [vmem:[%s704_s5] sm:$0xff] %v390_v31  ;;  %v391_v35 = vmul.f32 %v522_v32, %v293_v61 }
 0x108   :  { %v526_v36 = vpop.eup %525  ;;  %400 = vst [vmem:[%s704_s5 + $0x10] sm:$0xff] %v392_v33  ;;  %v393_v37 = vmul.f32 %v524_v34, %v336_v62 }
 0x109   :  { %v528_v38 = vpop.eup %527  ;;  %399 = vst [vmem:[%s704_s5 + $0x8] sm:$0xff] %v391_v35  ;;  %v394_v39 = vmul.f32 %v526_v36, %v295_v3 }
 0x10a   :  { %v530_v40 = vpop.eup %529  ;;  %401 = vst [vmem:[%s704_s5 + $0x18] sm:$0xff] %v393_v37  ;;  %v396_v41 = vmul.f32 %v528_v38, %v338_v4 }
 0x10b   :  { %v532_v42 = vpop.eup %531  ;;  %402 = vst [vmem:[%s704_s5 + $0x20] sm:$0xff] %v394_v39  ;;  %v395_v43 = vmul.f32 %v530_v40, %v297_v8 }
 0x10c   :  { %404 = vst [vmem:[%s704_s5 + $0x30] sm:$0xff] %v396_v41  ;;  %v397_v44 = vmul.f32 %v532_v42, %v340_v9 }
 0x10d   :  { %403 = vst [vmem:[%s704_s5 + $0x28] sm:$0xff] %v395_v43 }
 0x10e   :  { %405 = vst [vmem:[%s704_s5 + $0x38] sm:$0xff] %v397_v44 }

// kernel: squeezeformer_encoder.37
= control target key start
LH: loop header
LB: loop body
LE: loop exit
PB: predicated region body
PF: predicated region fallthrough
CT: control target
= control target key end

     0   :  { %s723_s1 = inlined_call_operand.vmem [shape: bf16[512,128], index: 1, kind: input, shape index: {}]   ;;  %s724_s0 = inlined_call_operand.vmem [shape: f32[16,512], index: 0, kind: input, shape index: {}]   ;;  %s725_s2 = inlined_call_operand.vmem [shape: f32[1,128], index: 2, kind: input, shape index: {}]   ;;  %s726_s3 = inlined_call_operand.vmem [shape: f32[16,128], index: 3, kind: input, shape index: {}]   ;;  %s727_s4 = inlined_call_operand.vmem [shape: f32[1,128], index: 4, kind: input, shape index: {}]   ;;  %s728_s5 = inlined_call_operand.vmem [shape: f32[1,128], index: 5, kind: input, shape index: {}]   ;;  %s729_s6 = inlined_call_operand.vmem [shape: f32[16,128], index: 6, kind: output, shape index: {}]  }
   0x1   :  { %v511_v0 = vld [vmem:[%s723_s1 + $0x78] sm:$0xff]   ;;  %v515_v4 = vld [vmem:[%s723_s1 + $0x70] sm:$0xff]   ;;  %v519_v8 = vld [vmem:[%s723_s1 + $0x68] sm:$0xff]  }
   0x2   :  { %v512_v1 = vld [vmem:[%s723_s1 + $0xf8] sm:$0xff]   ;;  %467 = vmatprep.subr.bf16.mxu0 %v511_v0  ;;  %v516_v5 = vld [vmem:[%s723_s1 + $0xf0] sm:$0xff]   ;;  %v520_v9 = vld [vmem:[%s723_s1 + $0xe8] sm:$0xff]  }
   0x3   :  { %v513_v2 = vld [vmem:[%s723_s1 + $0x38] sm:$0xff]   ;;  %489 = vmatprep.subr.bf16.mxu1 %v512_v1  ;;  %v517_v6 = vld [vmem:[%s723_s1 + $0x30] sm:$0xff]   ;;  %v521_v10 = vld [vmem:[%s723_s1 + $0x28] sm:$0xff]  }
   0x4   :  { %v514_v3 = vld [vmem:[%s723_s1 + $0xb8] sm:$0xff]   ;;  %468 = vmatpush3.bf16.msra.mxu0 %v513_v2  ;;  %v518_v7 = vld [vmem:[%s723_s1 + $0xb0] sm:$0xff]   ;;  %v522_v11 = vld [vmem:[%s723_s1 + $0xa8] sm:$0xff]  }
   0x5   :  { %490 = vmatpush3.bf16.msra.mxu1 %v514_v3  ;;  %469 = vmatprep.subr.bf16.mxu0 %v515_v4  ;;  %v523_v12 = vld [vmem:[%s723_s1 + $0x60] sm:$0xff]   ;;  %v527_v16 = vld [vmem:[%s723_s1 + $0x58] sm:$0xff]   ;;  %v531_v20 = vld [vmem:[%s723_s1 + $0x50] sm:$0xff]  }
   0x6   :  { %491 = vmatprep.subr.bf16.mxu1 %v516_v5  ;;  %v524_v13 = vld [vmem:[%s723_s1 + $0xe0] sm:$0xff]   ;;  %v528_v17 = vld [vmem:[%s723_s1 + $0xd8] sm:$0xff]   ;;  %v532_v21 = vld [vmem:[%s723_s1 + $0xd0] sm:$0xff]  }
   0x7   :  { %v525_v14 = vld [vmem:[%s723_s1 + $0x20] sm:$0xff]   ;;  %v529_v18 = vld [vmem:[%s723_s1 + $0x18] sm:$0xff]   ;;  %v533_v22 = vld [vmem:[%s723_s1 + $0x10] sm:$0xff]  }
   0x8   :  { %470 = vmatpush3.bf16.msra.mxu0 %v517_v6  ;;  %v526_v15 = vld [vmem:[%s723_s1 + $0xa0] sm:$0xff]   ;;  %v530_v19 = vld [vmem:[%s723_s1 + $0x98] sm:$0xff]   ;;  %v534_v23 = vld [vmem:[%s723_s1 + $0x90] sm:$0xff]  }
   0x9   :  { %492 = vmatpush3.bf16.msra.mxu1 %v518_v7  ;;  %471 = vmatprep.subr.bf16.mxu0 %v519_v8  ;;  %v535_v24 = vld [vmem:[%s723_s1 + $0x48] sm:$0xff]   ;;  %v539_v28 = vld [vmem:[%s723_s1 + $0x40] sm:$0xff]   ;;  %v27_v34 = vld [vmem:[%s724_s0 + $0x18] sm:$0xff] }
   0xa   :  { %493 = vmatprep.subr.bf16.mxu1 %v520_v9  ;;  %v536_v25 = vld [vmem:[%s723_s1 + $0xc8] sm:$0xff]   ;;  %v540_v29 = vld [vmem:[%s723_s1 + $0xc0] sm:$0xff]   ;;  %v31_v36 = vld [vmem:[%s724_s0 + $0x38] sm:$0xff] }
   0xb   :  { %v537_v26 = vld [vmem:[%s723_s1 + $0x8] sm:$0xff]   ;;  %v541_v30 = vld [vmem:[%s723_s1] sm:$0xff]   ;;  %v35_v39 = vpack.c.bf16 %v31_v36, %v27_v34  ;;  %v26_v41 = vld [vmem:[%s724_s0 + $0x10] sm:$0xff] }
   0xc   :  { %472 = vmatpush3.bf16.msra.mxu0 %v521_v10  ;;  %v538_v27 = vld [vmem:[%s723_s1 + $0x88] sm:$0xff]   ;;  %v542_v31 = vld [vmem:[%s723_s1 + $0x80] sm:$0xff]   ;;  %v30_v42 = vld [vmem:[%s724_s0 + $0x30] sm:$0xff] }
   0xd   :  { %494 = vmatpush3.bf16.msra.mxu1 %v522_v11  ;;  %473 = vmatprep.subr.bf16.mxu0 %v523_v12  ;;  %v25_v32 = vld [vmem:[%s724_s0 + $0x8] sm:$0xff]  ;;  %v24_v37 = vld [vmem:[%s724_s0] sm:$0xff]  ;;  %v34_v43 = vpack.c.bf16 %v30_v42, %v26_v41 }
   0xe   :  { %495 = vmatprep.subr.bf16.mxu1 %v524_v13  ;;  %v29_v33 = vld [vmem:[%s724_s0 + $0x28] sm:$0xff]  ;;  %v28_v38 = vld [vmem:[%s724_s0 + $0x20] sm:$0xff]  ;;  %372 = vmatprep.mubr.bf16.mxu1 %v35_v39 }
   0xf   :  { %v33_v35 = vpack.c.bf16 %v29_v33, %v25_v32  ;;  %v32_v40 = vpack.c.bf16 %v28_v38, %v24_v37  ;;  %v432_v46 = vld [vmem:[%s725_s2] ss:$0 sm:$0xff]  ;;  %v382_v62 = vld [vmem:[%s726_s3 + $0x8] sm:$0xff] }
  0x10   :  { %474 = vmatpush3.bf16.msra.mxu0 %v525_v14  ;;  %v381_v55 = vld [vmem:[%s726_s3] sm:$0xff] }
  0x11   :  { %496 = vmatpush3.bf16.msra.mxu1 %v526_v15  ;;  %475 = vmatprep.subr.bf16.mxu0 %v527_v16  ;;  %v465_v16 = vld [vmem:[%s727_s4] ss:$0 sm:$0xff] }
  0x12   :  { %497 = vmatprep.subr.bf16.mxu1 %v528_v17  ;;  %331 = vmatprep.mubr.bf16.mxu0 %v33_v35 }
  0x14   :  { %476 = vmatpush3.bf16.msra.mxu0 %v529_v18  ;;  %v466_v18 = vld [vmem:[%s728_s5] ss:$0 sm:$0xff] }
  0x15   :  { %498 = vmatpush3.bf16.msra.mxu1 %v530_v19  ;;  %477 = vmatprep.subr.bf16.mxu0 %v531_v20 }
  0x16   :  { %499 = vmatprep.subr.bf16.mxu1 %v532_v21 }
  0x18   :  { %478 = vmatpush3.bf16.msra.mxu0 %v533_v22 }
  0x19   :  { %500 = vmatpush3.bf16.msra.mxu1 %v534_v23  ;;  %479 = vmatprep.subr.bf16.mxu0 %v535_v24 }
  0x1a   :  { %501 = vmatprep.subr.bf16.mxu1 %v536_v25 }
  0x1c   :  { %480 = vmatpush3.bf16.msra.mxu0 %v537_v26 }
  0x1d   :  { %502 = vmatpush3.bf16.msra.mxu1 %v538_v27  ;;  %481 = vmatprep.subr.bf16.mxu0 %v539_v28 }
  0x1e   :  { %503 = vmatprep.subr.bf16.mxu1 %v540_v29 }
  0x20   :  { %482 = vmatpush3.bf16.msra.mxu0 %v541_v30 }
  0x21   :  { %504 = vmatpush3.bf16.msra.mxu1 %v542_v31 }
  0x23   :  { %332 = vmatmul.mubr.bf16.vlgmr.msra.gmra.mxu0 %v32_v40 }
  0x24   :  { %373 = vmatmul.mubr.bf16.vlgmr.msra.gmra.mxu1 %v34_v43 }
  0xe3   :  { %v483_v44 = vpop.f32.mrf.mxu0 }
  0xe4   :  { %v505_v45 = vpop.f32.mrf.mxu1 }
  0xe5   :  { %v484_v47 = vpop.f32.mrf.mxu0 }
  0xe6   :  { %v485_v48 = vadd.f32 %v484_v47, %v483_v44  ;;  %v506_v49 = vpop.f32.mrf.mxu1 }
  0xe7   :  { %v486_v50 = vpop.f32.mrf.mxu0  ;;  %v507_v52 = vadd.f32 %v506_v49, %v505_v45 }
  0xe8   :  { %v334_v51 = vadd.f32 %v485_v48, %v432_v46  ;;  %v508_v53 = vpop.f32.mrf.mxu1 }
  0xe9   :  { %v487_v54 = vpop.f32.mrf.mxu0 }
  0xea   :  { %v375_v56 = vadd.f32 %v507_v52, %v334_v51  ;;  %v488_v57 = vadd.f32 %v487_v54, %v486_v50  ;;  %v509_v58 = vpop.f32.mrf.mxu1 }
  0xeb   :  { %v510_v60 = vadd.f32 %v509_v58, %v508_v53 }
  0xec   :  { %v337_v59 = vadd.f32 %v488_v57, %v432_v46  ;;  %v383_v61 = vadd.f32 %v381_v55, %v375_v56 }
  0xee   :  { %v378_v63 = vadd.f32 %v510_v60, %v337_v59  ;;  %385 = vadd.xlane.f32.xlu0 %v383_v61 }
  0xf0   :  { %v384_v0 = vadd.f32 %v382_v62, %v378_v63 }
  0xf2   :  { %387 = vadd.xlane.f32.xlu0 %v384_v0 }
 0x177   :  { %v386_v1 = vpop.xlane.xlu0 %385 }
 0x178   :  { %v390_v2 = vmul.f32 0.0078125, %v386_v1 }
 0x17a   :  { %v392_v3 = vsub.f32 %v383_v61, %v390_v2 }
 0x17b   :  { %v388_v4 = vpop.xlane.xlu0 %387 }
 0x17c   :  { %v391_v5 = vmul.f32 0.0078125, %v388_v4  ;;  %v394_v6 = vmul.f32 %v392_v3, %v392_v3 }
 0x17e   :  { %v393_v7 = vsub.f32 %v384_v0, %v391_v5  ;;  %396 = vadd.xlane.f32.xlu1 %v394_v6 }
 0x180   :  { %v395_v8 = vmul.f32 %v393_v7, %v393_v7 }
 0x182   :  { %398 = vadd.xlane.f32.xlu1 %v395_v8 }
 0x207   :  { %v397_v9 = vpop.xlane.xlu1 %396 }
 0x208   :  { %v400_v10 = vmul.f32 0.0078125, %v397_v9 }
 0x20a   :  { %v402_v11 = vadd.f32 1e-05, %v400_v10 }
 0x20b   :  { %v399_v12 = vpop.xlane.xlu1 %398 }
 0x20c   :  { %543 = vrsqrt.f32 %v402_v11  ;;  %v401_v13 = vmul.f32 0.0078125, %v399_v12 }
 0x20e   :  { %v403_v14 = vadd.f32 1e-05, %v401_v13 }
 0x210   :  { %545 = vrsqrt.f32 %v403_v14 }
 0x219   :  { %v544_v15 = vpop.eup %543 }
 0x21a   :  { %v406_v17 = vmul.f32 %v544_v15, %v392_v3 }
 0x21c   :  { %v415_v19 = vmul.f32 %v465_v16, %v406_v17 }
 0x21d   :  { %v546_v20 = vpop.eup %545 }
 0x21e   :  { %v424_v21 = vadd.f32 %v466_v18, %v415_v19  ;;  %v407_v22 = vmul.f32 %v546_v20, %v393_v7 }
 0x220   :  { %426 = vst [vmem:[%s729_s6] sm:$0xff] %v424_v21  ;;  %v416_v23 = vmul.f32 %v465_v16, %v407_v22 }
 0x222   :  { %v425_v24 = vadd.f32 %v466_v18, %v416_v23 }
 0x224   :  { %427 = vst [vmem:[%s729_s6 + $0x8] sm:$0xff] %v425_v24 }

// kernel: squeezeformer_encoder.38
= control target key start
LH: loop header
LB: loop body
LE: loop exit
PB: predicated region body
PF: predicated region fallthrough
CT: control target
= control target key end

     0   :  { %v292_v1 = vmov 0   ;;  %v60_v26 = vlaneseq  ;;  %s398_s1 = inlined_call_operand.vmem [shape: bf16[128,256], index: 1, kind: input, shape index: {}]   ;;  %s399_s0 = inlined_call_operand.vmem [shape: f32[16,128], index: 0, kind: input, shape index: {}]   ;;  %s400_s3 = inlined_call_operand.vmem [shape: f32[1,128], index: 3, kind: input, shape index: {}]   ;;  %s401_s4 = inlined_call_operand.vmem [shape: f32[1,128], index: 4, kind: input, shape index: {}]   ;;  %s402_s2 = inlined_call_operand.vmem [shape: f32[1,256], index: 2, kind: input, shape index: {}]   ;;  %s403_s5 = inlined_call_operand.vmem [shape: f32[16,256], index: 5, kind: output, shape index: {}]  }
   0x1   :  { %v252_v0 = vld [vmem:[%s398_s1 + $0x74] ss:$8 sps:$4 sm:$0xff]   ;;  %182 = vmatprep.mubr.bf16.mxu0 %v292_v1  ;;  %v254_v2 = vld [vmem:[%s398_s1 + $0x70] ss:$8 sps:$4 sm:$0xff]   ;;  %v255_v3 = vld [vmem:[%s398_s1 + $0x64] ss:$8 sps:$4 sm:$0xff]  }
   0x2   :  { %150 = vmatprep.subr.bf16.mxu0 %v252_v0  ;;  %v257_v4 = vld [vmem:[%s398_s1 + $0x60] ss:$8 sps:$4 sm:$0xff]   ;;  %v258_v5 = vld [vmem:[%s398_s1 + $0x54] ss:$8 sps:$4 sm:$0xff]   ;;  %v260_v6 = vld [vmem:[%s398_s1 + $0x50] ss:$8 sps:$4 sm:$0xff]  }
   0x3   :  { %151 = vmatpush1.bf16.msra.mxu0 %v254_v2  ;;  %v261_v7 = vld [vmem:[%s398_s1 + $0x44] ss:$8 sps:$4 sm:$0xff]   ;;  %v263_v8 = vld [vmem:[%s398_s1 + $0x40] ss:$8 sps:$4 sm:$0xff]   ;;  %v264_v9 = vld [vmem:[%s398_s1 + $0x34] ss:$8 sps:$4 sm:$0xff]  }
   0x4   :  { %152 = vmatprep.subr.bf16.mxu0 %v255_v3  ;;  %v266_v10 = vld [vmem:[%s398_s1 + $0x30] ss:$8 sps:$4 sm:$0xff]   ;;  %v267_v11 = vld [vmem:[%s398_s1 + $0x24] ss:$8 sps:$4 sm:$0xff]   ;;  %v269_v12 = vld [vmem:[%s398_s1 + $0x20] ss:$8 sps:$4 sm:$0xff]  }
   0x5   :  { %v21_v13 = vld [vmem:[%s399_s0] sm:$0xff]  ;;  %v22_v14 = vld [vmem:[%s399_s0 + $0x8] sm:$0xff]  ;;  %v270_v16 = vld [vmem:[%s398_s1 + $0x14] ss:$8 sps:$4 sm:$0xff]   ;;  %v61_v27 = vshrl.u32 %v60_v26, 7 }
   0x6   :  { %v229_v15 = vld [vmem:[%s400_s3] ss:$0 sm:$0xff]  ;;  %v272_v19 = vld [vmem:[%s398_s1 + $0x10] ss:$8 sps:$4 sm:$0xff]   ;;  %v273_v21 = vld [vmem:[%s398_s1 + $0x4] ss:$8 sps:$4 sm:$0xff]  }
   0x7   :  { %153 = vmatpush1.bf16.msra.mxu0 %v257_v4  ;;  %v30_v17 = vmul.f32 %v229_v15, %v21_v13  ;;  %v31_v18 = vmul.f32 %v229_v15, %v22_v14  ;;  %v230_v20 = vld [vmem:[%s401_s4] ss:$0 sm:$0xff]  ;;  %v62_v28 = vsub.s32 0, %v61_v27  ;;  %v66_v30 = vsub.s32 1, %v61_v27 }
   0x8   :  { %154 = vmatprep.subr.bf16.mxu0 %v258_v5  ;;  %v275_v24 = vld [vmem:[%s398_s1] ss:$8 sps:$4 sm:$0xff]  }
   0x9   :  { %v39_v22 = vadd.f32 %v230_v20, %v30_v17  ;;  %v40_v23 = vadd.f32 %v230_v20, %v31_v18  ;;  %v58_v29 = vld [vmem:[%s402_s2] sm:$0x3] }
   0xa   :  { %v63_v31 = vrot.slane %v58_v29, %v62_v28  ;;  %v67_v32 = vrot.slane %v58_v29, %v66_v30 }
   0xb   :  { %155 = vmatpush1.bf16.msra.mxu0 %v260_v6  ;;  %v41_v25 = vpack.c.bf16 %v40_v23, %v39_v22 }
   0xc   :  { %156 = vmatprep.subr.bf16.mxu0 %v261_v7 }
   0xf   :  { %157 = vmatpush1.bf16.msra.mxu0 %v263_v8 }
  0x10   :  { %158 = vmatprep.subr.bf16.mxu0 %v264_v9 }
  0x13   :  { %159 = vmatpush1.bf16.msra.mxu0 %v266_v10 }
  0x14   :  { %160 = vmatprep.subr.bf16.mxu0 %v267_v11 }
  0x17   :  { %161 = vmatpush1.bf16.msra.mxu0 %v269_v12 }
  0x18   :  { %162 = vmatprep.subr.bf16.mxu0 %v270_v16 }
  0x1b   :  { %163 = vmatpush1.bf16.msra.mxu0 %v272_v19 }
  0x1c   :  { %164 = vmatprep.subr.bf16.mxu0 %v273_v21 }
  0x1f   :  { %165 = vmatpush1.bf16.msra.mxu0 %v275_v24 }
  0x22   :  { %183 = vmatmul.mubr.bf16.vlgmr.msra.gmra.mxu0 %v41_v25 }
  0xe2   :  { %v184_v33 = vpop.f32.mrf.mxu0 }
  0xe3   :  { %v185_v34 = vadd.f32 %v184_v33, %v63_v31 }
  0xe4   :  { %v186_v35 = vpop.f32.mrf.mxu0 }
  0xe5   :  { %v247_v36 = vmul.f32 -1.442695, %v185_v34  ;;  %v187_v37 = vadd.f32 %v186_v35, %v67_v32 }
  0xe6   :  { %v188_v38 = vpop.f32.mrf.mxu0 }
  0xe7   :  { %276 = vpow2.f32 %v247_v36  ;;  %v248_v39 = vmul.f32 -1.442695, %v187_v37  ;;  %v189_v40 = vadd.f32 %v188_v38, %v63_v31 }
  0xe8   :  { %v190_v41 = vpop.f32.mrf.mxu0 }
  0xe9   :  { %278 = vpow2.f32 %v248_v39  ;;  %v249_v42 = vmul.f32 -1.442695, %v189_v40  ;;  %v191_v43 = vadd.f32 %v190_v41, %v67_v32 }
  0xeb   :  { %280 = vpow2.f32 %v249_v42  ;;  %v250_v44 = vmul.f32 -1.442695, %v191_v43 }
  0xed   :  { %282 = vpow2.f32 %v250_v44 }
  0xf4   :  { %v277_v45 = vpop.eup %276 }
  0xf5   :  { %v205_v46 = vadd.f32 1.0, %v277_v45 }
  0xf6   :  { %v279_v47 = vpop.eup %278 }
  0xf7   :  { %284 = vrcp.f32 %v205_v46  ;;  %v206_v48 = vadd.f32 1.0, %v279_v47 }
  0xf8   :  { %v281_v49 = vpop.eup %280 }
  0xf9   :  { %286 = vrcp.f32 %v206_v48  ;;  %v207_v50 = vadd.f32 1.0, %v281_v49 }
  0xfa   :  { %v283_v51 = vpop.eup %282 }
  0xfb   :  { %288 = vrcp.f32 %v207_v50  ;;  %v208_v52 = vadd.f32 1.0, %v283_v51 }
  0xfd   :  { %290 = vrcp.f32 %v208_v52 }
 0x104   :  { %v285_v53 = vpop.eup %284 }
 0x105   :  { %v217_v54 = vmul.f32 %v285_v53, %v185_v34 }
 0x106   :  { %v287_v55 = vpop.eup %286 }
 0x107   :  { %221 = vst [vmem:[%s403_s5] sm:$0xff] %v217_v54  ;;  %v218_v56 = vmul.f32 %v287_v55, %v187_v37 }
 0x108   :  { %v289_v57 = vpop.eup %288 }
 0x109   :  { %222 = vst [vmem:[%s403_s5 + $0x8] sm:$0xff] %v218_v56  ;;  %v219_v58 = vmul.f32 %v289_v57, %v189_v40 }
 0x10a   :  { %v291_v59 = vpop.eup %290 }
 0x10b   :  { %223 = vst [vmem:[%s403_s5 + $0x10] sm:$0xff] %v219_v58  ;;  %v220_v60 = vmul.f32 %v291_v59, %v191_v43 }
 0x10d   :  { %224 = vst [vmem:[%s403_s5 + $0x18] sm:$0xff] %v220_v60 }

// kernel: squeezeformer_encoder.39
= control target key start
LH: loop header
LB: loop body
LE: loop exit
PB: predicated region body
PF: predicated region fallthrough
CT: control target
= control target key end

     0   :  { %s846_s18 = smov 0   ;;  %s848_s19 = smov 0   ;;  %s989_s0 = inlined_call_operand.vmem [shape: f32[2,14,256], index: 0, kind: input, shape index: {}]   ;;  %s990_s1 = inlined_call_operand.vmem [shape: f32[7,256], index: 1, kind: input, shape index: {}]   ;;  %s991_s2 = inlined_call_operand.vmem [shape: f32[1,256], index: 2, kind: input, shape index: {}]   ;;  %s992_s3 = inlined_call_operand.vmem [shape: f32[1,256], index: 3, kind: input, shape index: {}]   ;;  %s993_s4 = inlined_call_operand.vmem [shape: f32[1,256], index: 4, kind: input, shape index: {}]   ;;  %s994_s5 = inlined_call_operand.vmem [shape: f32[2,8,256], index: 5, kind: output, shape index: {}]  }
   0x1   :  { %s850_s20 = smov 0  }
   0x2 LB: > { %s27_s21 = sadd.s32 1, %s810_s19  ;;  %p749_p0 = scmp.ge.s32.totalorder %s814_s20, 1  ;;  %s814_s20 = sphi %s850_s20, %s15_s20   ;;  %s810_s19 = sphi %s848_s19, %s996_s19   ;;  %s806_s18 = sphi %s846_s18, %s995_s18  }
   0x3   : > { %p29_p1 = scmp.ge.s32.totalorder %s27_s21, 2  ;;  %p249_p2 = scmp.lt.s32.totalorder %s814_s20, 3 }
   0x5   : > { %s998_s21 = smov (%p29_p1, %s27_s21), 0  ;;  %p250_p3 = pnand %p749_p0, %p249_p2 }
   0x6   : > { %p303_p4 = scmp.lt.s32.totalorder (!%p250_p3), %s806_s18, 1 }
   0x7   : > { %253 = sbr.rel (%p250_p3) target bundleno = 86 (0x56), region = 40 }
   0xc   : > { %v347_v0 = vlaneseq  ;;  %s1000_s18 = smov (!%p303_p4, %s806_s18), 1  ;;  %v871_v2 = vld [vmem:[%s990_s1] sm:$0x7f]  ;;  %v876_v3 = vld [vmem:[%s990_s1 + $0x8] sm:$0x7f]  ;;  %vm379_vm0 = vcmask 1046528  }
   0xd   : > { %s758_s26 = sshll.u32 %s1000_s18, 5  ;;  %vm410_vm1 = vcmask 1045504   ;;  %vm441_vm2 = vcmask 1044480   ;;  %vm472_vm3 = vcmask 1043456   ;;  %vm503_vm4 = vcmask 1042432   ;;  %s759_s11 = sshll.u32 %s1000_s18, 4 }
   0xe   : > { %v866_v1 = vshrl.u32 %v347_v0, 7  ;;  %s890_s29 = scalar_lea.vmem %s989_s0, %s758_s26  ;;  %vm534_vm5 = vcmask 1041408   ;;  %s341_s14 = scalar_lea.vmem %s994_s5, %s759_s11 }
   0xf   : > { %v345_v11 = vld [vmem:[%s890_s29] sm:$0xff]  ;;  %v346_v12 = vld [vmem:[%s890_s29 + $0x8] sm:$0xff]  ;;  %v361_v19 = vld [vmem:[%s890_s29 + $0x10] sm:$0x1] }
  0x10   : > { %v880_v4 = vsub.s32 0, %v866_v1  ;;  %v883_v5 = vsub.s32 1, %v866_v1  ;;  %v396_v6 = vsub.s32 2, %v866_v1  ;;  %v427_v7 = vsub.s32 3, %v866_v1  ;;  %v359_v15 = vld [vmem:[%s890_s29] sm:$0xfe] }
  0x11   : > { %v458_v8 = vsub.s32 4, %v866_v1  ;;  %v489_v9 = vsub.s32 5, %v866_v1  ;;  %v520_v10 = vsub.s32 6, %v866_v1  ;;  %v360_v18 = vld [vmem:[%s890_s29 + $0x8] sm:$0xfe] }
  0x12   : > { %v350_v13 = vrot.slane %v871_v2, %v880_v4  ;;  %v354_v14 = vrot.slane %v876_v3, %v880_v4  ;;  %v366_v16 = vrot.slane %v871_v2, %v883_v5  ;;  %v370_v17 = vrot.slane %v876_v3, %v883_v5  ;;  %v362_v20 = vld [vmem:[%s890_s29 + $0x18] sm:$0x1]  ;;  %v390_v29 = vld [vmem:[%s890_s29] sm:$0xfc]  ;;  %v391_v30 = vld [vmem:[%s890_s29 + $0x8] sm:$0xfc] }
  0x13   : > { %v397_v21 = vrot.slane %v871_v2, %v396_v6  ;;  %v401_v22 = vrot.slane %v876_v3, %v396_v6  ;;  %v428_v23 = vrot.slane %v871_v2, %v427_v7  ;;  %v432_v24 = vrot.slane %v876_v3, %v427_v7  ;;  %v392_v31 = vld [vmem:[%s890_s29 + $0x10] sm:$0x3]  ;;  %v393_v34 = vld [vmem:[%s890_s29 + $0x18] sm:$0x3]  ;;  %v421_v37 = vld [vmem:[%s890_s29] sm:$0xf8] }
  0x14   : > { %v355_v25 = vmul.f32 %v350_v13, %v345_v11  ;;  %v356_v26 = vmul.f32 %v354_v14, %v346_v12  ;;  %v371_v27 = vmul.f32 %v366_v16, %v359_v15  ;;  %v372_v28 = vmul.f32 %v370_v17, %v360_v18  ;;  %v422_v38 = vld [vmem:[%s890_s29 + $0x8] sm:$0xf8]  ;;  %v423_v43 = vld [vmem:[%s890_s29 + $0x10] sm:$0x7]  ;;  %v424_v44 = vld [vmem:[%s890_s29 + $0x18] sm:$0x7] }
  0x15   : > { %v373_v32 = vmul.f32 %v366_v16, %v361_v19  ;;  %v374_v33 = vmul.f32 %v370_v17, %v362_v20  ;;  %v402_v35 = vmul.f32 %v397_v21, %v390_v29  ;;  %v403_v36 = vmul.f32 %v401_v22, %v391_v30  ;;  %v452_v61 = vld [vmem:[%s890_s29] sm:$0xf0]  ;;  %v453_v62 = vld [vmem:[%s890_s29 + $0x8] sm:$0xf0]  ;;  %v454_v11 = vld [vmem:[%s890_s29 + $0x10] sm:$0xf] }
  0x16   : > { %v380_v39 = vrot.slane %v371_v27, 1  ;;  %v383_v40 = vrot.slane %v372_v28, 1  ;;  %v404_v41 = vmul.f32 %v397_v21, %v392_v31  ;;  %v405_v42 = vmul.f32 %v401_v22, %v393_v34  ;;  %v455_v14 = vld [vmem:[%s890_s29 + $0x18] sm:$0xf]  ;;  %v483_v17 = vld [vmem:[%s890_s29] sm:$0xe0] }
  0x17   : > { %v381_v45 = vrot.slane %v373_v32, 1  ;;  %v384_v46 = vrot.slane %v374_v33, 1  ;;  %v411_v47 = vrot.slane %v402_v35, 2  ;;  %v414_v48 = vrot.slane %v403_v36, 2  ;;  %v484_v18 = vld [vmem:[%s890_s29 + $0x8] sm:$0xe0] }
  0x18   : > { %v412_v49 = vrot.slane %v404_v41, 2  ;;  %v415_v50 = vrot.slane %v405_v42, 2  ;;  %v433_v51 = vmul.f32 %v428_v23, %v421_v37  ;;  %v434_v52 = vmul.f32 %v432_v24, %v422_v38  ;;  %v485_v21 = vld [vmem:[%s890_s29 + $0x10] sm:$0x1f]  ;;  %v486_v22 = vld [vmem:[%s890_s29 + $0x18] sm:$0x1f] }
  0x19   : > { %v382_v53 = vsel %vm379_vm0, %v380_v39, %v381_v45  ;;  %v385_v54 = vsel %vm379_vm0, %v383_v40, %v384_v46  ;;  %v435_v55 = vmul.f32 %v428_v23, %v423_v43  ;;  %v436_v56 = vmul.f32 %v432_v24, %v424_v44  ;;  %v514_v36 = vld [vmem:[%s890_s29] sm:$0xc0]  ;;  %v515_v40 = vld [vmem:[%s890_s29 + $0x8] sm:$0xc0]  ;;  %v516_v43 = vld [vmem:[%s890_s29 + $0x10] sm:$0x3f] }
  0x1a   : > { %v388_v57 = vadd.f32 %v382_v53, %v355_v25  ;;  %v389_v58 = vadd.f32 %v385_v54, %v356_v26  ;;  %v413_v59 = vsel %vm410_vm1, %v411_v47, %v412_v49  ;;  %v416_v60 = vsel %vm410_vm1, %v414_v48, %v415_v50  ;;  %v517_v44 = vld [vmem:[%s890_s29 + $0x18] sm:$0x3f]  ;;  %v545_v1 = vld [vmem:[%s991_s2] sm:$0x3] }
  0x1b   : > { %v442_v63 = vrot.slane %v433_v51, 3  ;;  %v443_v0 = vrot.slane %v435_v55, 3  ;;  %v445_v6 = vrot.slane %v434_v52, 3  ;;  %v446_v7 = vrot.slane %v436_v56, 3 }
  0x1c   : > { %v419_v12 = vadd.f32 %v413_v59, %v388_v57  ;;  %v420_v13 = vadd.f32 %v416_v60, %v389_v58  ;;  %v459_v15 = vrot.slane %v871_v2, %v458_v8  ;;  %v463_v16 = vrot.slane %v876_v3, %v458_v8  ;;  %v559_v60 = vld [vmem:[%s992_s3] sm:$0x3] }
  0x1d   : > { %v444_v19 = vsel %vm441_vm2, %v442_v63, %v443_v0  ;;  %v447_v20 = vsel %vm441_vm2, %v445_v6, %v446_v7  ;;  %v490_v23 = vrot.slane %v871_v2, %v489_v9  ;;  %v494_v24 = vrot.slane %v876_v3, %v489_v9  ;;  %v573_v6 = vld [vmem:[%s993_s4] sm:$0x3] }
  0x1e   : > { %v450_v25 = vadd.f32 %v444_v19, %v419_v12  ;;  %v451_v26 = vadd.f32 %v447_v20, %v420_v13  ;;  %v464_v8 = vmul.f32 %v459_v15, %v452_v61  ;;  %v465_v27 = vmul.f32 %v463_v16, %v453_v62 }
  0x1f   : > { %v466_v28 = vmul.f32 %v459_v15, %v454_v11  ;;  %v467_v29 = vmul.f32 %v463_v16, %v455_v14  ;;  %v495_v30 = vmul.f32 %v490_v23, %v483_v17  ;;  %v496_v31 = vmul.f32 %v494_v24, %v484_v18 }
  0x20   : > { %v473_v32 = vrot.slane %v464_v8, 4  ;;  %v476_v33 = vrot.slane %v465_v27, 4  ;;  %v497_v34 = vmul.f32 %v490_v23, %v485_v21  ;;  %v498_v35 = vmul.f32 %v494_v24, %v486_v22 }
  0x21   : > { %v474_v37 = vrot.slane %v466_v28, 4  ;;  %v477_v38 = vrot.slane %v467_v29, 4  ;;  %v504_v39 = vrot.slane %v495_v30, 5  ;;  %v507_v9 = vrot.slane %v496_v31, 5 }
  0x22   : > { %v505_v41 = vrot.slane %v497_v34, 5  ;;  %v508_v42 = vrot.slane %v498_v35, 5  ;;  %v521_v45 = vrot.slane %v871_v2, %v520_v10  ;;  %v525_v46 = vrot.slane %v876_v3, %v520_v10 }
  0x23   : > { %v475_v47 = vsel %vm472_vm3, %v473_v32, %v474_v37  ;;  %v478_v48 = vsel %vm472_vm3, %v476_v33, %v477_v38  ;;  %v550_v61 = vrot.slane %v545_v1, %v880_v4  ;;  %v554_v62 = vrot.slane %v545_v1, %v883_v5 }
  0x24   : > { %v481_v49 = vadd.f32 %v475_v47, %v450_v25  ;;  %v482_v50 = vadd.f32 %v478_v48, %v451_v26  ;;  %v506_v51 = vsel %vm503_vm4, %v504_v39, %v505_v41  ;;  %v509_v52 = vsel %vm503_vm4, %v507_v9, %v508_v42 }
  0x25   : > { %v526_v53 = vmul.f32 %v521_v45, %v514_v36  ;;  %v527_v54 = vmul.f32 %v525_v46, %v515_v40  ;;  %v528_v55 = vmul.f32 %v521_v45, %v516_v43  ;;  %v529_v56 = vmul.f32 %v525_v46, %v517_v44 }
  0x26   : > { %v512_v2 = vadd.f32 %v506_v51, %v481_v49  ;;  %v513_v3 = vadd.f32 %v509_v52, %v482_v50  ;;  %v564_v12 = vrot.slane %v559_v60, %v880_v4  ;;  %v568_v13 = vrot.slane %v559_v60, %v883_v5 }
  0x27   : > { %v535_v10 = vrot.slane %v526_v53, 6  ;;  %v536_v57 = vrot.slane %v528_v55, 6  ;;  %v538_v58 = vrot.slane %v527_v54, 6  ;;  %v539_v59 = vrot.slane %v529_v56, 6 }
  0x28   : > { %v578_v16 = vrot.slane %v573_v6, %v880_v4  ;;  %v582_v17 = vrot.slane %v573_v6, %v883_v5 }
  0x29   : > { %v537_v63 = vsel %vm534_vm5, %v535_v10, %v536_v57  ;;  %v540_v0 = vsel %vm534_vm5, %v538_v58, %v539_v59 }
  0x2a   : > { %v543_v7 = vadd.f32 %v537_v63, %v512_v2  ;;  %v544_v11 = vadd.f32 %v540_v0, %v513_v3 }
  0x2c   : > { %v557_v14 = vadd.f32 %v550_v61, %v543_v7  ;;  %v558_v15 = vadd.f32 %v554_v62, %v544_v11 }
  0x2e   : > { %v571_v18 = vmul.f32 %v564_v12, %v557_v14  ;;  %v572_v19 = vmul.f32 %v568_v13, %v558_v15 }
  0x30   : > { %v585_v20 = vadd.f32 %v578_v16, %v571_v18  ;;  %v586_v21 = vadd.f32 %v582_v17, %v572_v19 }
  0x32   : > { %v754_v22 = vmul.f32 -1.442695, %v585_v20  ;;  %v755_v23 = vmul.f32 -1.442695, %v586_v21 }
  0x34   : > { %784 = vpow2.f32 %v754_v22 }
  0x35   : > { %786 = vpow2.f32 %v755_v23 }
  0x41   : > { %v785_v24 = vpop.eup %784 }
  0x42   : > { %v787_v25 = vpop.eup %786  ;;  %v593_v26 = vadd.f32 1.0, %v785_v24 }
  0x43   : > { %v594_v8 = vadd.f32 1.0, %v787_v25 }
  0x44   : > { %788 = vrcp.f32 %v593_v26 }
  0x45   : > { %790 = vrcp.f32 %v594_v8 }
  0x51   : > { %v789_v27 = vpop.eup %788 }
  0x52   : > { %v791_v4 = vpop.eup %790  ;;  %v599_v5 = vmul.f32 %v789_v27, %v585_v20 }
  0x53   : > { %v600_v28 = vmul.f32 %v791_v4, %v586_v21 }
  0x54   : > { %601 = vst [vmem:[%s341_s14] sm:$0xff] %v599_v5 }
  0x55   : > { %602 = vst [vmem:[%s341_s14 + $0x8] sm:$0xff] %v600_v28 }
  0x56 PF: > { %s15_s20 = sadd.s32 1, %s814_s20   ;;  %s995_s18 = smov %s810_s19 }
  0x57   : > { %p12_p5 = scmp.ge.s32.totalorder %s15_s20, 4   ;;  %s996_s19 = smov %s998_s21 }
  0x59   :  { %14 = sbr.rel (!%p12_p5) target bundleno = 2 (0x2), region = 82 }

// kernel: squeezeformer_encoder.40
= control target key start
LH: loop header
LB: loop body
LE: loop exit
PB: predicated region body
PF: predicated region fallthrough
CT: control target
= control target key end

     0   :  { %s434_s1 = inlined_call_operand.vmem [shape: bf16[256,128], index: 1, kind: input, shape index: {}]   ;;  %s435_s0 = inlined_call_operand.vmem [shape: f32[16,256], index: 0, kind: input, shape index: {}]   ;;  %s436_s2 = inlined_call_operand.vmem [shape: f32[1,128], index: 2, kind: input, shape index: {}]   ;;  %s437_s3 = inlined_call_operand.vmem [shape: f32[16,128], index: 3, kind: input, shape index: {}]   ;;  %s438_s4 = inlined_call_operand.vmem [shape: f32[1,128], index: 4, kind: input, shape index: {}]   ;;  %s439_s5 = inlined_call_operand.vmem [shape: f32[1,128], index: 5, kind: input, shape index: {}]   ;;  %s440_s6 = inlined_call_operand.vmem [shape: f32[16,128], index: 6, kind: output, shape index: {}]  }
   0x1   :  { %v298_v0 = vld [vmem:[%s434_s1 + $0x78] sm:$0xff]   ;;  %v300_v2 = vld [vmem:[%s434_s1 + $0x70] sm:$0xff]   ;;  %v302_v4 = vld [vmem:[%s434_s1 + $0x68] sm:$0xff]  }
   0x2   :  { %v299_v1 = vld [vmem:[%s434_s1 + $0x38] sm:$0xff]   ;;  %276 = vmatprep.subr.bf16.mxu0 %v298_v0  ;;  %v301_v3 = vld [vmem:[%s434_s1 + $0x30] sm:$0xff]   ;;  %v303_v5 = vld [vmem:[%s434_s1 + $0x28] sm:$0xff]  }
   0x3   :  { %277 = vmatpush3.bf16.msra.mxu0 %v299_v1  ;;  %v304_v6 = vld [vmem:[%s434_s1 + $0x60] sm:$0xff]   ;;  %v306_v8 = vld [vmem:[%s434_s1 + $0x58] sm:$0xff]   ;;  %v308_v10 = vld [vmem:[%s434_s1 + $0x50] sm:$0xff]  }
   0x4   :  { %278 = vmatprep.subr.bf16.mxu0 %v300_v2  ;;  %v305_v7 = vld [vmem:[%s434_s1 + $0x20] sm:$0xff]   ;;  %v307_v9 = vld [vmem:[%s434_s1 + $0x18] sm:$0xff]   ;;  %v25_v11 = vld [vmem:[%s435_s0 + $0x8] sm:$0xff] }
   0x5   :  { %v27_v12 = vld [vmem:[%s435_s0 + $0x18] sm:$0xff]  ;;  %v309_v14 = vld [vmem:[%s434_s1 + $0x10] sm:$0xff]   ;;  %v310_v15 = vld [vmem:[%s434_s1 + $0x48] sm:$0xff]  }
   0x6   :  { %v29_v13 = vpack.c.bf16 %v27_v12, %v25_v11  ;;  %v311_v16 = vld [vmem:[%s434_s1 + $0x8] sm:$0xff]   ;;  %v312_v17 = vld [vmem:[%s434_s1 + $0x40] sm:$0xff]   ;;  %v26_v20 = vld [vmem:[%s435_s0 + $0x10] sm:$0xff] }
   0x7   :  { %279 = vmatpush3.bf16.msra.mxu0 %v301_v3  ;;  %v313_v18 = vld [vmem:[%s434_s1] sm:$0xff]   ;;  %v207_v32 = vld [vmem:[%s437_s3 + $0x8] sm:$0xff] }
   0x8   :  { %280 = vmatprep.subr.bf16.mxu0 %v302_v4  ;;  %197 = vmatprep.mubr.bf16.mxu0 %v29_v13  ;;  %v24_v19 = vld [vmem:[%s435_s0] sm:$0xff] }
   0x9   :  { %v28_v21 = vpack.c.bf16 %v26_v20, %v24_v19  ;;  %v257_v23 = vld [vmem:[%s436_s2] ss:$0 sm:$0xff] }
   0xa   :  { %v206_v27 = vld [vmem:[%s437_s3] sm:$0xff] }
   0xb   :  { %281 = vmatpush3.bf16.msra.mxu0 %v303_v5  ;;  %v274_v50 = vld [vmem:[%s438_s4] ss:$0 sm:$0xff] }
   0xc   :  { %282 = vmatprep.subr.bf16.mxu0 %v304_v6  ;;  %v275_v52 = vld [vmem:[%s439_s5] ss:$0 sm:$0xff] }
   0xf   :  { %283 = vmatpush3.bf16.msra.mxu0 %v305_v7 }
  0x10   :  { %284 = vmatprep.subr.bf16.mxu0 %v306_v8 }
  0x13   :  { %285 = vmatpush3.bf16.msra.mxu0 %v307_v9 }
  0x14   :  { %286 = vmatprep.subr.bf16.mxu0 %v308_v10 }
  0x17   :  { %287 = vmatpush3.bf16.msra.mxu0 %v309_v14 }
  0x18   :  { %288 = vmatprep.subr.bf16.mxu0 %v310_v15 }
  0x1b   :  { %289 = vmatpush3.bf16.msra.mxu0 %v311_v16 }
  0x1c   :  { %290 = vmatprep.subr.bf16.mxu0 %v312_v17 }
  0x1f   :  { %291 = vmatpush3.bf16.msra.mxu0 %v313_v18 }
  0x22   :  { %198 = vmatmul.mubr.bf16.vlgmr.msra.gmra.mxu0 %v28_v21 }
  0xe2   :  { %v292_v22 = vpop.f32.mrf.mxu0 }
  0xe4   :  { %v293_v24 = vpop.f32.mrf.mxu0 }
  0xe5   :  { %v294_v25 = vadd.f32 %v293_v24, %v292_v22 }
  0xe6   :  { %v295_v26 = vpop.f32.mrf.mxu0 }
  0xe7   :  { %v200_v28 = vadd.f32 %v294_v25, %v257_v23 }
  0xe8   :  { %v296_v29 = vpop.f32.mrf.mxu0 }
  0xe9   :  { %v297_v30 = vadd.f32 %v296_v29, %v295_v26  ;;  %v208_v31 = vadd.f32 %v206_v27, %v200_v28 }
  0xeb   :  { %v203_v33 = vadd.f32 %v297_v30, %v257_v23  ;;  %210 = vadd.xlane.f32.xlu0 %v208_v31 }
  0xed   :  { %v209_v34 = vadd.f32 %v207_v32, %v203_v33 }
  0xef   :  { %212 = vadd.xlane.f32.xlu0 %v209_v34 }
 0x174   :  { %v211_v35 = vpop.xlane.xlu0 %210 }
 0x175   :  { %v215_v36 = vmul.f32 0.0078125, %v211_v35 }
 0x177   :  { %v217_v37 = vsub.f32 %v208_v31, %v215_v36 }
 0x178   :  { %v213_v38 = vpop.xlane.xlu0 %212 }
 0x179   :  { %v216_v39 = vmul.f32 0.0078125, %v213_v38  ;;  %v219_v40 = vmul.f32 %v217_v37, %v217_v37 }
 0x17b   :  { %v218_v41 = vsub.f32 %v209_v34, %v216_v39  ;;  %221 = vadd.xlane.f32.xlu1 %v219_v40 }
 0x17d   :  { %v220_v42 = vmul.f32 %v218_v41, %v218_v41 }
 0x17f   :  { %223 = vadd.xlane.f32.xlu1 %v220_v42 }
 0x204   :  { %v222_v43 = vpop.xlane.xlu1 %221 }
 0x205   :  { %v225_v44 = vmul.f32 0.0078125, %v222_v43 }
 0x207   :  { %v227_v45 = vadd.f32 1e-05, %v225_v44 }
 0x208   :  { %v224_v46 = vpop.xlane.xlu1 %223 }
 0x209   :  { %314 = vrsqrt.f32 %v227_v45  ;;  %v226_v47 = vmul.f32 0.0078125, %v224_v46 }
 0x20b   :  { %v228_v48 = vadd.f32 1e-05, %v226_v47 }
 0x20d   :  { %316 = vrsqrt.f32 %v228_v48 }
 0x216   :  { %v315_v49 = vpop.eup %314 }
 0x217   :  { %v231_v51 = vmul.f32 %v315_v49, %v217_v37 }
 0x219   :  { %v240_v53 = vmul.f32 %v274_v50, %v231_v51 }
 0x21a   :  { %v317_v54 = vpop.eup %316 }
 0x21b   :  { %v249_v55 = vadd.f32 %v275_v52, %v240_v53  ;;  %v232_v56 = vmul.f32 %v317_v54, %v218_v41 }
 0x21d   :  { %251 = vst [vmem:[%s440_s6] sm:$0xff] %v249_v55  ;;  %v241_v57 = vmul.f32 %v274_v50, %v232_v56 }
 0x21f   :  { %v250_v58 = vadd.f32 %v275_v52, %v241_v57 }
 0x221   :  { %252 = vst [vmem:[%s440_s6 + $0x8] sm:$0xff] %v250_v58 }

// kernel: squeezeformer_encoder.43
= control target key start
LH: loop header
LB: loop body
LE: loop exit
PB: predicated region body
PF: predicated region fallthrough
CT: control target
= control target key end

     0   :  { %s295_s1 = inlined_call_operand.vmem [shape: bf16[128,128], index: 1, kind: input, shape index: {}]   ;;  %s296_s0 = inlined_call_operand.vmem [shape: f32[32,128], index: 0, kind: input, shape index: {}]   ;;  %s297_s2 = inlined_call_operand.vmem [shape: f32[1,128], index: 2, kind: input, shape index: {}]   ;;  %s298_s3 = inlined_call_operand.vmem [shape: f32[32,128], index: 3, kind: input, shape index: {}]   ;;  %s299_s4 = inlined_call_operand.vmem [shape: f32[32,128], index: 4, kind: output, shape index: {}]  }
   0x1   :  { %v199_v0 = vld [vmem:[%s295_s1 + $0x38] sm:$0xff]   ;;  %v200_v1 = vld [vmem:[%s295_s1 + $0x30] sm:$0xff]   ;;  %v201_v2 = vld [vmem:[%s295_s1 + $0x28] sm:$0xff]  }
   0x2   :  { %179 = vmatprep.subr.bf16.mxu0 %v199_v0  ;;  %v202_v3 = vld [vmem:[%s295_s1 + $0x20] sm:$0xff]   ;;  %v19_v5 = vld [vmem:[%s296_s0 + $0x8] sm:$0xff]  ;;  %v203_v7 = vld [vmem:[%s295_s1 + $0x18] sm:$0xff]  }
   0x3   :  { %180 = vmatpush3.bf16.msra.mxu0 %v199_v0  ;;  %v18_v4 = vld [vmem:[%s296_s0] sm:$0xff]  ;;  %v204_v8 = vld [vmem:[%s295_s1 + $0x10] sm:$0xff]   ;;  %v205_v9 = vld [vmem:[%s295_s1 + $0x8] sm:$0xff]  }
   0x4   :  { %181 = vmatprep.subr.bf16.mxu0 %v200_v1  ;;  %v22_v6 = vpack.c.bf16 %v19_v5, %v18_v4  ;;  %v206_v10 = vld [vmem:[%s295_s1] sm:$0xff]   ;;  %v20_v11 = vld [vmem:[%s296_s0 + $0x10] sm:$0xff]  ;;  %v21_v12 = vld [vmem:[%s296_s0 + $0x18] sm:$0xff] }
   0x5   :  { %v23_v13 = vpack.c.bf16 %v21_v12, %v20_v11  ;;  %v160_v14 = vld [vmem:[%s297_s2] ss:$0 sm:$0xff]  ;;  %v146_v16 = vld [vmem:[%s298_s3 + $0x10] sm:$0xff]  ;;  %v147_v23 = vld [vmem:[%s298_s3 + $0x18] sm:$0xff] }
   0x6   :  { %195 = vmatprep.mubr.bf16.mxu0 %v22_v6  ;;  %v144_v19 = vld [vmem:[%s298_s3] sm:$0xff]  ;;  %v145_v27 = vld [vmem:[%s298_s3 + $0x8] sm:$0xff] }
   0x7   :  { %182 = vmatpush3.bf16.msra.mxu0 %v200_v1 }
   0x8   :  { %183 = vmatprep.subr.bf16.mxu0 %v201_v2 }
   0xb   :  { %184 = vmatpush3.bf16.msra.mxu0 %v201_v2 }
   0xc   :  { %185 = vmatprep.subr.bf16.mxu0 %v202_v3 }
   0xf   :  { %186 = vmatpush3.bf16.msra.mxu0 %v202_v3 }
  0x10   :  { %187 = vmatprep.subr.bf16.mxu0 %v203_v7 }
  0x13   :  { %188 = vmatpush3.bf16.msra.mxu0 %v203_v7 }
  0x14   :  { %189 = vmatprep.subr.bf16.mxu0 %v204_v8 }
  0x17   :  { %190 = vmatpush3.bf16.msra.mxu0 %v204_v8 }
  0x18   :  { %191 = vmatprep.subr.bf16.mxu0 %v205_v9 }
  0x1b   :  { %192 = vmatpush3.bf16.msra.mxu0 %v205_v9 }
  0x1c   :  { %193 = vmatprep.subr.bf16.mxu0 %v206_v10 }
  0x1f   :  { %194 = vmatpush3.bf16.msra.mxu0 %v206_v10 }
  0x22   :  { %196 = vmatmul.mubr.bf16.vlgmr.msra.gmra.mxu0 %v23_v13 }
  0xe2   :  { %v197_v15 = vpop.f32.mrf.mxu0 }
  0xe3   :  { %v138_v17 = vadd.f32 %v197_v15, %v160_v14 }
  0xe4   :  { %v129_v18 = vpop.f32.mrf.mxu0 }
  0xe5   :  { %v150_v20 = vadd.f32 %v146_v16, %v138_v17  ;;  %v130_v21 = vadd.f32 %v160_v14, %v129_v18 }
  0xe6   :  { %v198_v22 = vpop.f32.mrf.mxu0 }
  0xe7   :  { %154 = vst [vmem:[%s299_s4 + $0x10] sm:$0xff] %v150_v20  ;;  %v148_v24 = vadd.f32 %v144_v19, %v130_v21  ;;  %v141_v25 = vadd.f32 %v198_v22, %v160_v14 }
  0xe8   :  { %v132_v26 = vpop.f32.mrf.mxu0 }
  0xe9   :  { %152 = vst [vmem:[%s299_s4] sm:$0xff] %v148_v24  ;;  %v151_v28 = vadd.f32 %v147_v23, %v141_v25  ;;  %v133_v29 = vadd.f32 %v160_v14, %v132_v26 }
  0xeb   :  { %155 = vst [vmem:[%s299_s4 + $0x18] sm:$0xff] %v151_v28  ;;  %v149_v30 = vadd.f32 %v145_v27, %v133_v29 }
  0xed   :  { %153 = vst [vmem:[%s299_s4 + $0x8] sm:$0xff] %v149_v30 }

// kernel: squeezeformer_encoder.44
= control target key start
LH: loop header
LB: loop body
LE: loop exit
PB: predicated region body
PF: predicated region fallthrough
CT: control target
= control target key end

     0   :  { %v439_v1 = vmov 0   ;;  %v85_v41 = vlaneseq  ;;  %s606_s1 = inlined_call_operand.vmem [shape: bf16[128,384], index: 1, kind: input, shape index: {}]   ;;  %s607_s0 = inlined_call_operand.vmem [shape: f32[32,128], index: 0, kind: input, shape index: {}]   ;;  %s608_s3 = inlined_call_operand.vmem [shape: f32[1,128], index: 3, kind: input, shape index: {}]   ;;  %s609_s4 = inlined_call_operand.vmem [shape: f32[1,128], index: 4, kind: input, shape index: {}]   ;;  %s610_s2 = inlined_call_operand.vmem [shape: f32[1,384], index: 2, kind: input, shape index: {}]   ;;  %s611_s5 = inlined_call_operand.vmem [shape: f32[32,128], index: 5, kind: output, shape index: {0}]   ;;  %s612_s6 = inlined_call_operand.vmem [shape: f32[32,256], index: 6, kind: output, shape index: {1}]  }
   0x1   :  { %v407_v0 = vld [vmem:[%s606_s1 + $0xac] ss:$12 sps:$4 sm:$0xff]   ;;  %260 = vmatprep.mubr.bf16.mxu0 %v439_v1  ;;  %v409_v2 = vld [vmem:[%s606_s1 + $0xa8] ss:$12 sps:$4 sm:$0xff]   ;;  %v410_v3 = vld [vmem:[%s606_s1 + $0xb0] ss:$12 sps:$4 sm:$0xff]  }
   0x2   :  { %228 = vmatprep.subr.bf16.mxu0 %v407_v0  ;;  %v411_v4 = vld [vmem:[%s606_s1 + $0x94] ss:$12 sps:$4 sm:$0xff]   ;;  %v413_v5 = vld [vmem:[%s606_s1 + $0x90] ss:$12 sps:$4 sm:$0xff]   ;;  %386 = vmatprep.subr.bf16.mxu1 %v410_v3  ;;  %v414_v6 = vld [vmem:[%s606_s1 + $0x98] ss:$12 sps:$4 sm:$0xff]  }
   0x3   :  { %229 = vmatpush1.bf16.msra.mxu0 %v409_v2  ;;  %387 = vmatpush3.bf16.msra.mxu1 %v410_v3  ;;  %v415_v7 = vld [vmem:[%s606_s1 + $0x7c] ss:$12 sps:$4 sm:$0xff]   ;;  %v418_v8 = vld [vmem:[%s606_s1 + $0x80] ss:$12 sps:$4 sm:$0xff]   ;;  %v417_v9 = vld [vmem:[%s606_s1 + $0x78] ss:$12 sps:$4 sm:$0xff]  }
   0x4   :  { %230 = vmatprep.subr.bf16.mxu0 %v411_v4  ;;  %388 = vmatprep.subr.bf16.mxu1 %v414_v6  ;;  %v419_v10 = vld [vmem:[%s606_s1 + $0x64] ss:$12 sps:$4 sm:$0xff]   ;;  %v422_v11 = vld [vmem:[%s606_s1 + $0x68] ss:$12 sps:$4 sm:$0xff]   ;;  %v421_v12 = vld [vmem:[%s606_s1 + $0x60] ss:$12 sps:$4 sm:$0xff]  }
   0x5   :  { %v423_v13 = vld [vmem:[%s606_s1 + $0x4c] ss:$12 sps:$4 sm:$0xff]   ;;  %v426_v14 = vld [vmem:[%s606_s1 + $0x50] ss:$12 sps:$4 sm:$0xff]   ;;  %v425_v15 = vld [vmem:[%s606_s1 + $0x48] ss:$12 sps:$4 sm:$0xff]  }
   0x6   :  { %v427_v16 = vld [vmem:[%s606_s1 + $0x34] ss:$12 sps:$4 sm:$0xff]   ;;  %v429_v17 = vld [vmem:[%s606_s1 + $0x30] ss:$12 sps:$4 sm:$0xff]   ;;  %v430_v18 = vld [vmem:[%s606_s1 + $0x38] ss:$12 sps:$4 sm:$0xff]  }
   0x7   :  { %231 = vmatpush1.bf16.msra.mxu0 %v413_v5  ;;  %389 = vmatpush3.bf16.msra.mxu1 %v414_v6  ;;  %v23_v19 = vld [vmem:[%s607_s0] sm:$0xff]  ;;  %v24_v20 = vld [vmem:[%s607_s0 + $0x8] sm:$0xff]  ;;  %v25_v26 = vld [vmem:[%s607_s0 + $0x10] sm:$0xff]  ;;  %v86_v42 = vshrl.u32 %v85_v41, 7 }
   0x8   :  { %232 = vmatprep.subr.bf16.mxu0 %v415_v7  ;;  %390 = vmatprep.subr.bf16.mxu1 %v418_v8  ;;  %v350_v21 = vld [vmem:[%s608_s3] ss:$0 sm:$0xff]  ;;  %v431_v23 = vld [vmem:[%s606_s1 + $0x1c] ss:$12 sps:$4 sm:$0xff]   ;;  %v433_v31 = vld [vmem:[%s606_s1 + $0x18] ss:$12 sps:$4 sm:$0xff]  }
   0x9   :  { %v351_v22 = vld [vmem:[%s609_s4] ss:$0 sm:$0xff]  ;;  %v34_v24 = vmul.f32 %v350_v21, %v23_v19  ;;  %v35_v25 = vmul.f32 %v350_v21, %v24_v20  ;;  %v26_v27 = vld [vmem:[%s607_s0 + $0x18] sm:$0xff]  ;;  %v435_v32 = vld [vmem:[%s606_s1 + $0x4] ss:$12 sps:$4 sm:$0xff]   ;;  %v36_v34 = vmul.f32 %v350_v21, %v25_v26  ;;  %v87_v43 = vsub.s32 0, %v86_v42 }
   0xa   :  { %v434_v28 = vld [vmem:[%s606_s1 + $0x20] ss:$12 sps:$4 sm:$0xff]   ;;  %v37_v35 = vmul.f32 %v350_v21, %v26_v27  ;;  %v438_v36 = vld [vmem:[%s606_s1 + $0x8] ss:$12 sps:$4 sm:$0xff]   ;;  %v91_v45 = vsub.s32 1, %v86_v42  ;;  %v95_v46 = vsub.s32 2, %v86_v42 }
   0xb   :  { %233 = vmatpush1.bf16.msra.mxu0 %v417_v9  ;;  %391 = vmatpush3.bf16.msra.mxu1 %v418_v8  ;;  %v45_v29 = vadd.f32 %v351_v22, %v34_v24  ;;  %v46_v30 = vadd.f32 %v351_v22, %v35_v25  ;;  %v437_v37 = vld [vmem:[%s606_s1] ss:$12 sps:$4 sm:$0xff]   ;;  %v47_v38 = vadd.f32 %v351_v22, %v36_v34 }
   0xc   :  { %234 = vmatprep.subr.bf16.mxu0 %v419_v10  ;;  %392 = vmatprep.subr.bf16.mxu1 %v422_v11  ;;  %v48_v39 = vadd.f32 %v351_v22, %v37_v35  ;;  %v83_v44 = vld [vmem:[%s610_s2] sm:$0x7] }
   0xd   :  { %v49_v33 = vpack.c.bf16 %v46_v30, %v45_v29  ;;  %v88_v47 = vrot.slane %v83_v44, %v87_v43  ;;  %v92_v48 = vrot.slane %v83_v44, %v91_v45  ;;  %v96_v49 = vrot.slane %v83_v44, %v95_v46 }
   0xe   :  { %v50_v40 = vpack.c.bf16 %v48_v39, %v47_v38 }
   0xf   :  { %235 = vmatpush1.bf16.msra.mxu0 %v421_v12  ;;  %393 = vmatpush3.bf16.msra.mxu1 %v422_v11 }
  0x10   :  { %236 = vmatprep.subr.bf16.mxu0 %v423_v13  ;;  %394 = vmatprep.subr.bf16.mxu1 %v426_v14 }
  0x11   :  { %402 = vmatprep.mubr.bf16.mxu1 %v49_v33 }
  0x13   :  { %237 = vmatpush1.bf16.msra.mxu0 %v425_v15  ;;  %395 = vmatpush3.bf16.msra.mxu1 %v426_v14 }
  0x14   :  { %238 = vmatprep.subr.bf16.mxu0 %v427_v16  ;;  %396 = vmatprep.subr.bf16.mxu1 %v430_v18 }
  0x17   :  { %239 = vmatpush1.bf16.msra.mxu0 %v429_v17  ;;  %397 = vmatpush3.bf16.msra.mxu1 %v430_v18 }
  0x18   :  { %240 = vmatprep.subr.bf16.mxu0 %v431_v23  ;;  %398 = vmatprep.subr.bf16.mxu1 %v434_v28 }
  0x1b   :  { %241 = vmatpush1.bf16.msra.mxu0 %v433_v31  ;;  %399 = vmatpush3.bf16.msra.mxu1 %v434_v28 }
  0x1c   :  { %242 = vmatprep.subr.bf16.mxu0 %v435_v32  ;;  %400 = vmatprep.subr.bf16.mxu1 %v438_v36 }
  0x1f   :  { %243 = vmatpush1.bf16.msra.mxu0 %v437_v37  ;;  %401 = vmatpush3.bf16.msra.mxu1 %v438_v36 }
  0x22   :  { %261 = vmatmul.mubr.bf16.vlgmr.msra.gmra.mxu0 %v49_v33  ;;  %403 = vmatmul.mubr.bf16.vlgmr.msra.gmra.mxu1 %v50_v40 }
  0x23   :  { %270 = vmatprep.mubr.bf16.mxu0 %v439_v1 }
  0x2a   :  { %271 = vmatmul.mubr.bf16.gmra.mxu0 %v50_v40 }
  0xe2   :  { %v262_v50 = vpop.f32.mrf.mxu0  ;;  %v404_v53 = vpop.f32.mrf.mxu1 }
  0xe3   :  { %v263_v51 = vadd.f32 %v262_v50, %v88_v47  ;;  %v324_v55 = vadd.f32 %v404_v53, %v96_v49 }
  0xe4   :  { %v264_v52 = vpop.f32.mrf.mxu0  ;;  %v315_v57 = vpop.f32.mrf.mxu1 }
  0xe5   :  { %330 = vst [vmem:[%s611_s5] sm:$0xff] %v263_v51  ;;  %v265_v54 = vadd.f32 %v264_v52, %v92_v48  ;;  %339 = vst [vmem:[%s612_s6 + $0x28] sm:$0xff] %v324_v55  ;;  %v316_v59 = vadd.f32 %v315_v57, %v96_v49 }
  0xe6   :  { %v266_v56 = vpop.f32.mrf.mxu0  ;;  %v405_v61 = vpop.f32.mrf.mxu1 }
  0xe7   :  { %334 = vst [vmem:[%s612_s6] sm:$0xff] %v265_v54  ;;  %v267_v58 = vadd.f32 %v266_v56, %v88_v47  ;;  %335 = vst [vmem:[%s612_s6 + $0x8] sm:$0xff] %v316_v59  ;;  %v327_v63 = vadd.f32 %v405_v61, %v96_v49 }
  0xe8   :  { %v268_v60 = vpop.f32.mrf.mxu0  ;;  %v318_v1 = vpop.f32.mrf.mxu1 }
  0xe9   :  { %331 = vst [vmem:[%s611_s5 + $0x8] sm:$0xff] %v267_v58  ;;  %v269_v62 = vadd.f32 %v268_v60, %v92_v48  ;;  %341 = vst [vmem:[%s612_s6 + $0x38] sm:$0xff] %v327_v63  ;;  %v319_v3 = vadd.f32 %v318_v1, %v96_v49 }
  0xea   :  { %v272_v0 = vpop.f32.mrf.mxu0 }
  0xeb   :  { %336 = vst [vmem:[%s612_s6 + $0x10] sm:$0xff] %v269_v62  ;;  %v273_v2 = vadd.f32 %v272_v0, %v88_v47  ;;  %337 = vst [vmem:[%s612_s6 + $0x18] sm:$0xff] %v319_v3 }
  0xec   :  { %v274_v4 = vpop.f32.mrf.mxu0 }
  0xed   :  { %332 = vst [vmem:[%s611_s5 + $0x10] sm:$0xff] %v273_v2  ;;  %v275_v5 = vadd.f32 %v274_v4, %v92_v48 }
  0xee   :  { %v276_v6 = vpop.f32.mrf.mxu0 }
  0xef   :  { %338 = vst [vmem:[%s612_s6 + $0x20] sm:$0xff] %v275_v5  ;;  %v277_v7 = vadd.f32 %v276_v6, %v88_v47 }
  0xf0   :  { %v278_v8 = vpop.f32.mrf.mxu0 }
  0xf1   :  { %333 = vst [vmem:[%s611_s5 + $0x18] sm:$0xff] %v277_v7  ;;  %v279_v9 = vadd.f32 %v278_v8, %v92_v48 }
  0xf3   :  { %340 = vst [vmem:[%s612_s6 + $0x30] sm:$0xff] %v279_v9 }

// kernel: squeezeformer_encoder.46
= control target key start
LH: loop header
LB: loop body
LE: loop exit
PB: predicated region body
PF: predicated region fallthrough
CT: control target
= control target key end

     0   :  { %s394_s1 = inlined_call_operand.vmem [shape: bf16[128,128], index: 1, kind: input, shape index: {}]   ;;  %s395_s0 = inlined_call_operand.vmem [shape: f32[32,128], index: 0, kind: input, shape index: {}]   ;;  %s396_s2 = inlined_call_operand.vmem [shape: f32[1,128], index: 2, kind: input, shape index: {}]   ;;  %s397_s3 = inlined_call_operand.vmem [shape: f32[32,128], index: 3, kind: input, shape index: {}]   ;;  %s398_s4 = inlined_call_operand.vmem [shape: f32[1,128], index: 4, kind: input, shape index: {}]   ;;  %s399_s5 = inlined_call_operand.vmem [shape: f32[1,128], index: 5, kind: input, shape index: {}]   ;;  %s400_s6 = inlined_call_operand.vmem [shape: f32[32,128], index: 6, kind: output, shape index: {}]  }
   0x1   :  { %v274_v0 = vld [vmem:[%s394_s1 + $0x38] sm:$0xff]   ;;  %v275_v1 = vld [vmem:[%s394_s1 + $0x30] sm:$0xff]   ;;  %v276_v2 = vld [vmem:[%s394_s1 + $0x28] sm:$0xff]  }
   0x2   :  { %254 = vmatprep.subr.bf16.mxu0 %v274_v0  ;;  %v277_v3 = vld [vmem:[%s394_s1 + $0x20] sm:$0xff]   ;;  %v25_v5 = vld [vmem:[%s395_s0 + $0x8] sm:$0xff]  ;;  %v278_v7 = vld [vmem:[%s394_s1 + $0x18] sm:$0xff]  }
   0x3   :  { %255 = vmatpush3.bf16.msra.mxu0 %v274_v0  ;;  %v24_v4 = vld [vmem:[%s395_s0] sm:$0xff]  ;;  %v279_v8 = vld [vmem:[%s394_s1 + $0x10] sm:$0xff]   ;;  %v280_v9 = vld [vmem:[%s394_s1 + $0x8] sm:$0xff]  }
   0x4   :  { %256 = vmatprep.subr.bf16.mxu0 %v275_v1  ;;  %v28_v6 = vpack.c.bf16 %v25_v5, %v24_v4  ;;  %v281_v10 = vld [vmem:[%s394_s1] sm:$0xff]   ;;  %v26_v11 = vld [vmem:[%s395_s0 + $0x10] sm:$0xff]  ;;  %v27_v12 = vld [vmem:[%s395_s0 + $0x18] sm:$0xff] }
   0x5   :  { %v29_v13 = vpack.c.bf16 %v27_v12, %v26_v11  ;;  %v233_v14 = vld [vmem:[%s396_s2] ss:$0 sm:$0xff]  ;;  %v152_v16 = vld [vmem:[%s397_s3 + $0x10] sm:$0xff]  ;;  %v153_v23 = vld [vmem:[%s397_s3 + $0x18] sm:$0xff] }
   0x6   :  { %270 = vmatprep.mubr.bf16.mxu0 %v28_v6  ;;  %v150_v19 = vld [vmem:[%s397_s3] sm:$0xff]  ;;  %v151_v27 = vld [vmem:[%s397_s3 + $0x8] sm:$0xff] }
   0x7   :  { %257 = vmatpush3.bf16.msra.mxu0 %v275_v1  ;;  %v242_v60 = vld [vmem:[%s398_s4] ss:$0 sm:$0xff] }
   0x8   :  { %258 = vmatprep.subr.bf16.mxu0 %v276_v2  ;;  %v243_v62 = vld [vmem:[%s399_s5] ss:$0 sm:$0xff] }
   0xb   :  { %259 = vmatpush3.bf16.msra.mxu0 %v276_v2 }
   0xc   :  { %260 = vmatprep.subr.bf16.mxu0 %v277_v3 }
   0xf   :  { %261 = vmatpush3.bf16.msra.mxu0 %v277_v3 }
  0x10   :  { %262 = vmatprep.subr.bf16.mxu0 %v278_v7 }
  0x13   :  { %263 = vmatpush3.bf16.msra.mxu0 %v278_v7 }
  0x14   :  { %264 = vmatprep.subr.bf16.mxu0 %v279_v8 }
  0x17   :  { %265 = vmatpush3.bf16.msra.mxu0 %v279_v8 }
  0x18   :  { %266 = vmatprep.subr.bf16.mxu0 %v280_v9 }
  0x1b   :  { %267 = vmatpush3.bf16.msra.mxu0 %v280_v9 }
  0x1c   :  { %268 = vmatprep.subr.bf16.mxu0 %v281_v10 }
  0x1f   :  { %269 = vmatpush3.bf16.msra.mxu0 %v281_v10 }
  0x22   :  { %271 = vmatmul.mubr.bf16.vlgmr.msra.gmra.mxu0 %v29_v13 }
  0xe2   :  { %v272_v15 = vpop.f32.mrf.mxu0 }
  0xe3   :  { %v144_v17 = vadd.f32 %v272_v15, %v233_v14 }
  0xe4   :  { %v135_v18 = vpop.f32.mrf.mxu0 }
  0xe5   :  { %v136_v20 = vadd.f32 %v233_v14, %v135_v18  ;;  %v156_v21 = vadd.f32 %v152_v16, %v144_v17 }
  0xe6   :  { %v273_v22 = vpop.f32.mrf.mxu0 }
  0xe7   :  { %v147_v24 = vadd.f32 %v273_v22, %v233_v14  ;;  %162 = vadd.xlane.f32.xlu1 %v156_v21  ;;  %v154_v25 = vadd.f32 %v150_v19, %v136_v20 }
  0xe8   :  { %v138_v26 = vpop.f32.mrf.mxu0 }
  0xe9   :  { %v139_v28 = vadd.f32 %v233_v14, %v138_v26  ;;  %158 = vadd.xlane.f32.xlu0 %v154_v25  ;;  %v157_v29 = vadd.f32 %v153_v23, %v147_v24 }
  0xeb   :  { %164 = vadd.xlane.f32.xlu1 %v157_v29  ;;  %v155_v30 = vadd.f32 %v151_v27, %v139_v28 }
  0xed   :  { %160 = vadd.xlane.f32.xlu0 %v155_v30 }
 0x170   :  { %v163_v31 = vpop.xlane.xlu1 %162 }
 0x171   :  { %v169_v33 = vmul.f32 0.0078125, %v163_v31 }
 0x172   :  { %v159_v32 = vpop.xlane.xlu0 %158 }
 0x173   :  { %v167_v34 = vmul.f32 0.0078125, %v159_v32  ;;  %v173_v38 = vsub.f32 %v156_v21, %v169_v33 }
 0x174   :  { %v165_v35 = vpop.xlane.xlu1 %164 }
 0x175   :  { %v171_v36 = vsub.f32 %v154_v25, %v167_v34  ;;  %v170_v39 = vmul.f32 0.0078125, %v165_v35  ;;  %v177_v44 = vmul.f32 %v173_v38, %v173_v38 }
 0x176   :  { %v161_v37 = vpop.xlane.xlu0 %160 }
 0x177   :  { %v168_v40 = vmul.f32 0.0078125, %v161_v37  ;;  %v175_v41 = vmul.f32 %v171_v36, %v171_v36  ;;  %v174_v43 = vsub.f32 %v157_v29, %v170_v39 }
 0x179   :  { %v172_v42 = vsub.f32 %v155_v30, %v168_v40  ;;  %179 = vadd.xlane.f32.xlu0 %v175_v41  ;;  %v178_v46 = vmul.f32 %v174_v43, %v174_v43 }
 0x17b   :  { %v176_v45 = vmul.f32 %v172_v42, %v172_v42 }
 0x17d   :  { %183 = vadd.xlane.f32.xlu0 %v177_v44  ;;  %181 = vadd.xlane.f32.xlu1 %v176_v45 }
 0x181   :  { %185 = vadd.xlane.f32.xlu1 %v178_v46 }
 0x202   :  { %v180_v47 = vpop.xlane.xlu0 %179 }
 0x203   :  { %v187_v48 = vmul.f32 0.0078125, %v180_v47 }
 0x205   :  { %v191_v49 = vadd.f32 1e-05, %v187_v48 }
 0x206   :  { %v182_v50 = vpop.xlane.xlu1 %181  ;;  %v184_v51 = vpop.xlane.xlu0 %183 }
 0x207   :  { %282 = vrsqrt.f32 %v191_v49  ;;  %v188_v52 = vmul.f32 0.0078125, %v182_v50  ;;  %v189_v53 = vmul.f32 0.0078125, %v184_v51 }
 0x209   :  { %v192_v54 = vadd.f32 1e-05, %v188_v52  ;;  %v193_v55 = vadd.f32 1e-05, %v189_v53 }
 0x20a   :  { %v186_v56 = vpop.xlane.xlu1 %185 }
 0x20b   :  { %284 = vrsqrt.f32 %v192_v54  ;;  %v190_v57 = vmul.f32 0.0078125, %v186_v56 }
 0x20c   :  { %286 = vrsqrt.f32 %v193_v55 }
 0x20d   :  { %v194_v58 = vadd.f32 1e-05, %v190_v57 }
 0x20f   :  { %288 = vrsqrt.f32 %v194_v58 }
 0x214   :  { %v283_v59 = vpop.eup %282 }
 0x215   :  { %v199_v61 = vmul.f32 %v283_v59, %v171_v36 }
 0x217   :  { %v210_v63 = vmul.f32 %v242_v60, %v199_v61 }
 0x218   :  { %v285_v0 = vpop.eup %284 }
 0x219   :  { %v287_v1 = vpop.eup %286  ;;  %v221_v2 = vadd.f32 %v243_v62, %v210_v63  ;;  %v200_v3 = vmul.f32 %v285_v0, %v172_v42 }
 0x21a   :  { %v201_v4 = vmul.f32 %v287_v1, %v173_v38 }
 0x21b   :  { %225 = vst [vmem:[%s400_s6] sm:$0xff] %v221_v2  ;;  %v211_v5 = vmul.f32 %v242_v60, %v200_v3 }
 0x21c   :  { %v289_v6 = vpop.eup %288  ;;  %v212_v7 = vmul.f32 %v242_v60, %v201_v4 }
 0x21d   :  { %v222_v8 = vadd.f32 %v243_v62, %v211_v5  ;;  %v202_v9 = vmul.f32 %v289_v6, %v174_v43 }
 0x21e   :  { %v223_v10 = vadd.f32 %v243_v62, %v212_v7 }
 0x21f   :  { %226 = vst [vmem:[%s400_s6 + $0x8] sm:$0xff] %v222_v8  ;;  %v213_v11 = vmul.f32 %v242_v60, %v202_v9 }
 0x220   :  { %227 = vst [vmem:[%s400_s6 + $0x10] sm:$0xff] %v223_v10 }
 0x221   :  { %v224_v12 = vadd.f32 %v243_v62, %v213_v11 }
 0x223   :  { %228 = vst [vmem:[%s400_s6 + $0x18] sm:$0xff] %v224_v12 }

// kernel: squeezeformer_encoder.47
= control target key start
LH: loop header
LB: loop body
LE: loop exit
PB: predicated region body
PF: predicated region fallthrough
CT: control target
= control target key end

     0   :  { %v664_v1 = vmov 0   ;;  %v83_v49 = vlaneseq  ;;  %s928_s1 = inlined_call_operand.vmem [shape: bf16[128,512], index: 1, kind: input, shape index: {}]   ;;  %s929_s0 = inlined_call_operand.vmem [shape: f32[32,128], index: 0, kind: input, shape index: {}]   ;;  %s930_s3 = inlined_call_operand.vmem [shape: f32[1,128], index: 3, kind: input, shape index: {}]   ;;  %s931_s4 = inlined_call_operand.vmem [shape: f32[1,128], index: 4, kind: input, shape index: {}]   ;;  %s932_s2 = inlined_call_operand.vmem [shape: f32[1,512], index: 2, kind: input, shape index: {}]   ;;  %s933_s5 = inlined_call_operand.vmem [shape: f32[32,512], index: 5, kind: output, shape index: {}]  }
   0x1   :  { %v552_v0 = vld [vmem:[%s928_s1 + $0xe4] ss:$16 sps:$4 sm:$0xff]   ;;  %295 = vmatprep.mubr.bf16.mxu0 %v664_v1  ;;  %348 = vmatprep.mubr.bf16.mxu1 %v664_v1  ;;  %v554_v2 = vld [vmem:[%s928_s1 + $0xec] ss:$16 sps:$4 sm:$0xff]   ;;  %v556_v3 = vld [vmem:[%s928_s1 + $0xe0] ss:$16 sps:$4 sm:$0xff]  }
   0x2   :  { %263 = vmatprep.subr.bf16.mxu0 %v552_v0  ;;  %v557_v4 = vld [vmem:[%s928_s1 + $0xe8] ss:$16 sps:$4 sm:$0xff]   ;;  %316 = vmatprep.subr.bf16.mxu1 %v554_v2  ;;  %v558_v5 = vld [vmem:[%s928_s1 + $0xc4] ss:$16 sps:$4 sm:$0xff]   ;;  %v560_v6 = vld [vmem:[%s928_s1 + $0xcc] ss:$16 sps:$4 sm:$0xff]  }
   0x3   :  { %264 = vmatpush1.bf16.msra.mxu0 %v556_v3  ;;  %317 = vmatpush1.bf16.msra.mxu1 %v557_v4  ;;  %v562_v7 = vld [vmem:[%s928_s1 + $0xc0] ss:$16 sps:$4 sm:$0xff]   ;;  %v563_v8 = vld [vmem:[%s928_s1 + $0xc8] ss:$16 sps:$4 sm:$0xff]   ;;  %v564_v9 = vld [vmem:[%s928_s1 + $0xa4] ss:$16 sps:$4 sm:$0xff]  }
   0x4   :  { %265 = vmatprep.subr.bf16.mxu0 %v558_v5  ;;  %318 = vmatprep.subr.bf16.mxu1 %v560_v6  ;;  %v566_v10 = vld [vmem:[%s928_s1 + $0xac] ss:$16 sps:$4 sm:$0xff]   ;;  %v568_v11 = vld [vmem:[%s928_s1 + $0xa0] ss:$16 sps:$4 sm:$0xff]   ;;  %v569_v12 = vld [vmem:[%s928_s1 + $0xa8] ss:$16 sps:$4 sm:$0xff]  }
   0x5   :  { %v570_v13 = vld [vmem:[%s928_s1 + $0x84] ss:$16 sps:$4 sm:$0xff]   ;;  %v572_v14 = vld [vmem:[%s928_s1 + $0x8c] ss:$16 sps:$4 sm:$0xff]   ;;  %v574_v15 = vld [vmem:[%s928_s1 + $0x80] ss:$16 sps:$4 sm:$0xff]  }
   0x6   :  { %v575_v16 = vld [vmem:[%s928_s1 + $0x88] ss:$16 sps:$4 sm:$0xff]   ;;  %v576_v17 = vld [vmem:[%s928_s1 + $0x64] ss:$16 sps:$4 sm:$0xff]   ;;  %v578_v18 = vld [vmem:[%s928_s1 + $0x6c] ss:$16 sps:$4 sm:$0xff]  }
   0x7   :  { %266 = vmatpush1.bf16.msra.mxu0 %v562_v7  ;;  %319 = vmatpush1.bf16.msra.mxu1 %v563_v8  ;;  %v580_v19 = vld [vmem:[%s928_s1 + $0x60] ss:$16 sps:$4 sm:$0xff]   ;;  %v581_v20 = vld [vmem:[%s928_s1 + $0x68] ss:$16 sps:$4 sm:$0xff]   ;;  %v582_v21 = vld [vmem:[%s928_s1 + $0x44] ss:$16 sps:$4 sm:$0xff]  }
   0x8   :  { %267 = vmatprep.subr.bf16.mxu0 %v564_v9  ;;  %320 = vmatprep.subr.bf16.mxu1 %v566_v10  ;;  %v584_v22 = vld [vmem:[%s928_s1 + $0x4c] ss:$16 sps:$4 sm:$0xff]   ;;  %v586_v23 = vld [vmem:[%s928_s1 + $0x40] ss:$16 sps:$4 sm:$0xff]   ;;  %v587_v24 = vld [vmem:[%s928_s1 + $0x48] ss:$16 sps:$4 sm:$0xff]  }
   0x9   :  { %v588_v25 = vld [vmem:[%s928_s1 + $0x24] ss:$16 sps:$4 sm:$0xff]   ;;  %v590_v26 = vld [vmem:[%s928_s1 + $0x2c] ss:$16 sps:$4 sm:$0xff]   ;;  %v501_v29 = vld [vmem:[%s930_s3] ss:$0 sm:$0xff] }
   0xa   :  { %v21_v27 = vld [vmem:[%s929_s0] sm:$0xff]  ;;  %v22_v28 = vld [vmem:[%s929_s0 + $0x8] sm:$0xff]  ;;  %v23_v41 = vld [vmem:[%s929_s0 + $0x10] sm:$0xff]  ;;  %v84_v50 = vshrl.u32 %v83_v49, 7 }
   0xb   :  { %268 = vmatpush1.bf16.msra.mxu0 %v568_v11  ;;  %321 = vmatpush1.bf16.msra.mxu1 %v569_v12  ;;  %v32_v30 = vmul.f32 %v501_v29, %v21_v27  ;;  %v33_v31 = vmul.f32 %v501_v29, %v22_v28  ;;  %v592_v32 = vld [vmem:[%s928_s1 + $0x20] ss:$16 sps:$4 sm:$0xff]   ;;  %v593_v33 = vld [vmem:[%s928_s1 + $0x28] ss:$16 sps:$4 sm:$0xff]   ;;  %v594_v35 = vld [vmem:[%s928_s1 + $0x4] ss:$16 sps:$4 sm:$0xff]   ;;  %v34_v44 = vmul.f32 %v501_v29, %v23_v41 }
   0xc   :  { %269 = vmatprep.subr.bf16.mxu0 %v570_v13  ;;  %322 = vmatprep.subr.bf16.mxu1 %v572_v14  ;;  %v502_v34 = vld [vmem:[%s931_s4] ss:$0 sm:$0xff]  ;;  %v596_v36 = vld [vmem:[%s928_s1 + $0xc] ss:$16 sps:$4 sm:$0xff]   ;;  %v599_v40 = vld [vmem:[%s928_s1 + $0x8] ss:$16 sps:$4 sm:$0xff]  }
   0xd   :  { %v598_v37 = vld [vmem:[%s928_s1] ss:$16 sps:$4 sm:$0xff]   ;;  %v43_v38 = vadd.f32 %v502_v34, %v32_v30  ;;  %v44_v39 = vadd.f32 %v502_v34, %v33_v31  ;;  %v24_v42 = vld [vmem:[%s929_s0 + $0x18] sm:$0xff]  ;;  %v45_v46 = vadd.f32 %v502_v34, %v34_v44  ;;  %v85_v51 = vsub.s32 0, %v84_v50 }
   0xe   :  { %v35_v45 = vmul.f32 %v501_v29, %v24_v42  ;;  %v93_v52 = vsub.s32 2, %v84_v50  ;;  %v81_v53 = vld [vmem:[%s932_s2] sm:$0xf]  ;;  %v89_v54 = vsub.s32 1, %v84_v50  ;;  %v97_v55 = vsub.s32 3, %v84_v50 }
   0xf   :  { %270 = vmatpush1.bf16.msra.mxu0 %v574_v15  ;;  %323 = vmatpush1.bf16.msra.mxu1 %v575_v16  ;;  %v47_v43 = vpack.c.bf16 %v44_v39, %v43_v38  ;;  %v86_v56 = vrot.slane %v81_v53, %v85_v51 }
  0x10   :  { %271 = vmatprep.subr.bf16.mxu0 %v576_v17  ;;  %324 = vmatprep.subr.bf16.mxu1 %v578_v18  ;;  %v46_v47 = vadd.f32 %v502_v34, %v35_v45  ;;  %v94_v57 = vrot.slane %v81_v53, %v93_v52  ;;  %v90_v58 = vrot.slane %v81_v53, %v89_v54 }
  0x11   :  { %v98_v59 = vrot.slane %v81_v53, %v97_v55 }
  0x12   :  { %v48_v48 = vpack.c.bf16 %v46_v47, %v45_v46 }
  0x13   :  { %272 = vmatpush1.bf16.msra.mxu0 %v580_v19  ;;  %325 = vmatpush1.bf16.msra.mxu1 %v581_v20 }
  0x14   :  { %273 = vmatprep.subr.bf16.mxu0 %v582_v21  ;;  %326 = vmatprep.subr.bf16.mxu1 %v584_v22 }
  0x17   :  { %274 = vmatpush1.bf16.msra.mxu0 %v586_v23  ;;  %327 = vmatpush1.bf16.msra.mxu1 %v587_v24 }
  0x18   :  { %275 = vmatprep.subr.bf16.mxu0 %v588_v25  ;;  %328 = vmatprep.subr.bf16.mxu1 %v590_v26 }
  0x1b   :  { %276 = vmatpush1.bf16.msra.mxu0 %v592_v32  ;;  %329 = vmatpush1.bf16.msra.mxu1 %v593_v33 }
  0x1c   :  { %277 = vmatprep.subr.bf16.mxu0 %v594_v35  ;;  %330 = vmatprep.subr.bf16.mxu1 %v596_v36 }
  0x1f   :  { %278 = vmatpush1.bf16.msra.mxu0 %v598_v37  ;;  %331 = vmatpush1.bf16.msra.mxu1 %v599_v40 }
  0x22   :  { %296 = vmatmul.mubr.bf16.vlgmr.msra.gmra.mxu0 %v47_v43  ;;  %349 = vmatmul.mubr.bf16.vlgmr.msra.gmra.mxu1 %v47_v43 }
  0x23   :  { %305 = vmatprep.mubr.bf16.mxu0 %v664_v1  ;;  %358 = vmatprep.mubr.bf16.mxu1 %v664_v1 }
  0x2a   :  { %306 = vmatmul.mubr.bf16.gmra.mxu0 %v48_v48  ;;  %359 = vmatmul.mubr.bf16.gmra.mxu1 %v48_v48 }
  0xe2   :  { %v297_v60 = vpop.f32.mrf.mxu0  ;;  %v350_v61 = vpop.f32.mrf.mxu1 }
  0xe3   :  { %v816_v62 = vadd.f32 %v297_v60, %v86_v56  ;;  %v818_v63 = vadd.f32 %v350_v61, %v94_v57 }
  0xe4   :  { %v299_v0 = vpop.f32.mrf.mxu0  ;;  %v352_v1 = vpop.f32.mrf.mxu1 }
  0xe5   :  { %v535_v2 = vmul.f32 -1.442695, %v816_v62  ;;  %v537_v3 = vmul.f32 -1.442695, %v818_v63  ;;  %v822_v4 = vadd.f32 %v299_v0, %v90_v58  ;;  %v824_v5 = vadd.f32 %v352_v1, %v98_v59 }
  0xe6   :  { %v301_v6 = vpop.f32.mrf.mxu0  ;;  %v354_v7 = vpop.f32.mrf.mxu1 }
  0xe7   :  { %600 = vpow2.f32 %v535_v2  ;;  %v536_v8 = vmul.f32 -1.442695, %v822_v4  ;;  %v538_v9 = vmul.f32 -1.442695, %v824_v5  ;;  %v828_v10 = vadd.f32 %v301_v6, %v86_v56 }
  0xe8   :  { %602 = vpow2.f32 %v537_v3  ;;  %v830_v11 = vadd.f32 %v354_v7, %v94_v57  ;;  %v303_v12 = vpop.f32.mrf.mxu0  ;;  %v356_v13 = vpop.f32.mrf.mxu1 }
  0xe9   :  { %604 = vpow2.f32 %v536_v8  ;;  %v539_v14 = vmul.f32 -1.442695, %v828_v10  ;;  %v833_v15 = vadd.f32 %v303_v12, %v90_v58  ;;  %v835_v16 = vadd.f32 %v356_v13, %v98_v59 }
  0xea   :  { %606 = vpow2.f32 %v538_v9  ;;  %v541_v17 = vmul.f32 -1.442695, %v830_v11  ;;  %v307_v18 = vpop.f32.mrf.mxu0  ;;  %v360_v19 = vpop.f32.mrf.mxu1 }
  0xeb   :  { %608 = vpow2.f32 %v539_v14  ;;  %v540_v20 = vmul.f32 -1.442695, %v833_v15  ;;  %v542_v21 = vmul.f32 -1.442695, %v835_v16  ;;  %v840_v22 = vadd.f32 %v307_v18, %v86_v56 }
  0xec   :  { %610 = vpow2.f32 %v541_v17  ;;  %v842_v23 = vadd.f32 %v360_v19, %v94_v57  ;;  %v309_v24 = vpop.f32.mrf.mxu0  ;;  %v362_v25 = vpop.f32.mrf.mxu1 }
  0xed   :  { %612 = vpow2.f32 %v540_v20  ;;  %v543_v26 = vmul.f32 -1.442695, %v840_v22  ;;  %v845_v27 = vadd.f32 %v309_v24, %v90_v58  ;;  %v847_v28 = vadd.f32 %v362_v25, %v98_v59 }
  0xee   :  { %614 = vpow2.f32 %v542_v21  ;;  %v545_v29 = vmul.f32 -1.442695, %v842_v23  ;;  %v311_v30 = vpop.f32.mrf.mxu0  ;;  %v364_v31 = vpop.f32.mrf.mxu1 }
  0xef   :  { %616 = vpow2.f32 %v543_v26  ;;  %v544_v32 = vmul.f32 -1.442695, %v845_v27  ;;  %v546_v33 = vmul.f32 -1.442695, %v847_v28  ;;  %v852_v34 = vadd.f32 %v311_v30, %v86_v56 }
  0xf0   :  { %618 = vpow2.f32 %v545_v29  ;;  %v854_v35 = vadd.f32 %v364_v31, %v94_v57  ;;  %v313_v36 = vpop.f32.mrf.mxu0  ;;  %v366_v37 = vpop.f32.mrf.mxu1 }
  0xf1   :  { %620 = vpow2.f32 %v544_v32  ;;  %v547_v38 = vmul.f32 -1.442695, %v852_v34  ;;  %v857_v39 = vadd.f32 %v313_v36, %v90_v58  ;;  %v859_v40 = vadd.f32 %v366_v37, %v98_v59 }
  0xf2   :  { %622 = vpow2.f32 %v546_v33  ;;  %v549_v41 = vmul.f32 -1.442695, %v854_v35 }
  0xf3   :  { %624 = vpow2.f32 %v547_v38  ;;  %v548_v42 = vmul.f32 -1.442695, %v857_v39  ;;  %v550_v43 = vmul.f32 -1.442695, %v859_v40 }
  0xf4   :  { %v601_v44 = vpop.eup %600  ;;  %626 = vpow2.f32 %v549_v41 }
  0xf5   :  { %v603_v45 = vpop.eup %602  ;;  %v417_v46 = vadd.f32 1.0, %v601_v44  ;;  %628 = vpow2.f32 %v548_v42 }
  0xf6   :  { %v605_v47 = vpop.eup %604  ;;  %v419_v48 = vadd.f32 1.0, %v603_v45  ;;  %630 = vpow2.f32 %v550_v43 }
  0xf7   :  { %v607_v49 = vpop.eup %606  ;;  %632 = vrcp.f32 %v417_v46  ;;  %v418_v50 = vadd.f32 1.0, %v605_v47 }
  0xf8   :  { %v609_v51 = vpop.eup %608  ;;  %634 = vrcp.f32 %v419_v48  ;;  %v420_v52 = vadd.f32 1.0, %v607_v49 }
  0xf9   :  { %v611_v53 = vpop.eup %610  ;;  %636 = vrcp.f32 %v418_v50  ;;  %v421_v54 = vadd.f32 1.0, %v609_v51 }
  0xfa   :  { %v613_v55 = vpop.eup %612  ;;  %638 = vrcp.f32 %v420_v52  ;;  %v423_v56 = vadd.f32 1.0, %v611_v53 }
  0xfb   :  { %v615_v57 = vpop.eup %614  ;;  %640 = vrcp.f32 %v421_v54  ;;  %v422_v58 = vadd.f32 1.0, %v613_v55 }
  0xfc   :  { %v617_v59 = vpop.eup %616  ;;  %642 = vrcp.f32 %v423_v56  ;;  %v424_v60 = vadd.f32 1.0, %v615_v57 }
  0xfd   :  { %v619_v61 = vpop.eup %618  ;;  %644 = vrcp.f32 %v422_v58  ;;  %v425_v0 = vadd.f32 1.0, %v617_v59 }
  0xfe   :  { %v621_v1 = vpop.eup %620  ;;  %646 = vrcp.f32 %v424_v60  ;;  %v427_v2 = vadd.f32 1.0, %v619_v61 }
  0xff   :  { %v623_v3 = vpop.eup %622  ;;  %648 = vrcp.f32 %v425_v0  ;;  %v426_v6 = vadd.f32 1.0, %v621_v1 }
 0x100   :  { %v625_v7 = vpop.eup %624  ;;  %650 = vrcp.f32 %v427_v2  ;;  %v428_v8 = vadd.f32 1.0, %v623_v3 }
 0x101   :  { %v627_v9 = vpop.eup %626  ;;  %652 = vrcp.f32 %v426_v6  ;;  %v429_v12 = vadd.f32 1.0, %v625_v7 }
 0x102   :  { %v629_v13 = vpop.eup %628  ;;  %654 = vrcp.f32 %v428_v8  ;;  %v431_v14 = vadd.f32 1.0, %v627_v9 }
 0x103   :  { %v631_v17 = vpop.eup %630  ;;  %656 = vrcp.f32 %v429_v12  ;;  %v430_v18 = vadd.f32 1.0, %v629_v13 }
 0x104   :  { %v633_v19 = vpop.eup %632  ;;  %658 = vrcp.f32 %v431_v14  ;;  %v432_v20 = vadd.f32 1.0, %v631_v17 }
 0x105   :  { %v635_v21 = vpop.eup %634  ;;  %v465_v24 = vmul.f32 %v633_v19, %v816_v62  ;;  %660 = vrcp.f32 %v430_v18 }
 0x106   :  { %v637_v25 = vpop.eup %636  ;;  %v467_v26 = vmul.f32 %v635_v21, %v818_v63  ;;  %662 = vrcp.f32 %v432_v20 }
 0x107   :  { %v639_v29 = vpop.eup %638  ;;  %481 = vst [vmem:[%s933_s5] sm:$0xff] %v465_v24  ;;  %v466_v30 = vmul.f32 %v637_v25, %v822_v4 }
 0x108   :  { %v641_v31 = vpop.eup %640  ;;  %483 = vst [vmem:[%s933_s5 + $0x10] sm:$0xff] %v467_v26  ;;  %v468_v32 = vmul.f32 %v639_v29, %v824_v5 }
 0x109   :  { %v643_v62 = vpop.eup %642  ;;  %482 = vst [vmem:[%s933_s5 + $0x8] sm:$0xff] %v466_v30  ;;  %v469_v63 = vmul.f32 %v641_v31, %v828_v10 }
 0x10a   :  { %v645_v33 = vpop.eup %644  ;;  %484 = vst [vmem:[%s933_s5 + $0x18] sm:$0xff] %v468_v32  ;;  %v471_v4 = vmul.f32 %v643_v62, %v830_v11 }
 0x10b   :  { %v647_v36 = vpop.eup %646  ;;  %485 = vst [vmem:[%s933_s5 + $0x20] sm:$0xff] %v469_v63  ;;  %v470_v5 = vmul.f32 %v645_v33, %v833_v15 }
 0x10c   :  { %v649_v37 = vpop.eup %648  ;;  %487 = vst [vmem:[%s933_s5 + $0x30] sm:$0xff] %v471_v4  ;;  %v472_v10 = vmul.f32 %v647_v36, %v835_v16 }
 0x10d   :  { %v651_v38 = vpop.eup %650  ;;  %486 = vst [vmem:[%s933_s5 + $0x28] sm:$0xff] %v470_v5  ;;  %v473_v11 = vmul.f32 %v649_v37, %v840_v22 }
 0x10e   :  { %v653_v41 = vpop.eup %652  ;;  %488 = vst [vmem:[%s933_s5 + $0x38] sm:$0xff] %v472_v10  ;;  %v475_v15 = vmul.f32 %v651_v38, %v842_v23 }
 0x10f   :  { %v655_v42 = vpop.eup %654  ;;  %489 = vst [vmem:[%s933_s5 + $0x40] sm:$0xff] %v473_v11  ;;  %v474_v16 = vmul.f32 %v653_v41, %v845_v27 }
 0x110   :  { %v657_v43 = vpop.eup %656  ;;  %491 = vst [vmem:[%s933_s5 + $0x50] sm:$0xff] %v475_v15  ;;  %v476_v22 = vmul.f32 %v655_v42, %v847_v28 }
 0x111   :  { %v659_v44 = vpop.eup %658  ;;  %490 = vst [vmem:[%s933_s5 + $0x48] sm:$0xff] %v474_v16  ;;  %v477_v23 = vmul.f32 %v657_v43, %v852_v34 }
 0x112   :  { %v661_v45 = vpop.eup %660  ;;  %492 = vst [vmem:[%s933_s5 + $0x58] sm:$0xff] %v476_v22  ;;  %v479_v27 = vmul.f32 %v659_v44, %v854_v35 }
 0x113   :  { %v663_v46 = vpop.eup %662  ;;  %493 = vst [vmem:[%s933_s5 + $0x60] sm:$0xff] %v477_v23  ;;  %v478_v28 = vmul.f32 %v661_v45, %v857_v39 }
 0x114   :  { %495 = vst [vmem:[%s933_s5 + $0x70] sm:$0xff] %v479_v27  ;;  %v480_v34 = vmul.f32 %v663_v46, %v859_v40 }
 0x115   :  { %494 = vst [vmem:[%s933_s5 + $0x68] sm:$0xff] %v478_v28 }
 0x116   :  { %496 = vst [vmem:[%s933_s5 + $0x78] sm:$0xff] %v480_v34 }

// kernel: squeezeformer_encoder.45
= control target key start
LH: loop header
LB: loop body
LE: loop exit
PB: predicated region body
PF: predicated region fallthrough
CT: control target
= control target key end

     0   :  { %s1412_s9 = smov 0   ;;  %s1414_s10 = smov 0   ;;  %s1761_s0 = inlined_call_operand.vmem [shape: f32[2,16,128], index: 0, kind: input, shape index: {}]   ;;  %s1762_s1 = inlined_call_operand.vmem [shape: f32[2,16,256], index: 1, kind: input, shape index: {}]   ;;  %s1763_s2 = inlined_call_operand.vmem [shape: f32[2,16,128], index: 2, kind: output, shape index: {}]  }
   0x1   :  { %s1416_s11 = smov 0  }
   0x2 LB: > { %s31_s12 = sadd.s32 1, %s1384_s10  ;;  %p1201_p0 = scmp.ge.s32.totalorder %s1388_s11, 1  ;;  %s1388_s11 = sphi %s1416_s11, %s12_s11   ;;  %s1384_s10 = sphi %s1414_s10, %s1765_s10   ;;  %s1380_s9 = sphi %s1412_s9, %s1764_s9  }
   0x3   : > { %p33_p1 = scmp.ge.s32.totalorder %s31_s12, 2  ;;  %p158_p2 = scmp.lt.s32.totalorder %s1388_s11, 3 }
   0x5   : > { %s1767_s12 = smov (%p33_p1, %s31_s12), 0  ;;  %p159_p3 = pnand %p1201_p0, %p158_p2 }
   0x6   : > { %p199_p4 = scmp.lt.s32.totalorder (!%p159_p3), %s1380_s9, 1  ;;  %s1394_s21 = smov (!%p159_p3), 96  }
   0x7   : > { %162 = sbr.rel (%p159_p3) target bundleno = 1420 (0x58c), region = 28  ;;  %s1395_s22 = smov (!%p159_p3), 64  }
   0x8   : > { %s1396_s23 = smov (!%p159_p3), 32  }
   0xc   : > { %vm251_vm0 = vcmask 261120   ;;  %v1390_v0 = vmov 0.0   ;;  %vm1391_vm1 = vmmov 0   ;;  %s1769_s9 = smov (!%p199_p4, %s1380_s9), 1  ;;  %vm234_vm2 = vcmask 7168  }
   0xd   : > { %1237 = vmatprep.subr.bf16.mxu0 %v1390_v0  ;;  %252 = vst.msk [vmem:[#allocation4] sm:$0xff] %vm251_vm0, %v1390_v0  ;;  %253 = vst.msk [vmem:[#allocation4 + $0x8] sm:$0xff] %vm251_vm0, %v1390_v0  ;;  %1239 = vmatprep.mubr.msk.bf16.mxu0 %vm1391_vm1, %v1390_v0  ;;  %s1219_s13 = sshll.u32 %s1769_s9, 5  ;;  %s1218_s14 = sshll.u32 %s1769_s9, 4  ;;  %v1392_v10 = vmov -1e+30   ;;  %v261_v11 = vlaneseq }
   0xe   : > { %254 = vst.msk [vmem:[#allocation4 + $0x10] sm:$0xff] %vm251_vm0, %v1390_v0  ;;  %255 = vst.msk [vmem:[#allocation4 + $0x18] sm:$0xff] %vm251_vm0, %v1390_v0  ;;  %1243 = vmatprep.subr.bf16.mxu1 %v1390_v0  ;;  %1245 = vmatprep.mubr.msk.bf16.mxu1 %vm1391_vm1, %v1390_v0  ;;  %s1460_s17 = scalar_lea.vmem %s1762_s1, %s1219_s13  ;;  %s206_s20 = scalar_lea.vmem %s1761_s0, %s1218_s14  ;;  %vm330_vm4 = vcmask 130048   ;;  %v1393_v21 = vmov 0   ;;  %vm1078_vm5 = vcmask 523264   ;;  %vm1081_vm6 = vcmask 785408  }
   0xf   : > { %256 = vst.msk [vmem:[#allocation4 + $0x20] sm:$0xff] %vm251_vm0, %v1390_v0  ;;  %257 = vst.msk [vmem:[#allocation4 + $0x28] sm:$0xff] %vm251_vm0, %v1390_v0  ;;  %v270_v1 = vld [vmem:[%s1460_s17] sm:$0xff]  ;;  %v271_v2 = vld [vmem:[%s1460_s17 + $0x10] sm:$0xff]  ;;  %v1501_v12 = vand.u32 127, %v261_v11  ;;  %1316 = vset.pattern.permute.xlu1 %v1393_v21  ;;  %1317 = vset.pattern.permute.xlu0 %v1393_v21  ;;  %s227_s26 = scalar_lea.vmem %s1763_s2, %s1218_s14 }
  0x10   : > { %258 = vst.msk [vmem:[#allocation4 + $0x30] sm:$0xff] %vm251_vm0, %v1390_v0  ;;  %259 = vst.msk [vmem:[#allocation4 + $0x38] sm:$0xff] %vm251_vm0, %v1390_v0  ;;  %v266_v3 = vld [vmem:[%s206_s20] sm:$0xff]  ;;  %v1469_v4 = vpack.c.bf16 %v271_v2, %v270_v1  ;;  %v267_v5 = vld [vmem:[%s206_s20 + $0x8] sm:$0xff] }
  0x11   : > { %v268_v7 = vmul.f32 0.17677669, %v266_v3  ;;  %v269_v8 = vmul.f32 0.17677669, %v267_v5  ;;  %235 = vst.msk [vmem:[#allocation2] sm:$0xff] %vm234_vm2, %v1392_v10  ;;  %236 = vst.msk [vmem:[#allocation2 + $0x8] sm:$0xff] %vm234_vm2, %v1392_v10 }
  0x12   : > { %v281_v6 = vsel %vm251_vm0, %v1469_v4, 0  ;;  %237 = vst.msk [vmem:[#allocation2 + $0x10] sm:$0xff] %vm234_vm2, %v1392_v10  ;;  %238 = vst.msk [vmem:[#allocation2 + $0x18] sm:$0xff] %vm234_vm2, %v1392_v10  ;;  %vm265_vm3 = vcmp.lt.s32.totalorder %v1501_v12, 16  ;;  %v272_v30 = vld [vmem:[%s1460_s17 + $0x8] sm:$0xff]  ;;  %v273_v31 = vld [vmem:[%s1460_s17 + $0x18] sm:$0xff] }
  0x13   : > { %1238 = vmatpush3.bf16.xpose.msra.mxu0 %v281_v6  ;;  %v274_v9 = vpack.c.bf16 %v269_v8, %v268_v7  ;;  %239 = vst.msk [vmem:[#allocation2 + $0x20] sm:$0xff] %vm234_vm2, %v1392_v10  ;;  %240 = vst.msk [vmem:[#allocation2 + $0x28] sm:$0xff] %vm234_vm2, %v1392_v10  ;;  %v1534_v32 = vpack.c.bf16 %v273_v31, %v272_v30 }
  0x14   : > { %1255 = vmatprep.subr.bf16.mxu0 %v1390_v0  ;;  %241 = vst.msk [vmem:[#allocation2 + $0x30] sm:$0xff] %vm234_vm2, %v1392_v10  ;;  %242 = vst.msk [vmem:[#allocation2 + $0x38] sm:$0xff] %vm234_vm2, %v1392_v10 }
  0x15   : > { %243 = vst.msk [vmem:[#allocation3] sm:$0xff] %vm234_vm2, %v1390_v0  ;;  %244 = vst.msk [vmem:[#allocation3 + $0x8] sm:$0xff] %vm234_vm2, %v1390_v0  ;;  %1244 = vmatpush3.bf16.msra.mxu1 %v1534_v32 }
  0x16   : > { %245 = vst.msk [vmem:[#allocation3 + $0x10] sm:$0xff] %vm234_vm2, %v1390_v0  ;;  %246 = vst.msk [vmem:[#allocation3 + $0x18] sm:$0xff] %vm234_vm2, %v1390_v0  ;;  %1249 = vmatprep.subr.bf16.mxu1 %v1390_v0 }
  0x17   : > { %247 = vst.msk [vmem:[#allocation3 + $0x20] sm:$0xff] %vm234_vm2, %v1390_v0  ;;  %248 = vst.msk [vmem:[#allocation3 + $0x28] sm:$0xff] %vm234_vm2, %v1390_v0 }
  0x18   : > { %249 = vst.msk [vmem:[#allocation3 + $0x30] sm:$0xff] %vm234_vm2, %v1390_v0  ;;  %250 = vst.msk [vmem:[#allocation3 + $0x38] sm:$0xff] %vm234_vm2, %v1390_v0  ;;  %v1512_v22 = vld [vmem:[#allocation2] sm:$0xff]  ;;  %v1517_v25 = vld [vmem:[#allocation2 + $0x8] sm:$0xff] }
  0x1a   : > { %1240 = vmatmul.mubr.msk.bf16.vlgmr.msra.gmra.mxu0 %vm251_vm0, %v274_v9 }
  0x1b   : > { %1257 = vmatprep.mubr.msk.bf16.mxu0 %vm1391_vm1, %v1390_v0 }
  0xda   : > { %v317_v13 = vpop.f32.mrf.mxu0 }
  0xdb   : > { %v326_v14 = vsel %vm265_vm3, %v317_v13, -1e+30 }
  0xdc   : > { %v1241_v15 = vpop.f32.mrf.mxu0  ;;  %v331_v16 = vsel %vm330_vm4, %v326_v14, -inf }
  0xdd   : > { %332 = vmax.xlane.f32.xlu0 %v331_v16 }
  0xde   : > { %v320_v17 = vpop.f32.mrf.mxu0 }
  0xdf   : > { %v327_v18 = vsel %vm265_vm3, %v320_v17, -1e+30  ;;  %v1606_v17 = vld [vmem:[#allocation2 + $0x10] sm:$0xff] }
  0xe0   : > { %v1242_v19 = vpop.f32.mrf.mxu0  ;;  %v334_v20 = vsel %vm330_vm4, %v327_v18, -inf }
  0xe1   : > { %335 = vmax.xlane.f32.xlu0 %v334_v20  ;;  %v1611_v20 = vld [vmem:[#allocation2 + $0x18] sm:$0xff] }
  0xf7   : > { %451 = vrot.lane.b32.xlu0 %v1469_v4, %s1394_s21 }
 0x166   : > { %v333_v23 = vpop.xlane.xlu0 %332 }
 0x167   : > { %v1515_v24 = vmax.f32 %v1512_v22, %v333_v23 }
 0x169   : > { %v339_v26 = vsub.f32 %v1512_v22, %v1515_v24  ;;  %440 = vst.msk [vmem:[#allocation2] sm:$0xff] %vm234_vm2, %v1515_v24  ;;  %347 = vperm.xlu1 %1316, %v1515_v24  }
 0x16a   : > { %v336_v27 = vpop.xlane.xlu0 %335 }
 0x16b   : > { %v1525_v28 = vmax.f32 %v1517_v25, %v336_v27  ;;  %v1621_v27 = vld [vmem:[#allocation2 + $0x20] sm:$0xff] }
 0x16d   : > { %v340_v29 = vsub.f32 %v1517_v25, %v1525_v28  ;;  %441 = vst.msk [vmem:[#allocation2 + $0x8] sm:$0xff] %vm234_vm2, %v1525_v28  ;;  %352 = vperm.xlu1 %1316, %v1525_v28  }
 0x16e   : > { %v452_v40 = vpop.permute.xlu0 %451 }
 0x16f   : > { %v457_v43 = vsel %vm251_vm0, %v452_v40, 0 }
 0x171   : > { %448 = vrot.lane.b32.xlu1 %v274_v9, %s1394_s21 }
 0x175   : > { %629 = vrot.lane.b32.xlu1 %v1469_v4, %s1395_s22 }
 0x179   : > { %626 = vrot.lane.b32.xlu1 %v274_v9, %s1395_s22 }
 0x17d   : > { %807 = vrot.lane.b32.xlu1 %v1469_v4, %s1396_s23 }
 0x181   : > { %804 = vrot.lane.b32.xlu1 %v274_v9, %s1396_s23 }
 0x1e4   : > { %v348_v33 = vpop.permute.xlu1 %347 }
 0x1e5   : > { %v355_v34 = vsub.f32 %v326_v14, %v348_v33 }
 0x1e7   : > { %v357_v35 = vmul.f32 1.442695, %v355_v34  ;;  %v1633_v34 = vld [vmem:[#allocation2 + $0x28] sm:$0xff] }
 0x1e8   : > { %v353_v36 = vpop.permute.xlu1 %352 }
 0x1e9   : > { %v356_v37 = vsub.f32 %v327_v18, %v353_v36  ;;  %1318 = vpow2.f32 %v357_v35 }
 0x1eb   : > { %v359_v38 = vmul.f32 1.442695, %v356_v37 }
 0x1ec   : > { %v449_v39 = vpop.permute.xlu1 %448 }
 0x1ed   : > { %1320 = vpow2.f32 %v359_v38  ;;  %v1643_v38 = vld [vmem:[#allocation2 + $0x30] sm:$0xff] }
 0x1f0   : > { %v630_v45 = vpop.permute.xlu1 %629 }
 0x1f1   : > { %v635_v47 = vsel %vm251_vm0, %v630_v45, 0 }
 0x1f4   : > { %v627_v46 = vpop.permute.xlu1 %626 }
 0x1f6   : > { %v1545_v41 = vpop.eup %1318 }
 0x1f8   : > { %v808_v48 = vpop.permute.xlu1 %807 }
 0x1f9   : > { %v813_v49 = vsel %vm251_vm0, %v808_v48, 0 }
 0x1fa   : > { %v1547_v42 = vpop.eup %1320 }
 0x1fb   : > { %v390_v44 = vpack.c.bf16 %v1547_v42, %v1545_v41 }
 0x1fc   : > { %v805_v50 = vpop.permute.xlu1 %804 }
 0x1fd   : > { %1246 = vmatmul.mubr.msk.bf16.vlgmr.msra.gmra.mxu1 %vm330_vm4, %v390_v44  ;;  %v1653_v44 = vld [vmem:[#allocation2 + $0x38] sm:$0xff] }
 0x1fe   : > { %1250 = vmatpush3.bf16.xpose.msra.mxu1 %v457_v43  ;;  %1251 = vmatprep.mubr.msk.bf16.mxu1 %vm1391_vm1, %v1390_v0 }
 0x1ff   : > { %1261 = vmatprep.subr.bf16.mxu1 %v1390_v0 }
 0x205   : > { %1252 = vmatmul.mubr.msk.bf16.vlgmr.msra.gmra.mxu1 %vm251_vm0, %v449_v39 }
 0x206   : > { %1262 = vmatpush3.bf16.xpose.msra.mxu1 %v635_v47  ;;  %1263 = vmatprep.mubr.msk.bf16.mxu1 %vm1391_vm1, %v1390_v0 }
 0x207   : > { %1273 = vmatprep.subr.bf16.mxu1 %v1390_v0 }
 0x20d   : > { %1264 = vmatmul.mubr.msk.bf16.vlgmr.msra.gmra.mxu1 %vm251_vm0, %v627_v46 }
 0x20e   : > { %1274 = vmatpush3.bf16.xpose.msra.mxu1 %v813_v49  ;;  %1275 = vmatprep.mubr.msk.bf16.mxu1 %vm1391_vm1, %v1390_v0  ;;  %v368_v49 = vsel %vm330_vm4, %v1547_v42, 0.0 }
 0x215   : > { %1276 = vmatmul.mubr.msk.bf16.vlgmr.msra.gmra.mxu1 %vm251_vm0, %v805_v50  ;;  %v365_v50 = vsel %vm330_vm4, %v1545_v41, 0.0 }
 0x2bd   : > { %v1566_v51 = vpop.f32.mrf.mxu1 }
 0x2bf   : > { %v1247_v52 = vpop.f32.mrf.mxu1 }
 0x2c1   : > { %v1568_v53 = vpop.f32.mrf.mxu1 }
 0x2c3   : > { %v1248_v54 = vpop.f32.mrf.mxu1 }
 0x2c5   : > { %v493_v55 = vpop.f32.mrf.mxu1 }
 0x2c6   : > { %v1572_v56 = vsel %vm265_vm3, %v493_v55, -1e+30 }
 0x2c7   : > { %v1253_v57 = vpop.f32.mrf.mxu1  ;;  %v505_v58 = vsel %vm330_vm4, %v1572_v56, -inf }
 0x2c8   : > { %506 = vmax.xlane.f32.xlu1 %v505_v58 }
 0x2c9   : > { %v496_v59 = vpop.f32.mrf.mxu1 }
 0x2ca   : > { %v1578_v60 = vsel %vm265_vm3, %v496_v59, -1e+30 }
 0x2cb   : > { %v1254_v61 = vpop.f32.mrf.mxu1  ;;  %v508_v62 = vsel %vm330_vm4, %v1578_v60, -inf }
 0x2cc   : > { %509 = vmax.xlane.f32.xlu0 %v508_v62 }
 0x2cd   : > { %v671_v63 = vpop.f32.mrf.mxu1 }
 0x2ce   : > { %v1584_v1 = vsel %vm265_vm3, %v671_v63, -1e+30 }
 0x2cf   : > { %v1265_v2 = vpop.f32.mrf.mxu1  ;;  %v683_v3 = vsel %vm330_vm4, %v1584_v1, -inf }
 0x2d0   : > { %684 = vmax.xlane.f32.xlu0 %v683_v3 }
 0x2d1   : > { %v674_v4 = vpop.f32.mrf.mxu1 }
 0x2d2   : > { %v1590_v5 = vsel %vm265_vm3, %v674_v4, -1e+30 }
 0x2d3   : > { %v1266_v6 = vpop.f32.mrf.mxu1  ;;  %v686_v7 = vsel %vm330_vm4, %v1590_v5, -inf }
 0x2d4   : > { %687 = vmax.xlane.f32.xlu1 %v686_v7 }
 0x2d5   : > { %v849_v8 = vpop.f32.mrf.mxu1 }
 0x2d6   : > { %v1596_v9 = vsel %vm265_vm3, %v849_v8, -1e+30 }
 0x2d7   : > { %v1277_v10 = vpop.f32.mrf.mxu1  ;;  %v861_v11 = vsel %vm330_vm4, %v1596_v9, -inf }
 0x2d8   : > { %862 = vmax.xlane.f32.xlu0 %v861_v11 }
 0x2d9   : > { %v852_v13 = vpop.f32.mrf.mxu1 }
 0x2da   : > { %v1602_v14 = vsel %vm265_vm3, %v852_v13, -1e+30 }
 0x2db   : > { %v1278_v15 = vpop.f32.mrf.mxu1  ;;  %v864_v16 = vsel %vm330_vm4, %v1602_v14, -inf }
 0x2dc   : > { %865 = vmax.xlane.f32.xlu1 %v864_v16 }
 0x351   : > { %v507_v18 = vpop.xlane.xlu1 %506 }
 0x352   : > { %v1609_v19 = vmax.f32 %v1606_v17, %v507_v18 }
 0x354   : > { %v513_v21 = vsub.f32 %v1606_v17, %v1609_v19  ;;  %619 = vst.msk [vmem:[#allocation2 + $0x10] sm:$0xff] %vm234_vm2, %v1609_v19  ;;  %521 = vperm.xlu0 %1317, %v1609_v19  }
 0x355   : > { %v510_v12 = vpop.xlane.xlu0 %509 }
 0x356   : > { %v1619_v23 = vmax.f32 %v1611_v20, %v510_v12  ;;  %v515_v24 = vmul.f32 1.442695, %v513_v21 }
 0x358   : > { %v514_v30 = vsub.f32 %v1611_v20, %v1619_v23  ;;  %620 = vst.msk [vmem:[#allocation2 + $0x18] sm:$0xff] %vm234_vm2, %v1619_v23  ;;  %924 = vrot.lane.b32.xlu0 %v1534_v32, %s1396_s23  ;;  %526 = vperm.xlu1 %1316, %v1619_v23  }
 0x359   : > { %v685_v31 = vpop.xlane.xlu0 %684 }
 0x35a   : > { %v1631_v33 = vmax.f32 %v1621_v27, %v685_v31 }
 0x35c   : > { %v691_v35 = vsub.f32 %v1621_v27, %v1631_v33  ;;  %797 = vst.msk [vmem:[#allocation2 + $0x20] sm:$0xff] %vm234_vm2, %v1631_v33  ;;  %699 = vperm.xlu1 %1316, %v1631_v33   ;;  %v517_v27 = vmul.f32 1.442695, %v514_v30 }
 0x35d   : > { %v688_v36 = vpop.xlane.xlu1 %687 }
 0x35e   : > { %v1641_v37 = vmax.f32 %v1633_v34, %v688_v36  ;;  %v693_v12 = vmul.f32 1.442695, %v691_v35  ;;  %v362_v36 = vld [vmem:[#allocation3 + $0x8] sm:$0xff] }
 0x360   : > { %v692_v39 = vsub.f32 %v1633_v34, %v1641_v37  ;;  %798 = vst.msk [vmem:[#allocation2 + $0x28] sm:$0xff] %vm234_vm2, %v1641_v37  ;;  %704 = vperm.xlu1 %1316, %v1641_v37  }
 0x361   : > { %v863_v40 = vpop.xlane.xlu0 %862 }
 0x362   : > { %v1651_v43 = vmax.f32 %v1643_v38, %v863_v40  ;;  %v695_v21 = vmul.f32 1.442695, %v692_v39 }
 0x364   : > { %v869_v45 = vsub.f32 %v1643_v38, %v1651_v43  ;;  %975 = vst.msk [vmem:[#allocation2 + $0x30] sm:$0xff] %vm234_vm2, %v1651_v43  ;;  %877 = vperm.xlu1 %1316, %v1651_v43  }
 0x365   : > { %v866_v46 = vpop.xlane.xlu1 %865 }
 0x366   : > { %v1661_v47 = vmax.f32 %v1653_v44, %v866_v46 }
 0x368   : > { %v870_v48 = vsub.f32 %v1653_v44, %v1661_v47  ;;  %976 = vst.msk [vmem:[#allocation2 + $0x38] sm:$0xff] %vm234_vm2, %v1661_v47  ;;  %882 = vperm.xlu1 %1316, %v1661_v47   ;;  %v361_v47 = vld [vmem:[#allocation3] sm:$0xff] }
 0x36a   : > { %v873_v34 = vmul.f32 1.442695, %v870_v48 }
 0x36c   : > { %568 = vrot.lane.b32.xlu1 %v1534_v32, %s1394_s21 }
 0x370   : > { %746 = vrot.lane.b32.xlu1 %v1534_v32, %s1395_s22 }
 0x377   : > { %369 = vadd.xlane.f32.xlu0 %v368_v49 }
 0x394   : > { %366 = vadd.xlane.f32.xlu1 %v365_v50 }
 0x3cf   : > { %v522_v52 = vpop.permute.xlu0 %521 }
 0x3d0   : > { %v529_v54 = vsub.f32 %v1572_v56, %v522_v52 }
 0x3d2   : > { %v531_v55 = vmul.f32 1.442695, %v529_v54 }
 0x3d3   : > { %v527_v57 = vpop.permute.xlu1 %526  ;;  %v925_v28 = vpop.permute.xlu0 %924 }
 0x3d4   : > { %1322 = vpow2.f32 %v531_v55  ;;  %v530_v58 = vsub.f32 %v1578_v60, %v527_v57  ;;  %v536_v55 = vld [vmem:[#allocation3 + $0x10] sm:$0xff] }
 0x3d6   : > { %v533_v59 = vmul.f32 1.442695, %v530_v58 }
 0x3d7   : > { %v700_v61 = vpop.permute.xlu1 %699 }
 0x3d8   : > { %1324 = vpow2.f32 %v533_v59  ;;  %v707_v32 = vsub.f32 %v1584_v1, %v700_v61  ;;  %v537_v59 = vld [vmem:[#allocation3 + $0x18] sm:$0xff] }
 0x3da   : > { %v709_v62 = vmul.f32 1.442695, %v707_v32 }
 0x3db   : > { %v705_v42 = vpop.permute.xlu1 %704 }
 0x3dc   : > { %1326 = vpow2.f32 %v709_v62  ;;  %v708_v63 = vsub.f32 %v1590_v5, %v705_v42  ;;  %v714_v42 = vld [vmem:[#allocation3 + $0x20] sm:$0xff] }
 0x3de   : > { %v711_v41 = vmul.f32 1.442695, %v708_v63 }
 0x3df   : > { %v878_v2 = vpop.permute.xlu1 %877 }
 0x3e0   : > { %1328 = vpow2.f32 %v711_v41  ;;  %v885_v56 = vsub.f32 %v1596_v9, %v878_v2  ;;  %v341_v9 = vmul.f32 1.442695, %v339_v26 }
 0x3e1   : > { %v1323_v3 = vpop.eup %1322 }
 0x3e2   : > { %v887_v4 = vmul.f32 1.442695, %v885_v56  ;;  %v540_v6 = vsel %vm330_vm4, %v1323_v3, 0.0  ;;  %v715_v56 = vld [vmem:[#allocation3 + $0x28] sm:$0xff] }
 0x3e3   : > { %541 = vadd.xlane.f32.xlu1 %v540_v6  ;;  %v883_v60 = vpop.permute.xlu1 %882 }
 0x3e4   : > { %1330 = vpow2.f32 %v887_v4  ;;  %v886_v7 = vsub.f32 %v1602_v14, %v883_v60  ;;  %v343_v14 = vmul.f32 1.442695, %v340_v29  ;;  %v376_v4 = vld [vmem:[#allocation4] sm:$0xff] }
 0x3e5   : > { %v1325_v1 = vpop.eup %1324 }
 0x3e6   : > { %v889_v8 = vmul.f32 1.442695, %v886_v7  ;;  %v543_v10 = vsel %vm330_vm4, %v1325_v1, 0.0  ;;  %v565_v13 = vpack.c.bf16 %v1325_v1, %v1323_v3 }
 0x3e7   : > { %544 = vadd.xlane.f32.xlu0 %v543_v10  ;;  %v569_v5 = vpop.permute.xlu1 %568 }
 0x3e8   : > { %1332 = vpow2.f32 %v889_v8  ;;  %1256 = vmatpush3.bf16.msra.mxu0 %v569_v5  ;;  %v892_v8 = vld [vmem:[#allocation3 + $0x30] sm:$0xff] }
 0x3e9   : > { %v1327_v11 = vpop.eup %1326  ;;  %1267 = vmatprep.subr.bf16.mxu0 %v1390_v0  ;;  %1334 = vpow2.f32 %v341_v9 }
 0x3ea   : > { %v718_v15 = vsel %vm330_vm4, %v1327_v11, 0.0  ;;  %1336 = vpow2.f32 %v343_v14  ;;  %v893_v14 = vld [vmem:[#allocation3 + $0x38] sm:$0xff] }
 0x3eb   : > { %719 = vadd.xlane.f32.xlu1 %v718_v15  ;;  %1258 = vmatmul.mubr.msk.bf16.vlgmr.msra.gmra.mxu0 %vm330_vm4, %v565_v13  ;;  %v747_v16 = vpop.permute.xlu1 %746  ;;  %1338 = vpow2.f32 %v515_v24 }
 0x3ec   : > { %1268 = vmatpush3.bf16.msra.mxu0 %v747_v16  ;;  %1269 = vmatprep.mubr.msk.bf16.mxu0 %vm1391_vm1, %v1390_v0  ;;  %1340 = vpow2.f32 %v693_v12 }
 0x3ed   : > { %v1329_v18 = vpop.eup %1328  ;;  %1279 = vmatprep.subr.bf16.mxu0 %v1390_v0  ;;  %1342 = vpow2.f32 %v695_v21 }
 0x3ee   : > { %v721_v22 = vsel %vm330_vm4, %v1329_v18, 0.0  ;;  %v743_v26 = vpack.c.bf16 %v1329_v18, %v1327_v11  ;;  %1344 = vpow2.f32 %v517_v27 }
 0x3ef   : > { %722 = vadd.xlane.f32.xlu1 %v721_v22 }
 0x3f1   : > { %v1331_v25 = vpop.eup %1330 }
 0x3f2   : > { %v896_v29 = vsel %vm330_vm4, %v1331_v25, 0.0 }
 0x3f3   : > { %897 = vadd.xlane.f32.xlu1 %v896_v29  ;;  %1270 = vmatmul.mubr.msk.bf16.vlgmr.msra.gmra.mxu0 %vm330_vm4, %v743_v26  ;;  %v377_v26 = vld [vmem:[#allocation4 + $0x8] sm:$0xff] }
 0x3f4   : > { %1280 = vmatpush3.bf16.msra.mxu0 %v925_v28  ;;  %1281 = vmatprep.mubr.msk.bf16.mxu0 %vm1391_vm1, %v1390_v0  ;;  %v871_v0 = vmul.f32 1.442695, %v869_v45 }
 0x3f5   : > { %v1333_v17 = vpop.eup %1332 }
 0x3f6   : > { %v899_v19 = vsel %vm330_vm4, %v1333_v17, 0.0  ;;  %v921_v31 = vpack.c.bf16 %v1333_v17, %v1331_v25  ;;  %v1335_v33 = vpop.eup %1334  ;;  %1346 = vpow2.f32 %v871_v0 }
 0x3f7   : > { %900 = vadd.xlane.f32.xlu1 %v899_v19  ;;  %v1337_v35 = vpop.eup %1336  ;;  %1348 = vpow2.f32 %v873_v34  ;;  %v363_v48 = vmul.f32 %v1335_v33, %v361_v47  ;;  %v551_v34 = vld [vmem:[#allocation4 + $0x10] sm:$0xff] }
 0x3f8   : > { %v364_v37 = vmul.f32 %v1337_v35, %v362_v36  ;;  %v1339_v20 = vpop.eup %1338 }
 0x3f9   : > { %v1341_v38 = vpop.eup %1340  ;;  %v538_v57 = vmul.f32 %v1339_v20, %v536_v55 }
 0x3fa   : > { %v1343_v39 = vpop.eup %1342  ;;  %v716_v41 = vmul.f32 %v1341_v38, %v714_v42  ;;  %v908_v42 = vld [vmem:[#allocation4 + $0x38] sm:$0xff] }
 0x3fb   : > { %1282 = vmatmul.mubr.msk.bf16.vlgmr.msra.gmra.mxu0 %vm330_vm4, %v921_v31  ;;  %v1345_v43 = vpop.eup %1344  ;;  %v717_v60 = vmul.f32 %v1343_v39, %v715_v56 }
 0x3fc   : > { %v539_v32 = vmul.f32 %v1345_v43, %v537_v59 }
 0x3fd   : > { %380 = vperm.xlu0 %1317, %v1335_v33  }
 0x400   : > { %v370_v23 = vpop.xlane.xlu0 %369 }
 0x401   : > { %v372_v30 = vadd.f32 %v370_v23, %v364_v37  ;;  %555 = vperm.xlu0 %1317, %v1339_v20  }
 0x403   : > { %375 = vst.msk [vmem:[#allocation3 + $0x8] sm:$0xff] %vm234_vm2, %v372_v30  ;;  %v1347_v45 = vpop.eup %1346 }
 0x404   : > { %v1349_v44 = vpop.eup %1348  ;;  %v894_v9 = vmul.f32 %v1347_v45, %v892_v8 }
 0x405   : > { %733 = vperm.xlu0 %1317, %v1341_v38   ;;  %v895_v22 = vmul.f32 %v1349_v44, %v893_v14 }
 0x408   : > { %385 = vperm.xlu1 %1316, %v1337_v35  }
 0x409   : > { %738 = vperm.xlu0 %1317, %v1343_v39  }
 0x40a   : > { %v983_v40 = vld [vmem:[#allocation3 + $0x8] sm:$0xff] }
 0x40b   : > { %1350 = vrcp.f32 %v983_v40 }
 0x40c   : > { %560 = vperm.xlu1 %1316, %v1345_v43   ;;  %v729_v43 = vld [vmem:[#allocation4 + $0x20] sm:$0xff] }
 0x40d   : > { %911 = vperm.xlu0 %1317, %v1347_v45  }
 0x411   : > { %916 = vperm.xlu0 %1317, %v1349_v44  }
 0x418   : > { %v1351_v46 = vpop.eup %1350 }
 0x419   : > { %993 = vperm.xlu0 %1317, %v1351_v46  }
 0x41d   : > { %v367_v49 = vpop.xlane.xlu1 %366 }
 0x41e   : > { %v371_v50 = vadd.f32 %v367_v49, %v363_v48  ;;  %v730_v49 = vld [vmem:[#allocation4 + $0x28] sm:$0xff] }
 0x420   : > { %374 = vst.msk [vmem:[#allocation3] sm:$0xff] %vm234_vm2, %v371_v50 }
 0x427   : > { %v982_v52 = vld [vmem:[#allocation3] sm:$0xff] }
 0x428   : > { %1352 = vrcp.f32 %v982_v52 }
 0x435   : > { %v1353_v54 = vpop.eup %1352 }
 0x436   : > { %988 = vperm.xlu1 %1316, %v1353_v54  }
 0x46c   : > { %v542_v58 = vpop.xlane.xlu1 %541 }
 0x46d   : > { %v546_v61 = vadd.f32 %v542_v58, %v538_v57  ;;  %v907_v58 = vld [vmem:[#allocation4 + $0x30] sm:$0xff] }
 0x46f   : > { %548 = vst.msk [vmem:[#allocation3 + $0x10] sm:$0xff] %vm234_vm2, %v546_v61 }
 0x470   : > { %v545_v62 = vpop.xlane.xlu0 %544 }
 0x471   : > { %v547_v63 = vadd.f32 %v545_v62, %v539_v32 }
 0x473   : > { %549 = vst.msk [vmem:[#allocation3 + $0x18] sm:$0xff] %vm234_vm2, %v547_v63 }
 0x474   : > { %v720_v2 = vpop.xlane.xlu1 %719 }
 0x475   : > { %v724_v3 = vadd.f32 %v720_v2, %v716_v41 }
 0x476   : > { %v1000_v6 = vld [vmem:[#allocation3 + $0x10] sm:$0xff] }
 0x477   : > { %726 = vst.msk [vmem:[#allocation3 + $0x20] sm:$0xff] %vm234_vm2, %v724_v3  ;;  %1354 = vrcp.f32 %v1000_v6 }
 0x478   : > { %v381_v7 = vpop.permute.xlu0 %380  ;;  %v723_v1 = vpop.xlane.xlu1 %722 }
 0x479   : > { %v388_v10 = vmul.f32 %v381_v7, %v376_v4  ;;  %v725_v5 = vadd.f32 %v723_v1, %v717_v60 }
 0x47a   : > { %v1001_v11 = vld [vmem:[#allocation3 + $0x18] sm:$0xff] }
 0x47b   : > { %v436_v13 = vadd.f32 %v1566_v51, %v388_v10  ;;  %727 = vst.msk [vmem:[#allocation3 + $0x28] sm:$0xff] %vm234_vm2, %v725_v5  ;;  %1356 = vrcp.f32 %v1001_v11 }
 0x47c   : > { %v898_v15 = vpop.xlane.xlu1 %897  ;;  %v556_v36 = vpop.permute.xlu0 %555 }
 0x47d   : > { %438 = vst.msk [vmem:[#allocation4] sm:$0xff] %vm251_vm0, %v436_v13  ;;  %v902_v16 = vadd.f32 %v898_v15, %v894_v9  ;;  %v563_v20 = vmul.f32 %v556_v36, %v551_v34 }
 0x47e   : > { %v1018_v18 = vld [vmem:[#allocation3 + $0x20] sm:$0xff] }
 0x47f   : > { %904 = vst.msk [vmem:[#allocation3 + $0x30] sm:$0xff] %vm234_vm2, %v902_v16  ;;  %1358 = vrcp.f32 %v1018_v18 }
 0x480   : > { %v901_v24 = vpop.xlane.xlu1 %900  ;;  %v734_v37 = vpop.permute.xlu0 %733 }
 0x481   : > { %v903_v25 = vadd.f32 %v901_v24, %v895_v22  ;;  %v741_v48 = vmul.f32 %v734_v37, %v729_v43 }
 0x482   : > { %v1019_v28 = vld [vmem:[#allocation3 + $0x28] sm:$0xff] }
 0x483   : > { %905 = vst.msk [vmem:[#allocation3 + $0x38] sm:$0xff] %vm234_vm2, %v903_v25  ;;  %1360 = vrcp.f32 %v1019_v28 }
 0x484   : > { %v1355_v51 = vpop.eup %1354  ;;  %v386_v29 = vpop.permute.xlu1 %385 }
 0x485   : > { %v389_v12 = vmul.f32 %v386_v29, %v377_v26  ;;  %1006 = vperm.xlu1 %1316, %v1355_v51   ;;  %v739_v45 = vpop.permute.xlu0 %738 }
 0x486   : > { %v1036_v17 = vld [vmem:[#allocation3 + $0x30] sm:$0xff]  ;;  %v742_v57 = vmul.f32 %v739_v45, %v730_v49 }
 0x487   : > { %v437_v19 = vadd.f32 %v1568_v53, %v389_v12  ;;  %1362 = vrcp.f32 %v1036_v17  ;;  %v552_v53 = vld [vmem:[#allocation4 + $0x18] sm:$0xff] }
 0x488   : > { %v1357_v21 = vpop.eup %1356  ;;  %v561_v23 = vpop.permute.xlu1 %560 }
 0x489   : > { %439 = vst.msk [vmem:[#allocation4 + $0x8] sm:$0xff] %vm251_vm0, %v437_v19  ;;  %1011 = vperm.xlu0 %1317, %v1357_v21   ;;  %v564_v40 = vmul.f32 %v561_v23, %v552_v53  ;;  %v912_v54 = vpop.permute.xlu0 %911  ;;  %v980_v19 = vld [vmem:[#allocation4] sm:$0xff] }
 0x48a   : > { %v1037_v31 = vld [vmem:[#allocation3 + $0x38] sm:$0xff]  ;;  %v919_v62 = vmul.f32 %v912_v54, %v907_v58 }
 0x48b   : > { %1364 = vrcp.f32 %v1037_v31 }
 0x48c   : > { %v1359_v27 = vpop.eup %1358 }
 0x48d   : > { %1024 = vperm.xlu1 %1316, %v1359_v27   ;;  %v917_v63 = vpop.permute.xlu0 %916 }
 0x48e   : > { %v920_v3 = vmul.f32 %v917_v63, %v908_v42 }
 0x490   : > { %v1361_v33 = vpop.eup %1360 }
 0x491   : > { %1029 = vperm.xlu0 %1317, %v1361_v33  }
 0x494   : > { %v1363_v0 = vpop.eup %1362  ;;  %v994_v1 = vpop.permute.xlu0 %993 }
 0x495   : > { %1042 = vperm.xlu1 %1316, %v1363_v0   ;;  %v981_v0 = vld [vmem:[#allocation4 + $0x8] sm:$0xff] }
 0x496   : > { %v997_v37 = vmul.f32 %v994_v1, %v981_v0 }
 0x498   : > { %v1365_v35 = vpop.eup %1364 }
 0x499   : > { %1047 = vperm.xlu0 %1317, %v1365_v35  }
 0x4ab   : > { %v608_v30 = vpop.f32.mrf.mxu0 }
 0x4ac   : > { %v615_v38 = vadd.f32 %v608_v30, %v563_v20 }
 0x4ad   : > { %v1259_v39 = vpop.f32.mrf.mxu0 }
 0x4ae   : > { %617 = vst.msk [vmem:[#allocation4 + $0x10] sm:$0xff] %vm251_vm0, %v615_v38 }
 0x4af   : > { %v611_v44 = vpop.f32.mrf.mxu0 }
 0x4b0   : > { %v616_v46 = vadd.f32 %v611_v44, %v564_v40 }
 0x4b1   : > { %v1260_v47 = vpop.f32.mrf.mxu0  ;;  %v989_v7 = vpop.permute.xlu1 %988 }
 0x4b2   : > { %618 = vst.msk [vmem:[#allocation4 + $0x18] sm:$0xff] %vm251_vm0, %v616_v46  ;;  %v996_v27 = vmul.f32 %v989_v7, %v980_v19 }
 0x4b3   : > { %v786_v50 = vpop.f32.mrf.mxu0 }
 0x4b4   : > { %v793_v52 = vadd.f32 %v786_v50, %v741_v48 }
 0x4b5   : > { %v1271_v55 = vpop.f32.mrf.mxu0  ;;  %v998_v10 = vld [vmem:[#allocation4 + $0x10] sm:$0xff] }
 0x4b6   : > { %795 = vst.msk [vmem:[#allocation4 + $0x20] sm:$0xff] %vm251_vm0, %v793_v52 }
 0x4b7   : > { %v789_v59 = vpop.f32.mrf.mxu0 }
 0x4b8   : > { %v794_v61 = vadd.f32 %v789_v59, %v742_v57 }
 0x4b9   : > { %v1272_v32 = vpop.f32.mrf.mxu0  ;;  %v999_v13 = vld [vmem:[#allocation4 + $0x18] sm:$0xff] }
 0x4ba   : > { %796 = vst.msk [vmem:[#allocation4 + $0x28] sm:$0xff] %vm251_vm0, %v794_v61 }
 0x4bb   : > { %v964_v41 = vpop.f32.mrf.mxu0 }
 0x4bc   : > { %v971_v2 = vadd.f32 %v964_v41, %v919_v62 }
 0x4bd   : > { %v1283_v56 = vpop.f32.mrf.mxu0  ;;  %v1016_v14 = vld [vmem:[#allocation4 + $0x20] sm:$0xff] }
 0x4be   : > { %973 = vst.msk [vmem:[#allocation4 + $0x30] sm:$0xff] %vm251_vm0, %v971_v2 }
 0x4bf   : > { %v967_v4 = vpop.f32.mrf.mxu0 }
 0x4c0   : > { %v972_v6 = vadd.f32 %v967_v4, %v920_v3 }
 0x4c1   : > { %v1284_v60 = vpop.f32.mrf.mxu0  ;;  %v1017_v22 = vld [vmem:[#allocation4 + $0x28] sm:$0xff] }
 0x4c2   : > { %974 = vst.msk [vmem:[#allocation4 + $0x38] sm:$0xff] %vm251_vm0, %v972_v6 }
 0x4c5   : > { %v1034_v26 = vld [vmem:[#allocation4 + $0x30] sm:$0xff] }
 0x4c9   : > { %v1035_v29 = vld [vmem:[#allocation4 + $0x38] sm:$0xff] }
 0x500   : > { %v1007_v8 = vpop.permute.xlu1 %1006 }
 0x501   : > { %v1014_v5 = vmul.f32 %v1007_v8, %v998_v10 }
 0x503   : > { %1054 = vrot.lane.b32.xlu1 %v1014_v5, %s1396_s23 }
 0x504   : > { %v1012_v11 = vpop.permute.xlu0 %1011 }
 0x505   : > { %v1015_v9 = vmul.f32 %v1012_v11, %v999_v13 }
 0x507   : > { %1056 = vrot.lane.b32.xlu0 %v1015_v9, %s1396_s23 }
 0x508   : > { %v1025_v15 = vpop.permute.xlu1 %1024 }
 0x509   : > { %v1032_v16 = vmul.f32 %v1025_v15, %v1016_v14 }
 0x50b   : > { %1062 = vrot.lane.b32.xlu1 %v1032_v16, %s1395_s22 }
 0x50c   : > { %v1030_v18 = vpop.permute.xlu0 %1029 }
 0x50d   : > { %v1033_v24 = vmul.f32 %v1030_v18, %v1017_v22 }
 0x50f   : > { %1064 = vrot.lane.b32.xlu0 %v1033_v24, %s1395_s22 }
 0x510   : > { %v1043_v25 = vpop.permute.xlu1 %1042 }
 0x511   : > { %v1050_v28 = vmul.f32 %v1043_v25, %v1034_v26 }
 0x513   : > { %1070 = vrot.lane.b32.xlu1 %v1050_v28, %s1394_s21 }
 0x514   : > { %v1048_v51 = vpop.permute.xlu0 %1047 }
 0x515   : > { %v1051_v12 = vmul.f32 %v1048_v51, %v1035_v29 }
 0x517   : > { %1072 = vrot.lane.b32.xlu0 %v1051_v12, %s1394_s21 }
 0x575   : > { %v1055_v17 = vpop.permute.xlu1 %1054 }
 0x576   : > { %v1076_v33 = vsel %vm251_vm0, %v996_v27, %v1055_v17 }
 0x579   : > { %v1057_v21 = vpop.permute.xlu0 %1056 }
 0x57a   : > { %v1077_v53 = vsel %vm251_vm0, %v997_v37, %v1057_v21 }
 0x57d   : > { %v1063_v31 = vpop.permute.xlu1 %1062 }
 0x57e   : > { %v1079_v35 = vsel %vm1078_vm5, %v1076_v33, %v1063_v31 }
 0x581   : > { %v1065_v36 = vpop.permute.xlu0 %1064 }
 0x582   : > { %v1080_v23 = vsel %vm1078_vm5, %v1077_v53, %v1065_v36 }
 0x585   : > { %v1071_v34 = vpop.permute.xlu1 %1070 }
 0x586   : > { %v1082_v20 = vsel %vm1081_vm6, %v1079_v35, %v1071_v34 }
 0x587   : > { %1084 = vst [vmem:[%s227_s26] sm:$0xff] %v1082_v20 }
 0x589   : > { %v1073_v30 = vpop.permute.xlu0 %1072 }
 0x58a   : > { %v1083_v38 = vsel %vm1081_vm6, %v1080_v23, %v1073_v30 }
 0x58b   : > { %1085 = vst [vmem:[%s227_s26 + $0x8] sm:$0xff] %v1083_v38 }
 0x58c PF: > { %s12_s11 = sadd.s32 1, %s1388_s11   ;;  %s1764_s9 = smov %s1384_s10 }
 0x58d   : > { %p9_p5 = scmp.ge.s32.totalorder %s12_s11, 4   ;;  %s1765_s10 = smov %s1767_s12 }
 0x58f   :  { %11 = sbr.rel (!%p9_p5) target bundleno = 2 (0x2), region = 78 }

// kernel: squeezeformer_encoder.49
= control target key start
LH: loop header
LB: loop body
LE: loop exit
PB: predicated region body
PF: predicated region fallthrough
CT: control target
= control target key end

     0   :  { %v377_v1 = vmov 0   ;;  %v67_v33 = vlaneseq  ;;  %s501_s1 = inlined_call_operand.vmem [shape: bf16[128,256], index: 1, kind: input, shape index: {}]   ;;  %s502_s0 = inlined_call_operand.vmem [shape: f32[32,128], index: 0, kind: input, shape index: {}]   ;;  %s503_s3 = inlined_call_operand.vmem [shape: f32[1,128], index: 3, kind: input, shape index: {}]   ;;  %s504_s4 = inlined_call_operand.vmem [shape: f32[1,128], index: 4, kind: input, shape index: {}]   ;;  %s505_s2 = inlined_call_operand.vmem [shape: f32[1,256], index: 2, kind: input, shape index: {}]   ;;  %s506_s5 = inlined_call_operand.vmem [shape: f32[32,256], index: 5, kind: output, shape index: {}]  }
   0x1   :  { %v321_v0 = vld [vmem:[%s501_s1 + $0x74] ss:$8 sps:$4 sm:$0xff]   ;;  %189 = vmatprep.mubr.bf16.mxu0 %v377_v1  ;;  %199 = vmatprep.mubr.bf16.mxu1 %v377_v1  ;;  %v323_v2 = vld [vmem:[%s501_s1 + $0x70] ss:$8 sps:$4 sm:$0xff]   ;;  %v324_v3 = vld [vmem:[%s501_s1 + $0x64] ss:$8 sps:$4 sm:$0xff]  }
   0x2   :  { %157 = vmatprep.subr.bf16.mxu0 %v321_v0  ;;  %304 = vmatprep.subr.bf16.mxu1 %v321_v0  ;;  %v326_v4 = vld [vmem:[%s501_s1 + $0x60] ss:$8 sps:$4 sm:$0xff]   ;;  %v327_v5 = vld [vmem:[%s501_s1 + $0x54] ss:$8 sps:$4 sm:$0xff]   ;;  %v329_v6 = vld [vmem:[%s501_s1 + $0x50] ss:$8 sps:$4 sm:$0xff]  }
   0x3   :  { %158 = vmatpush1.bf16.msra.mxu0 %v323_v2  ;;  %312 = vmatpush1.bf16.msra.mxu1 %v323_v2  ;;  %v330_v7 = vld [vmem:[%s501_s1 + $0x44] ss:$8 sps:$4 sm:$0xff]   ;;  %v332_v8 = vld [vmem:[%s501_s1 + $0x40] ss:$8 sps:$4 sm:$0xff]   ;;  %v333_v9 = vld [vmem:[%s501_s1 + $0x34] ss:$8 sps:$4 sm:$0xff]  }
   0x4   :  { %159 = vmatprep.subr.bf16.mxu0 %v324_v3  ;;  %305 = vmatprep.subr.bf16.mxu1 %v324_v3  ;;  %v335_v10 = vld [vmem:[%s501_s1 + $0x30] ss:$8 sps:$4 sm:$0xff]   ;;  %v336_v11 = vld [vmem:[%s501_s1 + $0x24] ss:$8 sps:$4 sm:$0xff]   ;;  %v338_v12 = vld [vmem:[%s501_s1 + $0x20] ss:$8 sps:$4 sm:$0xff]  }
   0x5   :  { %v21_v13 = vld [vmem:[%s502_s0] sm:$0xff]  ;;  %v22_v14 = vld [vmem:[%s502_s0 + $0x8] sm:$0xff]  ;;  %v23_v16 = vld [vmem:[%s502_s0 + $0x10] sm:$0xff]  ;;  %v68_v34 = vshrl.u32 %v67_v33, 7 }
   0x6   :  { %v278_v15 = vld [vmem:[%s503_s3] ss:$0 sm:$0xff]  ;;  %v24_v17 = vld [vmem:[%s502_s0 + $0x18] sm:$0xff]  ;;  %v342_v25 = vld [vmem:[%s501_s1 + $0x4] ss:$8 sps:$4 sm:$0xff]  }
   0x7   :  { %160 = vmatpush1.bf16.msra.mxu0 %v326_v4  ;;  %313 = vmatpush1.bf16.msra.mxu1 %v326_v4  ;;  %v339_v18 = vld [vmem:[%s501_s1 + $0x14] ss:$8 sps:$4 sm:$0xff]   ;;  %v32_v19 = vmul.f32 %v278_v15, %v21_v13  ;;  %v33_v20 = vmul.f32 %v278_v15, %v22_v14  ;;  %v34_v21 = vmul.f32 %v278_v15, %v23_v16  ;;  %v341_v23 = vld [vmem:[%s501_s1 + $0x10] ss:$8 sps:$4 sm:$0xff]   ;;  %v279_v24 = vld [vmem:[%s504_s4] ss:$0 sm:$0xff] }
   0x8   :  { %161 = vmatprep.subr.bf16.mxu0 %v327_v5  ;;  %306 = vmatprep.subr.bf16.mxu1 %v327_v5  ;;  %v35_v22 = vmul.f32 %v278_v15, %v24_v17  ;;  %v344_v30 = vld [vmem:[%s501_s1] ss:$8 sps:$4 sm:$0xff]   ;;  %v69_v35 = vsub.s32 0, %v68_v34  ;;  %v73_v37 = vsub.s32 1, %v68_v34 }
   0x9   :  { %v43_v26 = vadd.f32 %v279_v24, %v32_v19  ;;  %v44_v27 = vadd.f32 %v279_v24, %v33_v20  ;;  %v45_v28 = vadd.f32 %v279_v24, %v34_v21  ;;  %v65_v36 = vld [vmem:[%s505_s2] sm:$0x3] }
   0xa   :  { %v46_v29 = vadd.f32 %v279_v24, %v35_v22  ;;  %v70_v38 = vrot.slane %v65_v36, %v69_v35  ;;  %v74_v39 = vrot.slane %v65_v36, %v73_v37 }
   0xb   :  { %162 = vmatpush1.bf16.msra.mxu0 %v329_v6  ;;  %314 = vmatpush1.bf16.msra.mxu1 %v329_v6  ;;  %v47_v31 = vpack.c.bf16 %v44_v27, %v43_v26 }
   0xc   :  { %163 = vmatprep.subr.bf16.mxu0 %v330_v7  ;;  %307 = vmatprep.subr.bf16.mxu1 %v330_v7  ;;  %v48_v32 = vpack.c.bf16 %v46_v29, %v45_v28 }
   0xf   :  { %164 = vmatpush1.bf16.msra.mxu0 %v332_v8  ;;  %315 = vmatpush1.bf16.msra.mxu1 %v332_v8 }
  0x10   :  { %165 = vmatprep.subr.bf16.mxu0 %v333_v9  ;;  %308 = vmatprep.subr.bf16.mxu1 %v333_v9 }
  0x13   :  { %166 = vmatpush1.bf16.msra.mxu0 %v335_v10  ;;  %316 = vmatpush1.bf16.msra.mxu1 %v335_v10 }
  0x14   :  { %167 = vmatprep.subr.bf16.mxu0 %v336_v11  ;;  %309 = vmatprep.subr.bf16.mxu1 %v336_v11 }
  0x17   :  { %168 = vmatpush1.bf16.msra.mxu0 %v338_v12  ;;  %317 = vmatpush1.bf16.msra.mxu1 %v338_v12 }
  0x18   :  { %169 = vmatprep.subr.bf16.mxu0 %v339_v18  ;;  %310 = vmatprep.subr.bf16.mxu1 %v339_v18 }
  0x1b   :  { %170 = vmatpush1.bf16.msra.mxu0 %v341_v23  ;;  %318 = vmatpush1.bf16.msra.mxu1 %v341_v23 }
  0x1c   :  { %171 = vmatprep.subr.bf16.mxu0 %v342_v25  ;;  %311 = vmatprep.subr.bf16.mxu1 %v342_v25 }
  0x1f   :  { %172 = vmatpush1.bf16.msra.mxu0 %v344_v30  ;;  %319 = vmatpush1.bf16.msra.mxu1 %v344_v30 }
  0x22   :  { %190 = vmatmul.mubr.bf16.vlgmr.msra.gmra.mxu0 %v47_v31  ;;  %200 = vmatmul.mubr.bf16.vlgmr.msra.gmra.mxu1 %v48_v32 }
  0xe2   :  { %v191_v40 = vpop.f32.mrf.mxu0  ;;  %v201_v41 = vpop.f32.mrf.mxu1 }
  0xe3   :  { %v192_v42 = vadd.f32 %v191_v40, %v70_v38  ;;  %v202_v43 = vadd.f32 %v201_v41, %v70_v38 }
  0xe4   :  { %v193_v44 = vpop.f32.mrf.mxu0  ;;  %v203_v45 = vpop.f32.mrf.mxu1 }
  0xe5   :  { %v296_v46 = vmul.f32 -1.442695, %v192_v42  ;;  %v300_v47 = vmul.f32 -1.442695, %v202_v43  ;;  %v194_v48 = vadd.f32 %v193_v44, %v74_v39  ;;  %v204_v49 = vadd.f32 %v203_v45, %v74_v39 }
  0xe6   :  { %v195_v50 = vpop.f32.mrf.mxu0  ;;  %v205_v51 = vpop.f32.mrf.mxu1 }
  0xe7   :  { %345 = vpow2.f32 %v296_v46  ;;  %v297_v52 = vmul.f32 -1.442695, %v194_v48  ;;  %v301_v53 = vmul.f32 -1.442695, %v204_v49  ;;  %v196_v54 = vadd.f32 %v195_v50, %v70_v38 }
  0xe8   :  { %347 = vpow2.f32 %v300_v47  ;;  %v206_v55 = vadd.f32 %v205_v51, %v70_v38  ;;  %v197_v56 = vpop.f32.mrf.mxu0  ;;  %v207_v57 = vpop.f32.mrf.mxu1 }
  0xe9   :  { %349 = vpow2.f32 %v297_v52  ;;  %v298_v58 = vmul.f32 -1.442695, %v196_v54  ;;  %v198_v59 = vadd.f32 %v197_v56, %v74_v39  ;;  %v208_v60 = vadd.f32 %v207_v57, %v74_v39 }
  0xea   :  { %351 = vpow2.f32 %v301_v53  ;;  %v302_v61 = vmul.f32 -1.442695, %v206_v55 }
  0xeb   :  { %353 = vpow2.f32 %v298_v58  ;;  %v299_v62 = vmul.f32 -1.442695, %v198_v59  ;;  %v303_v63 = vmul.f32 -1.442695, %v208_v60 }
  0xec   :  { %355 = vpow2.f32 %v302_v61 }
  0xed   :  { %357 = vpow2.f32 %v299_v62 }
  0xee   :  { %359 = vpow2.f32 %v303_v63 }
  0xf4   :  { %v346_v0 = vpop.eup %345 }
  0xf5   :  { %v348_v1 = vpop.eup %347  ;;  %v234_v2 = vadd.f32 1.0, %v346_v0 }
  0xf6   :  { %v350_v3 = vpop.eup %349  ;;  %v238_v4 = vadd.f32 1.0, %v348_v1 }
  0xf7   :  { %v352_v5 = vpop.eup %351  ;;  %361 = vrcp.f32 %v234_v2  ;;  %v235_v6 = vadd.f32 1.0, %v350_v3 }
  0xf8   :  { %v354_v7 = vpop.eup %353  ;;  %363 = vrcp.f32 %v238_v4  ;;  %v239_v8 = vadd.f32 1.0, %v352_v5 }
  0xf9   :  { %v356_v9 = vpop.eup %355  ;;  %365 = vrcp.f32 %v235_v6  ;;  %v236_v10 = vadd.f32 1.0, %v354_v7 }
  0xfa   :  { %v358_v11 = vpop.eup %357  ;;  %367 = vrcp.f32 %v239_v8  ;;  %v240_v12 = vadd.f32 1.0, %v356_v9 }
  0xfb   :  { %v360_v13 = vpop.eup %359  ;;  %369 = vrcp.f32 %v236_v10  ;;  %v237_v14 = vadd.f32 1.0, %v358_v11 }
  0xfc   :  { %371 = vrcp.f32 %v240_v12  ;;  %v241_v15 = vadd.f32 1.0, %v360_v13 }
  0xfd   :  { %373 = vrcp.f32 %v237_v14 }
  0xfe   :  { %375 = vrcp.f32 %v241_v15 }
 0x104   :  { %v362_v16 = vpop.eup %361 }
 0x105   :  { %v364_v17 = vpop.eup %363  ;;  %v258_v18 = vmul.f32 %v362_v16, %v192_v42 }
 0x106   :  { %v366_v19 = vpop.eup %365  ;;  %v262_v20 = vmul.f32 %v364_v17, %v202_v43 }
 0x107   :  { %v368_v21 = vpop.eup %367  ;;  %266 = vst [vmem:[%s506_s5] sm:$0xff] %v258_v18  ;;  %v259_v22 = vmul.f32 %v366_v19, %v194_v48 }
 0x108   :  { %v370_v23 = vpop.eup %369  ;;  %270 = vst [vmem:[%s506_s5 + $0x20] sm:$0xff] %v262_v20  ;;  %v263_v24 = vmul.f32 %v368_v21, %v204_v49 }
 0x109   :  { %v372_v25 = vpop.eup %371  ;;  %267 = vst [vmem:[%s506_s5 + $0x8] sm:$0xff] %v259_v22  ;;  %v260_v26 = vmul.f32 %v370_v23, %v196_v54 }
 0x10a   :  { %v374_v27 = vpop.eup %373  ;;  %271 = vst [vmem:[%s506_s5 + $0x28] sm:$0xff] %v263_v24  ;;  %v264_v28 = vmul.f32 %v372_v25, %v206_v55 }
 0x10b   :  { %v376_v29 = vpop.eup %375  ;;  %268 = vst [vmem:[%s506_s5 + $0x10] sm:$0xff] %v260_v26  ;;  %v261_v30 = vmul.f32 %v374_v27, %v198_v59 }
 0x10c   :  { %272 = vst [vmem:[%s506_s5 + $0x30] sm:$0xff] %v264_v28  ;;  %v265_v31 = vmul.f32 %v376_v29, %v208_v60 }
 0x10d   :  { %269 = vst [vmem:[%s506_s5 + $0x18] sm:$0xff] %v261_v30 }
 0x10e   :  { %273 = vst [vmem:[%s506_s5 + $0x38] sm:$0xff] %v265_v31 }

// kernel: squeezeformer_encoder.50
= control target key start
LH: loop header
LB: loop body
LE: loop exit
PB: predicated region body
PF: predicated region fallthrough
CT: control target
= control target key end

     0   :  { %s955_s18 = smov 0   ;;  %s957_s19 = smov 0   ;;  %s1302_s0 = inlined_call_operand.vmem [shape: f32[2,22,256], index: 0, kind: input, shape index: {}]   ;;  %s1303_s1 = inlined_call_operand.vmem [shape: f32[7,256], index: 1, kind: input, shape index: {}]   ;;  %s1304_s2 = inlined_call_operand.vmem [shape: f32[1,256], index: 2, kind: input, shape index: {}]   ;;  %s1305_s3 = inlined_call_operand.vmem [shape: f32[1,256], index: 3, kind: input, shape index: {}]   ;;  %s1306_s4 = inlined_call_operand.vmem [shape: f32[1,256], index: 4, kind: input, shape index: {}]   ;;  %s1307_s5 = inlined_call_operand.vmem [shape: f32[2,16,256], index: 5, kind: output, shape index: {}]  }
   0x1   :  { %s959_s20 = smov 0  }
   0x2 LB: > { %s27_s21 = sadd.s32 1, %s919_s19  ;;  %p849_p0 = scmp.ge.s32.totalorder %s923_s20, 1  ;;  %s923_s20 = sphi %s959_s20, %s15_s20   ;;  %s919_s19 = sphi %s957_s19, %s1313_s19   ;;  %s915_s18 = sphi %s955_s18, %s1312_s18  }
   0x3   : > { %p29_p1 = scmp.ge.s32.totalorder %s27_s21, 2  ;;  %p249_p2 = scmp.lt.s32.totalorder %s923_s20, 3 }
   0x5   : > { %s1315_s21 = smov (%p29_p1, %s27_s21), 0  ;;  %p250_p3 = pnand %p849_p0, %p249_p2 }
   0x6   : > { %p303_p4 = scmp.lt.s32.totalorder (!%p250_p3), %s915_s18, 1 }
   0x7   : > { %253 = sbr.rel (%p250_p3) target bundleno = 105 (0x69), region = 40 }
   0xc   : > { %v349_v0 = vlaneseq  ;;  %s1317_s18 = smov (!%p303_p4, %s915_s18), 1  ;;  %v343_v2 = vld [vmem:[%s1303_s1] sm:$0x7f]  ;;  %vm389_vm0 = vcmask 1046528   ;;  %vm432_vm1 = vcmask 1045504   ;;  %vm475_vm2 = vcmask 1044480  }
   0xd   : > { %s860_s24 = smul.u32 48, %s1317_s18  ;;  %vm518_vm3 = vcmask 1043456   ;;  %vm561_vm4 = vcmask 1042432   ;;  %vm604_vm5 = vcmask 1041408   ;;  %v1052_v32 = vld [vmem:[%s1304_s2] sm:$0x3] }
   0xe   : > { %v975_v1 = vshrl.u32 %v349_v0, 7  ;;  %v1074_v46 = vld [vmem:[%s1305_s3] sm:$0x3]  ;;  %v344_v51 = vld [vmem:[%s1303_s1 + $0x8] sm:$0x7f]  ;;  %s859_s11 = sshll.u32 %s1317_s18, 5 }
   0xf   : > { %s995_s27 = scalar_lea.vmem %s1302_s0, %s860_s24  ;;  %s341_s14 = scalar_lea.vmem %s1307_s5, %s859_s11 }
  0x10   : > { %v982_v3 = vsub.s32 0, %v975_v1  ;;  %v985_v4 = vsub.s32 1, %v975_v1  ;;  %v414_v5 = vsub.s32 2, %v975_v1  ;;  %v457_v6 = vsub.s32 3, %v975_v1  ;;  %v345_v14 = vld [vmem:[%s995_s27] sm:$0xff]  ;;  %v1013_v15 = vld [vmem:[%s995_s27 + $0x10] sm:$0xff] }
  0x11   : > { %v500_v7 = vsub.s32 4, %v975_v1  ;;  %v543_v8 = vsub.s32 5, %v975_v1  ;;  %v586_v9 = vsub.s32 6, %v975_v1  ;;  %v365_v16 = vld [vmem:[%s995_s27] sm:$0xfe]  ;;  %v346_v60 = vld [vmem:[%s995_s27 + $0x8] sm:$0xff] }
  0x12   : > { %v998_v10 = vrot.slane %v343_v2, %v982_v3  ;;  %v1001_v11 = vrot.slane %v343_v2, %v985_v4  ;;  %v1005_v12 = vrot.slane %v343_v2, %v414_v5  ;;  %v1009_v13 = vrot.slane %v343_v2, %v457_v6  ;;  %v408_v23 = vld [vmem:[%s995_s27] sm:$0xfc]  ;;  %v1104_v61 = vld [vmem:[%s995_s27 + $0x18] sm:$0xff]  ;;  %v366_v62 = vld [vmem:[%s995_s27 + $0x8] sm:$0xfe] }
  0x13   : > { %v1018_v17 = vrot.slane %v343_v2, %v500_v7  ;;  %v1022_v18 = vrot.slane %v343_v2, %v543_v8  ;;  %v1026_v19 = vrot.slane %v343_v2, %v586_v9  ;;  %v451_v25 = vld [vmem:[%s995_s27] sm:$0xf8]  ;;  %v1082_v50 = vrot.slane %v1052_v32, %v982_v3 }
  0x14   : > { %v357_v20 = vmul.f32 %v998_v10, %v345_v14  ;;  %v377_v21 = vmul.f32 %v1001_v11, %v365_v16  ;;  %v1032_v22 = vmul.f32 %v1001_v11, %v1013_v15  ;;  %v1037_v24 = vmul.f32 %v1005_v12, %v1013_v15  ;;  %v494_v26 = vld [vmem:[%s995_s27] sm:$0xf0]  ;;  %v409_v16 = vld [vmem:[%s995_s27 + $0x8] sm:$0xfc] }
  0x15   : > { %v420_v27 = vmul.f32 %v1005_v12, %v408_v23  ;;  %v463_v28 = vmul.f32 %v1009_v13, %v451_v25  ;;  %v1045_v29 = vmul.f32 %v1009_v13, %v1013_v15  ;;  %v506_v30 = vmul.f32 %v1018_v17, %v494_v26  ;;  %v537_v31 = vld [vmem:[%s995_s27] sm:$0xe0]  ;;  %v495_v26 = vld [vmem:[%s995_s27 + $0x8] sm:$0xf0] }
  0x16   : > { %v390_v33 = vrot.slane %v377_v21, 1  ;;  %v391_v34 = vrot.slane %v1032_v22, 1  ;;  %v434_v35 = vrot.slane %v1037_v24, 2  ;;  %v1058_v36 = vmul.f32 %v1018_v17, %v1013_v15  ;;  %v580_v37 = vld [vmem:[%s995_s27] sm:$0xc0] }
  0x17   : > { %v433_v38 = vrot.slane %v420_v27, 2  ;;  %v476_v39 = vrot.slane %v463_v28, 3  ;;  %v477_v40 = vrot.slane %v1045_v29, 3  ;;  %v519_v41 = vrot.slane %v506_v30, 4 }
  0x18   : > { %v392_v42 = vsel %vm389_vm0, %v390_v33, %v391_v34  ;;  %v520_v43 = vrot.slane %v1058_v36, 4  ;;  %v549_v44 = vmul.f32 %v1022_v18, %v537_v31  ;;  %v1069_v45 = vmul.f32 %v1022_v18, %v1013_v15 }
  0x19   : > { %v404_v47 = vadd.f32 %v392_v42, %v357_v20  ;;  %v435_v48 = vsel %vm432_vm1, %v433_v38, %v434_v35  ;;  %v592_v49 = vmul.f32 %v1026_v19, %v580_v37  ;;  %v478_v52 = vsel %vm475_vm2, %v476_v39, %v477_v40  ;;  %v452_v20 = vld [vmem:[%s995_s27 + $0x8] sm:$0xf8] }
  0x1a   : > { %v562_v53 = vrot.slane %v549_v44, 5  ;;  %v563_v54 = vrot.slane %v1069_v45, 5  ;;  %v1093_v55 = vmul.f32 %v1026_v19, %v1013_v15  ;;  %v521_v57 = vsel %vm518_vm3, %v519_v41, %v520_v43 }
  0x1b   : > { %v447_v56 = vadd.f32 %v435_v48, %v404_v47  ;;  %v605_v58 = vrot.slane %v592_v49, 6  ;;  %v1100_v59 = vrot.slane %v1074_v46, %v982_v3  ;;  %v1112_v2 = vrot.slane %v344_v51, %v982_v3  ;;  %v655_v47 = vld [vmem:[%s1306_s4] sm:$0x3] }
  0x1c   : > { %v564_v63 = vsel %vm561_vm4, %v562_v53, %v563_v54  ;;  %v606_v0 = vrot.slane %v1093_v55, 6  ;;  %v1115_v14 = vrot.slane %v344_v51, %v985_v4  ;;  %v1121_v23 = vrot.slane %v344_v51, %v414_v5 }
  0x1d   : > { %v490_v21 = vadd.f32 %v478_v52, %v447_v56  ;;  %v1125_v25 = vrot.slane %v344_v51, %v457_v6  ;;  %v1130_v27 = vrot.slane %v344_v51, %v500_v7  ;;  %v358_v30 = vmul.f32 %v1112_v2, %v346_v60  ;;  %v538_v60 = vld [vmem:[%s995_s27 + $0x8] sm:$0xe0] }
  0x1e   : > { %v607_v28 = vsel %vm604_vm5, %v605_v58, %v606_v0  ;;  %v378_v31 = vmul.f32 %v1115_v14, %v366_v62  ;;  %v1139_v5 = vmul.f32 %v1115_v14, %v1104_v61  ;;  %v421_v6 = vmul.f32 %v1121_v23, %v409_v16 }
  0x1f   : > { %v533_v33 = vadd.f32 %v521_v57, %v490_v21  ;;  %v1144_v7 = vmul.f32 %v1121_v23, %v1104_v61  ;;  %v464_v37 = vmul.f32 %v1125_v25, %v452_v20  ;;  %v1150_v41 = vmul.f32 %v1125_v25, %v1104_v61  ;;  %v581_v21 = vld [vmem:[%s995_s27 + $0x8] sm:$0xc0] }
  0x20   : > { %v393_v38 = vrot.slane %v378_v31, 1  ;;  %v394_v39 = vrot.slane %v1139_v5, 1  ;;  %v507_v42 = vmul.f32 %v1130_v27, %v495_v26  ;;  %v436_v48 = vrot.slane %v421_v6, 2 }
  0x21   : > { %v576_v44 = vadd.f32 %v564_v63, %v533_v33  ;;  %v437_v49 = vrot.slane %v1144_v7, 2  ;;  %v479_v52 = vrot.slane %v464_v37, 3  ;;  %v480_v56 = vrot.slane %v1150_v41, 3 }
  0x22   : > { %v395_v53 = vsel %vm389_vm0, %v393_v38, %v394_v39  ;;  %v1163_v57 = vmul.f32 %v1130_v27, %v1104_v61  ;;  %v522_v58 = vrot.slane %v507_v42, 4  ;;  %v1171_v20 = vrot.slane %v344_v51, %v543_v8 }
  0x23   : > { %v619_v62 = vadd.f32 %v607_v28, %v576_v44  ;;  %v405_v63 = vadd.f32 %v395_v53, %v358_v30  ;;  %v438_v16 = vsel %vm432_vm1, %v436_v48, %v437_v49  ;;  %v1175_v26 = vrot.slane %v655_v47, %v982_v3  ;;  %v453_v53 = vld [vmem:[%s995_s27 + $0x20] sm:$0x7] }
  0x24   : > { %v481_v31 = vsel %vm475_vm2, %v479_v52, %v480_v56  ;;  %v1308_v28 = vrot.slane %v1163_v57, 4  ;;  %v1183_v30 = vrot.slane %v344_v51, %v586_v9  ;;  %v550_v6 = vmul.f32 %v1171_v20, %v538_v60  ;;  %v367_v9 = vld [vmem:[%s995_s27 + $0x20] sm:$0x1] }
  0x25   : > { %v635_v33 = vadd.f32 %v1082_v50, %v619_v62  ;;  %v448_v8 = vadd.f32 %v438_v16, %v405_v63  ;;  %v1189_v3 = vmul.f32 %v1171_v20, %v1104_v61  ;;  %v410_v51 = vld [vmem:[%s995_s27 + $0x20] sm:$0x3]  ;;  %v1208_v63 = vrot.slane %v1052_v32, %v985_v4 }
  0x26   : > { %v524_v37 = vsel %vm518_vm3, %v522_v58, %v1308_v28  ;;  %v593_v38 = vmul.f32 %v1183_v30, %v581_v21  ;;  %v1197_v1 = vmul.f32 %v1183_v30, %v1104_v61  ;;  %v565_v48 = vrot.slane %v550_v6, 5  ;;  %v496_v60 = vld [vmem:[%s995_s27 + $0x20] sm:$0xf] }
  0x27   : > { %v651_v42 = vmul.f32 %v1100_v59, %v635_v33  ;;  %v491_v44 = vadd.f32 %v481_v31, %v448_v8  ;;  %v566_v52 = vrot.slane %v1189_v3, 5  ;;  %v359_v16 = vmul.f32 %v998_v10, %v1013_v15  ;;  %v539_v21 = vld [vmem:[%s995_s27 + $0x20] sm:$0x1f] }
  0x28   : > { %v608_v62 = vrot.slane %v593_v38, 6  ;;  %v1309_v58 = vrot.slane %v1197_v1, 6  ;;  %v381_v8 = vmul.f32 %v1001_v11, %v367_v9  ;;  %v582_v6 = vld [vmem:[%s995_s27 + $0x20] sm:$0x3f]  ;;  %v424_v38 = vmul.f32 %v1005_v12, %v410_v51  ;;  %v368_v51 = vld [vmem:[%s995_s27 + $0x28] sm:$0x1] }
  0x29   : > { %v1214_v28 = vadd.f32 %v1175_v26, %v651_v42  ;;  %v534_v31 = vadd.f32 %v524_v37, %v491_v44  ;;  %v567_v33 = vsel %vm561_vm4, %v565_v48, %v566_v52  ;;  %v467_v10 = vmul.f32 %v1009_v13, %v453_v53  ;;  %v411_v53 = vld [vmem:[%s995_s27 + $0x28] sm:$0x3] }
  0x2a   : > { %v610_v32 = vsel %vm604_vm5, %v608_v62, %v1309_v58  ;;  %v510_v15 = vmul.f32 %v1018_v17, %v496_v60  ;;  %v396_v44 = vrot.slane %v381_v8, 1  ;;  %v553_v11 = vmul.f32 %v1022_v18, %v539_v21  ;;  %v454_v60 = vld [vmem:[%s995_s27 + $0x28] sm:$0x7] }
  0x2b   : > { %v853_v37 = vmul.f32 -1.442695, %v1214_v28  ;;  %v577_v42 = vadd.f32 %v567_v33, %v534_v31  ;;  %v439_v9 = vrot.slane %v424_v38, 2  ;;  %v482_v48 = vrot.slane %v467_v10, 3  ;;  %v497_v33 = vld [vmem:[%s995_s27 + $0x28] sm:$0xf] }
  0x2c   : > { %v525_v62 = vrot.slane %v510_v15, 4  ;;  %v596_v58 = vmul.f32 %v1026_v19, %v582_v6  ;;  %v648_v13 = vrot.slane %v1074_v46, %v985_v4  ;;  %v397_v17 = vsel %vm389_vm0, %v391_v34, %v396_v44  ;;  %v540_v8 = vld [vmem:[%s995_s27 + $0x28] sm:$0x1f] }
  0x2d   : > { %885 = vpow2.f32 %v853_v37  ;;  %v620_v12 = vadd.f32 %v610_v32, %v577_v42  ;;  %v664_v18 = vrot.slane %v655_v47, %v985_v4  ;;  %v406_v21 = vadd.f32 %v397_v17, %v359_v16  ;;  %v583_v38 = vld [vmem:[%s995_s27 + $0x28] sm:$0x3f] }
  0x2e   : > { %v440_v31 = vsel %vm432_vm1, %v434_v35, %v439_v9  ;;  %v568_v19 = vrot.slane %v553_v11, 5  ;;  %v483_v22 = vsel %vm475_vm2, %v477_v40, %v482_v48  ;;  %v526_v34 = vsel %vm518_vm3, %v520_v43, %v525_v62 }
  0x2f   : > { %v636_v46 = vadd.f32 %v1208_v63, %v620_v12  ;;  %v611_v4 = vrot.slane %v596_v58, 6  ;;  %v449_v47 = vadd.f32 %v440_v31, %v406_v21  ;;  %v382_v24 = vmul.f32 %v1115_v14, %v368_v51 }
  0x30   : > { %v425_v35 = vmul.f32 %v1121_v23, %v411_v53  ;;  %v468_v16 = vmul.f32 %v1125_v25, %v454_v60  ;;  %v360_v32 = vmul.f32 %v1112_v2, %v1104_v61  ;;  %v511_v29 = vmul.f32 %v1130_v27, %v497_v33 }
  0x31   : > { %v652_v6 = vmul.f32 %v648_v13, %v636_v46  ;;  %v554_v40 = vmul.f32 %v1171_v20, %v540_v8  ;;  %v492_v36 = vadd.f32 %v483_v22, %v449_v47  ;;  %v398_v10 = vrot.slane %v382_v24, 1 }
  0x32   : > { %v441_v43 = vrot.slane %v425_v35, 2  ;;  %v484_v58 = vrot.slane %v468_v16, 3  ;;  %v569_v14 = vsel %vm561_vm4, %v563_v54, %v568_v19  ;;  %v527_v23 = vrot.slane %v511_v29, 4 }
  0x33   : > { %v668_v15 = vadd.f32 %v664_v18, %v652_v6  ;;  %v535_v25 = vadd.f32 %v526_v34, %v492_v36  ;;  %v399_v61 = vsel %vm389_vm0, %v394_v39, %v398_v10  ;;  %v597_v27 = vmul.f32 %v1183_v30, %v583_v38 }
  0x34   : > { %v442_v2 = vsel %vm432_vm1, %v437_v49, %v441_v43  ;;  %v612_v37 = vsel %vm604_vm5, %v606_v0, %v611_v4  ;;  %v407_v45 = vadd.f32 %v399_v61, %v360_v32  ;;  %v485_v54 = vsel %vm475_vm2, %v480_v56, %v484_v58 }
  0x35   : > { %v854_v20 = vmul.f32 -1.442695, %v668_v15  ;;  %v578_v42 = vadd.f32 %v569_v14, %v535_v25  ;;  %v570_v5 = vrot.slane %v554_v40, 5  ;;  %v1310_v7 = vrot.slane %v1163_v57, 4 }
  0x36   : > { %v450_v39 = vadd.f32 %v442_v2, %v407_v45  ;;  %v613_v30 = vrot.slane %v597_v27, 6  ;;  %v1311_v62 = vrot.slane %v1197_v1, 6 }
  0x37   : > { %887 = vpow2.f32 %v854_v20  ;;  %v621_v44 = vadd.f32 %v612_v37, %v578_v42  ;;  %v528_v49 = vsel %vm518_vm3, %v1310_v7, %v527_v23  ;;  %v571_v0 = vsel %vm561_vm4, %v566_v52, %v570_v5 }
  0x38   : > { %v493_v11 = vadd.f32 %v485_v54, %v450_v39  ;;  %v614_v57 = vsel %vm604_vm5, %v1311_v62, %v613_v30 }
  0x39   : > { %v637_v55 = vadd.f32 %v1082_v50, %v621_v44 }
  0x3a   : > { %v886_v9 = vpop.eup %885  ;;  %v536_v56 = vadd.f32 %v528_v49, %v493_v11 }
  0x3b   : > { %v683_v41 = vadd.f32 1.0, %v886_v9  ;;  %v653_v48 = vmul.f32 %v1100_v59, %v637_v55 }
  0x3c   : > { %v579_v12 = vadd.f32 %v571_v0, %v536_v56 }
  0x3d   : > { %889 = vrcp.f32 %v683_v41  ;;  %v669_v17 = vadd.f32 %v1175_v26, %v653_v48 }
  0x3e   : > { %v622_v51 = vadd.f32 %v614_v57, %v579_v12 }
  0x3f   : > { %v855_v53 = vmul.f32 -1.442695, %v669_v17 }
  0x40   : > { %v638_v50 = vadd.f32 %v1208_v63, %v622_v51 }
  0x41   : > { %891 = vpow2.f32 %v855_v53 }
  0x42   : > { %v654_v3 = vmul.f32 %v648_v13, %v638_v50 }
  0x44   : > { %v888_v52 = vpop.eup %887  ;;  %v670_v21 = vadd.f32 %v664_v18, %v654_v3 }
  0x45   : > { %v684_v60 = vadd.f32 1.0, %v888_v52 }
  0x46   : > { %v856_v59 = vmul.f32 -1.442695, %v670_v21 }
  0x47   : > { %893 = vrcp.f32 %v684_v60 }
  0x48   : > { %895 = vpow2.f32 %v856_v59 }
  0x4a   : > { %v890_v1 = vpop.eup %889 }
  0x4b   : > { %v695_v26 = vmul.f32 %v890_v1, %v1214_v28 }
  0x4d   : > { %699 = vst [vmem:[%s341_s14] sm:$0xff] %v695_v26 }
  0x4e   : > { %v892_v31 = vpop.eup %891 }
  0x4f   : > { %v685_v19 = vadd.f32 1.0, %v892_v31 }
  0x51   : > { %897 = vrcp.f32 %v685_v19 }
  0x54   : > { %v894_v63 = vpop.eup %893 }
  0x55   : > { %v696_v13 = vmul.f32 %v894_v63, %v668_v15  ;;  %v896_v33 = vpop.eup %895 }
  0x56   : > { %v686_v18 = vadd.f32 1.0, %v896_v33 }
  0x57   : > { %700 = vst [vmem:[%s341_s14 + $0x8] sm:$0xff] %v696_v13 }
  0x58   : > { %899 = vrcp.f32 %v686_v18 }
  0x5e   : > { %v898_v8 = vpop.eup %897 }
  0x5f   : > { %v697_v46 = vmul.f32 %v898_v8, %v669_v17 }
  0x61   : > { %701 = vst [vmem:[%s341_s14 + $0x10] sm:$0xff] %v697_v46 }
  0x65   : > { %v900_v22 = vpop.eup %899 }
  0x66   : > { %v698_v34 = vmul.f32 %v900_v22, %v670_v21 }
  0x68   : > { %702 = vst [vmem:[%s341_s14 + $0x18] sm:$0xff] %v698_v34 }
  0x69 PF: > { %s15_s20 = sadd.s32 1, %s923_s20   ;;  %s1312_s18 = smov %s919_s19 }
  0x6a   : > { %p12_p5 = scmp.ge.s32.totalorder %s15_s20, 4   ;;  %s1313_s19 = smov %s1315_s21 }
  0x6c   :  { %14 = sbr.rel (!%p12_p5) target bundleno = 2 (0x2), region = 82 }

// kernel: squeezeformer_encoder.51
= control target key start
LH: loop header
LB: loop body
LE: loop exit
PB: predicated region body
PF: predicated region fallthrough
CT: control target
= control target key end

     0   :  { %s530_s1 = inlined_call_operand.vmem [shape: bf16[256,128], index: 1, kind: input, shape index: {}]   ;;  %s531_s0 = inlined_call_operand.vmem [shape: f32[32,256], index: 0, kind: input, shape index: {}]   ;;  %s532_s2 = inlined_call_operand.vmem [shape: f32[1,128], index: 2, kind: input, shape index: {}]   ;;  %s533_s3 = inlined_call_operand.vmem [shape: f32[32,128], index: 3, kind: input, shape index: {}]   ;;  %s534_s4 = inlined_call_operand.vmem [shape: f32[1,128], index: 4, kind: input, shape index: {}]   ;;  %s535_s5 = inlined_call_operand.vmem [shape: f32[1,128], index: 5, kind: input, shape index: {}]   ;;  %s536_s6 = inlined_call_operand.vmem [shape: f32[32,128], index: 6, kind: output, shape index: {}]  }
   0x1   :  { %v366_v0 = vld [vmem:[%s530_s1 + $0x78] sm:$0xff]   ;;  %v368_v2 = vld [vmem:[%s530_s1 + $0x70] sm:$0xff]   ;;  %v370_v4 = vld [vmem:[%s530_s1 + $0x68] sm:$0xff]  }
   0x2   :  { %v367_v1 = vld [vmem:[%s530_s1 + $0x38] sm:$0xff]   ;;  %322 = vmatprep.subr.bf16.mxu0 %v366_v0  ;;  %350 = vmatprep.subr.bf16.mxu1 %v366_v0  ;;  %v369_v3 = vld [vmem:[%s530_s1 + $0x30] sm:$0xff]   ;;  %v371_v5 = vld [vmem:[%s530_s1 + $0x28] sm:$0xff]  }
   0x3   :  { %323 = vmatpush3.bf16.msra.mxu0 %v367_v1  ;;  %358 = vmatpush3.bf16.msra.mxu1 %v367_v1  ;;  %v372_v6 = vld [vmem:[%s530_s1 + $0x60] sm:$0xff]   ;;  %v374_v8 = vld [vmem:[%s530_s1 + $0x58] sm:$0xff]   ;;  %v376_v10 = vld [vmem:[%s530_s1 + $0x50] sm:$0xff]  }
   0x4   :  { %324 = vmatprep.subr.bf16.mxu0 %v368_v2  ;;  %351 = vmatprep.subr.bf16.mxu1 %v368_v2  ;;  %v373_v7 = vld [vmem:[%s530_s1 + $0x20] sm:$0xff]   ;;  %v375_v9 = vld [vmem:[%s530_s1 + $0x18] sm:$0xff]   ;;  %v25_v11 = vld [vmem:[%s531_s0 + $0x8] sm:$0xff] }
   0x5   :  { %v27_v12 = vld [vmem:[%s531_s0 + $0x18] sm:$0xff]  ;;  %v29_v13 = vld [vmem:[%s531_s0 + $0x28] sm:$0xff]  ;;  %v377_v17 = vld [vmem:[%s530_s1 + $0x10] sm:$0xff]  }
   0x6   :  { %v33_v14 = vpack.c.bf16 %v27_v12, %v25_v11  ;;  %v31_v15 = vld [vmem:[%s531_s0 + $0x38] sm:$0xff]  ;;  %v378_v18 = vld [vmem:[%s530_s1 + $0x48] sm:$0xff]   ;;  %v380_v20 = vld [vmem:[%s530_s1 + $0x40] sm:$0xff]  }
   0x7   :  { %325 = vmatpush3.bf16.msra.mxu0 %v369_v3  ;;  %359 = vmatpush3.bf16.msra.mxu1 %v369_v3  ;;  %v35_v16 = vpack.c.bf16 %v31_v15, %v29_v13  ;;  %v379_v19 = vld [vmem:[%s530_s1 + $0x8] sm:$0xff]   ;;  %v381_v21 = vld [vmem:[%s530_s1] sm:$0xff]   ;;  %v26_v23 = vld [vmem:[%s531_s0 + $0x10] sm:$0xff] }
   0x8   :  { %326 = vmatprep.subr.bf16.mxu0 %v370_v4  ;;  %352 = vmatprep.subr.bf16.mxu1 %v370_v4  ;;  %v24_v22 = vld [vmem:[%s531_s0] sm:$0xff]  ;;  %v30_v25 = vld [vmem:[%s531_s0 + $0x30] sm:$0xff]  ;;  %v223_v47 = vld [vmem:[%s533_s3 + $0x18] sm:$0xff] }
   0x9   :  { %203 = vmatprep.mubr.bf16.mxu0 %v33_v14  ;;  %211 = vmatprep.mubr.bf16.mxu1 %v35_v16  ;;  %v28_v24 = vld [vmem:[%s531_s0 + $0x20] sm:$0xff]  ;;  %v32_v26 = vpack.c.bf16 %v26_v23, %v24_v22  ;;  %v222_v37 = vld [vmem:[%s533_s3 + $0x10] sm:$0xff]  ;;  %v221_v48 = vld [vmem:[%s533_s3 + $0x8] sm:$0xff] }
   0xa   :  { %v34_v27 = vpack.c.bf16 %v30_v25, %v28_v24  ;;  %v303_v30 = vld [vmem:[%s532_s2] ss:$0 sm:$0xff] }
   0xb   :  { %327 = vmatpush3.bf16.msra.mxu0 %v371_v5  ;;  %360 = vmatpush3.bf16.msra.mxu1 %v371_v5  ;;  %v220_v38 = vld [vmem:[%s533_s3] sm:$0xff] }
   0xc   :  { %328 = vmatprep.subr.bf16.mxu0 %v372_v6  ;;  %353 = vmatprep.subr.bf16.mxu1 %v372_v6 }
   0xf   :  { %329 = vmatpush3.bf16.msra.mxu0 %v373_v7  ;;  %361 = vmatpush3.bf16.msra.mxu1 %v373_v7 }
  0x10   :  { %330 = vmatprep.subr.bf16.mxu0 %v374_v8  ;;  %354 = vmatprep.subr.bf16.mxu1 %v374_v8 }
  0x13   :  { %331 = vmatpush3.bf16.msra.mxu0 %v375_v9  ;;  %362 = vmatpush3.bf16.msra.mxu1 %v375_v9 }
  0x14   :  { %332 = vmatprep.subr.bf16.mxu0 %v376_v10  ;;  %355 = vmatprep.subr.bf16.mxu1 %v376_v10 }
  0x17   :  { %333 = vmatpush3.bf16.msra.mxu0 %v377_v17  ;;  %363 = vmatpush3.bf16.msra.mxu1 %v377_v17 }
  0x18   :  { %334 = vmatprep.subr.bf16.mxu0 %v378_v18  ;;  %356 = vmatprep.subr.bf16.mxu1 %v378_v18  ;;  %v320_v18 = vld [vmem:[%s534_s4] ss:$0 sm:$0xff] }
  0x1b   :  { %335 = vmatpush3.bf16.msra.mxu0 %v379_v19  ;;  %364 = vmatpush3.bf16.msra.mxu1 %v379_v19 }
  0x1c   :  { %336 = vmatprep.subr.bf16.mxu0 %v380_v20  ;;  %357 = vmatprep.subr.bf16.mxu1 %v380_v20  ;;  %v321_v20 = vld [vmem:[%s535_s5] ss:$0 sm:$0xff] }
  0x1f   :  { %337 = vmatpush3.bf16.msra.mxu0 %v381_v21  ;;  %365 = vmatpush3.bf16.msra.mxu1 %v381_v21 }
  0x22   :  { %204 = vmatmul.mubr.bf16.vlgmr.msra.gmra.mxu0 %v32_v26  ;;  %212 = vmatmul.mubr.bf16.vlgmr.msra.gmra.mxu1 %v34_v27 }
  0xe2   :  { %v338_v28 = vpop.f32.mrf.mxu0  ;;  %v344_v29 = vpop.f32.mrf.mxu1 }
  0xe4   :  { %v339_v31 = vpop.f32.mrf.mxu0  ;;  %v345_v32 = vpop.f32.mrf.mxu1 }
  0xe5   :  { %v340_v33 = vadd.f32 %v339_v31, %v338_v28  ;;  %v346_v34 = vadd.f32 %v345_v32, %v344_v29 }
  0xe6   :  { %v341_v35 = vpop.f32.mrf.mxu0  ;;  %v347_v36 = vpop.f32.mrf.mxu1 }
  0xe7   :  { %v206_v39 = vadd.f32 %v340_v33, %v303_v30  ;;  %v214_v40 = vadd.f32 %v346_v34, %v303_v30 }
  0xe8   :  { %v342_v41 = vpop.f32.mrf.mxu0  ;;  %v348_v42 = vpop.f32.mrf.mxu1 }
  0xe9   :  { %v343_v43 = vadd.f32 %v342_v41, %v341_v35  ;;  %v349_v44 = vadd.f32 %v348_v42, %v347_v36  ;;  %v226_v45 = vadd.f32 %v222_v37, %v214_v40  ;;  %v224_v46 = vadd.f32 %v220_v38, %v206_v39 }
  0xeb   :  { %v209_v49 = vadd.f32 %v343_v43, %v303_v30  ;;  %v217_v50 = vadd.f32 %v349_v44, %v303_v30  ;;  %232 = vadd.xlane.f32.xlu1 %v226_v45  ;;  %228 = vadd.xlane.f32.xlu0 %v224_v46 }
  0xed   :  { %v227_v51 = vadd.f32 %v223_v47, %v217_v50  ;;  %v225_v52 = vadd.f32 %v221_v48, %v209_v49 }
  0xef   :  { %234 = vadd.xlane.f32.xlu1 %v227_v51  ;;  %230 = vadd.xlane.f32.xlu0 %v225_v52 }
 0x174   :  { %v233_v53 = vpop.xlane.xlu1 %232  ;;  %v229_v54 = vpop.xlane.xlu0 %228 }
 0x175   :  { %v239_v55 = vmul.f32 0.0078125, %v233_v53  ;;  %v237_v56 = vmul.f32 0.0078125, %v229_v54 }
 0x177   :  { %v241_v57 = vsub.f32 %v224_v46, %v237_v56  ;;  %v243_v60 = vsub.f32 %v226_v45, %v239_v55 }
 0x178   :  { %v235_v58 = vpop.xlane.xlu1 %234  ;;  %v231_v59 = vpop.xlane.xlu0 %230 }
 0x179   :  { %v240_v61 = vmul.f32 0.0078125, %v235_v58  ;;  %v238_v62 = vmul.f32 0.0078125, %v231_v59  ;;  %v245_v63 = vmul.f32 %v241_v57, %v241_v57  ;;  %v247_v2 = vmul.f32 %v243_v60, %v243_v60 }
 0x17b   :  { %v242_v0 = vsub.f32 %v225_v52, %v238_v62  ;;  %249 = vadd.xlane.f32.xlu0 %v245_v63  ;;  %v244_v1 = vsub.f32 %v227_v51, %v240_v61 }
 0x17d   :  { %v246_v3 = vmul.f32 %v242_v0, %v242_v0  ;;  %v248_v4 = vmul.f32 %v244_v1, %v244_v1 }
 0x17f   :  { %253 = vadd.xlane.f32.xlu0 %v247_v2  ;;  %251 = vadd.xlane.f32.xlu1 %v246_v3 }
 0x183   :  { %255 = vadd.xlane.f32.xlu1 %v248_v4 }
 0x204   :  { %v250_v5 = vpop.xlane.xlu0 %249 }
 0x205   :  { %v257_v6 = vmul.f32 0.0078125, %v250_v5 }
 0x207   :  { %v261_v7 = vadd.f32 1e-05, %v257_v6 }
 0x208   :  { %v252_v8 = vpop.xlane.xlu1 %251  ;;  %v254_v9 = vpop.xlane.xlu0 %253 }
 0x209   :  { %382 = vrsqrt.f32 %v261_v7  ;;  %v258_v10 = vmul.f32 0.0078125, %v252_v8  ;;  %v259_v11 = vmul.f32 0.0078125, %v254_v9 }
 0x20b   :  { %v262_v12 = vadd.f32 1e-05, %v258_v10  ;;  %v263_v13 = vadd.f32 1e-05, %v259_v11 }
 0x20c   :  { %v256_v14 = vpop.xlane.xlu1 %255 }
 0x20d   :  { %384 = vrsqrt.f32 %v262_v12  ;;  %v260_v15 = vmul.f32 0.0078125, %v256_v14 }
 0x20e   :  { %386 = vrsqrt.f32 %v263_v13 }
 0x20f   :  { %v264_v16 = vadd.f32 1e-05, %v260_v15 }
 0x211   :  { %388 = vrsqrt.f32 %v264_v16 }
 0x216   :  { %v383_v17 = vpop.eup %382 }
 0x217   :  { %v269_v19 = vmul.f32 %v383_v17, %v241_v57 }
 0x219   :  { %v280_v21 = vmul.f32 %v320_v18, %v269_v19 }
 0x21a   :  { %v385_v22 = vpop.eup %384 }
 0x21b   :  { %v387_v23 = vpop.eup %386  ;;  %v291_v24 = vadd.f32 %v321_v20, %v280_v21  ;;  %v270_v25 = vmul.f32 %v385_v22, %v242_v0 }
 0x21c   :  { %v271_v26 = vmul.f32 %v387_v23, %v243_v60 }
 0x21d   :  { %295 = vst [vmem:[%s536_s6] sm:$0xff] %v291_v24  ;;  %v281_v27 = vmul.f32 %v320_v18, %v270_v25 }
 0x21e   :  { %v389_v28 = vpop.eup %388  ;;  %v282_v29 = vmul.f32 %v320_v18, %v271_v26 }
 0x21f   :  { %v292_v30 = vadd.f32 %v321_v20, %v281_v27  ;;  %v272_v31 = vmul.f32 %v389_v28, %v244_v1 }
 0x220   :  { %v293_v32 = vadd.f32 %v321_v20, %v282_v29 }
 0x221   :  { %296 = vst [vmem:[%s536_s6 + $0x8] sm:$0xff] %v292_v30  ;;  %v283_v33 = vmul.f32 %v320_v18, %v272_v31 }
 0x222   :  { %297 = vst [vmem:[%s536_s6 + $0x10] sm:$0xff] %v293_v32 }
 0x223   :  { %v294_v34 = vadd.f32 %v321_v20, %v283_v33 }
 0x225   :  { %298 = vst [vmem:[%s536_s6 + $0x18] sm:$0xff] %v294_v34 }

// kernel: squeezeformer_encoder.53
= control target key start
LH: loop header
LB: loop body
LE: loop exit
PB: predicated region body
PF: predicated region fallthrough
CT: control target
= control target key end

     0   :  { %s867_s0 = inlined_call_operand.vmem [shape: f32[32,512], index: 0, kind: input, shape index: {}]   ;;  %s868_s1 = inlined_call_operand.vmem [shape: bf16[512,128], index: 1, kind: input, shape index: {}]   ;;  %s869_s2 = inlined_call_operand.vmem [shape: f32[1,128], index: 2, kind: input, shape index: {}]   ;;  %s870_s3 = inlined_call_operand.vmem [shape: f32[32,128], index: 3, kind: input, shape index: {}]   ;;  %s871_s4 = inlined_call_operand.vmem [shape: f32[1,128], index: 4, kind: input, shape index: {}]   ;;  %s872_s5 = inlined_call_operand.vmem [shape: f32[1,128], index: 5, kind: input, shape index: {}]   ;;  %s873_s6 = inlined_call_operand.hbm [shape: f32[32,128], index: 6, kind: output, shape index: {}]  }
   0x1   :  { %v599_v0 = vld [vmem:[%s868_s1 + $0x78] sm:$0xff]   ;;  %v603_v4 = vld [vmem:[%s868_s1 + $0x70] sm:$0xff]   ;;  %v607_v8 = vld [vmem:[%s868_s1 + $0x68] sm:$0xff]  }
   0x2   :  { %v600_v1 = vld [vmem:[%s868_s1 + $0xf8] sm:$0xff]   ;;  %540 = vmatprep.subr.bf16.mxu0 %v599_v0  ;;  %v604_v5 = vld [vmem:[%s868_s1 + $0xf0] sm:$0xff]   ;;  %v608_v9 = vld [vmem:[%s868_s1 + $0xe8] sm:$0xff]  }
   0x3   :  { %v601_v2 = vld [vmem:[%s868_s1 + $0x38] sm:$0xff]   ;;  %568 = vmatprep.subr.bf16.mxu1 %v600_v1  ;;  %v605_v6 = vld [vmem:[%s868_s1 + $0x30] sm:$0xff]   ;;  %v609_v10 = vld [vmem:[%s868_s1 + $0x28] sm:$0xff]  }
   0x4   :  { %v602_v3 = vld [vmem:[%s868_s1 + $0xb8] sm:$0xff]   ;;  %541 = vmatpush3.bf16.msra.mxu0 %v601_v2  ;;  %v606_v7 = vld [vmem:[%s868_s1 + $0xb0] sm:$0xff]   ;;  %v610_v11 = vld [vmem:[%s868_s1 + $0xa8] sm:$0xff]  }
   0x5   :  { %569 = vmatpush3.bf16.msra.mxu1 %v602_v3  ;;  %542 = vmatprep.subr.bf16.mxu0 %v603_v4  ;;  %v611_v12 = vld [vmem:[%s868_s1 + $0x60] sm:$0xff]   ;;  %v615_v16 = vld [vmem:[%s868_s1 + $0x58] sm:$0xff]   ;;  %v619_v20 = vld [vmem:[%s868_s1 + $0x50] sm:$0xff]  }
   0x6   :  { %570 = vmatprep.subr.bf16.mxu1 %v604_v5  ;;  %v612_v13 = vld [vmem:[%s868_s1 + $0xe0] sm:$0xff]   ;;  %v616_v17 = vld [vmem:[%s868_s1 + $0xd8] sm:$0xff]   ;;  %v620_v21 = vld [vmem:[%s868_s1 + $0xd0] sm:$0xff]  }
   0x7   :  { %v613_v14 = vld [vmem:[%s868_s1 + $0x20] sm:$0xff]   ;;  %v617_v18 = vld [vmem:[%s868_s1 + $0x18] sm:$0xff]   ;;  %v621_v22 = vld [vmem:[%s868_s1 + $0x10] sm:$0xff]  }
   0x8   :  { %543 = vmatpush3.bf16.msra.mxu0 %v605_v6  ;;  %v614_v15 = vld [vmem:[%s868_s1 + $0xa0] sm:$0xff]   ;;  %v618_v19 = vld [vmem:[%s868_s1 + $0x98] sm:$0xff]   ;;  %v622_v23 = vld [vmem:[%s868_s1 + $0x90] sm:$0xff]  }
   0x9   :  { %571 = vmatpush3.bf16.msra.mxu1 %v606_v7  ;;  %544 = vmatprep.subr.bf16.mxu0 %v607_v8  ;;  %v623_v24 = vld [vmem:[%s868_s1 + $0x48] sm:$0xff]   ;;  %v627_v28 = vld [vmem:[%s868_s1 + $0x40] sm:$0xff]   ;;  %v28_v34 = vld [vmem:[%s867_s0 + $0x18] sm:$0xff] }
   0xa   :  { %572 = vmatprep.subr.bf16.mxu1 %v608_v9  ;;  %v624_v25 = vld [vmem:[%s868_s1 + $0xc8] sm:$0xff]   ;;  %v628_v29 = vld [vmem:[%s868_s1 + $0xc0] sm:$0xff]   ;;  %v32_v36 = vld [vmem:[%s867_s0 + $0x38] sm:$0xff] }
   0xb   :  { %v625_v26 = vld [vmem:[%s868_s1 + $0x8] sm:$0xff]   ;;  %v629_v30 = vld [vmem:[%s868_s1] sm:$0xff]   ;;  %v44_v39 = vpack.c.bf16 %v32_v36, %v28_v34  ;;  %v27_v41 = vld [vmem:[%s867_s0 + $0x10] sm:$0xff] }
   0xc   :  { %545 = vmatpush3.bf16.msra.mxu0 %v609_v10  ;;  %v626_v27 = vld [vmem:[%s868_s1 + $0x88] sm:$0xff]   ;;  %v630_v31 = vld [vmem:[%s868_s1 + $0x80] sm:$0xff]   ;;  %v31_v42 = vld [vmem:[%s867_s0 + $0x30] sm:$0xff] }
   0xd   :  { %573 = vmatpush3.bf16.msra.mxu1 %v610_v11  ;;  %546 = vmatprep.subr.bf16.mxu0 %v611_v12  ;;  %v26_v32 = vld [vmem:[%s867_s0 + $0x8] sm:$0xff]  ;;  %v25_v37 = vld [vmem:[%s867_s0] sm:$0xff]  ;;  %v43_v44 = vpack.c.bf16 %v31_v42, %v27_v41  ;;  %v36_v46 = vld [vmem:[%s867_s0 + $0x58] sm:$0xff] }
   0xe   :  { %574 = vmatprep.subr.bf16.mxu1 %v612_v13  ;;  %v30_v33 = vld [vmem:[%s867_s0 + $0x28] sm:$0xff]  ;;  %v29_v38 = vld [vmem:[%s867_s0 + $0x20] sm:$0xff]  ;;  %v40_v47 = vld [vmem:[%s867_s0 + $0x78] sm:$0xff]  ;;  %393 = vmatprep.mubr.bf16.mxu1 %v44_v39 }
   0xf   :  { %v42_v35 = vpack.c.bf16 %v30_v33, %v26_v32  ;;  %v41_v40 = vpack.c.bf16 %v29_v38, %v25_v37  ;;  %v34_v43 = vld [vmem:[%s867_s0 + $0x48] sm:$0xff]  ;;  %v48_v49 = vpack.c.bf16 %v40_v47, %v36_v46  ;;  %v33_v50 = vld [vmem:[%s867_s0 + $0x40] sm:$0xff] }
  0x10   :  { %547 = vmatpush3.bf16.msra.mxu0 %v613_v14  ;;  %v38_v45 = vld [vmem:[%s867_s0 + $0x68] sm:$0xff]  ;;  %v37_v51 = vld [vmem:[%s867_s0 + $0x60] sm:$0xff] }
  0x11   :  { %575 = vmatpush3.bf16.msra.mxu1 %v614_v15  ;;  %548 = vmatprep.subr.bf16.mxu0 %v615_v16  ;;  %v46_v48 = vpack.c.bf16 %v38_v45, %v34_v43 }
  0x12   :  { %576 = vmatprep.subr.bf16.mxu1 %v616_v17  ;;  %344 = vmatprep.mubr.bf16.mxu0 %v42_v35 }
  0x14   :  { %549 = vmatpush3.bf16.msra.mxu0 %v617_v18 }
  0x15   :  { %577 = vmatpush3.bf16.msra.mxu1 %v618_v19  ;;  %550 = vmatprep.subr.bf16.mxu0 %v619_v20 }
  0x16   :  { %578 = vmatprep.subr.bf16.mxu1 %v620_v21 }
  0x18   :  { %551 = vmatpush3.bf16.msra.mxu0 %v621_v22 }
  0x19   :  { %579 = vmatpush3.bf16.msra.mxu1 %v622_v23  ;;  %552 = vmatprep.subr.bf16.mxu0 %v623_v24 }
  0x1a   :  { %580 = vmatprep.subr.bf16.mxu1 %v624_v25 }
  0x1c   :  { %553 = vmatpush3.bf16.msra.mxu0 %v625_v26 }
  0x1d   :  { %581 = vmatpush3.bf16.msra.mxu1 %v626_v27  ;;  %554 = vmatprep.subr.bf16.mxu0 %v627_v28 }
  0x1e   :  { %582 = vmatprep.subr.bf16.mxu1 %v628_v29 }
  0x20   :  { %555 = vmatpush3.bf16.msra.mxu0 %v629_v30 }
  0x21   :  { %583 = vmatpush3.bf16.msra.mxu1 %v630_v31 }
  0x23   :  { %345 = vmatmul.mubr.bf16.vlgmr.msra.gmra.mxu0 %v41_v40 }
  0x24   :  { %394 = vmatmul.mubr.bf16.vlgmr.msra.gmra.mxu1 %v43_v44 }
  0x25   :  { %11 = vsyncpa [#allocation3], 0  ;;  %352 = vmatprep.mubr.bf16.mxu0 %v46_v48  ;;  %401 = vmatprep.mubr.bf16.mxu1 %v48_v49  ;;  %v35_v52 = vld [vmem:[%s867_s0 + $0x50] sm:$0xff]  ;;  %v45_v54 = vpack.c.bf16 %v37_v51, %v33_v50  ;;  %v505_v58 = vld [vmem:[%s869_s2] ss:$0 sm:$0xff] }
  0x26   :  { %v39_v53 = vld [vmem:[%s867_s0 + $0x70] sm:$0xff]  ;;  %v410_v3 = vld [vmem:[%s870_s3] sm:$0xff]  ;;  %v411_v13 = vld [vmem:[%s870_s3 + $0x8] sm:$0xff] }
  0x27   :  { %v47_v55 = vpack.c.bf16 %v39_v53, %v35_v52  ;;  %v412_v23 = vld [vmem:[%s870_s3 + $0x10] sm:$0xff]  ;;  %v413_v30 = vld [vmem:[%s870_s3 + $0x18] sm:$0xff] }
  0x2b   :  { %353 = vmatmul.mubr.bf16.gmra.mxu0 %v45_v54 }
  0x2c   :  { %402 = vmatmul.mubr.bf16.gmra.mxu1 %v47_v55 }
  0xe3   :  { %v556_v56 = vpop.f32.mrf.mxu0 }
  0xe4   :  { %v584_v57 = vpop.f32.mrf.mxu1 }
  0xe5   :  { %v557_v59 = vpop.f32.mrf.mxu0 }
  0xe6   :  { %v558_v60 = vadd.f32 %v557_v59, %v556_v56  ;;  %v585_v61 = vpop.f32.mrf.mxu1 }
  0xe7   :  { %v559_v62 = vpop.f32.mrf.mxu0  ;;  %v586_v0 = vadd.f32 %v585_v61, %v584_v57 }
  0xe8   :  { %v347_v63 = vadd.f32 %v558_v60, %v505_v58  ;;  %v587_v1 = vpop.f32.mrf.mxu1 }
  0xe9   :  { %v560_v2 = vpop.f32.mrf.mxu0 }
  0xea   :  { %v396_v4 = vadd.f32 %v586_v0, %v347_v63  ;;  %v561_v5 = vadd.f32 %v560_v2, %v559_v62  ;;  %v588_v6 = vpop.f32.mrf.mxu1  ;;  %v538_v62 = vld [vmem:[%s871_s4] ss:$0 sm:$0xff]  ;;  %s661_s4 = smov [#allocation2]  }
  0xeb   :  { %v562_v7 = vpop.f32.mrf.mxu0  ;;  %v589_v9 = vadd.f32 %v588_v6, %v587_v1  ;;  %v539_v0 = vld [vmem:[%s872_s5] ss:$0 sm:$0xff]  ;;  %s494_s30 = sshll.u32 %s661_s4, 4  ;;  %s495_s30 = int_to_ptr.vmem [resolvable:$true] %s494_s30 }
  0xec   :  { %v350_v8 = vadd.f32 %v561_v5, %v505_v58  ;;  %v590_v10 = vpop.f32.mrf.mxu1  ;;  %v414_v11 = vadd.f32 %v410_v3, %v396_v4  ;;  %s639_s5 = scalar_lea.vmem %s495_s30, 512  ;;  %p644_p1 = scmp.lt.s32.totalorder %s495_s30, %s495_s30 }
  0xed   :  { %v563_v12 = vpop.f32.mrf.mxu0  ;;  %p640_p0 = scmp.ne.s32.totalorder %s495_s30, %s639_s5  ;;  %p645_p2 = scmp.lt.s32.totalorder %s639_s5, %s639_s5 }
  0xee   :  { %v399_v14 = vadd.f32 %v589_v9, %v350_v8  ;;  %v564_v15 = vadd.f32 %v563_v12, %v562_v7  ;;  %v591_v16 = vpop.f32.mrf.mxu1  ;;  %418 = vadd.xlane.f32.xlu0 %v414_v11 }
  0xef   :  { %v565_v17 = vpop.f32.mrf.mxu0  ;;  %v592_v19 = vadd.f32 %v591_v16, %v590_v10  ;;  %p646_p3 = por %p645_p2, %p644_p1 }
  0xf0   :  { %v355_v18 = vadd.f32 %v564_v15, %v505_v58  ;;  %v593_v20 = vpop.f32.mrf.mxu1  ;;  %v415_v21 = vadd.f32 %v411_v13, %v399_v14 }
  0xf1   :  { %v566_v22 = vpop.f32.mrf.mxu0  ;;  %p647_p4 = pnand %p646_p3, %p640_p0 }
  0xf2   :  { %v404_v24 = vadd.f32 %v592_v19, %v355_v18  ;;  %v567_v25 = vadd.f32 %v566_v22, %v565_v17  ;;  %v594_v26 = vpop.f32.mrf.mxu1  ;;  %420 = vadd.xlane.f32.xlu0 %v415_v21 }
  0xf3   :  { %v595_v28 = vadd.f32 %v594_v26, %v593_v20 }
  0xf4   :  { %v358_v27 = vadd.f32 %v567_v25, %v505_v58  ;;  %v416_v29 = vadd.f32 %v412_v23, %v404_v24 }
  0xf6   :  { %v407_v31 = vadd.f32 %v595_v28, %v358_v27  ;;  %422 = vadd.xlane.f32.xlu1 %v416_v29 }
  0xf8   :  { %v417_v32 = vadd.f32 %v413_v30, %v407_v31 }
  0xfa   :  { %424 = vadd.xlane.f32.xlu1 %v417_v32 }
 0x177   :  { %v419_v33 = vpop.xlane.xlu0 %418 }
 0x178   :  { %v427_v34 = vmul.f32 0.0078125, %v419_v33 }
 0x17a   :  { %v431_v35 = vsub.f32 %v414_v11, %v427_v34 }
 0x17b   :  { %v421_v36 = vpop.xlane.xlu0 %420 }
 0x17c   :  { %v428_v37 = vmul.f32 0.0078125, %v421_v36  ;;  %v435_v38 = vmul.f32 %v431_v35, %v431_v35 }
 0x17e   :  { %v432_v39 = vsub.f32 %v415_v21, %v428_v37  ;;  %439 = vadd.xlane.f32.xlu0 %v435_v38 }
 0x17f   :  { %v423_v40 = vpop.xlane.xlu1 %422 }
 0x180   :  { %v429_v41 = vmul.f32 0.0078125, %v423_v40  ;;  %v436_v42 = vmul.f32 %v432_v39, %v432_v39 }
 0x182   :  { %v433_v43 = vsub.f32 %v416_v29, %v429_v41  ;;  %441 = vadd.xlane.f32.xlu1 %v436_v42 }
 0x183   :  { %v425_v44 = vpop.xlane.xlu1 %424 }
 0x184   :  { %v430_v45 = vmul.f32 0.0078125, %v425_v44  ;;  %v437_v46 = vmul.f32 %v433_v43, %v433_v43 }
 0x186   :  { %v434_v47 = vsub.f32 %v417_v32, %v430_v45  ;;  %443 = vadd.xlane.f32.xlu0 %v437_v46 }
 0x188   :  { %v438_v48 = vmul.f32 %v434_v47, %v434_v47 }
 0x18a   :  { %445 = vadd.xlane.f32.xlu1 %v438_v48 }
 0x207   :  { %v440_v49 = vpop.xlane.xlu0 %439 }
 0x208   :  { %v447_v50 = vmul.f32 0.0078125, %v440_v49 }
 0x20a   :  { %v451_v51 = vadd.f32 1e-05, %v447_v50 }
 0x20b   :  { %v442_v52 = vpop.xlane.xlu1 %441 }
 0x20c   :  { %631 = vrsqrt.f32 %v451_v51  ;;  %v448_v53 = vmul.f32 0.0078125, %v442_v52 }
 0x20e   :  { %v452_v54 = vadd.f32 1e-05, %v448_v53 }
 0x20f   :  { %v444_v55 = vpop.xlane.xlu0 %443 }
 0x210   :  { %633 = vrsqrt.f32 %v452_v54  ;;  %v449_v56 = vmul.f32 0.0078125, %v444_v55 }
 0x212   :  { %v453_v57 = vadd.f32 1e-05, %v449_v56 }
 0x213   :  { %v446_v58 = vpop.xlane.xlu1 %445 }
 0x214   :  { %635 = vrsqrt.f32 %v453_v57  ;;  %v450_v59 = vmul.f32 0.0078125, %v446_v58 }
 0x216   :  { %v454_v60 = vadd.f32 1e-05, %v450_v59 }
 0x218   :  { %637 = vrsqrt.f32 %v454_v60 }
 0x219   :  { %v632_v61 = vpop.eup %631 }
 0x21a   :  { %v459_v63 = vmul.f32 %v632_v61, %v431_v35 }
 0x21c   :  { %v470_v1 = vmul.f32 %v538_v62, %v459_v63 }
 0x21d   :  { %v634_v2 = vpop.eup %633 }
 0x21e   :  { %v460_v3 = vmul.f32 %v634_v2, %v432_v39  ;;  %v481_v4 = vadd.f32 %v539_v0, %v470_v1 }
 0x220   :  { %v471_v5 = vmul.f32 %v538_v62, %v460_v3  ;;  %485 = vst [vmem:[#allocation2] sm:$0xff] %v481_v4 }
 0x221   :  { %v636_v6 = vpop.eup %635 }
 0x222   :  { %v461_v7 = vmul.f32 %v636_v6, %v433_v43  ;;  %v482_v8 = vadd.f32 %v539_v0, %v471_v5 }
 0x224   :  { %v472_v9 = vmul.f32 %v538_v62, %v461_v7  ;;  %486 = vst [vmem:[#allocation2 + $0x8] sm:$0xff] %v482_v8 }
 0x225   :  { %v638_v10 = vpop.eup %637 }
 0x226   :  { %v462_v11 = vmul.f32 %v638_v10, %v434_v47  ;;  %v483_v12 = vadd.f32 %v539_v0, %v472_v9 }
 0x228   :  { %v473_v13 = vmul.f32 %v538_v62, %v462_v11  ;;  %487 = vst [vmem:[#allocation2 + $0x10] sm:$0xff] %v483_v12 }
 0x22a   :  { %v484_v14 = vadd.f32 %v539_v0, %v473_v13 }
 0x22c   :  { %488 = vst [vmem:[#allocation2 + $0x18] sm:$0xff] %v484_v14 }
 0x22d   :  { %650 = shalt.err (!%p647_p4)
}
 0x22e   :  { %s662_s7 = smov 128   ;;  %s663_s8 = smov 8  }
 0x22f   :  { %500 = dma.vmem_to_hbm [thread:$0]  %s495_s30, 512, %s873_s6, [#allocation3], %s662_s7, %s662_s7, %s663_s8  }
 0x230   :  { %659 = dma.done.wait [#allocation3], 512  }
 0x231   :  { %660 = vsyncadd [#allocation3], 4294966784 }
 0x232   :  { %504 = vsyncpa [#allocation3], 1 }

</bundles_post_ra>
